<compile_context>
chip_gen: v7x
topology: tpu7x:2x2x1
jax: 0.10.0
libtpu: 0.0.40
codegen_flags: <defaults>
</compile_context>

<pallas_src>
import jax
import jax.numpy as jnp
from jax.experimental import pallas as pl
from jax.experimental.pallas import tpu as pltpu

EPS = 1e-5            # BatchNorm eps
LRELU_SLOPE = 0.2


def _lrelu(v):
    return jnp.where(v >= 0, v, LRELU_SLOPE * v)


def _sum_all(v):
    # full reduction of a 2-D value, kept as a (1, 1) array (Mosaic-friendly)
    return jnp.sum(jnp.sum(v, axis=1, keepdims=True), axis=0, keepdims=True)


# ----------------------------- Pallas kernels -----------------------------

def conv3d_kernel(x0_ref, x1_ref, x2_ref, w_ref, y1_ref, s1_ref, s2_ref):
    """3x3x3 conv (pad=1, no bias) for one batch sample, channels-last.

    xk_ref : (D+2, H+2, W, P)  x padded in D/H/W, pre-shifted by kw=k along W
    w_ref  : (27, P, C4)       taps in (kd, kh, kw) row-major order
    y1_ref : (S, C4)           conv output, S = D*H*W rows
    s1/s2  : (1, C4)           per-sample sum / sum-of-squares (for BN1 stats)
    """
    dpad, hpad, wdim, p = x0_ref.shape
    dd, hh = dpad - 2, hpad - 2
    s, c4 = y1_ref.shape
    xs = (x0_ref, x1_ref, x2_ref)
    acc = jnp.zeros((s, c4), jnp.float32)
    for kd in range(3):
        for kh in range(3):
            for kw in range(3):
                win = xs[kw][kd:kd + dd, kh:kh + hh, :, :]       # (D, H, W, P)
                win = win.reshape(s, p)                          # major-dim collapse
                acc = acc + jnp.dot(win, w_ref[kd * 9 + kh * 3 + kw],
                                    preferred_element_type=jnp.float32)
    y1_ref[...] = acc
    s1_ref[...] = jnp.sum(acc, axis=0, keepdims=True)
    s2_ref[...] = jnp.sum(acc * acc, axis=0, keepdims=True)


def bn1_w2_kernel(y1t_ref, gd_ref, sc1_ref, sh1_ref, w2_ref,
                  y2t_ref, sy1_ref, sy2_ref, sg1_ref, sg2_ref):
    """BN1-apply + LeakyReLU + 1x1x1 conv_x2 (channel-first) with fused moments.

    y1t_ref : (C4, S)   gd_ref : (1, S)   sc1/sh1 : (C4, 1)   w2 : (C8, C4)
    y2t_ref : (C8, S)   sy1/sy2: (C8, 1)  sg1/sg2 : (1, 1)
    """
    x1a = _lrelu(y1t_ref[...] * sc1_ref[...] + sh1_ref[...])            # (C4, S)
    y2 = jnp.dot(w2_ref[...], x1a, preferred_element_type=jnp.float32)  # (C8, S)
    y2t_ref[...] = y2
    sy1_ref[...] = jnp.sum(y2, axis=1, keepdims=True)
    sy2_ref[...] = jnp.sum(y2 * y2, axis=1, keepdims=True)
    gd = gd_ref[...]
    sg1_ref[...] = jnp.sum(gd, axis=1, keepdims=True)
    sg2_ref[...] = jnp.sum(gd * gd, axis=1, keepdims=True)


def fuse_kernel(y2t_ref, gd_ref, sc2_ref, sh2_ref, scg_ref, shg_ref,
                wbt_ref, bb_ref, wseg_ref, bseg_ref, fmap_ref, fseg_ref):
    """BN2+LReLU (x & g paths, in-register) + per-sample AdaIN + add + LReLU
    + map_back (1x1x1, bias) + layer_seg + sigmoid.  Channel-first, lane-dense.

    y2t_ref : (C8, S)   gd_ref : (1, S)
    sc2/sh2/scg/shg : (C8, 1)   wbt : (P, C8)  bb : (P, 1)  wseg : (1, P)  bseg : (1, 1)
    fmap_ref : (P, S)   fseg_ref : (1, S)
    """
    x2 = _lrelu(y2t_ref[...] * sc2_ref[...] + sh2_ref[...])             # (C8, S)
    gf = _lrelu(gd_ref[...] * scg_ref[...] + shg_ref[...])              # (C8, S)

    c8, s = x2.shape
    n_a = float(c8 * s)
    # per-sample AdaIN stats over C*D*H*W; two-pass, unbiased std (== torch.std)
    s_mean = _sum_all(x2) / n_a                                         # (1, 1)
    c_mean = _sum_all(gf) / n_a
    xc = x2 - s_mean
    gc = gf - c_mean
    s_std = jnp.sqrt(_sum_all(xc * xc) / (n_a - 1.0))
    c_std = jnp.sqrt(_sum_all(gc * gc) / (n_a - 1.0))
    a_scale = s_std / c_std
    a_shift = s_mean - c_mean * a_scale

    f = _lrelu(gf * a_scale + a_shift + x2)                             # (C8, S)
    fmap = jnp.dot(wbt_ref[...], f,
                   preferred_element_type=jnp.float32) + bb_ref[...]    # (P, S)
    fmap_ref[...] = fmap
    seg = jnp.dot(wseg_ref[...], fmap,
                  preferred_element_type=jnp.float32) + bseg_ref[...]   # (1, S)
    fseg_ref[...] = jax.nn.sigmoid(seg)


# ----------------------------- pallas_call wrappers -----------------------------

def _conv3d(xw0, xw1, xw2, w_taps):
    n, dp, hp, wdim, p = xw0.shape
    c4 = w_taps.shape[2]
    s = (dp - 2) * (hp - 2) * wdim
    xspec = pl.BlockSpec((None, dp, hp, wdim, p), lambda b: (b, 0, 0, 0, 0))
    return pl.pallas_call(
        conv3d_kernel,
        out_shape=(jax.ShapeDtypeStruct((n, s, c4), jnp.float32),
                   jax.ShapeDtypeStruct((n, 1, c4), jnp.float32),
                   jax.ShapeDtypeStruct((n, 1, c4), jnp.float32)),
        grid=(n,),
        in_specs=[xspec, xspec, xspec,
                  pl.BlockSpec((27, p, c4), lambda b: (0, 0, 0))],
        out_specs=(pl.BlockSpec((None, s, c4), lambda b: (b, 0, 0)),
                   pl.BlockSpec((None, 1, c4), lambda b: (b, 0, 0)),
                   pl.BlockSpec((None, 1, c4), lambda b: (b, 0, 0))),
        compiler_params=pltpu.CompilerParams(dimension_semantics=("parallel",)),
    )(xw0, xw1, xw2, w_taps)


def _bn1_w2(y1t, gd, sc1c, sh1c, w2):
    n, c4, s = y1t.shape
    c8 = w2.shape[0]
    return pl.pallas_call(
        bn1_w2_kernel,
        out_shape=(jax.ShapeDtypeStruct((n, c8, s), jnp.float32),
                   jax.ShapeDtypeStruct((n, c8, 1), jnp.float32),
                   jax.ShapeDtypeStruct((n, c8, 1), jnp.float32),
                   jax.ShapeDtypeStruct((n, 1, 1), jnp.float32),
                   jax.ShapeDtypeStruct((n, 1, 1), jnp.float32)),
        grid=(n,),
        in_specs=[pl.BlockSpec((None, c4, s), lambda b: (b, 0, 0)),
                  pl.BlockSpec((None, 1, s), lambda b: (b, 0, 0)),
                  pl.BlockSpec((c4, 1), lambda b: (0, 0)),
                  pl.BlockSpec((c4, 1), lambda b: (0, 0)),
                  pl.BlockSpec((c8, c4), lambda b: (0, 0))],
        out_specs=(pl.BlockSpec((None, c8, s), lambda b: (b, 0, 0)),
                   pl.BlockSpec((None, c8, 1), lambda b: (b, 0, 0)),
                   pl.BlockSpec((None, c8, 1), lambda b: (b, 0, 0)),
                   pl.BlockSpec((None, 1, 1), lambda b: (b, 0, 0)),
                   pl.BlockSpec((None, 1, 1), lambda b: (b, 0, 0))),
        compiler_params=pltpu.CompilerParams(dimension_semantics=("parallel",)),
    )(y1t, gd, sc1c, sh1c, w2)


def _fuse(y2t, gd, sc2c, sh2c, scgc, shgc, wbt, bbc, wsegr, bseg11):
    n, c8, s = y2t.shape
    p = wbt.shape[0]

    def vec(shape):
        return pl.BlockSpec(shape, lambda b: (0, 0))

    return pl.pallas_call(
        fuse_kernel,
        out_shape=(jax.ShapeDtypeStruct((n, p, s), jnp.float32),
                   jax.ShapeDtypeStruct((n, 1, s), jnp.float32)),
        grid=(n,),
        in_specs=[pl.BlockSpec((None, c8, s), lambda b: (b, 0, 0)),
                  pl.BlockSpec((None, 1, s), lambda b: (b, 0, 0)),
                  vec((c8, 1)), vec((c8, 1)), vec((c8, 1)), vec((c8, 1)),
                  vec((p, c8)), vec((p, 1)), vec((1, p)), vec((1, 1))],
        out_specs=(pl.BlockSpec((None, p, s), lambda b: (b, 0, 0)),
                   pl.BlockSpec((None, 1, s), lambda b: (b, 0, 0))),
        compiler_params=pltpu.CompilerParams(dimension_semantics=("parallel",)),
    )(y2t, gd, sc2c, sh2c, scgc, shgc, wbt, bbc, wsegr, bseg11)


# ----------------------------- forward (glue + kernels) -----------------------------

def layer_refine_light_forward(x, g, params, drop_key, p_drop=0.1):
    n, planes, d, h, w = x.shape
    s = d * h * w
    c4 = params["W1"].shape[0]
    c8 = params["W2"].shape[0]
    n_bn = float(n * s)

    # ---- conv_x1 (3x3x3, pad 1, no bias): in-kernel over the 27 taps.  Glue only
    #      builds three W-shifted channels-last padded views (3x of x, not 27x).
    xcl = jnp.transpose(x, (0, 2, 3, 4, 1))                      # (N, D, H, W, P)
    xp = jnp.pad(xcl, ((0, 0), (1, 1), (1, 1), (1, 1), (0, 0)))  # (N, D+2, H+2, W+2, P)
    xw0, xw1, xw2 = (xp[:, :, :, k:k + w, :] for k in range(3))  # (N, D+2, H+2, W, P)
    w_taps = jnp.transpose(params["W1"], (2, 3, 4, 1, 0)).reshape(27, planes, c4)

    y1, s1, s2 = _conv3d(xw0, xw1, xw2, w_taps)                  # y1: (N, S, C4) + moments

    # ---- BN1 (training-mode batch stats, biased var) folded into scale/shift ----
    mean1 = jnp.sum(s1, axis=(0, 1)) / n_bn
    var1 = jnp.maximum(jnp.sum(s2, axis=(0, 1)) / n_bn - mean1 ** 2, 0.0)
    sc1 = params["gamma1"] / jnp.sqrt(var1 + EPS)
    sh1 = params["beta1"] - mean1 * sc1

    # channel-first (C, S) views for every later narrow-channel stage (lane-dense)
    y1t = jnp.transpose(y1, (0, 2, 1))                           # (N, C4, S)  tiny

    # ---- g path: dropout3d on the single-channel g == per-sample channel dropout
    # TODO(synk): torch RNG for F.dropout3d is not reproducible; deterministic JAX key used.
    keep = jax.random.bernoulli(drop_key, 1.0 - p_drop, (n, 1, 1)).astype(jnp.float32)
    gd = g.reshape(n, 1, s) * (keep / (1.0 - p_drop))            # (N, 1, S)

    # ---- BN1-apply + LReLU + conv_x2 (with fused y2 / g moments) ----
    y2t, sy1, sy2, sg1, sg2 = _bn1_w2(
        y1t, gd, sc1.reshape(c4, 1), sh1.reshape(c4, 1), params["W2"])

    mean2 = jnp.sum(sy1, axis=(0, 2)) / n_bn
    var2 = jnp.maximum(jnp.sum(sy2, axis=(0, 2)) / n_bn - mean2 ** 2, 0.0)
    sc2 = params["gamma2"] / jnp.sqrt(var2 + EPS)
    sh2 = params["beta2"] - mean2 * sc2

    # conv_g (1x1x1, Cin=1) + BN2 (batch stats of conv_g(g_d)) folded into per-channel
    # scale/shift applied directly to g_d (exact since yg[:, c] = Wg[c] * g_d).
    mg = jnp.sum(sg1) / n_bn
    vg = jnp.maximum(jnp.sum(sg2) / n_bn - mg ** 2, 0.0)
    wg = params["Wg"]
    denomg = jnp.sqrt(wg ** 2 * vg + EPS)
    scg = params["gamma2"] * wg / denomg
    shg = params["beta2"] - params["gamma2"] * wg * mg / denomg

    # ---- fused BN2-apply (x & g) + AdaIN + add + LReLU + map_back + layer_seg ----
    fmap_cf, fseg_cf = _fuse(
        y2t, gd,
        sc2.reshape(c8, 1), sh2.reshape(c8, 1),
        scg.reshape(c8, 1), shg.reshape(c8, 1),
        params["Wback"], params["bback"].reshape(planes, 1),
        params["Wseg"], params["bseg"].reshape(1, 1))

    # channel-first (N, C, S) == NCDHW flattened: plain reshapes, no transpose
    f_map = fmap_cf.reshape(n, planes, d, h, w)
    f_seg = fseg_cf.reshape(n, 1, d, h, w)
    return f_map, f_seg


# ----------------------------- demo -----------------------------

if __name__ == "__main__":
    planes = 16
    N, D, H, W = 2, 8, 8, 8
    C4, C8 = planes // 4, planes // 8

    keys = jax.random.split(jax.random.PRNGKey(0), 16)
    x = jax.random.normal(keys[0], (N, planes, D, H, W), jnp.float32)
    g = jax.random.normal(keys[1], (N, 1, D, H, W), jnp.float32)

    params = dict(
        W1=0.1 * jax.random.normal(keys[2], (C4, planes, 3, 3, 3), jnp.float32),
        W2=0.3 * jax.random.normal(keys[3], (C8, C4), jnp.float32),          # conv_x2 (1x1x1)
        Wg=0.5 * jax.random.normal(keys[4], (C8,), jnp.float32),             # conv_g  (1x1x1, Cin=1)
        gamma1=1.0 + 0.1 * jax.random.normal(keys[5], (C4,), jnp.float32),
        beta1=0.1 * jax.random.normal(keys[6], (C4,), jnp.float32),
        gamma2=1.0 + 0.1 * jax.random.normal(keys[7], (C8,), jnp.float32),
        beta2=0.1 * jax.random.normal(keys[8], (C8,), jnp.float32),
        Wback=0.3 * jax.random.normal(keys[9], (planes, C8), jnp.float32),   # map_back (out, in)
        bback=0.1 * jax.random.normal(keys[10], (planes,), jnp.float32),
        Wseg=0.3 * jax.random.normal(keys[11], (1, planes), jnp.float32),    # layer_seg (out, in)
        bseg=0.1 * jax.random.normal(keys[12], (1,), jnp.float32),
    )

    f_map, f_seg = layer_refine_light_forward(x, g, params, keys[13], p_drop=0.1)
    jax.block_until_ready((f_map, f_seg))

    assert f_map.shape == (N, planes, D, H, W)
    assert f_seg.shape == (N, 1, D, H, W)
    assert bool(jnp.all(jnp.isfinite(f_map))) and bool(jnp.all(jnp.isfinite(f_seg)))
    print("KERNEL_OK")
</pallas_src>

<mosaic_0001>
module attributes {stable_mosaic.version = 11 : i64} {
  func.func @conv3d_kernel(%arg0: i32, %arg1: memref<1x10x10x8x16xf32, #tpu.memory_space<vmem>>, %arg2: memref<1x10x10x8x16xf32, #tpu.memory_space<vmem>>, %arg3: memref<1x10x10x8x16xf32, #tpu.memory_space<vmem>>, %arg4: memref<27x16x4xf32, #tpu.memory_space<vmem>>, %arg5: memref<1x512x4xf32, #tpu.memory_space<vmem>>, %arg6: memref<1x1x4xf32, #tpu.memory_space<vmem>>, %arg7: memref<1x1x4xf32, #tpu.memory_space<vmem>>) attributes {dimension_semantics = [#tpu.dimension_semantics<parallel>], iteration_bounds = array<i64: 2>, scalar_prefetch = 0 : i64, scratch_operands = 0 : i64, tpu.core_type = #tpu.core_type<tc>, window_params = [{transform_indices = @transform_0, window_bounds = array<i64: 1, 10, 10, 8, 16>}, {transform_indices = @transform_1, window_bounds = array<i64: 1, 10, 10, 8, 16>}, {transform_indices = @transform_2, window_bounds = array<i64: 1, 10, 10, 8, 16>}, {pipeline_mode = #tpu.pipeline_mode<synchronous>, transform_indices = @transform_3, window_bounds = array<i64: 27, 16, 4>}, {transform_indices = @transform_4, window_bounds = array<i64: 1, 512, 4>}, {transform_indices = @transform_5, window_bounds = array<i64: 1, 1, 4>}, {transform_indices = @transform_6, window_bounds = array<i64: 1, 1, 4>}]} {
    %cst = arith.constant 0.000000e+00 : f32
    %0 = vector.broadcast %cst : f32 to vector<512x4xf32>
    %c0 = arith.constant 0 : index
    %c0_0 = arith.constant 0 : index
    %c0_1 = arith.constant 0 : index
    %c0_2 = arith.constant 0 : index
    %c0_3 = arith.constant 0 : index
    %1 = vector.load %arg1[%c0, %c0_0, %c0_1, %c0_2, %c0_3] : memref<1x10x10x8x16xf32, #tpu.memory_space<vmem>>, vector<1x8x8x8x16xf32>
    %2 = vector.shape_cast %1 : vector<1x8x8x8x16xf32> to vector<8x8x8x16xf32>
    %3 = vector.shape_cast %2 : vector<8x8x8x16xf32> to vector<512x16xf32>
    %c0_4 = arith.constant 0 : index
    %c0_5 = arith.constant 0 : index
    %c0_6 = arith.constant 0 : index
    %4 = vector.load %arg4[%c0_4, %c0_5, %c0_6] : memref<27x16x4xf32, #tpu.memory_space<vmem>>, vector<1x16x4xf32>
    %5 = vector.shape_cast %4 : vector<1x16x4xf32> to vector<16x4xf32>
    %cst_7 = arith.constant dense<0.000000e+00> : vector<512x4xf32>
    %6 = tpu.matmul %3, %5, %cst_7 {dimension_numbers = #tpu.dot_dimension_numbers<[1], [0], [0], [1], [0, 0, 1, 1], [], []>} : vector<512x16xf32>, vector<16x4xf32>, vector<512x4xf32> -> vector<512x4xf32>
    %7 = arith.addf %0, %6 : vector<512x4xf32>
    %c0_8 = arith.constant 0 : index
    %c0_9 = arith.constant 0 : index
    %c0_10 = arith.constant 0 : index
    %c0_11 = arith.constant 0 : index
    %c0_12 = arith.constant 0 : index
    %8 = vector.load %arg2[%c0_8, %c0_9, %c0_10, %c0_11, %c0_12] : memref<1x10x10x8x16xf32, #tpu.memory_space<vmem>>, vector<1x8x8x8x16xf32>
    %9 = vector.shape_cast %8 : vector<1x8x8x8x16xf32> to vector<8x8x8x16xf32>
    %10 = vector.shape_cast %9 : vector<8x8x8x16xf32> to vector<512x16xf32>
    %c1 = arith.constant 1 : index
    %c0_13 = arith.constant 0 : index
    %c0_14 = arith.constant 0 : index
    %11 = vector.load %arg4[%c1, %c0_13, %c0_14] : memref<27x16x4xf32, #tpu.memory_space<vmem>>, vector<1x16x4xf32>
    %12 = vector.shape_cast %11 : vector<1x16x4xf32> to vector<16x4xf32>
    %cst_15 = arith.constant dense<0.000000e+00> : vector<512x4xf32>
    %13 = tpu.matmul %10, %12, %cst_15 {dimension_numbers = #tpu.dot_dimension_numbers<[1], [0], [0], [1], [0, 0, 1, 1], [], []>} : vector<512x16xf32>, vector<16x4xf32>, vector<512x4xf32> -> vector<512x4xf32>
    %14 = arith.addf %7, %13 : vector<512x4xf32>
    %c0_16 = arith.constant 0 : index
    %c0_17 = arith.constant 0 : index
    %c0_18 = arith.constant 0 : index
    %c0_19 = arith.constant 0 : index
    %c0_20 = arith.constant 0 : index
    %15 = vector.load %arg3[%c0_16, %c0_17, %c0_18, %c0_19, %c0_20] : memref<1x10x10x8x16xf32, #tpu.memory_space<vmem>>, vector<1x8x8x8x16xf32>
    %16 = vector.shape_cast %15 : vector<1x8x8x8x16xf32> to vector<8x8x8x16xf32>
    %17 = vector.shape_cast %16 : vector<8x8x8x16xf32> to vector<512x16xf32>
    %c2 = arith.constant 2 : index
    %c0_21 = arith.constant 0 : index
    %c0_22 = arith.constant 0 : index
    %18 = vector.load %arg4[%c2, %c0_21, %c0_22] : memref<27x16x4xf32, #tpu.memory_space<vmem>>, vector<1x16x4xf32>
    %19 = vector.shape_cast %18 : vector<1x16x4xf32> to vector<16x4xf32>
    %cst_23 = arith.constant dense<0.000000e+00> : vector<512x4xf32>
    %20 = tpu.matmul %17, %19, %cst_23 {dimension_numbers = #tpu.dot_dimension_numbers<[1], [0], [0], [1], [0, 0, 1, 1], [], []>} : vector<512x16xf32>, vector<16x4xf32>, vector<512x4xf32> -> vector<512x4xf32>
    %21 = arith.addf %14, %20 : vector<512x4xf32>
    %c0_24 = arith.constant 0 : index
    %c0_25 = arith.constant 0 : index
    %c1_26 = arith.constant 1 : index
    %c0_27 = arith.constant 0 : index
    %c0_28 = arith.constant 0 : index
    %22 = vector.load %arg1[%c0_24, %c0_25, %c1_26, %c0_27, %c0_28] : memref<1x10x10x8x16xf32, #tpu.memory_space<vmem>>, vector<1x8x8x8x16xf32>
    %23 = vector.shape_cast %22 : vector<1x8x8x8x16xf32> to vector<8x8x8x16xf32>
    %24 = vector.shape_cast %23 : vector<8x8x8x16xf32> to vector<512x16xf32>
    %c3 = arith.constant 3 : index
    %c0_29 = arith.constant 0 : index
    %c0_30 = arith.constant 0 : index
    %25 = vector.load %arg4[%c3, %c0_29, %c0_30] : memref<27x16x4xf32, #tpu.memory_space<vmem>>, vector<1x16x4xf32>
    %26 = vector.shape_cast %25 : vector<1x16x4xf32> to vector<16x4xf32>
    %cst_31 = arith.constant dense<0.000000e+00> : vector<512x4xf32>
    %27 = tpu.matmul %24, %26, %cst_31 {dimension_numbers = #tpu.dot_dimension_numbers<[1], [0], [0], [1], [0, 0, 1, 1], [], []>} : vector<512x16xf32>, vector<16x4xf32>, vector<512x4xf32> -> vector<512x4xf32>
    %28 = arith.addf %21, %27 : vector<512x4xf32>
    %c0_32 = arith.constant 0 : index
    %c0_33 = arith.constant 0 : index
    %c1_34 = arith.constant 1 : index
    %c0_35 = arith.constant 0 : index
    %c0_36 = arith.constant 0 : index
    %29 = vector.load %arg2[%c0_32, %c0_33, %c1_34, %c0_35, %c0_36] : memref<1x10x10x8x16xf32, #tpu.memory_space<vmem>>, vector<1x8x8x8x16xf32>
    %30 = vector.shape_cast %29 : vector<1x8x8x8x16xf32> to vector<8x8x8x16xf32>
    %31 = vector.shape_cast %30 : vector<8x8x8x16xf32> to vector<512x16xf32>
    %c4 = arith.constant 4 : index
    %c0_37 = arith.constant 0 : index
    %c0_38 = arith.constant 0 : index
    %32 = vector.load %arg4[%c4, %c0_37, %c0_38] : memref<27x16x4xf32, #tpu.memory_space<vmem>>, vector<1x16x4xf32>
    %33 = vector.shape_cast %32 : vector<1x16x4xf32> to vector<16x4xf32>
    %cst_39 = arith.constant dense<0.000000e+00> : vector<512x4xf32>
    %34 = tpu.matmul %31, %33, %cst_39 {dimension_numbers = #tpu.dot_dimension_numbers<[1], [0], [0], [1], [0, 0, 1, 1], [], []>} : vector<512x16xf32>, vector<16x4xf32>, vector<512x4xf32> -> vector<512x4xf32>
    %35 = arith.addf %28, %34 : vector<512x4xf32>
    %c0_40 = arith.constant 0 : index
    %c0_41 = arith.constant 0 : index
    %c1_42 = arith.constant 1 : index
    %c0_43 = arith.constant 0 : index
    %c0_44 = arith.constant 0 : index
    %36 = vector.load %arg3[%c0_40, %c0_41, %c1_42, %c0_43, %c0_44] : memref<1x10x10x8x16xf32, #tpu.memory_space<vmem>>, vector<1x8x8x8x16xf32>
    %37 = vector.shape_cast %36 : vector<1x8x8x8x16xf32> to vector<8x8x8x16xf32>
    %38 = vector.shape_cast %37 : vector<8x8x8x16xf32> to vector<512x16xf32>
    %c5 = arith.constant 5 : index
    %c0_45 = arith.constant 0 : index
    %c0_46 = arith.constant 0 : index
    %39 = vector.load %arg4[%c5, %c0_45, %c0_46] : memref<27x16x4xf32, #tpu.memory_space<vmem>>, vector<1x16x4xf32>
    %40 = vector.shape_cast %39 : vector<1x16x4xf32> to vector<16x4xf32>
    %cst_47 = arith.constant dense<0.000000e+00> : vector<512x4xf32>
    %41 = tpu.matmul %38, %40, %cst_47 {dimension_numbers = #tpu.dot_dimension_numbers<[1], [0], [0], [1], [0, 0, 1, 1], [], []>} : vector<512x16xf32>, vector<16x4xf32>, vector<512x4xf32> -> vector<512x4xf32>
    %42 = arith.addf %35, %41 : vector<512x4xf32>
    %c0_48 = arith.constant 0 : index
    %c0_49 = arith.constant 0 : index
    %c2_50 = arith.constant 2 : index
    %c0_51 = arith.constant 0 : index
    %c0_52 = arith.constant 0 : index
    %43 = vector.load %arg1[%c0_48, %c0_49, %c2_50, %c0_51, %c0_52] : memref<1x10x10x8x16xf32, #tpu.memory_space<vmem>>, vector<1x8x8x8x16xf32>
    %44 = vector.shape_cast %43 : vector<1x8x8x8x16xf32> to vector<8x8x8x16xf32>
    %45 = vector.shape_cast %44 : vector<8x8x8x16xf32> to vector<512x16xf32>
    %c6 = arith.constant 6 : index
    %c0_53 = arith.constant 0 : index
    %c0_54 = arith.constant 0 : index
    %46 = vector.load %arg4[%c6, %c0_53, %c0_54] : memref<27x16x4xf32, #tpu.memory_space<vmem>>, vector<1x16x4xf32>
    %47 = vector.shape_cast %46 : vector<1x16x4xf32> to vector<16x4xf32>
    %cst_55 = arith.constant dense<0.000000e+00> : vector<512x4xf32>
    %48 = tpu.matmul %45, %47, %cst_55 {dimension_numbers = #tpu.dot_dimension_numbers<[1], [0], [0], [1], [0, 0, 1, 1], [], []>} : vector<512x16xf32>, vector<16x4xf32>, vector<512x4xf32> -> vector<512x4xf32>
    %49 = arith.addf %42, %48 : vector<512x4xf32>
    %c0_56 = arith.constant 0 : index
    %c0_57 = arith.constant 0 : index
    %c2_58 = arith.constant 2 : index
    %c0_59 = arith.constant 0 : index
    %c0_60 = arith.constant 0 : index
    %50 = vector.load %arg2[%c0_56, %c0_57, %c2_58, %c0_59, %c0_60] : memref<1x10x10x8x16xf32, #tpu.memory_space<vmem>>, vector<1x8x8x8x16xf32>
    %51 = vector.shape_cast %50 : vector<1x8x8x8x16xf32> to vector<8x8x8x16xf32>
    %52 = vector.shape_cast %51 : vector<8x8x8x16xf32> to vector<512x16xf32>
    %c7 = arith.constant 7 : index
    %c0_61 = arith.constant 0 : index
    %c0_62 = arith.constant 0 : index
    %53 = vector.load %arg4[%c7, %c0_61, %c0_62] : memref<27x16x4xf32, #tpu.memory_space<vmem>>, vector<1x16x4xf32>
    %54 = vector.shape_cast %53 : vector<1x16x4xf32> to vector<16x4xf32>
    %cst_63 = arith.constant dense<0.000000e+00> : vector<512x4xf32>
    %55 = tpu.matmul %52, %54, %cst_63 {dimension_numbers = #tpu.dot_dimension_numbers<[1], [0], [0], [1], [0, 0, 1, 1], [], []>} : vector<512x16xf32>, vector<16x4xf32>, vector<512x4xf32> -> vector<512x4xf32>
    %56 = arith.addf %49, %55 : vector<512x4xf32>
    %c0_64 = arith.constant 0 : index
    %c0_65 = arith.constant 0 : index
    %c2_66 = arith.constant 2 : index
    %c0_67 = arith.constant 0 : index
    %c0_68 = arith.constant 0 : index
    %57 = vector.load %arg3[%c0_64, %c0_65, %c2_66, %c0_67, %c0_68] : memref<1x10x10x8x16xf32, #tpu.memory_space<vmem>>, vector<1x8x8x8x16xf32>
    %58 = vector.shape_cast %57 : vector<1x8x8x8x16xf32> to vector<8x8x8x16xf32>
    %59 = vector.shape_cast %58 : vector<8x8x8x16xf32> to vector<512x16xf32>
    %c8 = arith.constant 8 : index
    %c0_69 = arith.constant 0 : index
    %c0_70 = arith.constant 0 : index
    %60 = vector.load %arg4[%c8, %c0_69, %c0_70] : memref<27x16x4xf32, #tpu.memory_space<vmem>>, vector<1x16x4xf32>
    %61 = vector.shape_cast %60 : vector<1x16x4xf32> to vector<16x4xf32>
    %cst_71 = arith.constant dense<0.000000e+00> : vector<512x4xf32>
    %62 = tpu.matmul %59, %61, %cst_71 {dimension_numbers = #tpu.dot_dimension_numbers<[1], [0], [0], [1], [0, 0, 1, 1], [], []>} : vector<512x16xf32>, vector<16x4xf32>, vector<512x4xf32> -> vector<512x4xf32>
    %63 = arith.addf %56, %62 : vector<512x4xf32>
    %c0_72 = arith.constant 0 : index
    %c1_73 = arith.constant 1 : index
    %c0_74 = arith.constant 0 : index
    %c0_75 = arith.constant 0 : index
    %c0_76 = arith.constant 0 : index
    %64 = vector.load %arg1[%c0_72, %c1_73, %c0_74, %c0_75, %c0_76] : memref<1x10x10x8x16xf32, #tpu.memory_space<vmem>>, vector<1x8x8x8x16xf32>
    %65 = vector.shape_cast %64 : vector<1x8x8x8x16xf32> to vector<8x8x8x16xf32>
    %66 = vector.shape_cast %65 : vector<8x8x8x16xf32> to vector<512x16xf32>
    %c9 = arith.constant 9 : index
    %c0_77 = arith.constant 0 : index
    %c0_78 = arith.constant 0 : index
    %67 = vector.load %arg4[%c9, %c0_77, %c0_78] : memref<27x16x4xf32, #tpu.memory_space<vmem>>, vector<1x16x4xf32>
    %68 = vector.shape_cast %67 : vector<1x16x4xf32> to vector<16x4xf32>
    %cst_79 = arith.constant dense<0.000000e+00> : vector<512x4xf32>
    %69 = tpu.matmul %66, %68, %cst_79 {dimension_numbers = #tpu.dot_dimension_numbers<[1], [0], [0], [1], [0, 0, 1, 1], [], []>} : vector<512x16xf32>, vector<16x4xf32>, vector<512x4xf32> -> vector<512x4xf32>
    %70 = arith.addf %63, %69 : vector<512x4xf32>
    %c0_80 = arith.constant 0 : index
    %c1_81 = arith.constant 1 : index
    %c0_82 = arith.constant 0 : index
    %c0_83 = arith.constant 0 : index
    %c0_84 = arith.constant 0 : index
    %71 = vector.load %arg2[%c0_80, %c1_81, %c0_82, %c0_83, %c0_84] : memref<1x10x10x8x16xf32, #tpu.memory_space<vmem>>, vector<1x8x8x8x16xf32>
    %72 = vector.shape_cast %71 : vector<1x8x8x8x16xf32> to vector<8x8x8x16xf32>
    %73 = vector.shape_cast %72 : vector<8x8x8x16xf32> to vector<512x16xf32>
    %c10 = arith.constant 10 : index
    %c0_85 = arith.constant 0 : index
    %c0_86 = arith.constant 0 : index
    %74 = vector.load %arg4[%c10, %c0_85, %c0_86] : memref<27x16x4xf32, #tpu.memory_space<vmem>>, vector<1x16x4xf32>
    %75 = vector.shape_cast %74 : vector<1x16x4xf32> to vector<16x4xf32>
    %cst_87 = arith.constant dense<0.000000e+00> : vector<512x4xf32>
    %76 = tpu.matmul %73, %75, %cst_87 {dimension_numbers = #tpu.dot_dimension_numbers<[1], [0], [0], [1], [0, 0, 1, 1], [], []>} : vector<512x16xf32>, vector<16x4xf32>, vector<512x4xf32> -> vector<512x4xf32>
    %77 = arith.addf %70, %76 : vector<512x4xf32>
    %c0_88 = arith.constant 0 : index
    %c1_89 = arith.constant 1 : index
    %c0_90 = arith.constant 0 : index
    %c0_91 = arith.constant 0 : index
    %c0_92 = arith.constant 0 : index
    %78 = vector.load %arg3[%c0_88, %c1_89, %c0_90, %c0_91, %c0_92] : memref<1x10x10x8x16xf32, #tpu.memory_space<vmem>>, vector<1x8x8x8x16xf32>
    %79 = vector.shape_cast %78 : vector<1x8x8x8x16xf32> to vector<8x8x8x16xf32>
    %80 = vector.shape_cast %79 : vector<8x8x8x16xf32> to vector<512x16xf32>
    %c11 = arith.constant 11 : index
    %c0_93 = arith.constant 0 : index
    %c0_94 = arith.constant 0 : index
    %81 = vector.load %arg4[%c11, %c0_93, %c0_94] : memref<27x16x4xf32, #tpu.memory_space<vmem>>, vector<1x16x4xf32>
    %82 = vector.shape_cast %81 : vector<1x16x4xf32> to vector<16x4xf32>
    %cst_95 = arith.constant dense<0.000000e+00> : vector<512x4xf32>
    %83 = tpu.matmul %80, %82, %cst_95 {dimension_numbers = #tpu.dot_dimension_numbers<[1], [0], [0], [1], [0, 0, 1, 1], [], []>} : vector<512x16xf32>, vector<16x4xf32>, vector<512x4xf32> -> vector<512x4xf32>
    %84 = arith.addf %77, %83 : vector<512x4xf32>
    %c0_96 = arith.constant 0 : index
    %c1_97 = arith.constant 1 : index
    %c1_98 = arith.constant 1 : index
    %c0_99 = arith.constant 0 : index
    %c0_100 = arith.constant 0 : index
    %85 = vector.load %arg1[%c0_96, %c1_97, %c1_98, %c0_99, %c0_100] : memref<1x10x10x8x16xf32, #tpu.memory_space<vmem>>, vector<1x8x8x8x16xf32>
    %86 = vector.shape_cast %85 : vector<1x8x8x8x16xf32> to vector<8x8x8x16xf32>
    %87 = vector.shape_cast %86 : vector<8x8x8x16xf32> to vector<512x16xf32>
    %c12 = arith.constant 12 : index
    %c0_101 = arith.constant 0 : index
    %c0_102 = arith.constant 0 : index
    %88 = vector.load %arg4[%c12, %c0_101, %c0_102] : memref<27x16x4xf32, #tpu.memory_space<vmem>>, vector<1x16x4xf32>
    %89 = vector.shape_cast %88 : vector<1x16x4xf32> to vector<16x4xf32>
    %cst_103 = arith.constant dense<0.000000e+00> : vector<512x4xf32>
    %90 = tpu.matmul %87, %89, %cst_103 {dimension_numbers = #tpu.dot_dimension_numbers<[1], [0], [0], [1], [0, 0, 1, 1], [], []>} : vector<512x16xf32>, vector<16x4xf32>, vector<512x4xf32> -> vector<512x4xf32>
    %91 = arith.addf %84, %90 : vector<512x4xf32>
    %c0_104 = arith.constant 0 : index
    %c1_105 = arith.constant 1 : index
    %c1_106 = arith.constant 1 : index
    %c0_107 = arith.constant 0 : index
    %c0_108 = arith.constant 0 : index
    %92 = vector.load %arg2[%c0_104, %c1_105, %c1_106, %c0_107, %c0_108] : memref<1x10x10x8x16xf32, #tpu.memory_space<vmem>>, vector<1x8x8x8x16xf32>
    %93 = vector.shape_cast %92 : vector<1x8x8x8x16xf32> to vector<8x8x8x16xf32>
    %94 = vector.shape_cast %93 : vector<8x8x8x16xf32> to vector<512x16xf32>
    %c13 = arith.constant 13 : index
    %c0_109 = arith.constant 0 : index
    %c0_110 = arith.constant 0 : index
    %95 = vector.load %arg4[%c13, %c0_109, %c0_110] : memref<27x16x4xf32, #tpu.memory_space<vmem>>, vector<1x16x4xf32>
    %96 = vector.shape_cast %95 : vector<1x16x4xf32> to vector<16x4xf32>
    %cst_111 = arith.constant dense<0.000000e+00> : vector<512x4xf32>
    %97 = tpu.matmul %94, %96, %cst_111 {dimension_numbers = #tpu.dot_dimension_numbers<[1], [0], [0], [1], [0, 0, 1, 1], [], []>} : vector<512x16xf32>, vector<16x4xf32>, vector<512x4xf32> -> vector<512x4xf32>
    %98 = arith.addf %91, %97 : vector<512x4xf32>
    %c0_112 = arith.constant 0 : index
    %c1_113 = arith.constant 1 : index
    %c1_114 = arith.constant 1 : index
    %c0_115 = arith.constant 0 : index
    %c0_116 = arith.constant 0 : index
    %99 = vector.load %arg3[%c0_112, %c1_113, %c1_114, %c0_115, %c0_116] : memref<1x10x10x8x16xf32, #tpu.memory_space<vmem>>, vector<1x8x8x8x16xf32>
    %100 = vector.shape_cast %99 : vector<1x8x8x8x16xf32> to vector<8x8x8x16xf32>
    %101 = vector.shape_cast %100 : vector<8x8x8x16xf32> to vector<512x16xf32>
    %c14 = arith.constant 14 : index
    %c0_117 = arith.constant 0 : index
    %c0_118 = arith.constant 0 : index
    %102 = vector.load %arg4[%c14, %c0_117, %c0_118] : memref<27x16x4xf32, #tpu.memory_space<vmem>>, vector<1x16x4xf32>
    %103 = vector.shape_cast %102 : vector<1x16x4xf32> to vector<16x4xf32>
    %cst_119 = arith.constant dense<0.000000e+00> : vector<512x4xf32>
    %104 = tpu.matmul %101, %103, %cst_119 {dimension_numbers = #tpu.dot_dimension_numbers<[1], [0], [0], [1], [0, 0, 1, 1], [], []>} : vector<512x16xf32>, vector<16x4xf32>, vector<512x4xf32> -> vector<512x4xf32>
    %105 = arith.addf %98, %104 : vector<512x4xf32>
    %c0_120 = arith.constant 0 : index
    %c1_121 = arith.constant 1 : index
    %c2_122 = arith.constant 2 : index
    %c0_123 = arith.constant 0 : index
    %c0_124 = arith.constant 0 : index
    %106 = vector.load %arg1[%c0_120, %c1_121, %c2_122, %c0_123, %c0_124] : memref<1x10x10x8x16xf32, #tpu.memory_space<vmem>>, vector<1x8x8x8x16xf32>
    %107 = vector.shape_cast %106 : vector<1x8x8x8x16xf32> to vector<8x8x8x16xf32>
    %108 = vector.shape_cast %107 : vector<8x8x8x16xf32> to vector<512x16xf32>
    %c15 = arith.constant 15 : index
    %c0_125 = arith.constant 0 : index
    %c0_126 = arith.constant 0 : index
    %109 = vector.load %arg4[%c15, %c0_125, %c0_126] : memref<27x16x4xf32, #tpu.memory_space<vmem>>, vector<1x16x4xf32>
    %110 = vector.shape_cast %109 : vector<1x16x4xf32> to vector<16x4xf32>
    %cst_127 = arith.constant dense<0.000000e+00> : vector<512x4xf32>
    %111 = tpu.matmul %108, %110, %cst_127 {dimension_numbers = #tpu.dot_dimension_numbers<[1], [0], [0], [1], [0, 0, 1, 1], [], []>} : vector<512x16xf32>, vector<16x4xf32>, vector<512x4xf32> -> vector<512x4xf32>
    %112 = arith.addf %105, %111 : vector<512x4xf32>
    %c0_128 = arith.constant 0 : index
    %c1_129 = arith.constant 1 : index
    %c2_130 = arith.constant 2 : index
    %c0_131 = arith.constant 0 : index
    %c0_132 = arith.constant 0 : index
    %113 = vector.load %arg2[%c0_128, %c1_129, %c2_130, %c0_131, %c0_132] : memref<1x10x10x8x16xf32, #tpu.memory_space<vmem>>, vector<1x8x8x8x16xf32>
    %114 = vector.shape_cast %113 : vector<1x8x8x8x16xf32> to vector<8x8x8x16xf32>
    %115 = vector.shape_cast %114 : vector<8x8x8x16xf32> to vector<512x16xf32>
    %c16 = arith.constant 16 : index
    %c0_133 = arith.constant 0 : index
    %c0_134 = arith.constant 0 : index
    %116 = vector.load %arg4[%c16, %c0_133, %c0_134] : memref<27x16x4xf32, #tpu.memory_space<vmem>>, vector<1x16x4xf32>
    %117 = vector.shape_cast %116 : vector<1x16x4xf32> to vector<16x4xf32>
    %cst_135 = arith.constant dense<0.000000e+00> : vector<512x4xf32>
    %118 = tpu.matmul %115, %117, %cst_135 {dimension_numbers = #tpu.dot_dimension_numbers<[1], [0], [0], [1], [0, 0, 1, 1], [], []>} : vector<512x16xf32>, vector<16x4xf32>, vector<512x4xf32> -> vector<512x4xf32>
    %119 = arith.addf %112, %118 : vector<512x4xf32>
    %c0_136 = arith.constant 0 : index
    %c1_137 = arith.constant 1 : index
    %c2_138 = arith.constant 2 : index
    %c0_139 = arith.constant 0 : index
    %c0_140 = arith.constant 0 : index
    %120 = vector.load %arg3[%c0_136, %c1_137, %c2_138, %c0_139, %c0_140] : memref<1x10x10x8x16xf32, #tpu.memory_space<vmem>>, vector<1x8x8x8x16xf32>
    %121 = vector.shape_cast %120 : vector<1x8x8x8x16xf32> to vector<8x8x8x16xf32>
    %122 = vector.shape_cast %121 : vector<8x8x8x16xf32> to vector<512x16xf32>
    %c17 = arith.constant 17 : index
    %c0_141 = arith.constant 0 : index
    %c0_142 = arith.constant 0 : index
    %123 = vector.load %arg4[%c17, %c0_141, %c0_142] : memref<27x16x4xf32, #tpu.memory_space<vmem>>, vector<1x16x4xf32>
    %124 = vector.shape_cast %123 : vector<1x16x4xf32> to vector<16x4xf32>
    %cst_143 = arith.constant dense<0.000000e+00> : vector<512x4xf32>
    %125 = tpu.matmul %122, %124, %cst_143 {dimension_numbers = #tpu.dot_dimension_numbers<[1], [0], [0], [1], [0, 0, 1, 1], [], []>} : vector<512x16xf32>, vector<16x4xf32>, vector<512x4xf32> -> vector<512x4xf32>
    %126 = arith.addf %119, %125 : vector<512x4xf32>
    %c0_144 = arith.constant 0 : index
    %c2_145 = arith.constant 2 : index
    %c0_146 = arith.constant 0 : index
    %c0_147 = arith.constant 0 : index
    %c0_148 = arith.constant 0 : index
    %127 = vector.load %arg1[%c0_144, %c2_145, %c0_146, %c0_147, %c0_148] : memref<1x10x10x8x16xf32, #tpu.memory_space<vmem>>, vector<1x8x8x8x16xf32>
    %128 = vector.shape_cast %127 : vector<1x8x8x8x16xf32> to vector<8x8x8x16xf32>
    %129 = vector.shape_cast %128 : vector<8x8x8x16xf32> to vector<512x16xf32>
    %c18 = arith.constant 18 : index
    %c0_149 = arith.constant 0 : index
    %c0_150 = arith.constant 0 : index
    %130 = vector.load %arg4[%c18, %c0_149, %c0_150] : memref<27x16x4xf32, #tpu.memory_space<vmem>>, vector<1x16x4xf32>
    %131 = vector.shape_cast %130 : vector<1x16x4xf32> to vector<16x4xf32>
    %cst_151 = arith.constant dense<0.000000e+00> : vector<512x4xf32>
    %132 = tpu.matmul %129, %131, %cst_151 {dimension_numbers = #tpu.dot_dimension_numbers<[1], [0], [0], [1], [0, 0, 1, 1], [], []>} : vector<512x16xf32>, vector<16x4xf32>, vector<512x4xf32> -> vector<512x4xf32>
    %133 = arith.addf %126, %132 : vector<512x4xf32>
    %c0_152 = arith.constant 0 : index
    %c2_153 = arith.constant 2 : index
    %c0_154 = arith.constant 0 : index
    %c0_155 = arith.constant 0 : index
    %c0_156 = arith.constant 0 : index
    %134 = vector.load %arg2[%c0_152, %c2_153, %c0_154, %c0_155, %c0_156] : memref<1x10x10x8x16xf32, #tpu.memory_space<vmem>>, vector<1x8x8x8x16xf32>
    %135 = vector.shape_cast %134 : vector<1x8x8x8x16xf32> to vector<8x8x8x16xf32>
    %136 = vector.shape_cast %135 : vector<8x8x8x16xf32> to vector<512x16xf32>
    %c19 = arith.constant 19 : index
    %c0_157 = arith.constant 0 : index
    %c0_158 = arith.constant 0 : index
    %137 = vector.load %arg4[%c19, %c0_157, %c0_158] : memref<27x16x4xf32, #tpu.memory_space<vmem>>, vector<1x16x4xf32>
    %138 = vector.shape_cast %137 : vector<1x16x4xf32> to vector<16x4xf32>
    %cst_159 = arith.constant dense<0.000000e+00> : vector<512x4xf32>
    %139 = tpu.matmul %136, %138, %cst_159 {dimension_numbers = #tpu.dot_dimension_numbers<[1], [0], [0], [1], [0, 0, 1, 1], [], []>} : vector<512x16xf32>, vector<16x4xf32>, vector<512x4xf32> -> vector<512x4xf32>
    %140 = arith.addf %133, %139 : vector<512x4xf32>
    %c0_160 = arith.constant 0 : index
    %c2_161 = arith.constant 2 : index
    %c0_162 = arith.constant 0 : index
    %c0_163 = arith.constant 0 : index
    %c0_164 = arith.constant 0 : index
    %141 = vector.load %arg3[%c0_160, %c2_161, %c0_162, %c0_163, %c0_164] : memref<1x10x10x8x16xf32, #tpu.memory_space<vmem>>, vector<1x8x8x8x16xf32>
    %142 = vector.shape_cast %141 : vector<1x8x8x8x16xf32> to vector<8x8x8x16xf32>
    %143 = vector.shape_cast %142 : vector<8x8x8x16xf32> to vector<512x16xf32>
    %c20 = arith.constant 20 : index
    %c0_165 = arith.constant 0 : index
    %c0_166 = arith.constant 0 : index
    %144 = vector.load %arg4[%c20, %c0_165, %c0_166] : memref<27x16x4xf32, #tpu.memory_space<vmem>>, vector<1x16x4xf32>
    %145 = vector.shape_cast %144 : vector<1x16x4xf32> to vector<16x4xf32>
    %cst_167 = arith.constant dense<0.000000e+00> : vector<512x4xf32>
    %146 = tpu.matmul %143, %145, %cst_167 {dimension_numbers = #tpu.dot_dimension_numbers<[1], [0], [0], [1], [0, 0, 1, 1], [], []>} : vector<512x16xf32>, vector<16x4xf32>, vector<512x4xf32> -> vector<512x4xf32>
    %147 = arith.addf %140, %146 : vector<512x4xf32>
    %c0_168 = arith.constant 0 : index
    %c2_169 = arith.constant 2 : index
    %c1_170 = arith.constant 1 : index
    %c0_171 = arith.constant 0 : index
    %c0_172 = arith.constant 0 : index
    %148 = vector.load %arg1[%c0_168, %c2_169, %c1_170, %c0_171, %c0_172] : memref<1x10x10x8x16xf32, #tpu.memory_space<vmem>>, vector<1x8x8x8x16xf32>
    %149 = vector.shape_cast %148 : vector<1x8x8x8x16xf32> to vector<8x8x8x16xf32>
    %150 = vector.shape_cast %149 : vector<8x8x8x16xf32> to vector<512x16xf32>
    %c21 = arith.constant 21 : index
    %c0_173 = arith.constant 0 : index
    %c0_174 = arith.constant 0 : index
    %151 = vector.load %arg4[%c21, %c0_173, %c0_174] : memref<27x16x4xf32, #tpu.memory_space<vmem>>, vector<1x16x4xf32>
    %152 = vector.shape_cast %151 : vector<1x16x4xf32> to vector<16x4xf32>
    %cst_175 = arith.constant dense<0.000000e+00> : vector<512x4xf32>
    %153 = tpu.matmul %150, %152, %cst_175 {dimension_numbers = #tpu.dot_dimension_numbers<[1], [0], [0], [1], [0, 0, 1, 1], [], []>} : vector<512x16xf32>, vector<16x4xf32>, vector<512x4xf32> -> vector<512x4xf32>
    %154 = arith.addf %147, %153 : vector<512x4xf32>
    %c0_176 = arith.constant 0 : index
    %c2_177 = arith.constant 2 : index
    %c1_178 = arith.constant 1 : index
    %c0_179 = arith.constant 0 : index
    %c0_180 = arith.constant 0 : index
    %155 = vector.load %arg2[%c0_176, %c2_177, %c1_178, %c0_179, %c0_180] : memref<1x10x10x8x16xf32, #tpu.memory_space<vmem>>, vector<1x8x8x8x16xf32>
    %156 = vector.shape_cast %155 : vector<1x8x8x8x16xf32> to vector<8x8x8x16xf32>
    %157 = vector.shape_cast %156 : vector<8x8x8x16xf32> to vector<512x16xf32>
    %c22 = arith.constant 22 : index
    %c0_181 = arith.constant 0 : index
    %c0_182 = arith.constant 0 : index
    %158 = vector.load %arg4[%c22, %c0_181, %c0_182] : memref<27x16x4xf32, #tpu.memory_space<vmem>>, vector<1x16x4xf32>
    %159 = vector.shape_cast %158 : vector<1x16x4xf32> to vector<16x4xf32>
    %cst_183 = arith.constant dense<0.000000e+00> : vector<512x4xf32>
    %160 = tpu.matmul %157, %159, %cst_183 {dimension_numbers = #tpu.dot_dimension_numbers<[1], [0], [0], [1], [0, 0, 1, 1], [], []>} : vector<512x16xf32>, vector<16x4xf32>, vector<512x4xf32> -> vector<512x4xf32>
    %161 = arith.addf %154, %160 : vector<512x4xf32>
    %c0_184 = arith.constant 0 : index
    %c2_185 = arith.constant 2 : index
    %c1_186 = arith.constant 1 : index
    %c0_187 = arith.constant 0 : index
    %c0_188 = arith.constant 0 : index
    %162 = vector.load %arg3[%c0_184, %c2_185, %c1_186, %c0_187, %c0_188] : memref<1x10x10x8x16xf32, #tpu.memory_space<vmem>>, vector<1x8x8x8x16xf32>
    %163 = vector.shape_cast %162 : vector<1x8x8x8x16xf32> to vector<8x8x8x16xf32>
    %164 = vector.shape_cast %163 : vector<8x8x8x16xf32> to vector<512x16xf32>
    %c23 = arith.constant 23 : index
    %c0_189 = arith.constant 0 : index
    %c0_190 = arith.constant 0 : index
    %165 = vector.load %arg4[%c23, %c0_189, %c0_190] : memref<27x16x4xf32, #tpu.memory_space<vmem>>, vector<1x16x4xf32>
    %166 = vector.shape_cast %165 : vector<1x16x4xf32> to vector<16x4xf32>
    %cst_191 = arith.constant dense<0.000000e+00> : vector<512x4xf32>
    %167 = tpu.matmul %164, %166, %cst_191 {dimension_numbers = #tpu.dot_dimension_numbers<[1], [0], [0], [1], [0, 0, 1, 1], [], []>} : vector<512x16xf32>, vector<16x4xf32>, vector<512x4xf32> -> vector<512x4xf32>
    %168 = arith.addf %161, %167 : vector<512x4xf32>
    %c0_192 = arith.constant 0 : index
    %c2_193 = arith.constant 2 : index
    %c2_194 = arith.constant 2 : index
    %c0_195 = arith.constant 0 : index
    %c0_196 = arith.constant 0 : index
    %169 = vector.load %arg1[%c0_192, %c2_193, %c2_194, %c0_195, %c0_196] : memref<1x10x10x8x16xf32, #tpu.memory_space<vmem>>, vector<1x8x8x8x16xf32>
    %170 = vector.shape_cast %169 : vector<1x8x8x8x16xf32> to vector<8x8x8x16xf32>
    %171 = vector.shape_cast %170 : vector<8x8x8x16xf32> to vector<512x16xf32>
    %c24 = arith.constant 24 : index
    %c0_197 = arith.constant 0 : index
    %c0_198 = arith.constant 0 : index
    %172 = vector.load %arg4[%c24, %c0_197, %c0_198] : memref<27x16x4xf32, #tpu.memory_space<vmem>>, vector<1x16x4xf32>
    %173 = vector.shape_cast %172 : vector<1x16x4xf32> to vector<16x4xf32>
    %cst_199 = arith.constant dense<0.000000e+00> : vector<512x4xf32>
    %174 = tpu.matmul %171, %173, %cst_199 {dimension_numbers = #tpu.dot_dimension_numbers<[1], [0], [0], [1], [0, 0, 1, 1], [], []>} : vector<512x16xf32>, vector<16x4xf32>, vector<512x4xf32> -> vector<512x4xf32>
    %175 = arith.addf %168, %174 : vector<512x4xf32>
    %c0_200 = arith.constant 0 : index
    %c2_201 = arith.constant 2 : index
    %c2_202 = arith.constant 2 : index
    %c0_203 = arith.constant 0 : index
    %c0_204 = arith.constant 0 : index
    %176 = vector.load %arg2[%c0_200, %c2_201, %c2_202, %c0_203, %c0_204] : memref<1x10x10x8x16xf32, #tpu.memory_space<vmem>>, vector<1x8x8x8x16xf32>
    %177 = vector.shape_cast %176 : vector<1x8x8x8x16xf32> to vector<8x8x8x16xf32>
    %178 = vector.shape_cast %177 : vector<8x8x8x16xf32> to vector<512x16xf32>
    %c25 = arith.constant 25 : index
    %c0_205 = arith.constant 0 : index
    %c0_206 = arith.constant 0 : index
    %179 = vector.load %arg4[%c25, %c0_205, %c0_206] : memref<27x16x4xf32, #tpu.memory_space<vmem>>, vector<1x16x4xf32>
    %180 = vector.shape_cast %179 : vector<1x16x4xf32> to vector<16x4xf32>
    %cst_207 = arith.constant dense<0.000000e+00> : vector<512x4xf32>
    %181 = tpu.matmul %178, %180, %cst_207 {dimension_numbers = #tpu.dot_dimension_numbers<[1], [0], [0], [1], [0, 0, 1, 1], [], []>} : vector<512x16xf32>, vector<16x4xf32>, vector<512x4xf32> -> vector<512x4xf32>
    %182 = arith.addf %175, %181 : vector<512x4xf32>
    %c0_208 = arith.constant 0 : index
    %c2_209 = arith.constant 2 : index
    %c2_210 = arith.constant 2 : index
    %c0_211 = arith.constant 0 : index
    %c0_212 = arith.constant 0 : index
    %183 = vector.load %arg3[%c0_208, %c2_209, %c2_210, %c0_211, %c0_212] : memref<1x10x10x8x16xf32, #tpu.memory_space<vmem>>, vector<1x8x8x8x16xf32>
    %184 = vector.shape_cast %183 : vector<1x8x8x8x16xf32> to vector<8x8x8x16xf32>
    %185 = vector.shape_cast %184 : vector<8x8x8x16xf32> to vector<512x16xf32>
    %c26 = arith.constant 26 : index
    %c0_213 = arith.constant 0 : index
    %c0_214 = arith.constant 0 : index
    %186 = vector.load %arg4[%c26, %c0_213, %c0_214] : memref<27x16x4xf32, #tpu.memory_space<vmem>>, vector<1x16x4xf32>
    %187 = vector.shape_cast %186 : vector<1x16x4xf32> to vector<16x4xf32>
    %cst_215 = arith.constant dense<0.000000e+00> : vector<512x4xf32>
    %188 = tpu.matmul %185, %187, %cst_215 {dimension_numbers = #tpu.dot_dimension_numbers<[1], [0], [0], [1], [0, 0, 1, 1], [], []>} : vector<512x16xf32>, vector<16x4xf32>, vector<512x4xf32> -> vector<512x4xf32>
    %189 = arith.addf %182, %188 : vector<512x4xf32>
    %c0_216 = arith.constant 0 : index
    %c0_217 = arith.constant 0 : index
    %c0_218 = arith.constant 0 : index
    %190 = vector.load %arg5[%c0_216, %c0_217, %c0_218] : memref<1x512x4xf32, #tpu.memory_space<vmem>>, vector<1x512x4xf32>
    %191 = vector.shape_cast %190 : vector<1x512x4xf32> to vector<512x4xf32>
    %192 = vector.shape_cast %189 : vector<512x4xf32> to vector<1x512x4xf32>
    tpu.vector_store %arg5[%c0_216, %c0_217, %c0_218], %192 {strides = array<i32>} : memref<1x512x4xf32, #tpu.memory_space<vmem>>, vector<1x512x4xf32>,
    %cst_219 = arith.constant dense<0.000000e+00> : vector<4xf32>
    %193 = vector.multi_reduction <add>, %189, %cst_219 [0] : vector<512x4xf32> to vector<4xf32>
    %194 = vector.shape_cast %193 : vector<4xf32> to vector<1x4xf32>
    %c0_220 = arith.constant 0 : index
    %c0_221 = arith.constant 0 : index
    %c0_222 = arith.constant 0 : index
    %195 = vector.load %arg6[%c0_220, %c0_221, %c0_222] : memref<1x1x4xf32, #tpu.memory_space<vmem>>, vector<1x1x4xf32>
    %196 = vector.shape_cast %195 : vector<1x1x4xf32> to vector<1x4xf32>
    %197 = vector.shape_cast %194 : vector<1x4xf32> to vector<1x1x4xf32>
    tpu.vector_store %arg6[%c0_220, %c0_221, %c0_222], %197 {strides = array<i32>} : memref<1x1x4xf32, #tpu.memory_space<vmem>>, vector<1x1x4xf32>,
    %198 = arith.mulf %189, %189 : vector<512x4xf32>
    %cst_223 = arith.constant dense<0.000000e+00> : vector<4xf32>
    %199 = vector.multi_reduction <add>, %198, %cst_223 [0] : vector<512x4xf32> to vector<4xf32>
    %200 = vector.shape_cast %199 : vector<4xf32> to vector<1x4xf32>
    %c0_224 = arith.constant 0 : index
    %c0_225 = arith.constant 0 : index
    %c0_226 = arith.constant 0 : index
    %201 = vector.load %arg7[%c0_224, %c0_225, %c0_226] : memref<1x1x4xf32, #tpu.memory_space<vmem>>, vector<1x1x4xf32>
    %202 = vector.shape_cast %201 : vector<1x1x4xf32> to vector<1x4xf32>
    %203 = vector.shape_cast %200 : vector<1x4xf32> to vector<1x1x4xf32>
    tpu.vector_store %arg7[%c0_224, %c0_225, %c0_226], %203 {strides = array<i32>} : memref<1x1x4xf32, #tpu.memory_space<vmem>>, vector<1x1x4xf32>,
    return
  }
  func.func @transform_0(%arg0: i32) -> (i32, i32, i32, i32, i32) {
    %c0_i32 = arith.constant 0 : i32
    %c0_i32_0 = arith.constant 0 : i32
    %c0_i32_1 = arith.constant 0 : i32
    %c0_i32_2 = arith.constant 0 : i32
    %c0_i32_3 = arith.constant 0 : i32
    return %arg0, %c0_i32, %c0_i32_0, %c0_i32_1, %c0_i32_2 : i32, i32, i32, i32, i32
  }
  func.func @transform_1(%arg0: i32) -> (i32, i32, i32, i32, i32) {
    %c0_i32 = arith.constant 0 : i32
    %c0_i32_0 = arith.constant 0 : i32
    %c0_i32_1 = arith.constant 0 : i32
    %c0_i32_2 = arith.constant 0 : i32
    %c0_i32_3 = arith.constant 0 : i32
    return %arg0, %c0_i32, %c0_i32_0, %c0_i32_1, %c0_i32_2 : i32, i32, i32, i32, i32
  }
  func.func @transform_2(%arg0: i32) -> (i32, i32, i32, i32, i32) {
    %c0_i32 = arith.constant 0 : i32
    %c0_i32_0 = arith.constant 0 : i32
    %c0_i32_1 = arith.constant 0 : i32
    %c0_i32_2 = arith.constant 0 : i32
    %c0_i32_3 = arith.constant 0 : i32
    return %arg0, %c0_i32, %c0_i32_0, %c0_i32_1, %c0_i32_2 : i32, i32, i32, i32, i32
  }
  func.func @transform_3(%arg0: i32) -> (i32, i32, i32) {
    %c0_i32 = arith.constant 0 : i32
    %c0_i32_0 = arith.constant 0 : i32
    %c0_i32_1 = arith.constant 0 : i32
    %c0_i32_2 = arith.constant 0 : i32
    return %c0_i32, %c0_i32_0, %c0_i32_1 : i32, i32, i32
  }
  func.func @transform_4(%arg0: i32) -> (i32, i32, i32) {
    %c0_i32 = arith.constant 0 : i32
    %c0_i32_0 = arith.constant 0 : i32
    %c0_i32_1 = arith.constant 0 : i32
    return %arg0, %c0_i32, %c0_i32_0 : i32, i32, i32
  }
  func.func @transform_5(%arg0: i32) -> (i32, i32, i32) {
    %c0_i32 = arith.constant 0 : i32
    %c0_i32_0 = arith.constant 0 : i32
    %c0_i32_1 = arith.constant 0 : i32
    return %arg0, %c0_i32, %c0_i32_0 : i32, i32, i32
  }
  func.func @transform_6(%arg0: i32) -> (i32, i32, i32) {
    %c0_i32 = arith.constant 0 : i32
    %c0_i32_0 = arith.constant 0 : i32
    %c0_i32_1 = arith.constant 0 : i32
    return %arg0, %c0_i32, %c0_i32_0 : i32, i32, i32
  }
}

</mosaic_0001>

<bundles_post_ra>
// kernel: tpu_custom_call.1
= control target key start
LH: loop header
LB: loop body
LE: loop exit
PB: predicated region body
PF: predicated region fallthrough
CT: control target
= control target key end

     0   :  { %s35892_s0 = inlined_call_operand.hbm [shape: f32[2,10,10,8,16], index: 0, kind: input, shape index: {}]   ;;  %s35893_s1 = inlined_call_operand.hbm [shape: f32[2,10,10,8,16], index: 1, kind: input, shape index: {}]   ;;  %s35894_s2 = inlined_call_operand.hbm [shape: f32[2,10,10,8,16], index: 2, kind: input, shape index: {}]   ;;  %s35895_s3 = inlined_call_operand.vmem [shape: f32[27,16,4], index: 3, kind: input, shape index: {}]   ;;  %s35896_s4 = inlined_call_operand.vmem [shape: f32[2,512,4], index: 4, kind: output, shape index: {0}]   ;;  %s35897_s5 = inlined_call_operand.hbm [shape: f32[2,1,4], index: 5, kind: output, shape index: {1}]   ;;  %s35898_s6 = inlined_call_operand.hbm [shape: f32[2,1,4], index: 6, kind: output, shape index: {2}]  }
   0x1   :  { %36116 = sst [smem:[#allocation89_spill]] %s35892_s0 }
   0x2   :  { %36117 = sst [smem:[#allocation90_spill]] %s35893_s1 }
   0x3   :  { %12 = vsyncpa [#allocation3], 0 }
   0x4   :  { %14 = vsyncpa [#allocation3 + $0x1], 0 }
   0x5   :  { %15 = vsyncpa [#allocation6], 0 }
   0x6   :  { %17 = vsyncpa [#allocation6 + $0x1], 0 }
   0x7   :  { %18 = vsyncpa [#allocation4], 0 }
   0x8   :  { %20 = vsyncpa [#allocation4 + $0x1], 0 }
   0x9   :  { %21 = vsyncpa [#allocation10], 0 }
   0xa   :  { %23 = vsyncpa [#allocation10 + $0x1], 0  ;;  %s29870_s21 = smov 0   ;;  %s29872_s22 = smov 0  }
   0xb   :  { %s29874_s23 = smov 0   ;;  %s29876_s24 = smov 0  }
   0xc LB: > { %s29891_s25 = sadd.s32 4294967295, %s29826_s24   ;;  %s19978_s26 = sadd.s32 4294967294, %s29826_s24   ;;  %s29826_s24 = sphi %s29876_s24, %s36551_s24   ;;  %s29822_s23 = sphi %s29874_s23, %s36555_s23   ;;  %s29818_s22 = sphi %s29872_s22, %s36554_s22   ;;  %s29814_s21 = sphi %s29870_s21, %s36553_s21  }
   0xd   : > { %s29895_s27 = sadd.s32 1, %s29826_s24   ;;  %s36_s28 = sadd.s32 1, %s29822_s23 }
   0xe   : > { %36118 = sst [smem:[#allocation15_spill]] %s29895_s27  ;;  %s33_s29 = ssub.s32 %s29826_s24, %s29895_s27 }
   0xf   : > { %p43_p0 = scmp.ne.s32.totalorder %s29822_s23, %s29818_s22  ;;  %p34_p1 = scmp.eq.s32.totalorder %s33_s29, 0 }
  0x10   : > { %p44_p2 = scmp.eq.s32.totalorder %s29826_s24, 0  ;;  %p49_p3 = scmp.ne.s32.totalorder %s29818_s22, %s29814_s21 }
  0x11   : > { %p50_p4 = scmp.eq.s32.totalorder %s29891_s25, 0  ;;  %p172_p7 = scmp.eq.s32.totalorder %s29891_s25, 1 }
  0x12   : > { %s29907_s30 = scalar_select %p34_p1, %s29822_s23, %s36_s28  }
  0x13   : > { %p45_p5 = por %p44_p2, %p43_p0  ;;  %p29909_p6 = por %p50_p4, %p49_p3 }
  0x14   : > { %36119 = sst [smem:[#allocation16_spill]] %s29907_s30  ;;  %p178_p8 = scmp.eq.s32.totalorder %s19978_s26, 1 }
  0x15   : > { %s36120_s7 = scalar_select %p29909_p6, 1, 0 }
  0x16   : > { %p29598_p10 = scmp.lt.s32.totalorder %s29826_s24, 2  ;;  %p29916_p11 = por %p172_p7, %p43_p0 }
  0x17   : > { %p29920_p12 = por %p178_p8, %p49_p3  ;;  %s35899_s10 = sand.u32 1, %s29822_s23  }
  0x18   : > { %s36121_s8 = scalar_select %p29916_p11, 1, 0 }
  0x19   : > { %s36122_s9 = scalar_select %p29920_p12, 1, 0 }
  0x1a   : > { %s29926_s11 = smul.u32 12800, %s29826_s24  ;;  %p29932_p13 = pnand %p29598_p10, %p45_p5 }
  0x1b   : > { %s29930_s12 = smul.u32 800, %s35899_s10  ;;  %s248_s14 = sand.u32 1, %s29826_s24  }
  0x1c   : > { %s36124_s1 = sld [smem:[#allocation90_spill]]  ;;  %s29947_s20 = scalar_lea.sflag [#allocation6], %s248_s14 }
  0x1d   : > { %s252_s18 = scalar_lea.vmem [#allocation5], %s29930_s12  ;;  %p29953_p2 = pneg %p29932_p13 }
  0x1e   : > { %s259_s19 = sshll.u32 %s252_s18, 4  ;;  %s29944_s19 = int_to_ptr.vmem [resolvable:$true] %s259_s19 }
  0x22   : > { %s29941_s17 = scalar_lea.hbm %s36124_s1, %s29926_s11  ;;  %s29639_s16 = scalar_lea.hbm %s36124_s1, 25600 }
  0x23   : > { %s29634_s26 = scalar_lea.hbm %s29941_s17, 12800  ;;  %p29640_p5 = scmp.lt.u32.totalorder %s29941_s17, %s36124_s1 }
  0x24   : > { %p29635_p1 = scmp.ne.s32.totalorder %s29941_s17, %s29634_s26  ;;  %p29641_p7 = scmp.lt.u32.totalorder %s29639_s16, %s29634_s26 }
  0x25   : > { %p29643_p10 = scmp.lt.u32.totalorder %s29634_s26, %s29941_s17 }
  0x26   : > { %p29637_p3 = pnand %p29953_p2, %p29635_p1  ;;  %p29642_p8 = por %p29641_p7, %p29640_p5 }
  0x28   : > { %p29638_p4 = pneg %p29637_p3  ;;  %p29644_p9 = por %p29643_p10, %p29642_p8 }
  0x2a   : > { %p29645_p0 = pnand %p29644_p9, %p29638_p4 }
  0x2c   : > { %29648 = shalt.err (!%p29645_p0)
}
  0x2d   : > { %s29649_s14 = scalar_lea.vmem %s29944_s19, 12800  ;;  %s29828_s29 = smov [#allocation5]  }
  0x2e   : > { %p29650_p1 = scmp.ne.s32.totalorder %s29944_s19, %s29649_s14  ;;  %s29654_s15 = sshll.u32 %s29828_s29, 4  ;;  %s29655_s15 = int_to_ptr.vmem [resolvable:$false] %s29654_s15 }
  0x2f   : > { %s29656_s10 = scalar_lea.vmem %s29655_s15, 25600  ;;  %p29657_p11 = scmp.lt.s32.totalorder %s29944_s19, %s29655_s15 }
  0x30   : > { %p29652_p3 = pnand %p29650_p1, %p29953_p2  ;;  %p29658_p6 = scmp.lt.s32.totalorder %s29656_s10, %s29649_s14 }
  0x32   : > { %p29653_p12 = pneg %p29652_p3  ;;  %p29659_p5 = por %p29658_p6, %p29657_p11 }
  0x34   : > { %p29660_p7 = pnand %p29659_p5, %p29653_p12 }
  0x36   : > { %29663 = shalt.err (!%p29660_p7)
}
  0x37   : > { %s35902_s26 = smov 128   ;;  %s35904_s16 = smov 8  }
  0x38   : > { %29587 = dma.hbm_to_vmem [thread:$0]  (!%p29932_p13), %s29941_s17, 12800, %s29944_s19, %s29947_s20, %s35902_s26, %s35902_s26, %s35904_s16  }
  0x39   : > { %p288_p6 = scmp.lt.s32.totalorder %s29826_s24, 3  ;;  %s36126_s0 = sld [smem:[#allocation89_spill]] }
  0x3a   : > { %p36127_p9 = scmp.ge.s32.totalorder %s29826_s24, 1  ;;  %s231_s10 = scalar_lea.vmem [#allocation2], %s29930_s12 }
  0x3b   : > { %s238_s1 = sshll.u32 %s231_s10, 4  ;;  %s36129_s17 = sand.u32 1, %s29822_s23   ;;  %s29994_s1 = int_to_ptr.vmem [resolvable:$true] %s238_s1 }
  0x3c   : > { %p29989_p11 = pnand %p36127_p9, %p288_p6  ;;  %s29998_s19 = scalar_lea.sflag [#allocation3], %s36129_s17 }
  0x3e   : > { %s36128_s15 = scalar_select %p29989_p11, 1, 0 }
  0x3f   : > { %s29985_s29 = scalar_lea.hbm %s36126_s0, %s29926_s11  ;;  %s29669_s16 = scalar_lea.hbm %s36126_s0, 25600 }
  0x40   : > { %s29664_s26 = scalar_lea.hbm %s29985_s29, 12800  ;;  %p29670_p8 = scmp.lt.u32.totalorder %s29985_s29, %s36126_s0 }
  0x41   : > { %p29665_p12 = scmp.ne.s32.totalorder %s29985_s29, %s29664_s26  ;;  %p29671_p10 = scmp.lt.u32.totalorder %s29669_s16, %s29664_s26 }
  0x42   : > { %p29673_p3 = scmp.lt.u32.totalorder %s29664_s26, %s29985_s29 }
  0x43   : > { %p29667_p0 = pnand %p29665_p12, %p29953_p2  ;;  %p29672_p1 = por %p29671_p10, %p29670_p8 }
  0x45   : > { %p29668_p4 = pneg %p29667_p0  ;;  %p29674_p5 = por %p29673_p3, %p29672_p1 }
  0x47   : > { %p29675_p7 = pnand %p29674_p5, %p29668_p4 }
  0x49   : > { %29678 = shalt.err (!%p29675_p7)
}
  0x4a   : > { %s29679_s10 = scalar_lea.vmem %s29994_s1, 12800  ;;  %s29831_s17 = smov [#allocation2]  }
  0x4b   : > { %p29680_p6 = scmp.ne.s32.totalorder %s29994_s1, %s29679_s10  ;;  %s29684_s18 = sshll.u32 %s29831_s17, 4  ;;  %s29685_s18 = int_to_ptr.vmem [resolvable:$false] %s29684_s18 }
  0x4c   : > { %s29686_s27 = scalar_lea.vmem %s29685_s18, 25600  ;;  %p29687_p0 = scmp.lt.s32.totalorder %s29994_s1, %s29685_s18 }
  0x4d   : > { %p29682_p9 = pnand %p29680_p6, %p29953_p2  ;;  %p29688_p11 = scmp.lt.s32.totalorder %s29686_s27, %s29679_s10 }
  0x4f   : > { %p29683_p12 = pneg %p29682_p9  ;;  %p29689_p8 = por %p29688_p11, %p29687_p0 }
  0x51   : > { %p29690_p10 = pnand %p29689_p8, %p29683_p12 }
  0x53   : > { %29693 = shalt.err (!%p29690_p10)
}
  0x54   : > { %s36130_s30 = smov 8   ;;  %s36131_s26 = smov 128  }
  0x55   : > { %29584 = dma.hbm_to_vmem [thread:$0]  (!%p29932_p13), %s29985_s29, 12800, %s29994_s1, %s29998_s19, %s36131_s26, %s36131_s26, %s36130_s30  }
  0x56   : > { %s30029_s17 = scalar_lea.hbm %s35894_s2, %s29926_s11  ;;  %s273_s10 = scalar_lea.vmem [#allocation7], %s29930_s12 }
  0x57   : > { %s280_s18 = sshll.u32 %s273_s10, 4  ;;  %s29694_s27 = scalar_lea.hbm %s30029_s17, 12800  ;;  %s30032_s18 = int_to_ptr.vmem [resolvable:$true] %s280_s18 }
  0x58   : > { %p29695_p11 = scmp.ne.s32.totalorder %s30029_s17, %s29694_s27  ;;  %s29699_s29 = scalar_lea.hbm %s35894_s2, 25600 }
  0x59   : > { %p29700_p3 = scmp.lt.u32.totalorder %s30029_s17, %s35894_s2  ;;  %p29701_p5 = scmp.lt.u32.totalorder %s29699_s29, %s29694_s27 }
  0x5a   : > { %p29697_p4 = pnand %p29695_p11, %p29953_p2  ;;  %p29703_p6 = scmp.lt.u32.totalorder %s29694_s27, %s30029_s17 }
  0x5b   : > { %p29702_p7 = por %p29701_p5, %p29700_p3 }
  0x5c   : > { %p29698_p1 = pneg %p29697_p4 }
  0x5d   : > { %p29704_p9 = por %p29703_p6, %p29702_p7 }
  0x5f   : > { %p29705_p12 = pnand %p29704_p9, %p29698_p1 }
  0x61   : > { %29708 = shalt.err (!%p29705_p12)
}
  0x62   : > { %s29709_s12 = scalar_lea.vmem %s30032_s18, 12800  ;;  %s29832_s0 = smov [#allocation7]  }
  0x63   : > { %p29710_p0 = scmp.ne.s32.totalorder %s30032_s18, %s29709_s12  ;;  %s29714_s16 = sshll.u32 %s29832_s0, 4  ;;  %s29715_s16 = int_to_ptr.vmem [resolvable:$false] %s29714_s16 }
  0x64   : > { %s29716_s14 = scalar_lea.vmem %s29715_s16, 25600  ;;  %p29717_p11 = scmp.lt.s32.totalorder %s30032_s18, %s29715_s16 }
  0x65   : > { %p29712_p8 = pnand %p29710_p0, %p29953_p2  ;;  %p29718_p4 = scmp.lt.s32.totalorder %s29716_s14, %s29709_s12 }
  0x67   : > { %p29713_p10 = pneg %p29712_p8  ;;  %p29719_p3 = por %p29718_p4, %p29717_p11 }
  0x69   : > { %p29720_p5 = pnand %p29719_p3, %p29713_p10 }
  0x6b   : > { %29723 = shalt.err (!%p29720_p5)
}
  0x6c   : > { %29590 = dma.hbm_to_vmem [thread:$0]  (!%p29932_p13), %s30029_s17, 12800, %s30032_s18, %s29947_s20, %s36131_s26, %s36131_s26, %s36130_s30  }
  0x6d   : > { %p36132_p2 = scmp.ne.s32.totalorder %s36128_s15, 0 }
  0x6f   : > { %292 = sbr.rel (%p36132_p2) target bundleno = 2127 (0x84f), region = 36 }
  0x76   : > { %s30062_s28 = sand.u32 1, %s29818_s22   ;;  %p36133_p1 = scmp.ne.s32.totalorder %s36120_s7, 0 }
  0x77   : > { %s30065_s10 = smul.u32 800, %s30062_s28  ;;  %s295_s13 = scalar_lea.sflag [#allocation3], %s30062_s28 }
  0x79   : > { %s30069_s27 = scalar_lea.vmem [#allocation2], %s30065_s10 }
  0x7a   : > { %29797 = dma.done.wait (%p36133_p1), %s295_s13, 12800  }
  0x7b   : > { %29799 = vsyncadd (%p36133_p1), %s295_s13, 4294954496  ;;  %s303_s20 = sand.u32 1, %s29891_s25   ;;  %s30077_s30 = scalar_lea.vmem [#allocation5], %s30065_s10 }
  0x7c   : > { %s304_s15 = scalar_lea.sflag [#allocation6], %s303_s20 }
  0x7d   : > { %29801 = dma.done.wait (%p36133_p1), %s304_s15, 25600  }
  0x7e   : > { %29803 = vsyncadd (%p36133_p1), %s304_s15, 4294941696  ;;  %vm501_vm0 = vcmask 130048   ;;  %v19987_v0 = vld [vmem:[%s35895_s3 + $0x10] sm:$0xff]  ;;  %v19988_v1 = vld [vmem:[%s35895_s3 + $0x18] sm:$0xff]  ;;  %s30236_s0 = scalar_lea.vmem [#allocation7], %s30065_s10  ;;  %p363_p13 = scmp.lt.s32.totalorder %s29891_s25, 1 }
  0x7f   : > { %v21547_v2 = vld [vmem:[%s35895_s3 + $0xd0] sm:$0xff]  ;;  %v27790_v3 = vpack.c.bf16 %v19988_v1, %v19987_v0  ;;  %v21548_v4 = vld [vmem:[%s35895_s3 + $0xd8] sm:$0xff]  ;;  %v434_v5 = vld [vmem:[%s30077_s30] sm:$0xff]  ;;  %vm19380_vm1 = vcmask 31744   ;;  %s23303_s19 = sshll.u32 %s29891_s25, 4  ;;  %s356_s11 = scalar_lea.vmem [#allocation8], %s30062_s28 }
  0x80   : > { %v21483_v6 = vld [vmem:[%s30077_s30 + $0x58] sm:$0xff]  ;;  %v30097_v7 = vpack.c.bf16 %v21548_v4, %v21547_v2  ;;  %25094 = vmatprep.mubr.msk.f32.mxu1 %vm501_vm0, %v434_v5  ;;  %v432_v8 = vld [vmem:[%s35895_s3] sm:$0xff]  ;;  %v433_v9 = vld [vmem:[%s35895_s3 + $0x8] sm:$0xff]  ;;  %s19803_s7 = sshll.u32 %s356_s11, 4  ;;  %vm19578_vm2 = vcmask 24576   ;;  %s362_s12 = scalar_lea.vmem [#allocation9], %s30062_s28  ;;  %s35817_s7 = int_to_ptr.vmem [resolvable:$true] %s19803_s7 }
  0x81   : > { %26394 = vmatprep.mubr.msk.f32.mxu0 %vm501_vm0, %v21483_v6  ;;  %27791 = vmatprep.subr.bf16.mxu1 %v27790_v3  ;;  %v27794_v10 = vpack.c.bf16 %v433_v9, %v432_v8  ;;  %v21677_v11 = vld [vmem:[%s35895_s3 + $0xe0] sm:$0xff]  ;;  %v21678_v12 = vld [vmem:[%s35895_s3 + $0xe8] sm:$0xff]  ;;  %v436_v16 = vld [vmem:[%s30077_s30 + $0x10] sm:$0xff]  ;;  %s19816_s10 = sshll.u32 %s362_s12, 4  ;;  %s35815_s13 = scalar_lea.hbm %s35897_s5, %s23303_s19  ;;  %s35825_s10 = int_to_ptr.vmem [resolvable:$true] %s19816_s10 }
  0x82   : > { %36134 = vst [vmem:[#allocation17_spill] sm:$0xff] %v30097_v7  ;;  %27843 = vmatprep.subr.bf16.mxu0 %v30097_v7  ;;  %27793 = vmatpush3.bf16.msra.mxu1 %v27790_v3  ;;  %v435_v13 = vld [vmem:[%s30077_s30 + $0x8] sm:$0xff]  ;;  %v27846_v14 = vpack.c.bf16 %v21678_v12, %v21677_v11  ;;  %v21484_v15 = vld [vmem:[%s30077_s30 + $0x60] sm:$0xff]  ;;  %v437_v18 = vld [vmem:[%s30077_s30 + $0x18] sm:$0xff]  ;;  %s35823_s15 = scalar_lea.hbm %s35898_s6, %s23303_s19  ;;  %s19784_s26 = scalar_lea.sflag [#allocation4], %s30062_s28 }
  0x83   : > { %27845 = vmatpush3.bf16.msra.mxu0 %v30097_v7  ;;  %27795 = vmatprep.subr.bf16.mxu1 %v27794_v10  ;;  %v21485_v17 = vld [vmem:[%s30077_s30 + $0x68] sm:$0xff]  ;;  %v21486_v19 = vld [vmem:[%s30077_s30 + $0x70] sm:$0xff]  ;;  %v438_v20 = vld [vmem:[%s30077_s30 + $0x20] sm:$0xff]  ;;  %s29724_s17 = scalar_lea.vmem %s35817_s7, 16  ;;  %p36548_p6 = scmp.ne.s32.totalorder %s36121_s8, 0 }
  0x84   : > { %27847 = vmatprep.subr.bf16.mxu0 %v27846_v14  ;;  %v21487_v21 = vld [vmem:[%s30077_s30 + $0x78] sm:$0xff]  ;;  %v439_v22 = vld [vmem:[%s30077_s30 + $0x28] sm:$0xff]  ;;  %v21488_v23 = vld [vmem:[%s30077_s30 + $0x80] sm:$0xff]  ;;  %p29725_p7 = scmp.ne.s32.totalorder %s35817_s7, %s29724_s17  ;;  %s29833_s18 = smov [#allocation8]  }
  0x85   : > { %25095 = vmatmul.mubr.msk.f32.vlgmr.msra.gmra.mrb[0].mxu1 %vm501_vm0, %v435_v13  ;;  %v440_v24 = vld [vmem:[%s30077_s30 + $0x30] sm:$0xff]  ;;  %v21489_v25 = vld [vmem:[%s30077_s30 + $0x88] sm:$0xff]  ;;  %v441_v26 = vld [vmem:[%s30077_s30 + $0x38] sm:$0xff] }
  0x86   : > { %26395 = vmatmul.mubr.msk.f32.vlgmr.msra.gmra.mrb[0].mxu0 %vm501_vm0, %v21484_v15  ;;  %27797 = vmatpush3.bf16.msra.mxu1 %v27794_v10  ;;  %v21490_v27 = vld [vmem:[%s30077_s30 + $0x90] sm:$0xff]  ;;  %v21491_v29 = vld [vmem:[%s30077_s30 + $0xa8] sm:$0xff]  ;;  %v21808_v31 = vld [vmem:[%s35895_s3 + $0xf8] sm:$0xff]  ;;  %p29726_p9 = pnand %p29725_p7, %p36548_p6 }
  0x87   : > { %27849 = vmatpush3.bf16.msra.mxu0 %v27846_v14  ;;  %25097 = vmatprep.mubr.msk.f32.mxu1 %vm501_vm0, %v436_v16  ;;  %v442_v28 = vld [vmem:[%s30077_s30 + $0x50] sm:$0xff]  ;;  %v21493_v34 = vld [vmem:[%s30077_s30 + $0xb8] sm:$0xff]  ;;  %v21494_v35 = vld [vmem:[%s30077_s30 + $0xc0] sm:$0xff] }
  0x88   : > { %26397 = vmatprep.mubr.msk.f32.mxu0 %vm501_vm0, %v21485_v17  ;;  %v21807_v30 = vld [vmem:[%s35895_s3 + $0xf0] sm:$0xff]  ;;  %v21495_v36 = vld [vmem:[%s30077_s30 + $0xc8] sm:$0xff]  ;;  %v21497_v38 = vld [vmem:[%s30077_s30 + $0xd8] sm:$0xff]  ;;  %p29727_p12 = pneg %p29726_p9 }
  0x89   : > { %25098 = vmatmul.mubr.msk.f32.gmra.mrb[2].mxu1 %vm501_vm0, %v437_v18  ;;  %v30150_v32 = vpack.c.bf16 %v21808_v31, %v21807_v30  ;;  %v21492_v33 = vld [vmem:[%s30077_s30 + $0xb0] sm:$0xff]  ;;  %v21498_v39 = vld [vmem:[%s30077_s30 + $0xe0] sm:$0xff]  ;;  %v21499_v41 = vld [vmem:[%s30077_s30 + $0xf8] sm:$0xff] }
  0x8a   : > { %26398 = vmatmul.mubr.msk.f32.gmra.mrb[2].mxu0 %vm501_vm0, %v21486_v19  ;;  %25100 = vmatprep.mubr.msk.f32.mxu1 %vm501_vm0, %v438_v20  ;;  %v21496_v37 = vld [vmem:[%s30077_s30 + $0xd0] sm:$0xff]  ;;  %v450_v40 = vld [vmem:[%s30077_s30 + $0xa0] sm:$0xff]  ;;  %v21501_v44 = vld [vmem:[%s30077_s30 + $0x108] sm:$0xff] }
  0x8b   : > { %26400 = vmatprep.mubr.msk.f32.mxu0 %vm501_vm0, %v21487_v21  ;;  %27851 = vmatprep.subr.bf16.mxu0 %v30150_v32  ;;  %v21500_v42 = vld [vmem:[%s30077_s30 + $0x100] sm:$0xff]  ;;  %v20118_v45 = vld [vmem:[%s35895_s3 + $0x28] sm:$0xff]  ;;  %v21502_v47 = vld [vmem:[%s30077_s30 + $0x110] sm:$0xff] }
  0x8c   : > { %v20117_v43 = vld [vmem:[%s35895_s3 + $0x20] sm:$0xff]  ;;  %v21503_v48 = vld [vmem:[%s30077_s30 + $0x118] sm:$0xff]  ;;  %v21505_v50 = vld [vmem:[%s30077_s30 + $0x128] sm:$0xff] }
  0x8d   : > { %25101 = vmatmul.mubr.msk.f32.gmra.mrb[4].mxu1 %vm501_vm0, %v439_v22  ;;  %v30190_v46 = vpack.c.bf16 %v20118_v45, %v20117_v43  ;;  %v21504_v49 = vld [vmem:[%s30077_s30 + $0x120] sm:$0xff]  ;;  %v21506_v51 = vld [vmem:[%s30077_s30 + $0x130] sm:$0xff]  ;;  %v21507_v53 = vld [vmem:[%s30077_s30 + $0x148] sm:$0xff] }
  0x8e   : > { %26401 = vmatmul.mubr.msk.f32.gmra.mrb[4].mxu0 %vm501_vm0, %v21488_v23  ;;  %25103 = vmatprep.mubr.msk.f32.mxu1 %vm501_vm0, %v440_v24  ;;  %v458_v52 = vld [vmem:[%s30077_s30 + $0xf0] sm:$0xff]  ;;  %v21509_v55 = vld [vmem:[%s30077_s30 + $0x158] sm:$0xff]  ;;  %v21510_v56 = vld [vmem:[%s30077_s30 + $0x160] sm:$0xff] }
  0x8f   : > { %26403 = vmatprep.mubr.msk.f32.mxu0 %vm501_vm0, %v21489_v25  ;;  %27799 = vmatprep.subr.bf16.mxu1 %v30190_v46  ;;  %v21508_v54 = vld [vmem:[%s30077_s30 + $0x150] sm:$0xff]  ;;  %v21511_v57 = vld [vmem:[%s30077_s30 + $0x168] sm:$0xff]  ;;  %v21513_v59 = vld [vmem:[%s30077_s30 + $0x178] sm:$0xff] }
  0x90   : > { %v21512_v58 = vld [vmem:[%s30077_s30 + $0x170] sm:$0xff]  ;;  %v21514_v60 = vld [vmem:[%s30077_s30 + $0x180] sm:$0xff]  ;;  %v30239_v62 = vld [vmem:[%s30236_s0 + $0x58] sm:$0xff] }
  0x91   : > { %25104 = vmatmul.mubr.msk.f32.gmra.mrb[6].mxu1 %vm501_vm0, %v441_v26  ;;  %v466_v61 = vld [vmem:[%s30077_s30 + $0x140] sm:$0xff]  ;;  %v30250_v0 = vld [vmem:[%s30236_s0 + $0x68] sm:$0xff]  ;;  %v30266_v3 = vld [vmem:[%s30236_s0 + $0x70] sm:$0xff] }
  0x92   : > { %26404 = vmatmul.mubr.msk.f32.gmra.mrb[6].mxu0 %vm501_vm0, %v21490_v27  ;;  %25106 = vmatprep.mubr.msk.f32.mxu1 %vm501_vm0, %v442_v28  ;;  %v30247_v63 = vld [vmem:[%s30236_s0 + $0x60] sm:$0xff]  ;;  %v21938_v2 = vld [vmem:[%s35895_s3 + $0x108] sm:$0xff]  ;;  %v30271_v5 = vld [vmem:[%s30236_s0 + $0x78] sm:$0xff] }
  0x93   : > { %26406 = vmatprep.mubr.msk.f32.mxu0 %vm501_vm0, %v21491_v29  ;;  %v21937_v1 = vld [vmem:[%s35895_s3 + $0x100] sm:$0xff]  ;;  %v30284_v8 = vld [vmem:[%s30236_s0 + $0x88] sm:$0xff]  ;;  %v21620_v9 = vld [vmem:[%s30236_s0 + $0x90] sm:$0xff] }
  0x94   : > { %v30268_v4 = vpack.c.bf16 %v21938_v2, %v21937_v1  ;;  %v474_v10 = vld [vmem:[%s30077_s30 + $0x190] sm:$0xff]  ;;  %v30295_v11 = vld [vmem:[%s30236_s0 + $0xa8] sm:$0xff]  ;;  %v475_v12 = vld [vmem:[%s30077_s30 + $0x198] sm:$0xff] }
  0x95   : > { %25107 = vmatmul.mubr.msk.f32.gmra.mrb[8].mxu1 %vm501_vm0, %v21483_v6  ;;  %v30281_v6 = vld [vmem:[%s30236_s0 + $0x80] sm:$0xff]  ;;  %v30304_v13 = vld [vmem:[%s30236_s0 + $0xb0] sm:$0xff]  ;;  %v477_v16 = vld [vmem:[%s30077_s30 + $0x1a8] sm:$0xff] }
  0x96   : > { %26407 = vmatmul.mubr.msk.f32.gmra.mrb[8].mxu0 %vm501_vm0, %v21492_v33  ;;  %25109 = vmatprep.mubr.msk.f32.mxu1 %vm501_vm0, %v21484_v15  ;;  %v476_v14 = vld [vmem:[%s30077_s30 + $0x1a0] sm:$0xff]  ;;  %v30308_v15 = vld [vmem:[%s30236_s0 + $0xb8] sm:$0xff]  ;;  %v478_v18 = vld [vmem:[%s30077_s30 + $0x1b0] sm:$0xff] }
  0x97   : > { %26409 = vmatprep.mubr.msk.f32.mxu0 %vm501_vm0, %v21493_v34  ;;  %v479_v20 = vld [vmem:[%s30077_s30 + $0x1b8] sm:$0xff]  ;;  %v480_v22 = vld [vmem:[%s30077_s30 + $0x1c0] sm:$0xff]  ;;  %v481_v24 = vld [vmem:[%s30077_s30 + $0x1c8] sm:$0xff] }
  0x98   : > { %v482_v26 = vld [vmem:[%s30077_s30 + $0x1e0] sm:$0xff]  ;;  %v30348_v27 = vld [vmem:[%s30236_s0 + $0xf8] sm:$0xff]  ;;  %v483_v28 = vld [vmem:[%s30077_s30 + $0x1e8] sm:$0xff] }
  0x99   : > { %25110 = vmatmul.mubr.msk.f32.gmra.mrb[10].mxu1 %vm501_vm0, %v21485_v17  ;;  %v30318_v17 = vld [vmem:[%s30236_s0 + $0xc0] sm:$0xff]  ;;  %v484_v30 = vld [vmem:[%s30077_s30 + $0x1f0] sm:$0xff]  ;;  %v30361_v31 = vld [vmem:[%s30236_s0 + $0x108] sm:$0xff] }
  0x9a   : > { %26410 = vmatmul.mubr.msk.f32.gmra.mrb[10].mxu0 %vm501_vm0, %v21494_v35  ;;  %25112 = vmatprep.mubr.msk.f32.mxu1 %vm501_vm0, %v21486_v19  ;;  %v30322_v19 = vld [vmem:[%s30236_s0 + $0xc8] sm:$0xff]  ;;  %v30410_v45 = vld [vmem:[%s30236_s0 + $0x150] sm:$0xff]  ;;  %v30463_v1 = vld [vmem:[%s30236_s0 + $0x1a0] sm:$0xff] }
  0x9b   : > { %26412 = vmatprep.mubr.msk.f32.mxu0 %vm501_vm0, %v21495_v36  ;;  %v30401_v43 = vld [vmem:[%s30236_s0 + $0x148] sm:$0xff]  ;;  %v370_v2 = vld [vmem:[%s30069_s27 + $0x10] sm:$0xff] }
  0x9c   : > { %v21668_v7 = vld [vmem:[%s30236_s0 + $0x270] sm:$0xff] }
  0x9d   : > { %25113 = vmatmul.mubr.msk.f32.gmra.mrb[12].mxu1 %vm501_vm0, %v21487_v21  ;;  %v30332_v21 = vld [vmem:[%s30236_s0 + $0xd0] sm:$0xff] }
  0x9e   : > { %26413 = vmatmul.mubr.msk.f32.gmra.mrb[12].mxu0 %vm501_vm0, %v21496_v37  ;;  %25115 = vmatprep.mubr.msk.f32.mxu1 %vm501_vm0, %v21488_v23  ;;  %v30336_v23 = vld [vmem:[%s30236_s0 + $0xd8] sm:$0xff] }
  0x9f   : > { %26415 = vmatprep.mubr.msk.f32.mxu0 %vm501_vm0, %v21497_v38 }
  0xa1   : > { %25116 = vmatmul.mubr.msk.f32.gmra.mrb[14].mxu1 %vm501_vm0, %v21489_v25  ;;  %v21628_v25 = vld [vmem:[%s30236_s0 + $0xe0] sm:$0xff] }
  0xa2   : > { %26416 = vmatmul.mubr.msk.f32.gmra.mrb[14].mxu0 %vm501_vm0, %v21498_v39  ;;  %25118 = vmatprep.mubr.msk.f32.mxu1 %vm501_vm0, %v450_v40  ;;  %v30389_v39 = vld [vmem:[%s30236_s0 + $0x128] sm:$0xff]  ;;  %v489_v40 = vld [vmem:[%s30077_s30 + $0x218] sm:$0xff] }
  0xa3   : > { %26418 = vmatprep.mubr.msk.f32.mxu0 %vm501_vm0, %v21499_v41 }
  0xa5   : > { %25119 = vmatmul.mubr.msk.f32.gmra.mrb[16].mxu1 %vm501_vm0, %v21491_v29  ;;  %v30357_v29 = vld [vmem:[%s30236_s0 + $0x100] sm:$0xff] }
  0xa6   : > { %26419 = vmatmul.mubr.msk.f32.gmra.mrb[16].mxu0 %vm501_vm0, %v21500_v42  ;;  %25121 = vmatprep.mubr.msk.f32.mxu1 %vm501_vm0, %v21492_v33  ;;  %v30371_v33 = vld [vmem:[%s30236_s0 + $0x110] sm:$0xff] }
  0xa7   : > { %26421 = vmatprep.mubr.msk.f32.mxu0 %vm501_vm0, %v21501_v44 }
  0xa9   : > { %25122 = vmatmul.mubr.msk.f32.gmra.mrb[18].mxu1 %vm501_vm0, %v21493_v34  ;;  %v486_v34 = vld [vmem:[%s30077_s30 + $0x200] sm:$0xff] }
  0xaa   : > { %26422 = vmatmul.mubr.msk.f32.gmra.mrb[18].mxu0 %vm501_vm0, %v21502_v47  ;;  %25124 = vmatprep.mubr.msk.f32.mxu1 %vm501_vm0, %v21494_v35  ;;  %v30375_v35 = vld [vmem:[%s30236_s0 + $0x118] sm:$0xff] }
  0xab   : > { %26424 = vmatprep.mubr.msk.f32.mxu0 %vm501_vm0, %v21503_v48 }
  0xad   : > { %25125 = vmatmul.mubr.msk.f32.gmra.mrb[20].mxu1 %vm501_vm0, %v21495_v36  ;;  %v487_v36 = vld [vmem:[%s30077_s30 + $0x208] sm:$0xff] }
  0xae   : > { %26425 = vmatmul.mubr.msk.f32.gmra.mrb[20].mxu0 %vm501_vm0, %v21504_v49  ;;  %25127 = vmatprep.mubr.msk.f32.mxu1 %vm501_vm0, %v21496_v37  ;;  %v30385_v37 = vld [vmem:[%s30236_s0 + $0x120] sm:$0xff] }
  0xaf   : > { %26427 = vmatprep.mubr.msk.f32.mxu0 %vm501_vm0, %v21505_v50 }
  0xb1   : > { %25128 = vmatmul.mubr.msk.f32.gmra.mrb[22].mxu1 %vm501_vm0, %v21497_v38  ;;  %v488_v38 = vld [vmem:[%s30077_s30 + $0x210] sm:$0xff] }
  0xb2   : > { %26428 = vmatmul.mubr.msk.f32.gmra.mrb[22].mxu0 %vm501_vm0, %v21506_v51  ;;  %25130 = vmatprep.mubr.msk.f32.mxu1 %vm501_vm0, %v458_v52  ;;  %v494_v51 = vld [vmem:[%s30077_s30 + $0x250] sm:$0xff]  ;;  %v30428_v52 = vld [vmem:[%s30236_s0 + $0x168] sm:$0xff] }
  0xb3   : > { %26430 = vmatprep.mubr.msk.f32.mxu0 %vm501_vm0, %v21507_v53 }
  0xb5   : > { %25131 = vmatmul.mubr.msk.f32.gmra.mrb[24].mxu1 %vm501_vm0, %v21499_v41  ;;  %v21636_v41 = vld [vmem:[%s30236_s0 + $0x130] sm:$0xff] }
  0xb6   : > { %26431 = vmatmul.mubr.msk.f32.gmra.mrb[24].mxu0 %vm501_vm0, %v21508_v54  ;;  %25133 = vmatprep.mubr.msk.f32.mxu1 %vm501_vm0, %v21500_v42  ;;  %v490_v42 = vld [vmem:[%s30077_s30 + $0x230] sm:$0xff] }
  0xb7   : > { %26433 = vmatprep.mubr.msk.f32.mxu0 %vm501_vm0, %v21509_v55 }
  0xb9   : > { %25134 = vmatmul.mubr.msk.f32.gmra.mrb[26].mxu1 %vm501_vm0, %v21501_v44  ;;  %v491_v44 = vld [vmem:[%s30077_s30 + $0x238] sm:$0xff] }
  0xba   : > { %26434 = vmatmul.mubr.msk.f32.gmra.mrb[26].mxu0 %vm501_vm0, %v21510_v56  ;;  %25136 = vmatprep.mubr.msk.f32.mxu1 %vm501_vm0, %v21502_v47  ;;  %v492_v47 = vld [vmem:[%s30077_s30 + $0x240] sm:$0xff] }
  0xbb   : > { %26436 = vmatprep.mubr.msk.f32.mxu0 %vm501_vm0, %v21511_v57 }
  0xbd   : > { %25137 = vmatmul.mubr.msk.f32.gmra.mrb[28].mxu1 %vm501_vm0, %v21503_v48  ;;  %v30414_v48 = vld [vmem:[%s30236_s0 + $0x158] sm:$0xff] }
  0xbe   : > { %26437 = vmatmul.mubr.msk.f32.gmra.mrb[28].mxu0 %vm501_vm0, %v21512_v58  ;;  %25139 = vmatprep.mubr.msk.f32.mxu1 %vm501_vm0, %v21504_v49  ;;  %v493_v49 = vld [vmem:[%s30077_s30 + $0x248] sm:$0xff] }
  0xbf   : > { %26439 = vmatprep.mubr.msk.f32.mxu0 %vm501_vm0, %v21513_v59 }
  0xc1   : > { %25140 = vmatmul.mubr.msk.f32.gmra.mrb[30].mxu1 %vm501_vm0, %v21505_v50  ;;  %v30424_v50 = vld [vmem:[%s30236_s0 + $0x160] sm:$0xff] }
  0xc2   : > { %26440 = vmatmul.mubr.msk.f32.gmra.mrb[30].mxu0 %vm501_vm0, %v21514_v60  ;;  %25142 = vmatprep.mubr.msk.f32.mxu1 %vm501_vm0, %v466_v61  ;;  %v30454_v60 = vld [vmem:[%s30236_s0 + $0x198] sm:$0xff]  ;;  %v369_v61 = vld [vmem:[%s30069_s27 + $0x8] sm:$0xff] }
  0xc3   : > { %26494 = vmatprep.mubr.msk.f32.mxu0 %vm501_vm0, %v30239_v62 }
  0xc5   : > { %25143 = vmatmul.mubr.msk.f32.gmra.mrb[32].mxu1 %vm501_vm0, %v21507_v53  ;;  %v495_v53 = vld [vmem:[%s30077_s30 + $0x258] sm:$0xff] }
  0xc6   : > { %26495 = vmatmul.mubr.msk.f32.vlgmr.msra.gmra.mrb[0].mxu0 %vm501_vm0, %v30247_v63  ;;  %25145 = vmatprep.mubr.msk.f32.mxu1 %vm501_vm0, %v21508_v54  ;;  %v30438_v54 = vld [vmem:[%s30236_s0 + $0x170] sm:$0xff] }
  0xc7   : > { %27853 = vmatpush3.bf16.msra.mxu0 %v30150_v32  ;;  %26497 = vmatprep.mubr.msk.f32.mxu0 %vm501_vm0, %v30250_v0  ;;  %v485_v32 = vld [vmem:[%s30077_s30 + $0x1f8] sm:$0xff] }
  0xc8   : > { %27855 = vmatprep.subr.bf16.mxu0 %v30268_v4 }
  0xc9   : > { %25146 = vmatmul.mubr.msk.f32.gmra.mrb[34].mxu1 %vm501_vm0, %v21509_v55  ;;  %v496_v55 = vld [vmem:[%s30077_s30 + $0x260] sm:$0xff] }
  0xca   : > { %26498 = vmatmul.mubr.msk.f32.gmra.mrb[2].mxu0 %vm501_vm0, %v30266_v3  ;;  %25148 = vmatprep.mubr.msk.f32.mxu1 %vm501_vm0, %v21510_v56  ;;  %v30442_v56 = vld [vmem:[%s30236_s0 + $0x178] sm:$0xff] }
  0xcb   : > { %26500 = vmatprep.mubr.msk.f32.mxu0 %vm501_vm0, %v30271_v5 }
  0xcd   : > { %25149 = vmatmul.mubr.msk.f32.gmra.mrb[36].mxu1 %vm501_vm0, %v21511_v57  ;;  %v497_v57 = vld [vmem:[%s30077_s30 + $0x268] sm:$0xff] }
  0xce   : > { %26501 = vmatmul.mubr.msk.f32.gmra.mrb[4].mxu0 %vm501_vm0, %v30281_v6  ;;  %25151 = vmatprep.mubr.msk.f32.mxu1 %vm501_vm0, %v21512_v58  ;;  %v21644_v58 = vld [vmem:[%s30236_s0 + $0x180] sm:$0xff] }
  0xcf   : > { %26503 = vmatprep.mubr.msk.f32.mxu0 %vm501_vm0, %v30284_v8 }
  0xd1   : > { %25152 = vmatmul.mubr.msk.f32.gmra.mrb[38].mxu1 %vm501_vm0, %v21513_v59  ;;  %v368_v59 = vld [vmem:[%s30069_s27] sm:$0xff] }
  0xd2   : > { %26504 = vmatmul.mubr.msk.f32.gmra.mrb[6].mxu0 %vm501_vm0, %v21620_v9  ;;  %25154 = vmatprep.mubr.msk.f32.mxu1 %vm501_vm0, %v474_v10  ;;  %v30467_v9 = vld [vmem:[%s30236_s0 + $0x1a8] sm:$0xff]  ;;  %v20247_v10 = vld [vmem:[%s35895_s3 + $0x30] sm:$0xff] }
  0xd3   : > { %26506 = vmatprep.mubr.msk.f32.mxu0 %vm501_vm0, %v30295_v11 }
  0xd5   : > { %25155 = vmatmul.mubr.msk.f32.gmra.mrb[40].mxu1 %vm501_vm0, %v475_v12  ;;  %v20248_v12 = vld [vmem:[%s35895_s3 + $0x38] sm:$0xff] }
  0xd6   : > { %26507 = vmatmul.mubr.msk.f32.gmra.mrb[8].mxu0 %vm501_vm0, %v30304_v13  ;;  %25157 = vmatprep.mubr.msk.f32.mxu1 %vm501_vm0, %v476_v14  ;;  %v371_v14 = vld [vmem:[%s30069_s27 + $0x18] sm:$0xff] }
  0xd7   : > { %26509 = vmatprep.mubr.msk.f32.mxu0 %vm501_vm0, %v30308_v15 }
  0xd9   : > { %25158 = vmatmul.mubr.msk.f32.gmra.mrb[42].mxu1 %vm501_vm0, %v477_v16  ;;  %v30480_v16 = vpack.c.bf16 %v20248_v12, %v20247_v10  ;;  %v385_v10 = vld [vmem:[%s30069_s27 + $0xa8] sm:$0xff]  ;;  %v30597_v12 = vld [vmem:[%s30236_s0 + $0x240] sm:$0xff] }
  0xda   : > { %26510 = vmatmul.mubr.msk.f32.gmra.mrb[10].mxu0 %vm501_vm0, %v30318_v17  ;;  %25160 = vmatprep.mubr.msk.f32.mxu1 %vm501_vm0, %v478_v18  ;;  %v30486_v18 = vld [vmem:[%s30236_s0 + $0x1b0] sm:$0xff]  ;;  %36139 = vst [vmem:[#allocation22_spill] sm:$0xff] %v30597_v12 }
  0xdb   : > { %26512 = vmatprep.mubr.msk.f32.mxu0 %vm501_vm0, %v30322_v19 }
  0xdd   : > { %25161 = vmatmul.mubr.msk.f32.gmra.mrb[44].mxu1 %vm501_vm0, %v479_v20  ;;  %v372_v20 = vld [vmem:[%s30069_s27 + $0x20] sm:$0xff] }
  0xde   : > { %26513 = vmatmul.mubr.msk.f32.gmra.mrb[12].mxu0 %vm501_vm0, %v30332_v21  ;;  %25163 = vmatprep.mubr.msk.f32.mxu1 %vm501_vm0, %v480_v22  ;;  %v30490_v22 = vld [vmem:[%s30236_s0 + $0x1b8] sm:$0xff] }
  0xdf   : > { %26515 = vmatprep.mubr.msk.f32.mxu0 %vm501_vm0, %v30336_v23 }
  0xe1   : > { %25164 = vmatmul.mubr.msk.f32.gmra.mrb[46].mxu1 %vm501_vm0, %v481_v24  ;;  %v30501_v24 = vld [vmem:[%s30236_s0 + $0x1c0] sm:$0xff] }
  0xe2   : > { %26516 = vmatmul.mubr.msk.f32.gmra.mrb[14].mxu0 %vm501_vm0, %v21628_v25  ;;  %25166 = vmatprep.mubr.msk.f32.mxu1 %vm501_vm0, %v482_v26  ;;  %v374_v25 = vld [vmem:[%s30069_s27 + $0x30] sm:$0xff]  ;;  %v30505_v26 = vld [vmem:[%s30236_s0 + $0x1c8] sm:$0xff] }
  0xe3   : > { %26518 = vmatprep.mubr.msk.f32.mxu0 %vm501_vm0, %v30348_v27 }
  0xe5   : > { %25167 = vmatmul.mubr.msk.f32.gmra.mrb[48].mxu1 %vm501_vm0, %v483_v28  ;;  %v375_v28 = vld [vmem:[%s30069_s27 + $0x38] sm:$0xff] }
  0xe6   : > { %26519 = vmatmul.mubr.msk.f32.gmra.mrb[16].mxu0 %vm501_vm0, %v30357_v29  ;;  %25169 = vmatprep.mubr.msk.f32.mxu1 %vm501_vm0, %v484_v30  ;;  %v21652_v30 = vld [vmem:[%s30236_s0 + $0x1d0] sm:$0xff] }
  0xe7   : > { %26521 = vmatprep.mubr.msk.f32.mxu0 %vm501_vm0, %v30361_v31 }
  0xe9   : > { %25170 = vmatmul.mubr.msk.f32.gmra.mrb[50].mxu1 %vm501_vm0, %v485_v32  ;;  %v376_v32 = vld [vmem:[%s30069_s27 + $0x50] sm:$0xff] }
  0xea   : > { %26522 = vmatmul.mubr.msk.f32.gmra.mrb[18].mxu0 %vm501_vm0, %v30371_v33  ;;  %25172 = vmatprep.mubr.msk.f32.mxu1 %vm501_vm0, %v486_v34  ;;  %v30517_v34 = vld [vmem:[%s30236_s0 + $0x1e8] sm:$0xff] }
  0xeb   : > { %26524 = vmatprep.mubr.msk.f32.mxu0 %vm501_vm0, %v30375_v35 }
  0xed   : > { %25173 = vmatmul.mubr.msk.f32.gmra.mrb[52].mxu1 %vm501_vm0, %v487_v36  ;;  %v377_v36 = vld [vmem:[%s30069_s27 + $0x58] sm:$0xff] }
  0xee   : > { %26525 = vmatmul.mubr.msk.f32.gmra.mrb[20].mxu0 %vm501_vm0, %v30385_v37  ;;  %25175 = vmatprep.mubr.msk.f32.mxu1 %vm501_vm0, %v488_v38  ;;  %v30526_v38 = vld [vmem:[%s30236_s0 + $0x1f0] sm:$0xff] }
  0xef   : > { %26527 = vmatprep.mubr.msk.f32.mxu0 %vm501_vm0, %v30389_v39 }
  0xf1   : > { %25176 = vmatmul.mubr.msk.f32.gmra.mrb[54].mxu1 %vm501_vm0, %v489_v40  ;;  %v30529_v40 = vld [vmem:[%s30069_s27 + $0x60] sm:$0xff] }
  0xf2   : > { %26528 = vmatmul.mubr.msk.f32.gmra.mrb[22].mxu0 %vm501_vm0, %v21636_v41  ;;  %25178 = vmatprep.mubr.msk.f32.mxu1 %vm501_vm0, %v490_v42  ;;  %v30532_v41 = vld [vmem:[%s30236_s0 + $0x1f8] sm:$0xff]  ;;  %v30540_v42 = vld [vmem:[%s30069_s27 + $0x68] sm:$0xff] }
  0xf3   : > { %26530 = vmatprep.mubr.msk.f32.mxu0 %vm501_vm0, %v30401_v43 }
  0xf5   : > { %25179 = vmatmul.mubr.msk.f32.gmra.mrb[56].mxu1 %vm501_vm0, %v491_v44  ;;  %v30545_v44 = vld [vmem:[%s30236_s0 + $0x200] sm:$0xff] }
  0xf6   : > { %26531 = vmatmul.mubr.msk.f32.gmra.mrb[24].mxu0 %vm501_vm0, %v30410_v45  ;;  %25181 = vmatprep.mubr.msk.f32.mxu1 %vm501_vm0, %v492_v47  ;;  %v30548_v47 = vld [vmem:[%s30069_s27 + $0x70] sm:$0xff] }
  0xf7   : > { %26533 = vmatprep.mubr.msk.f32.mxu0 %vm501_vm0, %v30414_v48 }
  0xf9   : > { %25182 = vmatmul.mubr.msk.f32.gmra.mrb[58].mxu1 %vm501_vm0, %v493_v49  ;;  %v30551_v49 = vld [vmem:[%s30236_s0 + $0x208] sm:$0xff] }
  0xfa   : > { %26534 = vmatmul.mubr.msk.f32.gmra.mrb[26].mxu0 %vm501_vm0, %v30424_v50  ;;  %25184 = vmatprep.mubr.msk.f32.mxu1 %vm501_vm0, %v494_v51  ;;  %36135 = vst [vmem:[#allocation18_spill] sm:$0xff] %v30551_v49  ;;  %v30560_v51 = vld [vmem:[%s30069_s27 + $0x78] sm:$0xff] }
  0xfb   : > { %26536 = vmatprep.mubr.msk.f32.mxu0 %vm501_vm0, %v30428_v52 }
  0xfd   : > { %25185 = vmatmul.mubr.msk.f32.gmra.mrb[60].mxu1 %vm501_vm0, %v495_v53  ;;  %v30565_v53 = vld [vmem:[%s30236_s0 + $0x210] sm:$0xff] }
  0xfe   : > { %26537 = vmatmul.mubr.msk.f32.gmra.mrb[28].mxu0 %vm501_vm0, %v30438_v54  ;;  %25187 = vmatprep.mubr.msk.f32.mxu1 %vm501_vm0, %v496_v55  ;;  %36136 = vst [vmem:[#allocation19_spill] sm:$0xff] %v30565_v53  ;;  %v30568_v55 = vld [vmem:[%s30069_s27 + $0x80] sm:$0xff] }
  0xff   : > { %26539 = vmatprep.mubr.msk.f32.mxu0 %vm501_vm0, %v30442_v56 }
 0x101   : > { %25188 = vmatmul.mubr.msk.f32.gmra.mrb[62].mxu1 %vm501_vm0, %v497_v57  ;;  %v30571_v57 = vld [vmem:[%s30236_s0 + $0x218] sm:$0xff] }
 0x102   : > { %26540 = vmatmul.mubr.msk.f32.gmra.mrb[30].mxu0 %vm501_vm0, %v21644_v58  ;;  %25194 = vmatprep.mubr.msk.f32.mxu1 %vm501_vm0, %v368_v59  ;;  %36137 = vst [vmem:[#allocation20_spill] sm:$0xff] %v30571_v57  ;;  %v30580_v58 = vld [vmem:[%s30069_s27 + $0x88] sm:$0xff]  ;;  %v21660_v59 = vld [vmem:[%s30236_s0 + $0x220] sm:$0xff] }
 0x103   : > { %26542 = vmatprep.mubr.msk.f32.mxu0 %vm501_vm0, %v30454_v60 }
 0x105   : > { %25195 = vmatmul.mubr.msk.f32.vlgmr.msra.gmra.mrb[0].mxu1 %vm501_vm0, %v369_v61  ;;  %v384_v61 = vld [vmem:[%s30069_s27 + $0xa0] sm:$0xff] }
 0x106   : > { %26543 = vmatmul.mubr.msk.f32.gmra.mrb[32].mxu0 %vm501_vm0, %v30463_v1  ;;  %27801 = vmatpush3.bf16.msra.mxu1 %v30190_v46  ;;  %v373_v46 = vld [vmem:[%s30069_s27 + $0x28] sm:$0xff] }
 0x107   : > { %25197 = vmatprep.mubr.msk.f32.mxu1 %vm501_vm0, %v370_v2  ;;  %26545 = vmatprep.mubr.msk.f32.mxu0 %vm501_vm0, %v30467_v9  ;;  %v30587_v2 = vld [vmem:[%s30236_s0 + $0x238] sm:$0xff] }
 0x108   : > { %27803 = vmatprep.subr.bf16.mxu1 %v30480_v16  ;;  %36138 = vst [vmem:[#allocation21_spill] sm:$0xff] %v30587_v2 }
 0x109   : > { %25198 = vmatmul.mubr.msk.f32.gmra.mrb[2].mxu1 %vm501_vm0, %v371_v14  ;;  %v30600_v14 = vld [vmem:[%s30069_s27 + $0xb0] sm:$0xff] }
 0x10a   : > { %26546 = vmatmul.mubr.msk.f32.gmra.mrb[34].mxu0 %vm501_vm0, %v30486_v18  ;;  %25200 = vmatprep.mubr.msk.f32.mxu1 %vm501_vm0, %v372_v20  ;;  %v30603_v20 = vld [vmem:[%s30236_s0 + $0x248] sm:$0xff] }
 0x10b   : > { %26548 = vmatprep.mubr.msk.f32.mxu0 %vm501_vm0, %v30490_v22  ;;  %36140 = vst [vmem:[#allocation23_spill] sm:$0xff] %v30603_v20 }
 0x10d   : > { %25201 = vmatmul.mubr.msk.f32.gmra.mrb[4].mxu1 %vm501_vm0, %v373_v46  ;;  %v30611_v46 = vld [vmem:[%s30069_s27 + $0xb8] sm:$0xff] }
 0x10e   : > { %26549 = vmatmul.mubr.msk.f32.gmra.mrb[36].mxu0 %vm501_vm0, %v30501_v24  ;;  %25203 = vmatprep.mubr.msk.f32.mxu1 %vm501_vm0, %v374_v25  ;;  %v30616_v25 = vld [vmem:[%s30236_s0 + $0x250] sm:$0xff] }
 0x10f   : > { %26551 = vmatprep.mubr.msk.f32.mxu0 %vm501_vm0, %v30505_v26  ;;  %36141 = vst [vmem:[#allocation24_spill] sm:$0xff] %v30616_v25 }
 0x111   : > { %25204 = vmatmul.mubr.msk.f32.gmra.mrb[6].mxu1 %vm501_vm0, %v375_v28  ;;  %v30619_v28 = vld [vmem:[%s30069_s27 + $0xc0] sm:$0xff] }
 0x112   : > { %26552 = vmatmul.mubr.msk.f32.gmra.mrb[38].mxu0 %vm501_vm0, %v21652_v30  ;;  %25206 = vmatprep.mubr.msk.f32.mxu1 %vm501_vm0, %v376_v32  ;;  %v30622_v30 = vld [vmem:[%s30236_s0 + $0x258] sm:$0xff]  ;;  %v30631_v32 = vld [vmem:[%s30069_s27 + $0xc8] sm:$0xff] }
 0x113   : > { %26554 = vmatprep.mubr.msk.f32.mxu0 %vm501_vm0, %v30517_v34  ;;  %36142 = vst [vmem:[#allocation25_spill] sm:$0xff] %v30622_v30 }
 0x115   : > { %25207 = vmatmul.mubr.msk.f32.gmra.mrb[8].mxu1 %vm501_vm0, %v377_v36  ;;  %v30636_v36 = vld [vmem:[%s30236_s0 + $0x260] sm:$0xff] }
 0x116   : > { %26555 = vmatmul.mubr.msk.f32.gmra.mrb[40].mxu0 %vm501_vm0, %v30526_v38  ;;  %25209 = vmatprep.mubr.msk.f32.mxu1 %vm501_vm0, %v30529_v40  ;;  %36143 = vst [vmem:[#allocation26_spill] sm:$0xff] %v30636_v36 }
 0x117   : > { %26557 = vmatprep.mubr.msk.f32.mxu0 %vm501_vm0, %v30532_v41 }
 0x119   : > { %25210 = vmatmul.mubr.msk.f32.gmra.mrb[10].mxu1 %vm501_vm0, %v30540_v42 }
 0x11a   : > { %26558 = vmatmul.mubr.msk.f32.gmra.mrb[42].mxu0 %vm501_vm0, %v30545_v44  ;;  %25212 = vmatprep.mubr.msk.f32.mxu1 %vm501_vm0, %v30548_v47 }
 0x11b   : > { %26560 = vmatprep.mubr.msk.f32.mxu0 %vm501_vm0, %v30551_v49  ;;  %v401_v49 = vld [vmem:[%s30069_s27 + $0x148] sm:$0xff] }
 0x11d   : > { %25213 = vmatmul.mubr.msk.f32.gmra.mrb[12].mxu1 %vm501_vm0, %v30560_v51 }
 0x11e   : > { %26561 = vmatmul.mubr.msk.f32.gmra.mrb[44].mxu0 %vm501_vm0, %v30565_v53  ;;  %25215 = vmatprep.mubr.msk.f32.mxu1 %vm501_vm0, %v30568_v55  ;;  %v21676_v53 = vld [vmem:[%s30236_s0 + $0x2c0] sm:$0xff] }
 0x11f   : > { %26563 = vmatprep.mubr.msk.f32.mxu0 %vm501_vm0, %v30571_v57  ;;  %v21675_v57 = vld [vmem:[%s30236_s0 + $0x2b8] sm:$0xff] }
 0x121   : > { %25216 = vmatmul.mubr.msk.f32.gmra.mrb[14].mxu1 %vm501_vm0, %v30580_v58 }
 0x122   : > { %26564 = vmatmul.mubr.msk.f32.gmra.mrb[46].mxu0 %vm501_vm0, %v21660_v59  ;;  %25218 = vmatprep.mubr.msk.f32.mxu1 %vm501_vm0, %v384_v61  ;;  %v30639_v59 = vld [vmem:[%s30069_s27 + $0xd0] sm:$0xff]  ;;  %v30642_v61 = vld [vmem:[%s30236_s0 + $0x268] sm:$0xff] }
 0x123   : > { %26566 = vmatprep.mubr.msk.f32.mxu0 %vm501_vm0, %v30587_v2  ;;  %36144 = vst [vmem:[#allocation27_spill] sm:$0xff] %v30642_v61  ;;  %v21673_v2 = vld [vmem:[%s30236_s0 + $0x2a8] sm:$0xff] }
 0x125   : > { %25219 = vmatmul.mubr.msk.f32.gmra.mrb[16].mxu1 %vm501_vm0, %v385_v10  ;;  %v30651_v10 = vld [vmem:[%s30069_s27 + $0xd8] sm:$0xff] }
 0x126   : > { %26567 = vmatmul.mubr.msk.f32.gmra.mrb[48].mxu0 %vm501_vm0, %v30597_v12  ;;  %25221 = vmatprep.mubr.msk.f32.mxu1 %vm501_vm0, %v30600_v14  ;;  %v21671_v12 = vld [vmem:[%s30236_s0 + $0x298] sm:$0xff] }
 0x127   : > { %26569 = vmatprep.mubr.msk.f32.mxu0 %vm501_vm0, %v30603_v20  ;;  %v21670_v20 = vld [vmem:[%s30236_s0 + $0x290] sm:$0xff] }
 0x129   : > { %25222 = vmatmul.mubr.msk.f32.gmra.mrb[18].mxu1 %vm501_vm0, %v30611_v46 }
 0x12a   : > { %26570 = vmatmul.mubr.msk.f32.gmra.mrb[50].mxu0 %vm501_vm0, %v30616_v25  ;;  %25224 = vmatprep.mubr.msk.f32.mxu1 %vm501_vm0, %v30619_v28  ;;  %v21669_v25 = vld [vmem:[%s30236_s0 + $0x288] sm:$0xff] }
 0x12b   : > { %26572 = vmatprep.mubr.msk.f32.mxu0 %vm501_vm0, %v30622_v30  ;;  %v392_v30 = vld [vmem:[%s30069_s27 + $0xf0] sm:$0xff] }
 0x12d   : > { %25225 = vmatmul.mubr.msk.f32.gmra.mrb[20].mxu1 %vm501_vm0, %v30631_v32 }
 0x12e   : > { %26573 = vmatmul.mubr.msk.f32.gmra.mrb[52].mxu0 %vm501_vm0, %v30636_v36  ;;  %25227 = vmatprep.mubr.msk.f32.mxu1 %vm501_vm0, %v30639_v59  ;;  %v393_v36 = vld [vmem:[%s30069_s27 + $0xf8] sm:$0xff] }
 0x12f   : > { %26575 = vmatprep.mubr.msk.f32.mxu0 %vm501_vm0, %v30642_v61  ;;  %v30666_v61 = vld [vmem:[%s30069_s27 + $0x100] sm:$0xff] }
 0x131   : > { %25228 = vmatmul.mubr.msk.f32.gmra.mrb[22].mxu1 %vm501_vm0, %v30651_v10 }
 0x132   : > { %26576 = vmatmul.mubr.msk.f32.gmra.mrb[54].mxu0 %vm501_vm0, %v21668_v7  ;;  %25230 = vmatprep.mubr.msk.f32.mxu1 %vm501_vm0, %v392_v30  ;;  %v30674_v7 = vld [vmem:[%s30069_s27 + $0x108] sm:$0xff]  ;;  %v30679_v30 = vld [vmem:[%s30069_s27 + $0x110] sm:$0xff] }
 0x133   : > { %26578 = vmatprep.mubr.msk.f32.mxu0 %vm501_vm0, %v21669_v25  ;;  %v21672_v25 = vld [vmem:[%s30236_s0 + $0x2a0] sm:$0xff] }
 0x135   : > { %25231 = vmatmul.mubr.msk.f32.gmra.mrb[24].mxu1 %vm501_vm0, %v393_v36  ;;  %v30693_v36 = vld [vmem:[%s30069_s27 + $0x120] sm:$0xff] }
 0x136   : > { %26579 = vmatmul.mubr.msk.f32.gmra.mrb[56].mxu0 %vm501_vm0, %v21670_v20  ;;  %25233 = vmatprep.mubr.msk.f32.mxu1 %vm501_vm0, %v30666_v61  ;;  %v30688_v20 = vld [vmem:[%s30069_s27 + $0x118] sm:$0xff] }
 0x137   : > { %26581 = vmatprep.mubr.msk.f32.mxu0 %vm501_vm0, %v21671_v12  ;;  %v21674_v12 = vld [vmem:[%s30236_s0 + $0x2b0] sm:$0xff] }
 0x139   : > { %25234 = vmatmul.mubr.msk.f32.gmra.mrb[26].mxu1 %vm501_vm0, %v30674_v7 }
 0x13a   : > { %26582 = vmatmul.mubr.msk.f32.gmra.mrb[58].mxu0 %vm501_vm0, %v21672_v25  ;;  %25236 = vmatprep.mubr.msk.f32.mxu1 %vm501_vm0, %v30679_v30  ;;  %v30702_v25 = vld [vmem:[%s30069_s27 + $0x128] sm:$0xff] }
 0x13b   : > { %26584 = vmatprep.mubr.msk.f32.mxu0 %vm501_vm0, %v21673_v2  ;;  %v400_v2 = vld [vmem:[%s30069_s27 + $0x140] sm:$0xff] }
 0x13d   : > { %25237 = vmatmul.mubr.msk.f32.gmra.mrb[28].mxu1 %vm501_vm0, %v30688_v20 }
 0x13e   : > { %26585 = vmatmul.mubr.msk.f32.gmra.mrb[60].mxu0 %vm501_vm0, %v21674_v12  ;;  %25239 = vmatprep.mubr.msk.f32.mxu1 %vm501_vm0, %v30693_v36  ;;  %v30715_v12 = vld [vmem:[%s30069_s27 + $0x150] sm:$0xff] }
 0x13f   : > { %26587 = vmatprep.mubr.msk.f32.mxu0 %vm501_vm0, %v21675_v57  ;;  %v22067_v57 = vld [vmem:[%s35895_s3 + $0x110] sm:$0xff] }
 0x141   : > { %25240 = vmatmul.mubr.msk.f32.gmra.mrb[30].mxu1 %vm501_vm0, %v30702_v25 }
 0x142   : > { %26588 = vmatmul.mubr.msk.f32.gmra.mrb[62].mxu0 %vm501_vm0, %v21676_v53  ;;  %25242 = vmatprep.mubr.msk.f32.mxu1 %vm501_vm0, %v400_v2  ;;  %v30723_v53 = vld [vmem:[%s30069_s27 + $0x158] sm:$0xff]  ;;  %v30755_v2 = vld [vmem:[%s30069_s27 + $0x90] sm:$0xff] }
 0x143   : > { %26594 = vmatprep.mubr.msk.f32.mxu0 %vm501_vm0, %v30529_v40  ;;  %v22068_v40 = vld [vmem:[%s35895_s3 + $0x118] sm:$0xff]  ;;  %36145 = vst [vmem:[#allocation28_spill] sm:$0xff] %v30755_v2 }
 0x145   : > { %25243 = vmatmul.mubr.msk.f32.gmra.mrb[32].mxu1 %vm501_vm0, %v401_v49  ;;  %v30737_v49 = vpack.c.bf16 %v22068_v40, %v22067_v57  ;;  %v408_v57 = vld [vmem:[%s30069_s27 + $0x190] sm:$0xff]  ;;  %v30778_v40 = vld [vmem:[%s30069_s27 + $0x1a0] sm:$0xff] }
 0x146   : > { %26595 = vmatmul.mubr.msk.f32.vlgmr.msra.gmra.mrb[0].mxu0 %vm501_vm0, %v30540_v42  ;;  %25245 = vmatprep.mubr.msk.f32.mxu1 %vm501_vm0, %v30715_v12  ;;  %v30735_v42 = vld [vmem:[%s30069_s27 + $0x160] sm:$0xff] }
 0x147   : > { %27857 = vmatpush3.bf16.msra.mxu0 %v30268_v4  ;;  %26597 = vmatprep.mubr.msk.f32.mxu0 %vm501_vm0, %v30548_v47  ;;  %v30747_v4 = vld [vmem:[%s30069_s27 + $0x168] sm:$0xff]  ;;  %v30752_v47 = vld [vmem:[%s30069_s27 + $0x170] sm:$0xff] }
 0x148   : > { %27859 = vmatprep.subr.bf16.mxu0 %v30737_v49 }
 0x149   : > { %25246 = vmatmul.mubr.msk.f32.gmra.mrb[34].mxu1 %vm501_vm0, %v30723_v53 }
 0x14a   : > { %26598 = vmatmul.mubr.msk.f32.gmra.mrb[2].mxu0 %vm501_vm0, %v30560_v51  ;;  %25248 = vmatprep.mubr.msk.f32.mxu1 %vm501_vm0, %v30735_v42  ;;  %v30764_v51 = vld [vmem:[%s30069_s27 + $0x178] sm:$0xff] }
 0x14b   : > { %26600 = vmatprep.mubr.msk.f32.mxu0 %vm501_vm0, %v30568_v55  ;;  %v21750_v55 = vld [vmem:[%s30069_s27 + $0x98] sm:$0xff] }
 0x14d   : > { %25249 = vmatmul.mubr.msk.f32.gmra.mrb[36].mxu1 %vm501_vm0, %v30747_v4 }
 0x14e   : > { %26601 = vmatmul.mubr.msk.f32.gmra.mrb[4].mxu0 %vm501_vm0, %v30580_v58  ;;  %25251 = vmatprep.mubr.msk.f32.mxu1 %vm501_vm0, %v30752_v47  ;;  %v409_v58 = vld [vmem:[%s30069_s27 + $0x198] sm:$0xff] }
 0x14f   : > { %26603 = vmatprep.mubr.msk.f32.mxu0 %vm501_vm0, %v30755_v2  ;;  %v30831_v2 = vld [vmem:[%s30069_s27 + $0x1f0] sm:$0xff] }
 0x151   : > { %25252 = vmatmul.mubr.msk.f32.gmra.mrb[38].mxu1 %vm501_vm0, %v30764_v51 }
 0x152   : > { %26604 = vmatmul.mubr.msk.f32.gmra.mrb[6].mxu0 %vm501_vm0, %v21750_v55  ;;  %25254 = vmatprep.mubr.msk.f32.mxu1 %vm501_vm0, %v408_v57  ;;  %v30786_v55 = vld [vmem:[%s30069_s27 + $0x1a8] sm:$0xff]  ;;  %v30791_v57 = vld [vmem:[%s30069_s27 + $0x1b0] sm:$0xff] }
 0x153   : > { %26606 = vmatprep.mubr.msk.f32.mxu0 %vm501_vm0, %v30600_v14  ;;  %v30800_v14 = vld [vmem:[%s30069_s27 + $0x1b8] sm:$0xff] }
 0x155   : > { %25255 = vmatmul.mubr.msk.f32.gmra.mrb[40].mxu1 %vm501_vm0, %v409_v58  ;;  %v416_v58 = vld [vmem:[%s30069_s27 + $0x1e0] sm:$0xff] }
 0x156   : > { %26607 = vmatmul.mubr.msk.f32.gmra.mrb[8].mxu0 %vm501_vm0, %v30611_v46  ;;  %25257 = vmatprep.mubr.msk.f32.mxu1 %vm501_vm0, %v30778_v40  ;;  %v30805_v46 = vld [vmem:[%s30069_s27 + $0x1c0] sm:$0xff] }
 0x157   : > { %26609 = vmatprep.mubr.msk.f32.mxu0 %vm501_vm0, %v30619_v28  ;;  %v30808_v28 = vld [vmem:[%s30069_s27 + $0xe0] sm:$0xff] }
 0x158   : > { %36146 = vst [vmem:[#allocation29_spill] sm:$0xff] %v30808_v28 }
 0x159   : > { %25258 = vmatmul.mubr.msk.f32.gmra.mrb[42].mxu1 %vm501_vm0, %v30786_v55 }
 0x15a   : > { %26610 = vmatmul.mubr.msk.f32.gmra.mrb[10].mxu0 %vm501_vm0, %v30631_v32  ;;  %25260 = vmatprep.mubr.msk.f32.mxu1 %vm501_vm0, %v30791_v57  ;;  %v30817_v32 = vld [vmem:[%s30069_s27 + $0x1c8] sm:$0xff] }
 0x15b   : > { %26612 = vmatprep.mubr.msk.f32.mxu0 %vm501_vm0, %v30639_v59  ;;  %v21758_v59 = vld [vmem:[%s30069_s27 + $0xe8] sm:$0xff] }
 0x15d   : > { %25261 = vmatmul.mubr.msk.f32.gmra.mrb[44].mxu1 %vm501_vm0, %v30800_v14 }
 0x15e   : > { %26613 = vmatmul.mubr.msk.f32.gmra.mrb[12].mxu0 %vm501_vm0, %v30651_v10  ;;  %25263 = vmatprep.mubr.msk.f32.mxu1 %vm501_vm0, %v30805_v46  ;;  %v417_v10 = vld [vmem:[%s30069_s27 + $0x1e8] sm:$0xff] }
 0x15f   : > { %26615 = vmatprep.mubr.msk.f32.mxu0 %vm501_vm0, %v30808_v28  ;;  %v30884_v28 = vld [vmem:[%s30069_s27 + $0x240] sm:$0xff] }
 0x161   : > { %25264 = vmatmul.mubr.msk.f32.gmra.mrb[46].mxu1 %vm501_vm0, %v30817_v32 }
 0x162   : > { %26616 = vmatmul.mubr.msk.f32.gmra.mrb[14].mxu0 %vm501_vm0, %v21758_v59  ;;  %25266 = vmatprep.mubr.msk.f32.mxu1 %vm501_vm0, %v416_v58  ;;  %v30839_v59 = vld [vmem:[%s30069_s27 + $0x1f8] sm:$0xff]  ;;  %v30844_v58 = vld [vmem:[%s30069_s27 + $0x200] sm:$0xff] }
 0x163   : > { %26618 = vmatprep.mubr.msk.f32.mxu0 %vm501_vm0, %v30666_v61  ;;  %v30853_v61 = vld [vmem:[%s30069_s27 + $0x208] sm:$0xff] }
 0x165   : > { %25267 = vmatmul.mubr.msk.f32.gmra.mrb[48].mxu1 %vm501_vm0, %v417_v10  ;;  %v424_v10 = vld [vmem:[%s30069_s27 + $0x230] sm:$0xff] }
 0x166   : > { %26619 = vmatmul.mubr.msk.f32.gmra.mrb[16].mxu0 %vm501_vm0, %v30674_v7  ;;  %25269 = vmatprep.mubr.msk.f32.mxu1 %vm501_vm0, %v30831_v2  ;;  %v30858_v7 = vld [vmem:[%s30069_s27 + $0x210] sm:$0xff] }
 0x167   : > { %26621 = vmatprep.mubr.msk.f32.mxu0 %vm501_vm0, %v30679_v30  ;;  %v30861_v30 = vld [vmem:[%s30069_s27 + $0x130] sm:$0xff] }
 0x168   : > { %36147 = vst [vmem:[#allocation30_spill] sm:$0xff] %v30861_v30 }
 0x169   : > { %25270 = vmatmul.mubr.msk.f32.gmra.mrb[50].mxu1 %vm501_vm0, %v30839_v59 }
 0x16a   : > { %26622 = vmatmul.mubr.msk.f32.gmra.mrb[18].mxu0 %vm501_vm0, %v30688_v20  ;;  %25272 = vmatprep.mubr.msk.f32.mxu1 %vm501_vm0, %v30844_v58  ;;  %v30870_v20 = vld [vmem:[%s30069_s27 + $0x218] sm:$0xff] }
 0x16b   : > { %26624 = vmatprep.mubr.msk.f32.mxu0 %vm501_vm0, %v30693_v36  ;;  %v21766_v36 = vld [vmem:[%s30069_s27 + $0x138] sm:$0xff] }
 0x16d   : > { %25273 = vmatmul.mubr.msk.f32.gmra.mrb[52].mxu1 %vm501_vm0, %v30853_v61 }
 0x16e   : > { %26625 = vmatmul.mubr.msk.f32.gmra.mrb[20].mxu0 %vm501_vm0, %v30702_v25  ;;  %25275 = vmatprep.mubr.msk.f32.mxu1 %vm501_vm0, %v30858_v7  ;;  %v425_v25 = vld [vmem:[%s30069_s27 + $0x238] sm:$0xff] }
 0x16f   : > { %26627 = vmatprep.mubr.msk.f32.mxu0 %vm501_vm0, %v30861_v30  ;;  %v1658_v30 = vld [vmem:[%s30236_s0 + $0x10] sm:$0xff] }
 0x171   : > { %25276 = vmatmul.mubr.msk.f32.gmra.mrb[54].mxu1 %vm501_vm0, %v30870_v20 }
 0x172   : > { %26628 = vmatmul.mubr.msk.f32.gmra.mrb[22].mxu0 %vm501_vm0, %v21766_v36  ;;  %25278 = vmatprep.mubr.msk.f32.mxu1 %vm501_vm0, %v424_v10  ;;  %v30892_v36 = vld [vmem:[%s30069_s27 + $0x248] sm:$0xff]  ;;  %v30897_v10 = vld [vmem:[%s30069_s27 + $0x250] sm:$0xff] }
 0x173   : > { %26630 = vmatprep.mubr.msk.f32.mxu0 %vm501_vm0, %v30715_v12  ;;  %v30906_v12 = vld [vmem:[%s30069_s27 + $0x258] sm:$0xff] }
 0x175   : > { %25279 = vmatmul.mubr.msk.f32.gmra.mrb[56].mxu1 %vm501_vm0, %v425_v25  ;;  %v1656_v25 = vld [vmem:[%s30236_s0] sm:$0xff] }
 0x176   : > { %26631 = vmatmul.mubr.msk.f32.gmra.mrb[24].mxu0 %vm501_vm0, %v30723_v53  ;;  %25281 = vmatprep.mubr.msk.f32.mxu1 %vm501_vm0, %v30884_v28  ;;  %v30911_v53 = vld [vmem:[%s30069_s27 + $0x260] sm:$0xff] }
 0x177   : > { %26633 = vmatprep.mubr.msk.f32.mxu0 %vm501_vm0, %v30735_v42  ;;  %v30914_v42 = vld [vmem:[%s30069_s27 + $0x180] sm:$0xff] }
 0x178   : > { %36148 = vst [vmem:[#allocation31_spill] sm:$0xff] %v30914_v42 }
 0x179   : > { %25282 = vmatmul.mubr.msk.f32.gmra.mrb[58].mxu1 %vm501_vm0, %v30892_v36 }
 0x17a   : > { %26634 = vmatmul.mubr.msk.f32.gmra.mrb[26].mxu0 %vm501_vm0, %v30747_v4  ;;  %25284 = vmatprep.mubr.msk.f32.mxu1 %vm501_vm0, %v30897_v10  ;;  %v30923_v4 = vld [vmem:[%s30069_s27 + $0x268] sm:$0xff] }
 0x17b   : > { %26636 = vmatprep.mubr.msk.f32.mxu0 %vm501_vm0, %v30752_v47  ;;  %v21774_v47 = vld [vmem:[%s30069_s27 + $0x188] sm:$0xff] }
 0x17d   : > { %25285 = vmatmul.mubr.msk.f32.gmra.mrb[60].mxu1 %vm501_vm0, %v30906_v12 }
 0x17e   : > { %26637 = vmatmul.mubr.msk.f32.gmra.mrb[28].mxu0 %vm501_vm0, %v30764_v51  ;;  %25287 = vmatprep.mubr.msk.f32.mxu1 %vm501_vm0, %v30911_v53  ;;  %v1657_v51 = vld [vmem:[%s30236_s0 + $0x8] sm:$0xff] }
 0x17f   : > { %26639 = vmatprep.mubr.msk.f32.mxu0 %vm501_vm0, %v30914_v42  ;;  %v20377_v42 = vld [vmem:[%s35895_s3 + $0x40] sm:$0xff] }
 0x181   : > { %25288 = vmatmul.mubr.msk.f32.gmra.mrb[62].mxu1 %vm501_vm0, %v30923_v4 }
 0x182   : > { %26640 = vmatmul.mubr.msk.f32.gmra.mrb[30].mxu0 %vm501_vm0, %v21774_v47  ;;  %25294 = vmatprep.mubr.msk.f32.mxu1 %vm501_vm0, %v1656_v25  ;;  %v20378_v47 = vld [vmem:[%s35895_s3 + $0x48] sm:$0xff] }
 0x183   : > { %26642 = vmatprep.mubr.msk.f32.mxu0 %vm501_vm0, %v30778_v40  ;;  %v1659_v40 = vld [vmem:[%s30236_s0 + $0x18] sm:$0xff]  ;;  %v30948_v25 = vpack.c.bf16 %v20378_v47, %v20377_v42  ;;  %v1664_v42 = vld [vmem:[%s30236_s0 + $0x50] sm:$0xff] }
 0x184   : > { %v31272_v47 = vld [vmem:[%s30077_s30 + $0x170] sm:$0xff] }
 0x185   : > { %25295 = vmatmul.mubr.msk.f32.vlgmr.msra.gmra.mrb[0].mxu1 %vm501_vm0, %v1657_v51  ;;  %v1660_v51 = vld [vmem:[%s30236_s0 + $0x20] sm:$0xff] }
 0x186   : > { %26643 = vmatmul.mubr.msk.f32.gmra.mrb[32].mxu0 %vm501_vm0, %v30786_v55  ;;  %27805 = vmatpush3.bf16.msra.mxu1 %v30480_v16  ;;  %v1661_v16 = vld [vmem:[%s30236_s0 + $0x28] sm:$0xff]  ;;  %v1662_v55 = vld [vmem:[%s30236_s0 + $0x30] sm:$0xff] }
 0x187   : > { %25297 = vmatprep.mubr.msk.f32.mxu1 %vm501_vm0, %v1658_v30  ;;  %26645 = vmatprep.mubr.msk.f32.mxu0 %vm501_vm0, %v30791_v57  ;;  %v30964_v30 = vld [vmem:[%s30069_s27 + $0x1d0] sm:$0xff]  ;;  %v1663_v57 = vld [vmem:[%s30236_s0 + $0x38] sm:$0xff] }
 0x188   : > { %27807 = vmatprep.subr.bf16.mxu1 %v30948_v25 }
 0x189   : > { %25298 = vmatmul.mubr.msk.f32.gmra.mrb[2].mxu1 %vm501_vm0, %v1659_v40  ;;  %v36154_v40 = vld [vmem:[#allocation23_spill] sm:$0xff] }
 0x18a   : > { %26646 = vmatmul.mubr.msk.f32.gmra.mrb[34].mxu0 %vm501_vm0, %v30800_v14  ;;  %25300 = vmatprep.mubr.msk.f32.mxu1 %vm501_vm0, %v1660_v51  ;;  %v21782_v14 = vld [vmem:[%s30069_s27 + $0x1d8] sm:$0xff] }
 0x18b   : > { %26648 = vmatprep.mubr.msk.f32.mxu0 %vm501_vm0, %v30805_v46  ;;  %v31140_v46 = vld [vmem:[%s30077_s30 + $0xb0] sm:$0xff]  ;;  %v36155_v51 = vld [vmem:[#allocation24_spill] sm:$0xff] }
 0x18d   : > { %25301 = vmatmul.mubr.msk.f32.gmra.mrb[4].mxu1 %vm501_vm0, %v1661_v16  ;;  %v31283_v16 = vld [vmem:[%s30077_s30 + $0x178] sm:$0xff] }
 0x18e   : > { %26649 = vmatmul.mubr.msk.f32.gmra.mrb[36].mxu0 %vm501_vm0, %v30817_v32  ;;  %25303 = vmatprep.mubr.msk.f32.mxu1 %vm501_vm0, %v1662_v55  ;;  %v31193_v32 = vld [vmem:[%s30077_s30 + $0x100] sm:$0xff] }
 0x18f   : > { %26651 = vmatprep.mubr.msk.f32.mxu0 %vm501_vm0, %v30964_v30  ;;  %v31286_v55 = vld [vmem:[%s30077_s30 + $0x180] sm:$0xff] }
 0x191   : > { %25304 = vmatmul.mubr.msk.f32.gmra.mrb[6].mxu1 %vm501_vm0, %v1663_v57  ;;  %v36156_v57 = vld [vmem:[#allocation25_spill] sm:$0xff] }
 0x192   : > { %26652 = vmatmul.mubr.msk.f32.gmra.mrb[38].mxu0 %vm501_vm0, %v21782_v14  ;;  %25306 = vmatprep.mubr.msk.f32.mxu1 %vm501_vm0, %v1664_v42  ;;  %v36157_v14 = vld [vmem:[#allocation26_spill] sm:$0xff] }
 0x193   : > { %26654 = vmatprep.mubr.msk.f32.mxu0 %vm501_vm0, %v30831_v2  ;;  %v31127_v2 = vld [vmem:[%s30077_s30 + $0x90] sm:$0xff]  ;;  %v21904_v42 = vld [vmem:[%s30077_s30 + $0x188] sm:$0xff] }
 0x195   : > { %25307 = vmatmul.mubr.msk.f32.gmra.mrb[8].mxu1 %vm501_vm0, %v30239_v62  ;;  %v30997_v62 = vld [vmem:[%s30069_s27 + $0x220] sm:$0xff] }
 0x196   : > { %26655 = vmatmul.mubr.msk.f32.gmra.mrb[40].mxu0 %vm501_vm0, %v30839_v59  ;;  %25309 = vmatprep.mubr.msk.f32.mxu1 %vm501_vm0, %v30247_v63  ;;  %v21790_v63 = vld [vmem:[%s30069_s27 + $0x228] sm:$0xff]  ;;  %v31219_v59 = vld [vmem:[%s30077_s30 + $0x120] sm:$0xff] }
 0x197   : > { %26657 = vmatprep.mubr.msk.f32.mxu0 %vm501_vm0, %v30844_v58  ;;  %v36149_v58 = vld [vmem:[#allocation18_spill] sm:$0xff] }
 0x199   : > { %25310 = vmatmul.mubr.msk.f32.gmra.mrb[10].mxu1 %vm501_vm0, %v30250_v0  ;;  %v1672_v0 = vld [vmem:[%s30236_s0 + $0xa0] sm:$0xff] }
 0x19a   : > { %26658 = vmatmul.mubr.msk.f32.gmra.mrb[42].mxu0 %vm501_vm0, %v30853_v61  ;;  %25312 = vmatprep.mubr.msk.f32.mxu1 %vm501_vm0, %v30266_v3  ;;  %v31032_v3 = vld [vmem:[%s30069_s27 + $0x270] sm:$0xff] }
 0x19b   : > { %26660 = vmatprep.mubr.msk.f32.mxu0 %vm501_vm0, %v30858_v7  ;;  %v1712_v61 = vld [vmem:[%s30236_s0 + $0x230] sm:$0xff] }
 0x19c   : > { %v31246_v7 = vld [vmem:[%s30077_s30 + $0x150] sm:$0xff] }
 0x19d   : > { %25313 = vmatmul.mubr.msk.f32.gmra.mrb[12].mxu1 %vm501_vm0, %v30271_v5  ;;  %v21798_v5 = vld [vmem:[%s30069_s27 + $0x278] sm:$0xff] }
 0x19e   : > { %26661 = vmatmul.mubr.msk.f32.gmra.mrb[44].mxu0 %vm501_vm0, %v30870_v20  ;;  %25315 = vmatprep.mubr.msk.f32.mxu1 %vm501_vm0, %v30281_v6  ;;  %v1680_v6 = vld [vmem:[%s30236_s0 + $0xf0] sm:$0xff]  ;;  %v36151_v20 = vld [vmem:[#allocation20_spill] sm:$0xff] }
 0x19f   : > { %26663 = vmatprep.mubr.msk.f32.mxu0 %vm501_vm0, %v30997_v62 }
 0x1a1   : > { %25316 = vmatmul.mubr.msk.f32.gmra.mrb[14].mxu1 %vm501_vm0, %v30284_v8  ;;  %v21799_v8 = vld [vmem:[%s30069_s27 + $0x290] sm:$0xff] }
 0x1a2   : > { %26664 = vmatmul.mubr.msk.f32.gmra.mrb[46].mxu0 %vm501_vm0, %v21790_v63  ;;  %25318 = vmatprep.mubr.msk.f32.mxu1 %vm501_vm0, %v1672_v0  ;;  %v20183_v63 = vld [vmem:[%s30069_s27 + $0x8] sm:$0xff]  ;;  %v31299_v0 = vld [vmem:[%s30077_s30 + $0x1a0] sm:$0xff] }
 0x1a3   : > { %26666 = vmatprep.mubr.msk.f32.mxu0 %vm501_vm0, %v30884_v28  ;;  %v31166_v28 = vld [vmem:[%s30077_s30 + $0xd0] sm:$0xff] }
 0x1a5   : > { %25319 = vmatmul.mubr.msk.f32.gmra.mrb[16].mxu1 %vm501_vm0, %v30295_v11  ;;  %v21800_v11 = vld [vmem:[%s30069_s27 + $0x298] sm:$0xff] }
 0x1a6   : > { %26667 = vmatmul.mubr.msk.f32.gmra.mrb[48].mxu0 %vm501_vm0, %v30892_v36  ;;  %25321 = vmatprep.mubr.msk.f32.mxu1 %vm501_vm0, %v30304_v13  ;;  %v21801_v13 = vld [vmem:[%s30069_s27 + $0x2a0] sm:$0xff]  ;;  %v31255_v36 = vld [vmem:[%s30077_s30 + $0x158] sm:$0xff] }
 0x1a7   : > { %26669 = vmatprep.mubr.msk.f32.mxu0 %vm501_vm0, %v30897_v10  ;;  %v31258_v10 = vld [vmem:[%s30077_s30 + $0x160] sm:$0xff] }
 0x1a9   : > { %25322 = vmatmul.mubr.msk.f32.gmra.mrb[18].mxu1 %vm501_vm0, %v30308_v15  ;;  %v21802_v15 = vld [vmem:[%s30069_s27 + $0x2a8] sm:$0xff] }
 0x1aa   : > { %26670 = vmatmul.mubr.msk.f32.gmra.mrb[50].mxu0 %vm501_vm0, %v30906_v12  ;;  %25324 = vmatprep.mubr.msk.f32.mxu1 %vm501_vm0, %v30318_v17  ;;  %v21803_v17 = vld [vmem:[%s30069_s27 + $0x2b0] sm:$0xff]  ;;  %v36152_v12 = vld [vmem:[#allocation21_spill] sm:$0xff] }
 0x1ab   : > { %26672 = vmatprep.mubr.msk.f32.mxu0 %vm501_vm0, %v30911_v53  ;;  %v36153_v53 = vld [vmem:[#allocation22_spill] sm:$0xff] }
 0x1ad   : > { %25325 = vmatmul.mubr.msk.f32.gmra.mrb[20].mxu1 %vm501_vm0, %v30322_v19  ;;  %v21804_v19 = vld [vmem:[%s30069_s27 + $0x2b8] sm:$0xff] }
 0x1ae   : > { %26673 = vmatmul.mubr.msk.f32.gmra.mrb[52].mxu0 %vm501_vm0, %v30923_v4  ;;  %25327 = vmatprep.mubr.msk.f32.mxu1 %vm501_vm0, %v30332_v21  ;;  %v21805_v21 = vld [vmem:[%s30069_s27 + $0x2c0] sm:$0xff]  ;;  %v31269_v4 = vld [vmem:[%s30077_s30 + $0x168] sm:$0xff] }
 0x1af   : > { %26675 = vmatprep.mubr.msk.f32.mxu0 %vm501_vm0, %v31032_v3 }
 0x1b1   : > { %25328 = vmatmul.mubr.msk.f32.gmra.mrb[22].mxu1 %vm501_vm0, %v30336_v23  ;;  %v21806_v23 = vld [vmem:[%s30069_s27 + $0x2c8] sm:$0xff] }
 0x1b2   : > { %26676 = vmatmul.mubr.msk.f32.gmra.mrb[54].mxu0 %vm501_vm0, %v21798_v5  ;;  %25330 = vmatprep.mubr.msk.f32.mxu1 %vm501_vm0, %v1680_v6  ;;  %v36158_v5 = vld [vmem:[#allocation27_spill] sm:$0xff] }
 0x1b3   : > { %26678 = vmatprep.mubr.msk.f32.mxu0 %vm501_vm0, %v21799_v8  ;;  %v20184_v6 = vld [vmem:[%s30069_s27 + $0x10] sm:$0xff]  ;;  %v31309_v8 = vld [vmem:[%s30077_s30 + $0x1a8] sm:$0xff] }
 0x1b5   : > { %25331 = vmatmul.mubr.msk.f32.gmra.mrb[24].mxu1 %vm501_vm0, %v30348_v27  ;;  %v1688_v27 = vld [vmem:[%s30236_s0 + $0x140] sm:$0xff] }
 0x1b6   : > { %26679 = vmatmul.mubr.msk.f32.gmra.mrb[56].mxu0 %vm501_vm0, %v21800_v11  ;;  %25333 = vmatprep.mubr.msk.f32.mxu1 %vm501_vm0, %v30357_v29  ;;  %v31077_v29 = vld [vmem:[%s30077_s30 + $0x60] sm:$0xff]  ;;  %v20185_v11 = vld [vmem:[%s30069_s27 + $0x18] sm:$0xff] }
 0x1b7   : > { %26681 = vmatprep.mubr.msk.f32.mxu0 %vm501_vm0, %v21801_v13  ;;  %v31313_v13 = vld [vmem:[%s30077_s30 + $0x1b0] sm:$0xff] }
 0x1b9   : > { %25334 = vmatmul.mubr.msk.f32.gmra.mrb[26].mxu1 %vm501_vm0, %v30361_v31  ;;  %v31086_v31 = vld [vmem:[%s30077_s30 + $0x68] sm:$0xff] }
 0x1ba   : > { %26682 = vmatmul.mubr.msk.f32.gmra.mrb[58].mxu0 %vm501_vm0, %v21802_v15  ;;  %25336 = vmatprep.mubr.msk.f32.mxu1 %vm501_vm0, %v30371_v33  ;;  %v31089_v33 = vld [vmem:[%s30077_s30 + $0x70] sm:$0xff] }
 0x1bb   : > { %26684 = vmatprep.mubr.msk.f32.mxu0 %vm501_vm0, %v21803_v17  ;;  %v20507_v15 = vld [vmem:[%s35895_s3 + $0x50] sm:$0xff]  ;;  %v20508_v17 = vld [vmem:[%s35895_s3 + $0x58] sm:$0xff] }
 0x1bd   : > { %25337 = vmatmul.mubr.msk.f32.gmra.mrb[28].mxu1 %vm501_vm0, %v30375_v35  ;;  %v22197_v35 = vld [vmem:[%s35895_s3 + $0x120] sm:$0xff] }
 0x1be   : > { %26685 = vmatmul.mubr.msk.f32.gmra.mrb[60].mxu0 %vm501_vm0, %v21804_v19  ;;  %25339 = vmatprep.mubr.msk.f32.mxu1 %vm501_vm0, %v30385_v37  ;;  %v22198_v37 = vld [vmem:[%s35895_s3 + $0x128] sm:$0xff]  ;;  %v20186_v19 = vld [vmem:[%s30069_s27 + $0x20] sm:$0xff] }
 0x1bf   : > { %26687 = vmatprep.mubr.msk.f32.mxu0 %vm501_vm0, %v21805_v21  ;;  %v31326_v21 = vpack.c.bf16 %v20508_v17, %v20507_v15  ;;  %v31417_v15 = vld [vmem:[%s30077_s30 + $0x240] sm:$0xff] }
 0x1c0   : > { %36165 = vst [vmem:[#allocation24_spill] sm:$0xff] %v31417_v15  ;;  %v36166_v17 = vld [vmem:[#allocation28_spill] sm:$0xff] }
 0x1c1   : > { %25340 = vmatmul.mubr.msk.f32.gmra.mrb[30].mxu1 %vm501_vm0, %v30389_v39  ;;  %v31107_v39 = vld [vmem:[%s30077_s30 + $0x78] sm:$0xff] }
 0x1c2   : > { %26688 = vmatmul.mubr.msk.f32.gmra.mrb[62].mxu0 %vm501_vm0, %v21806_v23  ;;  %25342 = vmatprep.mubr.msk.f32.mxu1 %vm501_vm0, %v1688_v27  ;;  %v31332_v23 = vld [vmem:[%s30077_s30 + $0x1b8] sm:$0xff]  ;;  %v20187_v27 = vld [vmem:[%s30069_s27 + $0x28] sm:$0xff] }
 0x1c3   : > { %26694 = vmatprep.mubr.msk.f32.mxu0 %vm501_vm0, %v31077_v29 }
 0x1c5   : > { %25343 = vmatmul.mubr.msk.f32.gmra.mrb[32].mxu1 %vm501_vm0, %v30401_v43  ;;  %v31109_v43 = vpack.c.bf16 %v22198_v37, %v22197_v35  ;;  %v31336_v35 = vld [vmem:[%s30077_s30 + $0x1c0] sm:$0xff]  ;;  %v31347_v37 = vld [vmem:[%s30077_s30 + $0x1c8] sm:$0xff] }
 0x1c6   : > { %26695 = vmatmul.mubr.msk.f32.vlgmr.msra.gmra.mrb[0].mxu0 %vm501_vm0, %v31086_v31  ;;  %25345 = vmatprep.mubr.msk.f32.mxu1 %vm501_vm0, %v30410_v45  ;;  %v31112_v45 = vld [vmem:[%s30077_s30 + $0x80] sm:$0xff] }
 0x1c7   : > { %27861 = vmatpush3.bf16.msra.mxu0 %v30737_v49  ;;  %26697 = vmatprep.mubr.msk.f32.mxu0 %vm501_vm0, %v31089_v33  ;;  %v31124_v49 = vld [vmem:[%s30077_s30 + $0x88] sm:$0xff] }
 0x1c8   : > { %27863 = vmatprep.subr.bf16.mxu0 %v31109_v43 }
 0x1c9   : > { %25346 = vmatmul.mubr.msk.f32.gmra.mrb[34].mxu1 %vm501_vm0, %v30414_v48  ;;  %v21880_v48 = vld [vmem:[%s30077_s30 + $0x98] sm:$0xff] }
 0x1ca   : > { %26698 = vmatmul.mubr.msk.f32.gmra.mrb[2].mxu0 %vm501_vm0, %v31107_v39  ;;  %25348 = vmatprep.mubr.msk.f32.mxu1 %vm501_vm0, %v30424_v50  ;;  %v1696_v50 = vld [vmem:[%s30236_s0 + $0x190] sm:$0xff] }
 0x1cb   : > { %26700 = vmatprep.mubr.msk.f32.mxu0 %vm501_vm0, %v31112_v45 }
 0x1cd   : > { %25349 = vmatmul.mubr.msk.f32.gmra.mrb[36].mxu1 %vm501_vm0, %v30428_v52  ;;  %v31149_v52 = vld [vmem:[%s30077_s30 + $0xb8] sm:$0xff] }
 0x1ce   : > { %26701 = vmatmul.mubr.msk.f32.gmra.mrb[4].mxu0 %vm501_vm0, %v31124_v49  ;;  %25351 = vmatprep.mubr.msk.f32.mxu1 %vm501_vm0, %v30438_v54  ;;  %v31152_v54 = vld [vmem:[%s30077_s30 + $0xc0] sm:$0xff] }
 0x1cf   : > { %26703 = vmatprep.mubr.msk.f32.mxu0 %vm501_vm0, %v31127_v2 }
 0x1d1   : > { %25352 = vmatmul.mubr.msk.f32.gmra.mrb[38].mxu1 %vm501_vm0, %v30442_v56  ;;  %v31163_v56 = vld [vmem:[%s30077_s30 + $0xc8] sm:$0xff] }
 0x1d2   : > { %26704 = vmatmul.mubr.msk.f32.gmra.mrb[6].mxu0 %vm501_vm0, %v21880_v48  ;;  %25354 = vmatprep.mubr.msk.f32.mxu1 %vm501_vm0, %v1696_v50  ;;  %v20189_v48 = vld [vmem:[%s30069_s27 + $0x38] sm:$0xff]  ;;  %v31351_v50 = vld [vmem:[%s30077_s30 + $0x1d0] sm:$0xff] }
 0x1d3   : > { %26706 = vmatprep.mubr.msk.f32.mxu0 %vm501_vm0, %v31140_v46 }
 0x1d5   : > { %25355 = vmatmul.mubr.msk.f32.gmra.mrb[40].mxu1 %vm501_vm0, %v30454_v60  ;;  %v31177_v60 = vld [vmem:[%s30077_s30 + $0xd8] sm:$0xff] }
 0x1d6   : > { %26707 = vmatmul.mubr.msk.f32.gmra.mrb[8].mxu0 %vm501_vm0, %v31149_v52  ;;  %25357 = vmatprep.mubr.msk.f32.mxu1 %vm501_vm0, %v30463_v1  ;;  %v31180_v1 = vld [vmem:[%s30077_s30 + $0xe0] sm:$0xff] }
 0x1d7   : > { %26709 = vmatprep.mubr.msk.f32.mxu0 %vm501_vm0, %v31152_v54 }
 0x1d9   : > { %25358 = vmatmul.mubr.msk.f32.gmra.mrb[42].mxu1 %vm501_vm0, %v30467_v9  ;;  %v21888_v9 = vld [vmem:[%s30077_s30 + $0xe8] sm:$0xff] }
 0x1da   : > { %26710 = vmatmul.mubr.msk.f32.gmra.mrb[10].mxu0 %vm501_vm0, %v31163_v56  ;;  %25360 = vmatprep.mubr.msk.f32.mxu1 %vm501_vm0, %v30486_v18  ;;  %v1704_v18 = vld [vmem:[%s30236_s0 + $0x1e0] sm:$0xff] }
 0x1db   : > { %26712 = vmatprep.mubr.msk.f32.mxu0 %vm501_vm0, %v31166_v28 }
 0x1dd   : > { %25361 = vmatmul.mubr.msk.f32.gmra.mrb[44].mxu1 %vm501_vm0, %v30490_v22  ;;  %v31202_v22 = vld [vmem:[%s30077_s30 + $0x108] sm:$0xff] }
 0x1de   : > { %26713 = vmatmul.mubr.msk.f32.gmra.mrb[12].mxu0 %vm501_vm0, %v31177_v60  ;;  %25363 = vmatprep.mubr.msk.f32.mxu1 %vm501_vm0, %v30501_v24  ;;  %v31205_v24 = vld [vmem:[%s30077_s30 + $0x110] sm:$0xff] }
 0x1df   : > { %26715 = vmatprep.mubr.msk.f32.mxu0 %vm501_vm0, %v31180_v1 }
 0x1e1   : > { %25364 = vmatmul.mubr.msk.f32.gmra.mrb[46].mxu1 %vm501_vm0, %v30505_v26  ;;  %v31216_v26 = vld [vmem:[%s30077_s30 + $0x118] sm:$0xff] }
 0x1e2   : > { %26716 = vmatmul.mubr.msk.f32.gmra.mrb[14].mxu0 %vm501_vm0, %v21888_v9  ;;  %25366 = vmatprep.mubr.msk.f32.mxu1 %vm501_vm0, %v1704_v18  ;;  %v20190_v9 = vld [vmem:[%s30069_s27 + $0x40] sm:$0xff]  ;;  %v21912_v18 = vld [vmem:[%s30077_s30 + $0x1d8] sm:$0xff] }
 0x1e3   : > { %26718 = vmatprep.mubr.msk.f32.mxu0 %vm501_vm0, %v31193_v32 }
 0x1e5   : > { %25367 = vmatmul.mubr.msk.f32.gmra.mrb[48].mxu1 %vm501_vm0, %v30517_v34  ;;  %v31230_v34 = vld [vmem:[%s30077_s30 + $0x128] sm:$0xff] }
 0x1e6   : > { %26719 = vmatmul.mubr.msk.f32.gmra.mrb[16].mxu0 %vm501_vm0, %v31202_v22  ;;  %25369 = vmatprep.mubr.msk.f32.mxu1 %vm501_vm0, %v30526_v38  ;;  %v31233_v38 = vld [vmem:[%s30077_s30 + $0x130] sm:$0xff] }
 0x1e7   : > { %26721 = vmatprep.mubr.msk.f32.mxu0 %vm501_vm0, %v31205_v24 }
 0x1e9   : > { %25370 = vmatmul.mubr.msk.f32.gmra.mrb[50].mxu1 %vm501_vm0, %v30532_v41  ;;  %v36150_v41 = vld [vmem:[#allocation19_spill] sm:$0xff] }
 0x1ea   : > { %26722 = vmatmul.mubr.msk.f32.gmra.mrb[18].mxu0 %vm501_vm0, %v31216_v26  ;;  %25372 = vmatprep.mubr.msk.f32.mxu1 %vm501_vm0, %v30545_v44  ;;  %v21896_v44 = vld [vmem:[%s30077_s30 + $0x138] sm:$0xff] }
 0x1eb   : > { %26724 = vmatprep.mubr.msk.f32.mxu0 %vm501_vm0, %v31219_v59 }
 0x1ed   : > { %25373 = vmatmul.mubr.msk.f32.gmra.mrb[52].mxu1 %vm501_vm0, %v36149_v58  ;;  %v20191_v58 = vld [vmem:[%s30069_s27 + $0x58] sm:$0xff] }
 0x1ee   : > { %26725 = vmatmul.mubr.msk.f32.gmra.mrb[20].mxu0 %vm501_vm0, %v31230_v34  ;;  %25375 = vmatprep.mubr.msk.f32.mxu1 %vm501_vm0, %v36150_v41  ;;  %v31363_v41 = vld [vmem:[%s30077_s30 + $0x1f0] sm:$0xff] }
 0x1ef   : > { %26727 = vmatprep.mubr.msk.f32.mxu0 %vm501_vm0, %v31233_v38 }
 0x1f1   : > { %25376 = vmatmul.mubr.msk.f32.gmra.mrb[54].mxu1 %vm501_vm0, %v36151_v20  ;;  %v20193_v20 = vld [vmem:[%s30069_s27 + $0x68] sm:$0xff] }
 0x1f2   : > { %26728 = vmatmul.mubr.msk.f32.gmra.mrb[22].mxu0 %vm501_vm0, %v21896_v44  ;;  %25378 = vmatprep.mubr.msk.f32.mxu1 %vm501_vm0, %v1712_v61  ;;  %v20192_v44 = vld [vmem:[%s30069_s27 + $0x60] sm:$0xff]  ;;  %v31372_v61 = vld [vmem:[%s30077_s30 + $0x1f8] sm:$0xff] }
 0x1f3   : > { %26730 = vmatprep.mubr.msk.f32.mxu0 %vm501_vm0, %v31246_v7  ;;  %36159 = vst [vmem:[#allocation18_spill] sm:$0xff] %v31372_v61 }
 0x1f5   : > { %25379 = vmatmul.mubr.msk.f32.gmra.mrb[56].mxu1 %vm501_vm0, %v36152_v12  ;;  %v31376_v12 = vld [vmem:[%s30077_s30 + $0x200] sm:$0xff] }
 0x1f6   : > { %26731 = vmatmul.mubr.msk.f32.gmra.mrb[24].mxu0 %vm501_vm0, %v31255_v36  ;;  %25381 = vmatprep.mubr.msk.f32.mxu1 %vm501_vm0, %v36153_v53  ;;  %36160 = vst [vmem:[#allocation19_spill] sm:$0xff] %v31376_v12  ;;  %v20194_v53 = vld [vmem:[%s30069_s27 + $0x70] sm:$0xff] }
 0x1f7   : > { %26733 = vmatprep.mubr.msk.f32.mxu0 %vm501_vm0, %v31258_v10 }
 0x1f9   : > { %25382 = vmatmul.mubr.msk.f32.gmra.mrb[58].mxu1 %vm501_vm0, %v36154_v40  ;;  %v31386_v40 = vld [vmem:[%s30077_s30 + $0x208] sm:$0xff] }
 0x1fa   : > { %26734 = vmatmul.mubr.msk.f32.gmra.mrb[26].mxu0 %vm501_vm0, %v31269_v4  ;;  %25384 = vmatprep.mubr.msk.f32.mxu1 %vm501_vm0, %v36155_v51  ;;  %36161 = vst [vmem:[#allocation20_spill] sm:$0xff] %v31386_v40  ;;  %v20195_v51 = vld [vmem:[%s30069_s27 + $0x78] sm:$0xff] }
 0x1fb   : > { %26736 = vmatprep.mubr.msk.f32.mxu0 %vm501_vm0, %v31272_v47 }
 0x1fd   : > { %25385 = vmatmul.mubr.msk.f32.gmra.mrb[60].mxu1 %vm501_vm0, %v36156_v57  ;;  %v31390_v57 = vld [vmem:[%s30077_s30 + $0x210] sm:$0xff] }
 0x1fe   : > { %26737 = vmatmul.mubr.msk.f32.gmra.mrb[28].mxu0 %vm501_vm0, %v31283_v16  ;;  %25387 = vmatprep.mubr.msk.f32.mxu1 %vm501_vm0, %v36157_v14  ;;  %36162 = vst [vmem:[#allocation21_spill] sm:$0xff] %v31390_v57  ;;  %v20196_v14 = vld [vmem:[%s30069_s27 + $0x80] sm:$0xff] }
 0x1ff   : > { %26739 = vmatprep.mubr.msk.f32.mxu0 %vm501_vm0, %v31286_v55 }
 0x201   : > { %25388 = vmatmul.mubr.msk.f32.gmra.mrb[62].mxu1 %vm501_vm0, %v36158_v5  ;;  %v31404_v5 = vld [vmem:[%s30077_s30 + $0x220] sm:$0xff] }
 0x202   : > { %26740 = vmatmul.mubr.msk.f32.gmra.mrb[30].mxu0 %vm501_vm0, %v21904_v42  ;;  %25394 = vmatprep.mubr.msk.f32.mxu1 %vm501_vm0, %v20183_v63  ;;  %v31400_v42 = vld [vmem:[%s30077_s30 + $0x218] sm:$0xff]  ;;  %v20197_v63 = vld [vmem:[%s30069_s27 + $0x88] sm:$0xff]  ;;  %36164 = vst [vmem:[#allocation23_spill] sm:$0xff] %v31404_v5 }
 0x203   : > { %26742 = vmatprep.mubr.msk.f32.mxu0 %vm501_vm0, %v31299_v0  ;;  %36163 = vst [vmem:[#allocation22_spill] sm:$0xff] %v31400_v42 }
 0x205   : > { %25395 = vmatmul.mubr.msk.f32.vlgmr.msra.gmra.mrb[0].mxu1 %vm501_vm0, %v20184_v6  ;;  %v21920_v6 = vld [vmem:[%s30077_s30 + $0x228] sm:$0xff] }
 0x206   : > { %26743 = vmatmul.mubr.msk.f32.gmra.mrb[32].mxu0 %vm501_vm0, %v31309_v8  ;;  %27809 = vmatpush3.bf16.msra.mxu1 %v30948_v25  ;;  %v20188_v25 = vld [vmem:[%s30069_s27 + $0x30] sm:$0xff] }
 0x207   : > { %25397 = vmatprep.mubr.msk.f32.mxu1 %vm501_vm0, %v20185_v11  ;;  %26745 = vmatprep.mubr.msk.f32.mxu0 %vm501_vm0, %v31313_v13  ;;  %v31414_v11 = vld [vmem:[%s30069_s27 + $0xa8] sm:$0xff] }
 0x208   : > { %27811 = vmatprep.subr.bf16.mxu1 %v31326_v21 }
 0x209   : > { %25398 = vmatmul.mubr.msk.f32.gmra.mrb[2].mxu1 %vm501_vm0, %v20186_v19  ;;  %v31425_v19 = vld [vmem:[%s30069_s27 + $0xb0] sm:$0xff] }
 0x20a   : > { %26746 = vmatmul.mubr.msk.f32.gmra.mrb[34].mxu0 %vm501_vm0, %v31332_v23  ;;  %25400 = vmatprep.mubr.msk.f32.mxu1 %vm501_vm0, %v20187_v27  ;;  %v31430_v27 = vld [vmem:[%s30077_s30 + $0x248] sm:$0xff] }
 0x20b   : > { %26748 = vmatprep.mubr.msk.f32.mxu0 %vm501_vm0, %v31336_v35  ;;  %36167 = vst [vmem:[#allocation25_spill] sm:$0xff] %v31430_v27 }
 0x20d   : > { %25401 = vmatmul.mubr.msk.f32.gmra.mrb[4].mxu1 %vm501_vm0, %v20188_v25  ;;  %v31433_v25 = vld [vmem:[%s30069_s27 + $0xb8] sm:$0xff] }
 0x20e   : > { %26749 = vmatmul.mubr.msk.f32.gmra.mrb[36].mxu0 %vm501_vm0, %v31347_v37  ;;  %25403 = vmatprep.mubr.msk.f32.mxu1 %vm501_vm0, %v20189_v48  ;;  %v31436_v48 = vld [vmem:[%s30077_s30 + $0x250] sm:$0xff] }
 0x20f   : > { %26751 = vmatprep.mubr.msk.f32.mxu0 %vm501_vm0, %v31351_v50  ;;  %36168 = vst [vmem:[#allocation26_spill] sm:$0xff] %v31436_v48 }
 0x211   : > { %25404 = vmatmul.mubr.msk.f32.gmra.mrb[6].mxu1 %vm501_vm0, %v20190_v9  ;;  %v31445_v9 = vld [vmem:[%s30069_s27 + $0xc0] sm:$0xff] }
 0x212   : > { %26752 = vmatmul.mubr.msk.f32.gmra.mrb[38].mxu0 %vm501_vm0, %v21912_v18  ;;  %25406 = vmatprep.mubr.msk.f32.mxu1 %vm501_vm0, %v20191_v58  ;;  %v31450_v18 = vld [vmem:[%s30077_s30 + $0x258] sm:$0xff]  ;;  %v31453_v58 = vld [vmem:[%s30069_s27 + $0xc8] sm:$0xff] }
 0x213   : > { %26754 = vmatprep.mubr.msk.f32.mxu0 %vm501_vm0, %v31363_v41  ;;  %36169 = vst [vmem:[#allocation27_spill] sm:$0xff] %v31450_v18 }
 0x215   : > { %25407 = vmatmul.mubr.msk.f32.gmra.mrb[8].mxu1 %vm501_vm0, %v20192_v44  ;;  %v31456_v44 = vld [vmem:[%s30077_s30 + $0x260] sm:$0xff] }
 0x216   : > { %26755 = vmatmul.mubr.msk.f32.gmra.mrb[40].mxu0 %vm501_vm0, %v31372_v61  ;;  %25409 = vmatprep.mubr.msk.f32.mxu1 %vm501_vm0, %v20193_v20  ;;  %36170 = vst [vmem:[#allocation28_spill] sm:$0xff] %v31456_v44  ;;  %v31465_v20 = vld [vmem:[%s30069_s27 + $0xd0] sm:$0xff]  ;;  %v31592_v61 = vld [vmem:[%s30236_s0 + $0x80] sm:$0xff] }
 0x217   : > { %26757 = vmatprep.mubr.msk.f32.mxu0 %vm501_vm0, %v31376_v12  ;;  %v31563_v12 = vld [vmem:[%s30236_s0 + $0x70] sm:$0xff]  ;;  %36183 = vst [vmem:[#allocation40_spill] sm:$0xff] %v31592_v61 }
 0x218   : > { %36179 = vst [vmem:[#allocation36_spill] sm:$0xff] %v31563_v12 }
 0x219   : > { %25410 = vmatmul.mubr.msk.f32.gmra.mrb[10].mxu1 %vm501_vm0, %v20194_v53  ;;  %v31470_v53 = vld [vmem:[%s30077_s30 + $0x268] sm:$0xff] }
 0x21a   : > { %26758 = vmatmul.mubr.msk.f32.gmra.mrb[42].mxu0 %vm501_vm0, %v31386_v40  ;;  %25412 = vmatprep.mubr.msk.f32.mxu1 %vm501_vm0, %v20195_v51  ;;  %36171 = vst [vmem:[#allocation32_spill] sm:$0xff] %v31470_v53  ;;  %v31473_v51 = vld [vmem:[%s30069_s27 + $0xd8] sm:$0xff] }
 0x21b   : > { %26760 = vmatprep.mubr.msk.f32.mxu0 %vm501_vm0, %v31390_v57  ;;  %v36175_v57 = vld [vmem:[#allocation30_spill] sm:$0xff]  ;;  %v31560_v40 = vld [vmem:[%s30069_s27 + $0x158] sm:$0xff] }
 0x21c   : > { %36178 = vst [vmem:[#allocation35_spill] sm:$0xff] %v31560_v40 }
 0x21d   : > { %25413 = vmatmul.mubr.msk.f32.gmra.mrb[12].mxu1 %vm501_vm0, %v20196_v14  ;;  %v31476_v14 = vld [vmem:[%s30077_s30 + $0x270] sm:$0xff] }
 0x21e   : > { %26761 = vmatmul.mubr.msk.f32.gmra.mrb[44].mxu0 %vm501_vm0, %v31400_v42  ;;  %25415 = vmatprep.mubr.msk.f32.mxu1 %vm501_vm0, %v20197_v63  ;;  %36172 = vst [vmem:[#allocation33_spill] sm:$0xff] %v31476_v14  ;;  %v21928_v63 = vld [vmem:[%s30077_s30 + $0x278] sm:$0xff]  ;;  %v31544_v42 = vld [vmem:[%s30236_s0 + $0x60] sm:$0xff] }
 0x21f   : > { %26763 = vmatprep.mubr.msk.f32.mxu0 %vm501_vm0, %v31404_v5  ;;  %v21935_v5 = vld [vmem:[%s30077_s30 + $0x2c0] sm:$0xff] }
 0x221   : > { %25416 = vmatmul.mubr.msk.f32.gmra.mrb[14].mxu1 %vm501_vm0, %v36166_v17  ;;  %v21929_v17 = vld [vmem:[%s30077_s30 + $0x290] sm:$0xff] }
 0x222   : > { %26764 = vmatmul.mubr.msk.f32.gmra.mrb[46].mxu0 %vm501_vm0, %v21920_v6  ;;  %25418 = vmatprep.mubr.msk.f32.mxu1 %vm501_vm0, %v31414_v11  ;;  %v31488_v6 = vld [vmem:[%s30069_s27 + $0xf8] sm:$0xff] }
 0x223   : > { %26766 = vmatprep.mubr.msk.f32.mxu0 %vm501_vm0, %v31417_v15  ;;  %v31530_v15 = vld [vmem:[%s30069_s27 + $0x128] sm:$0xff] }
 0x225   : > { %25419 = vmatmul.mubr.msk.f32.gmra.mrb[16].mxu1 %vm501_vm0, %v31425_v19 }
 0x226   : > { %26767 = vmatmul.mubr.msk.f32.gmra.mrb[48].mxu0 %vm501_vm0, %v31430_v27  ;;  %25421 = vmatprep.mubr.msk.f32.mxu1 %vm501_vm0, %v31433_v25  ;;  %v21933_v27 = vld [vmem:[%s30077_s30 + $0x2b0] sm:$0xff] }
 0x227   : > { %26769 = vmatprep.mubr.msk.f32.mxu0 %vm501_vm0, %v31436_v48  ;;  %v21931_v48 = vld [vmem:[%s30077_s30 + $0x2a0] sm:$0xff] }
 0x229   : > { %25422 = vmatmul.mubr.msk.f32.gmra.mrb[18].mxu1 %vm501_vm0, %v31445_v9 }
 0x22a   : > { %26770 = vmatmul.mubr.msk.f32.gmra.mrb[50].mxu0 %vm501_vm0, %v31450_v18  ;;  %25424 = vmatprep.mubr.msk.f32.mxu1 %vm501_vm0, %v31453_v58  ;;  %v31502_v18 = vld [vmem:[%s30069_s27 + $0x108] sm:$0xff] }
 0x22b   : > { %26772 = vmatprep.mubr.msk.f32.mxu0 %vm501_vm0, %v31456_v44  ;;  %v36173_v44 = vld [vmem:[#allocation29_spill] sm:$0xff] }
 0x22c   : > { %36174 = vst [vmem:[#allocation29_spill] sm:$0xff] %v31544_v42 }
 0x22d   : > { %25425 = vmatmul.mubr.msk.f32.gmra.mrb[20].mxu1 %vm501_vm0, %v31465_v20 }
 0x22e   : > { %26773 = vmatmul.mubr.msk.f32.gmra.mrb[52].mxu0 %vm501_vm0, %v31470_v53  ;;  %25427 = vmatprep.mubr.msk.f32.mxu1 %vm501_vm0, %v31473_v51  ;;  %v31497_v53 = vld [vmem:[%s30069_s27 + $0x100] sm:$0xff] }
 0x22f   : > { %26775 = vmatprep.mubr.msk.f32.mxu0 %vm501_vm0, %v31476_v14  ;;  %v21930_v14 = vld [vmem:[%s30077_s30 + $0x298] sm:$0xff] }
 0x231   : > { %25428 = vmatmul.mubr.msk.f32.gmra.mrb[22].mxu1 %vm501_vm0, %v36173_v44  ;;  %v31511_v44 = vld [vmem:[%s30069_s27 + $0x110] sm:$0xff] }
 0x232   : > { %26776 = vmatmul.mubr.msk.f32.gmra.mrb[54].mxu0 %vm501_vm0, %v21928_v63  ;;  %25430 = vmatprep.mubr.msk.f32.mxu1 %vm501_vm0, %v31488_v6  ;;  %v21932_v63 = vld [vmem:[%s30077_s30 + $0x2a8] sm:$0xff] }
 0x233   : > { %26778 = vmatprep.mubr.msk.f32.mxu0 %vm501_vm0, %v21929_v17  ;;  %v31516_v17 = vld [vmem:[%s30069_s27 + $0x118] sm:$0xff] }
 0x235   : > { %25431 = vmatmul.mubr.msk.f32.gmra.mrb[24].mxu1 %vm501_vm0, %v31497_v53 }
 0x236   : > { %26779 = vmatmul.mubr.msk.f32.gmra.mrb[56].mxu0 %vm501_vm0, %v21930_v14  ;;  %25433 = vmatprep.mubr.msk.f32.mxu1 %vm501_vm0, %v31502_v18  ;;  %v31525_v14 = vld [vmem:[%s30069_s27 + $0x120] sm:$0xff] }
 0x237   : > { %26781 = vmatprep.mubr.msk.f32.mxu0 %vm501_vm0, %v21931_v48  ;;  %v21934_v48 = vld [vmem:[%s30077_s30 + $0x2b8] sm:$0xff] }
 0x239   : > { %25434 = vmatmul.mubr.msk.f32.gmra.mrb[26].mxu1 %vm501_vm0, %v31511_v44 }
 0x23a   : > { %26782 = vmatmul.mubr.msk.f32.gmra.mrb[58].mxu0 %vm501_vm0, %v21932_v63  ;;  %25436 = vmatprep.mubr.msk.f32.mxu1 %vm501_vm0, %v31516_v17  ;;  %v21936_v63 = vld [vmem:[%s30077_s30 + $0x2c8] sm:$0xff] }
 0x23b   : > { %26784 = vmatprep.mubr.msk.f32.mxu0 %vm501_vm0, %v21933_v27  ;;  %v31541_v27 = vld [vmem:[%s30069_s27 + $0x148] sm:$0xff] }
 0x23d   : > { %25437 = vmatmul.mubr.msk.f32.gmra.mrb[28].mxu1 %vm501_vm0, %v31525_v14 }
 0x23e   : > { %26785 = vmatmul.mubr.msk.f32.gmra.mrb[60].mxu0 %vm501_vm0, %v21934_v48  ;;  %25439 = vmatprep.mubr.msk.f32.mxu1 %vm501_vm0, %v31530_v15  ;;  %v31552_v48 = vld [vmem:[%s30069_s27 + $0x150] sm:$0xff] }
 0x23f   : > { %26787 = vmatprep.mubr.msk.f32.mxu0 %vm501_vm0, %v21935_v5  ;;  %36176 = vst [vmem:[#allocation30_spill] sm:$0xff] %v31552_v48  ;;  %v31557_v5 = vld [vmem:[%s30236_s0 + $0x68] sm:$0xff] }
 0x240   : > { %36177 = vst [vmem:[#allocation34_spill] sm:$0xff] %v31557_v5 }
 0x241   : > { %25440 = vmatmul.mubr.msk.f32.gmra.mrb[30].mxu1 %vm501_vm0, %v36175_v57  ;;  %v31572_v57 = vld [vmem:[%s30069_s27 + $0x160] sm:$0xff] }
 0x242   : > { %26788 = vmatmul.mubr.msk.f32.gmra.mrb[62].mxu0 %vm501_vm0, %v21936_v63  ;;  %25442 = vmatprep.mubr.msk.f32.mxu1 %vm501_vm0, %v31541_v27  ;;  %36180 = vst [vmem:[#allocation37_spill] sm:$0xff] %v31572_v57  ;;  %v22327_v63 = vld [vmem:[%s35895_s3 + $0x130] sm:$0xff] }
 0x243   : > { %26794 = vmatprep.mubr.msk.f32.mxu0 %vm501_vm0, %v31544_v42  ;;  %v22328_v42 = vld [vmem:[%s35895_s3 + $0x138] sm:$0xff] }
 0x245   : > { %25443 = vmatmul.mubr.msk.f32.gmra.mrb[32].mxu1 %vm501_vm0, %v31552_v48  ;;  %v31589_v48 = vpack.c.bf16 %v22328_v42, %v22327_v63  ;;  %v31607_v42 = vld [vmem:[%s30236_s0 + $0x88] sm:$0xff]  ;;  %v31610_v63 = vld [vmem:[%s30069_s27 + $0x178] sm:$0xff] }
 0x246   : > { %26795 = vmatmul.mubr.msk.f32.vlgmr.msra.gmra.mrb[0].mxu0 %vm501_vm0, %v31557_v5  ;;  %25445 = vmatprep.mubr.msk.f32.mxu1 %vm501_vm0, %v31560_v40  ;;  %v31584_v5 = vld [vmem:[%s30236_s0 + $0x78] sm:$0xff]  ;;  %v31587_v40 = vld [vmem:[%s30069_s27 + $0x168] sm:$0xff]  ;;  %36185 = vst [vmem:[#allocation42_spill] sm:$0xff] %v31607_v42  ;;  %36186 = vst [vmem:[#allocation43_spill] sm:$0xff] %v31610_v63 }
 0x247   : > { %27865 = vmatpush3.bf16.msra.mxu0 %v31109_v43  ;;  %26797 = vmatprep.mubr.msk.f32.mxu0 %vm501_vm0, %v31563_v12  ;;  %36181 = vst [vmem:[#allocation38_spill] sm:$0xff] %v31584_v5  ;;  %36182 = vst [vmem:[#allocation39_spill] sm:$0xff] %v31587_v40  ;;  %v31602_v43 = vld [vmem:[%s30069_s27 + $0x170] sm:$0xff] }
 0x248   : > { %27867 = vmatprep.subr.bf16.mxu0 %v31589_v48  ;;  %36184 = vst [vmem:[#allocation41_spill] sm:$0xff] %v31602_v43  ;;  %v31613_v12 = vld [vmem:[%s30236_s0 + $0x90] sm:$0xff] }
 0x249   : > { %25446 = vmatmul.mubr.msk.f32.gmra.mrb[34].mxu1 %vm501_vm0, %v31572_v57  ;;  %36187 = vst [vmem:[#allocation44_spill] sm:$0xff] %v31613_v12  ;;  %v36190_v57 = vld [vmem:[#allocation31_spill] sm:$0xff] }
 0x24a   : > { %26798 = vmatmul.mubr.msk.f32.gmra.mrb[2].mxu0 %vm501_vm0, %v31584_v5  ;;  %25448 = vmatprep.mubr.msk.f32.mxu1 %vm501_vm0, %v31587_v40  ;;  %v31625_v5 = vld [vmem:[%s30069_s27 + $0x198] sm:$0xff]  ;;  %v31628_v40 = vld [vmem:[%s30236_s0 + $0xb0] sm:$0xff] }
 0x24b   : > { %26800 = vmatprep.mubr.msk.f32.mxu0 %vm501_vm0, %v31592_v61  ;;  %v22010_v61 = vld [vmem:[%s30236_s0 + $0x98] sm:$0xff]  ;;  %36188 = vst [vmem:[#allocation45_spill] sm:$0xff] %v31625_v5  ;;  %36189 = vst [vmem:[#allocation46_spill] sm:$0xff] %v31628_v40 }
 0x24d   : > { %25449 = vmatmul.mubr.msk.f32.gmra.mrb[36].mxu1 %vm501_vm0, %v31602_v43  ;;  %v31647_v43 = vld [vmem:[%s30236_s0 + $0xc0] sm:$0xff] }
 0x24e   : > { %26801 = vmatmul.mubr.msk.f32.gmra.mrb[4].mxu0 %vm501_vm0, %v31607_v42  ;;  %25451 = vmatprep.mubr.msk.f32.mxu1 %vm501_vm0, %v31610_v63  ;;  %v31636_v42 = vld [vmem:[%s30069_s27 + $0x1a0] sm:$0xff]  ;;  %v31644_v63 = vld [vmem:[%s30069_s27 + $0x1a8] sm:$0xff]  ;;  %36193 = vst [vmem:[#allocation48_spill] sm:$0xff] %v31647_v43 }
 0x24f   : > { %26803 = vmatprep.mubr.msk.f32.mxu0 %vm501_vm0, %v31613_v12  ;;  %v31641_v12 = vld [vmem:[%s30236_s0 + $0xb8] sm:$0xff]  ;;  %36192 = vst [vmem:[#allocation47_spill] sm:$0xff] %v31644_v63 }
 0x250   : > { %36191 = vst [vmem:[#allocation31_spill] sm:$0xff] %v31641_v12 }
 0x251   : > { %25452 = vmatmul.mubr.msk.f32.gmra.mrb[38].mxu1 %vm501_vm0, %v36190_v57  ;;  %v31661_v57 = vld [vmem:[%s30236_s0 + $0xc8] sm:$0xff] }
 0x252   : > { %26804 = vmatmul.mubr.msk.f32.gmra.mrb[6].mxu0 %vm501_vm0, %v22010_v61  ;;  %25454 = vmatprep.mubr.msk.f32.mxu1 %vm501_vm0, %v31625_v5  ;;  %v31656_v61 = vld [vmem:[%s30069_s27 + $0x1b0] sm:$0xff]  ;;  %36195 = vst [vmem:[#allocation50_spill] sm:$0xff] %v31661_v57 }
 0x253   : > { %26806 = vmatprep.mubr.msk.f32.mxu0 %vm501_vm0, %v31628_v40  ;;  %36194 = vst [vmem:[#allocation49_spill] sm:$0xff] %v31656_v61  ;;  %v31664_v40 = vld [vmem:[%s30069_s27 + $0x1b8] sm:$0xff]  ;;  %v31667_v5 = vld [vmem:[%s30236_s0 + $0xd0] sm:$0xff] }
 0x254   : > { %36196 = vst [vmem:[#allocation51_spill] sm:$0xff] %v31664_v40  ;;  %36197 = vst [vmem:[#allocation52_spill] sm:$0xff] %v31667_v5 }
 0x255   : > { %25455 = vmatmul.mubr.msk.f32.gmra.mrb[40].mxu1 %vm501_vm0, %v31636_v42 }
 0x256   : > { %26807 = vmatmul.mubr.msk.f32.gmra.mrb[8].mxu0 %vm501_vm0, %v31641_v12  ;;  %25457 = vmatprep.mubr.msk.f32.mxu1 %vm501_vm0, %v31644_v63  ;;  %v31681_v12 = vld [vmem:[%s30236_s0 + $0xd8] sm:$0xff]  ;;  %v31684_v63 = vld [vmem:[%s30069_s27 + $0x1c8] sm:$0xff] }
 0x257   : > { %26809 = vmatprep.mubr.msk.f32.mxu0 %vm501_vm0, %v31647_v43  ;;  %v31676_v43 = vld [vmem:[%s30069_s27 + $0x1c0] sm:$0xff]  ;;  %36199 = vst [vmem:[#allocation54_spill] sm:$0xff] %v31681_v12  ;;  %36200 = vst [vmem:[#allocation55_spill] sm:$0xff] %v31684_v63 }
 0x258   : > { %36198 = vst [vmem:[#allocation53_spill] sm:$0xff] %v31676_v43 }
 0x259   : > { %25458 = vmatmul.mubr.msk.f32.gmra.mrb[42].mxu1 %vm501_vm0, %v31656_v61  ;;  %v31687_v61 = vld [vmem:[%s30236_s0 + $0xe0] sm:$0xff] }
 0x25a   : > { %26810 = vmatmul.mubr.msk.f32.gmra.mrb[10].mxu0 %vm501_vm0, %v31661_v57  ;;  %25460 = vmatprep.mubr.msk.f32.mxu1 %vm501_vm0, %v31664_v40  ;;  %36201 = vst [vmem:[#allocation56_spill] sm:$0xff] %v31687_v61  ;;  %v31699_v57 = vld [vmem:[%s30069_s27 + $0x1e8] sm:$0xff]  ;;  %v31702_v40 = vld [vmem:[%s30236_s0 + $0x100] sm:$0xff] }
 0x25b   : > { %26812 = vmatprep.mubr.msk.f32.mxu0 %vm501_vm0, %v31667_v5  ;;  %v22018_v5 = vld [vmem:[%s30236_s0 + $0xe8] sm:$0xff]  ;;  %36202 = vst [vmem:[#allocation57_spill] sm:$0xff] %v31699_v57  ;;  %36203 = vst [vmem:[#allocation58_spill] sm:$0xff] %v31702_v40 }
 0x25d   : > { %25461 = vmatmul.mubr.msk.f32.gmra.mrb[44].mxu1 %vm501_vm0, %v31676_v43  ;;  %v31721_v43 = vld [vmem:[%s30236_s0 + $0x110] sm:$0xff] }
 0x25e   : > { %26813 = vmatmul.mubr.msk.f32.gmra.mrb[12].mxu0 %vm501_vm0, %v31681_v12  ;;  %25463 = vmatprep.mubr.msk.f32.mxu1 %vm501_vm0, %v31684_v63  ;;  %v31710_v12 = vld [vmem:[%s30069_s27 + $0x1f0] sm:$0xff]  ;;  %v31718_v63 = vld [vmem:[%s30069_s27 + $0x1f8] sm:$0xff]  ;;  %36207 = vst [vmem:[#allocation62_spill] sm:$0xff] %v31721_v43 }
 0x25f   : > { %26815 = vmatprep.mubr.msk.f32.mxu0 %vm501_vm0, %v31687_v61  ;;  %36204 = vst [vmem:[#allocation59_spill] sm:$0xff] %v31710_v12  ;;  %v31715_v61 = vld [vmem:[%s30236_s0 + $0x108] sm:$0xff]  ;;  %36206 = vst [vmem:[#allocation61_spill] sm:$0xff] %v31718_v63 }
 0x260   : > { %36205 = vst [vmem:[#allocation60_spill] sm:$0xff] %v31715_v61 }
 0x261   : > { %25464 = vmatmul.mubr.msk.f32.gmra.mrb[46].mxu1 %vm501_vm0, %v30964_v30  ;;  %v31730_v30 = vld [vmem:[%s30069_s27 + $0x200] sm:$0xff] }
 0x262   : > { %26816 = vmatmul.mubr.msk.f32.gmra.mrb[14].mxu0 %vm501_vm0, %v22018_v5  ;;  %25466 = vmatprep.mubr.msk.f32.mxu1 %vm501_vm0, %v31699_v57  ;;  %36208 = vst [vmem:[#allocation63_spill] sm:$0xff] %v31730_v30  ;;  %v31735_v5 = vld [vmem:[%s30236_s0 + $0x118] sm:$0xff]  ;;  %v31741_v57 = vld [vmem:[%s30236_s0 + $0x120] sm:$0xff] }
 0x263   : > { %26818 = vmatprep.mubr.msk.f32.mxu0 %vm501_vm0, %v31702_v40  ;;  %36209 = vst [vmem:[#allocation64_spill] sm:$0xff] %v31735_v5  ;;  %v31738_v40 = vld [vmem:[%s30069_s27 + $0x208] sm:$0xff]  ;;  %36211 = vst [vmem:[#allocation66_spill] sm:$0xff] %v31741_v57 }
 0x264   : > { %36210 = vst [vmem:[#allocation65_spill] sm:$0xff] %v31738_v40 }
 0x265   : > { %25467 = vmatmul.mubr.msk.f32.gmra.mrb[48].mxu1 %vm501_vm0, %v31710_v12  ;;  %v31885_v12 = vld [vmem:[%s30236_s0 + $0x1c0] sm:$0xff] }
 0x266   : > { %26819 = vmatmul.mubr.msk.f32.gmra.mrb[16].mxu0 %vm501_vm0, %v31715_v61  ;;  %25469 = vmatprep.mubr.msk.f32.mxu1 %vm501_vm0, %v31718_v63  ;;  %v31755_v61 = vld [vmem:[%s30236_s0 + $0x128] sm:$0xff]  ;;  %v31758_v63 = vld [vmem:[%s30069_s27 + $0x218] sm:$0xff]  ;;  %36232 = vst [vmem:[#allocation87_spill] sm:$0xff] %v31885_v12 }
 0x267   : > { %26821 = vmatprep.mubr.msk.f32.mxu0 %vm501_vm0, %v31721_v43  ;;  %v31750_v43 = vld [vmem:[%s30069_s27 + $0x210] sm:$0xff]  ;;  %36213 = vst [vmem:[#allocation68_spill] sm:$0xff] %v31755_v61  ;;  %36214 = vst [vmem:[#allocation69_spill] sm:$0xff] %v31758_v63 }
 0x268   : > { %36212 = vst [vmem:[#allocation67_spill] sm:$0xff] %v31750_v43 }
 0x269   : > { %25470 = vmatmul.mubr.msk.f32.gmra.mrb[50].mxu1 %vm501_vm0, %v31730_v30  ;;  %v31761_v30 = vld [vmem:[%s30236_s0 + $0x130] sm:$0xff] }
 0x26a   : > { %26822 = vmatmul.mubr.msk.f32.gmra.mrb[18].mxu0 %vm501_vm0, %v31735_v5  ;;  %25472 = vmatprep.mubr.msk.f32.mxu1 %vm501_vm0, %v31738_v40  ;;  %36215 = vst [vmem:[#allocation70_spill] sm:$0xff] %v31761_v30  ;;  %v31773_v5 = vld [vmem:[%s30069_s27 + $0x238] sm:$0xff]  ;;  %v31776_v40 = vld [vmem:[%s30236_s0 + $0x150] sm:$0xff] }
 0x26b   : > { %26824 = vmatprep.mubr.msk.f32.mxu0 %vm501_vm0, %v31741_v57  ;;  %v22026_v57 = vld [vmem:[%s30236_s0 + $0x138] sm:$0xff]  ;;  %36216 = vst [vmem:[#allocation71_spill] sm:$0xff] %v31773_v5  ;;  %36217 = vst [vmem:[#allocation72_spill] sm:$0xff] %v31776_v40 }
 0x26d   : > { %25473 = vmatmul.mubr.msk.f32.gmra.mrb[52].mxu1 %vm501_vm0, %v31750_v43  ;;  %v31795_v43 = vld [vmem:[%s30236_s0 + $0x160] sm:$0xff] }
 0x26e   : > { %26825 = vmatmul.mubr.msk.f32.gmra.mrb[20].mxu0 %vm501_vm0, %v31755_v61  ;;  %25475 = vmatprep.mubr.msk.f32.mxu1 %vm501_vm0, %v31758_v63  ;;  %v31784_v61 = vld [vmem:[%s30069_s27 + $0x240] sm:$0xff]  ;;  %v31792_v63 = vld [vmem:[%s30069_s27 + $0x248] sm:$0xff]  ;;  %36221 = vst [vmem:[#allocation76_spill] sm:$0xff] %v31795_v43 }
 0x26f   : > { %26827 = vmatprep.mubr.msk.f32.mxu0 %vm501_vm0, %v31761_v30  ;;  %36218 = vst [vmem:[#allocation73_spill] sm:$0xff] %v31784_v61  ;;  %v31789_v30 = vld [vmem:[%s30236_s0 + $0x158] sm:$0xff]  ;;  %36220 = vst [vmem:[#allocation75_spill] sm:$0xff] %v31792_v63 }
 0x270   : > { %36219 = vst [vmem:[#allocation74_spill] sm:$0xff] %v31789_v30 }
 0x271   : > { %25476 = vmatmul.mubr.msk.f32.gmra.mrb[54].mxu1 %vm501_vm0, %v30997_v62  ;;  %v31804_v62 = vld [vmem:[%s30069_s27 + $0x250] sm:$0xff] }
 0x272   : > { %26828 = vmatmul.mubr.msk.f32.gmra.mrb[22].mxu0 %vm501_vm0, %v22026_v57  ;;  %25478 = vmatprep.mubr.msk.f32.mxu1 %vm501_vm0, %v31773_v5  ;;  %36222 = vst [vmem:[#allocation77_spill] sm:$0xff] %v31804_v62  ;;  %v31809_v57 = vld [vmem:[%s30236_s0 + $0x168] sm:$0xff]  ;;  %v31815_v5 = vld [vmem:[%s30236_s0 + $0x170] sm:$0xff] }
 0x273   : > { %26830 = vmatprep.mubr.msk.f32.mxu0 %vm501_vm0, %v31776_v40  ;;  %36223 = vst [vmem:[#allocation78_spill] sm:$0xff] %v31809_v57  ;;  %v31812_v40 = vld [vmem:[%s30069_s27 + $0x258] sm:$0xff]  ;;  %36225 = vst [vmem:[#allocation80_spill] sm:$0xff] %v31815_v5 }
 0x274   : > { %36224 = vst [vmem:[#allocation79_spill] sm:$0xff] %v31812_v40 }
 0x275   : > { %25479 = vmatmul.mubr.msk.f32.gmra.mrb[56].mxu1 %vm501_vm0, %v31784_v61  ;;  %v20317_v61 = vld [vmem:[%s30077_s30 + $0x28] sm:$0xff] }
 0x276   : > { %26831 = vmatmul.mubr.msk.f32.gmra.mrb[24].mxu0 %vm501_vm0, %v31789_v30  ;;  %25481 = vmatprep.mubr.msk.f32.mxu1 %vm501_vm0, %v31792_v63  ;;  %v31829_v30 = vld [vmem:[%s30236_s0 + $0x178] sm:$0xff]  ;;  %v31832_v63 = vld [vmem:[%s30069_s27 + $0x268] sm:$0xff] }
 0x277   : > { %26833 = vmatprep.mubr.msk.f32.mxu0 %vm501_vm0, %v31795_v43  ;;  %v31824_v43 = vld [vmem:[%s30069_s27 + $0x260] sm:$0xff]  ;;  %36227 = vst [vmem:[#allocation82_spill] sm:$0xff] %v31829_v30  ;;  %36228 = vst [vmem:[#allocation83_spill] sm:$0xff] %v31832_v63 }
 0x278   : > { %36226 = vst [vmem:[#allocation81_spill] sm:$0xff] %v31824_v43 }
 0x279   : > { %25482 = vmatmul.mubr.msk.f32.gmra.mrb[58].mxu1 %vm501_vm0, %v31804_v62  ;;  %v31835_v62 = vld [vmem:[%s30236_s0 + $0x180] sm:$0xff] }
 0x27a   : > { %26834 = vmatmul.mubr.msk.f32.gmra.mrb[26].mxu0 %vm501_vm0, %v31809_v57  ;;  %25484 = vmatprep.mubr.msk.f32.mxu1 %vm501_vm0, %v31812_v40  ;;  %36229 = vst [vmem:[#allocation84_spill] sm:$0xff] %v31835_v62  ;;  %v20313_v57 = vld [vmem:[%s30077_s30 + $0x8] sm:$0xff]  ;;  %v31848_v40 = vld [vmem:[%s30236_s0 + $0x1a0] sm:$0xff] }
 0x27b   : > { %26836 = vmatprep.mubr.msk.f32.mxu0 %vm501_vm0, %v31815_v5  ;;  %v22034_v5 = vld [vmem:[%s30236_s0 + $0x188] sm:$0xff]  ;;  %36230 = vst [vmem:[#allocation85_spill] sm:$0xff] %v31848_v40 }
 0x27d   : > { %25485 = vmatmul.mubr.msk.f32.gmra.mrb[60].mxu1 %vm501_vm0, %v31824_v43  ;;  %v31862_v43 = vld [vmem:[%s30236_s0 + $0x1b0] sm:$0xff] }
 0x27e   : > { %26837 = vmatmul.mubr.msk.f32.gmra.mrb[28].mxu0 %vm501_vm0, %v31829_v30  ;;  %25487 = vmatprep.mubr.msk.f32.mxu1 %vm501_vm0, %v31832_v63  ;;  %v20314_v30 = vld [vmem:[%s30077_s30 + $0x10] sm:$0xff]  ;;  %v20315_v63 = vld [vmem:[%s30077_s30 + $0x18] sm:$0xff] }
 0x27f   : > { %26839 = vmatprep.mubr.msk.f32.mxu0 %vm501_vm0, %v31835_v62  ;;  %v31858_v62 = vld [vmem:[%s30236_s0 + $0x1a8] sm:$0xff] }
 0x281   : > { %25488 = vmatmul.mubr.msk.f32.gmra.mrb[62].mxu1 %vm501_vm0, %v31032_v3  ;;  %v20637_v3 = vld [vmem:[%s35895_s3 + $0x60] sm:$0xff] }
 0x282   : > { %26840 = vmatmul.mubr.msk.f32.gmra.mrb[30].mxu0 %vm501_vm0, %v22034_v5  ;;  %25494 = vmatprep.mubr.msk.f32.mxu1 %vm501_vm0, %v20313_v57  ;;  %v20638_v5 = vld [vmem:[%s35895_s3 + $0x68] sm:$0xff]  ;;  %v20316_v57 = vld [vmem:[%s30077_s30 + $0x20] sm:$0xff] }
 0x283   : > { %26842 = vmatprep.mubr.msk.f32.mxu0 %vm501_vm0, %v31848_v40  ;;  %v31875_v40 = vpack.c.bf16 %v20638_v5, %v20637_v3  ;;  %v20319_v3 = vld [vmem:[%s30077_s30 + $0x38] sm:$0xff]  ;;  %v31900_v5 = vld [vmem:[%s30236_s0 + $0x1d0] sm:$0xff] }
 0x285   : > { %25495 = vmatmul.mubr.msk.f32.vlgmr.msra.gmra.mrb[0].mxu1 %vm501_vm0, %v20314_v30  ;;  %v31881_v30 = vld [vmem:[%s30236_s0 + $0x1b8] sm:$0xff] }
 0x286   : > { %26843 = vmatmul.mubr.msk.f32.gmra.mrb[32].mxu0 %vm501_vm0, %v31858_v62  ;;  %27813 = vmatpush3.bf16.msra.mxu1 %v31326_v21  ;;  %36231 = vst [vmem:[#allocation86_spill] sm:$0xff] %v31881_v30  ;;  %v20318_v21 = vld [vmem:[%s30077_s30 + $0x30] sm:$0xff] }
 0x287   : > { %25497 = vmatprep.mubr.msk.f32.mxu1 %vm501_vm0, %v20315_v63  ;;  %26845 = vmatprep.mubr.msk.f32.mxu0 %vm501_vm0, %v31862_v43  ;;  %v31896_v63 = vld [vmem:[%s30236_s0 + $0x1c8] sm:$0xff] }
 0x288   : > { %27815 = vmatprep.subr.bf16.mxu1 %v31875_v40 }
 0x289   : > { %25498 = vmatmul.mubr.msk.f32.gmra.mrb[2].mxu1 %vm501_vm0, %v20316_v57  ;;  %v22042_v57 = vld [vmem:[%s30236_s0 + $0x1d8] sm:$0xff] }
 0x28a   : > { %26846 = vmatmul.mubr.msk.f32.gmra.mrb[34].mxu0 %vm501_vm0, %v31881_v30  ;;  %25500 = vmatprep.mubr.msk.f32.mxu1 %vm501_vm0, %v20317_v61  ;;  %v20320_v61 = vld [vmem:[%s30077_s30 + $0x40] sm:$0xff]  ;;  %v31912_v30 = vld [vmem:[%s30236_s0 + $0x1f0] sm:$0xff] }
 0x28b   : > { %26848 = vmatprep.mubr.msk.f32.mxu0 %vm501_vm0, %v31885_v12  ;;  %v20321_v12 = vld [vmem:[%s30077_s30 + $0x58] sm:$0xff] }
 0x28d   : > { %25501 = vmatmul.mubr.msk.f32.gmra.mrb[4].mxu1 %vm501_vm0, %v20318_v21  ;;  %v31920_v21 = vld [vmem:[%s30236_s0 + $0x1f8] sm:$0xff] }
 0x28e   : > { %26849 = vmatmul.mubr.msk.f32.gmra.mrb[36].mxu0 %vm501_vm0, %v31896_v63  ;;  %25503 = vmatprep.mubr.msk.f32.mxu1 %vm501_vm0, %v20319_v3  ;;  %v31923_v3 = vld [vmem:[%s30236_s0 + $0x200] sm:$0xff] }
 0x28f   : > { %26851 = vmatprep.mubr.msk.f32.mxu0 %vm501_vm0, %v31900_v5 }
 0x291   : > { %25504 = vmatmul.mubr.msk.f32.gmra.mrb[6].mxu1 %vm501_vm0, %v20320_v61  ;;  %v31937_v61 = vld [vmem:[%s30236_s0 + $0x210] sm:$0xff] }
 0x292   : > { %26852 = vmatmul.mubr.msk.f32.gmra.mrb[38].mxu0 %vm501_vm0, %v22042_v57  ;;  %25506 = vmatprep.mubr.msk.f32.mxu1 %vm501_vm0, %v20321_v12  ;;  %v31934_v12 = vld [vmem:[%s30236_s0 + $0x208] sm:$0xff]  ;;  %v31966_v57 = vld [vmem:[%s30236_s0 + $0x240] sm:$0xff] }
 0x293   : > { %26854 = vmatprep.mubr.msk.f32.mxu0 %vm501_vm0, %v31912_v30 }
 0x295   : > { %25507 = vmatmul.mubr.msk.f32.gmra.mrb[8].mxu1 %vm501_vm0, %v31077_v29  ;;  %v31948_v29 = vld [vmem:[%s30236_s0 + $0x218] sm:$0xff] }
 0x296   : > { %26855 = vmatmul.mubr.msk.f32.gmra.mrb[40].mxu0 %vm501_vm0, %v31920_v21  ;;  %25509 = vmatprep.mubr.msk.f32.mxu1 %vm501_vm0, %v31086_v31  ;;  %v31951_v31 = vld [vmem:[%s30236_s0 + $0x220] sm:$0xff] }
 0x297   : > { %26857 = vmatprep.mubr.msk.f32.mxu0 %vm501_vm0, %v31923_v3 }
 0x299   : > { %25510 = vmatmul.mubr.msk.f32.gmra.mrb[10].mxu1 %vm501_vm0, %v31089_v33  ;;  %v22050_v33 = vld [vmem:[%s30236_s0 + $0x228] sm:$0xff] }
 0x29a   : > { %26858 = vmatmul.mubr.msk.f32.gmra.mrb[42].mxu0 %vm501_vm0, %v31934_v12  ;;  %25512 = vmatprep.mubr.msk.f32.mxu1 %vm501_vm0, %v31107_v39  ;;  %v31963_v39 = vld [vmem:[%s30077_s30 + $0xa8] sm:$0xff] }
 0x29b   : > { %26860 = vmatprep.mubr.msk.f32.mxu0 %vm501_vm0, %v31937_v61 }
 0x29d   : > { %25513 = vmatmul.mubr.msk.f32.gmra.mrb[12].mxu1 %vm501_vm0, %v31112_v45  ;;  %v31976_v45 = vld [vmem:[%s30236_s0 + $0x248] sm:$0xff] }
 0x29e   : > { %26861 = vmatmul.mubr.msk.f32.gmra.mrb[44].mxu0 %vm501_vm0, %v31948_v29  ;;  %25515 = vmatprep.mubr.msk.f32.mxu1 %vm501_vm0, %v31124_v49  ;;  %v31979_v49 = vld [vmem:[%s30236_s0 + $0x250] sm:$0xff] }
 0x29f   : > { %26863 = vmatprep.mubr.msk.f32.mxu0 %vm501_vm0, %v31951_v31 }
 0x2a1   : > { %25516 = vmatmul.mubr.msk.f32.gmra.mrb[14].mxu1 %vm501_vm0, %v31127_v2  ;;  %v31990_v2 = vld [vmem:[%s30236_s0 + $0x258] sm:$0xff] }
 0x2a2   : > { %26864 = vmatmul.mubr.msk.f32.gmra.mrb[46].mxu0 %vm501_vm0, %v22050_v33  ;;  %25518 = vmatprep.mubr.msk.f32.mxu1 %vm501_vm0, %v31963_v39  ;;  %v31993_v33 = vld [vmem:[%s30236_s0 + $0x260] sm:$0xff] }
 0x2a3   : > { %26866 = vmatprep.mubr.msk.f32.mxu0 %vm501_vm0, %v31966_v57  ;;  %36233 = vst [vmem:[#allocation88_spill] sm:$0xff] %v31993_v33 }
 0x2a5   : > { %25519 = vmatmul.mubr.msk.f32.gmra.mrb[16].mxu1 %vm501_vm0, %v31140_v46  ;;  %v32004_v46 = vld [vmem:[%s30236_s0 + $0x268] sm:$0xff] }
 0x2a6   : > { %26867 = vmatmul.mubr.msk.f32.gmra.mrb[48].mxu0 %vm501_vm0, %v31976_v45  ;;  %25521 = vmatprep.mubr.msk.f32.mxu1 %vm501_vm0, %v31149_v52  ;;  %v32007_v52 = vld [vmem:[%s30236_s0 + $0x270] sm:$0xff] }
 0x2a7   : > { %26869 = vmatprep.mubr.msk.f32.mxu0 %vm501_vm0, %v31979_v49 }
 0x2a9   : > { %25522 = vmatmul.mubr.msk.f32.gmra.mrb[18].mxu1 %vm501_vm0, %v31152_v54  ;;  %v22058_v54 = vld [vmem:[%s30236_s0 + $0x278] sm:$0xff] }
 0x2aa   : > { %26870 = vmatmul.mubr.msk.f32.gmra.mrb[50].mxu0 %vm501_vm0, %v31990_v2  ;;  %25524 = vmatprep.mubr.msk.f32.mxu1 %vm501_vm0, %v31163_v56  ;;  %v32019_v56 = vld [vmem:[%s30077_s30 + $0xf8] sm:$0xff] }
 0x2ab   : > { %26872 = vmatprep.mubr.msk.f32.mxu0 %vm501_vm0, %v31993_v33  ;;  %v22059_v33 = vld [vmem:[%s30236_s0 + $0x290] sm:$0xff] }
 0x2ad   : > { %25525 = vmatmul.mubr.msk.f32.gmra.mrb[20].mxu1 %vm501_vm0, %v31166_v28  ;;  %v22060_v28 = vld [vmem:[%s30236_s0 + $0x298] sm:$0xff] }
 0x2ae   : > { %26873 = vmatmul.mubr.msk.f32.gmra.mrb[52].mxu0 %vm501_vm0, %v32004_v46  ;;  %25527 = vmatprep.mubr.msk.f32.mxu1 %vm501_vm0, %v31177_v60  ;;  %v22061_v60 = vld [vmem:[%s30236_s0 + $0x2a0] sm:$0xff] }
 0x2af   : > { %26875 = vmatprep.mubr.msk.f32.mxu0 %vm501_vm0, %v32007_v52 }
 0x2b1   : > { %25528 = vmatmul.mubr.msk.f32.gmra.mrb[22].mxu1 %vm501_vm0, %v31180_v1  ;;  %v22062_v1 = vld [vmem:[%s30236_s0 + $0x2a8] sm:$0xff] }
 0x2b2   : > { %26876 = vmatmul.mubr.msk.f32.gmra.mrb[54].mxu0 %vm501_vm0, %v22058_v54  ;;  %25530 = vmatprep.mubr.msk.f32.mxu1 %vm501_vm0, %v32019_v56  ;;  %v22063_v54 = vld [vmem:[%s30236_s0 + $0x2b0] sm:$0xff] }
 0x2b3   : > { %26878 = vmatprep.mubr.msk.f32.mxu0 %vm501_vm0, %v22059_v33  ;;  %v22065_v33 = vld [vmem:[%s30236_s0 + $0x2c0] sm:$0xff] }
 0x2b5   : > { %25531 = vmatmul.mubr.msk.f32.gmra.mrb[24].mxu1 %vm501_vm0, %v31193_v32  ;;  %v22064_v32 = vld [vmem:[%s30236_s0 + $0x2b8] sm:$0xff] }
 0x2b6   : > { %26879 = vmatmul.mubr.msk.f32.gmra.mrb[56].mxu0 %vm501_vm0, %v22060_v28  ;;  %25533 = vmatprep.mubr.msk.f32.mxu1 %vm501_vm0, %v31202_v22  ;;  %v22066_v22 = vld [vmem:[%s30236_s0 + $0x2c8] sm:$0xff]  ;;  %v22133_v28 = vld [vmem:[%s30069_s27 + $0xa0] sm:$0xff] }
 0x2b7   : > { %26881 = vmatprep.mubr.msk.f32.mxu0 %vm501_vm0, %v22061_v60  ;;  %v20444_v60 = vld [vmem:[%s30236_s0 + $0x10] sm:$0xff] }
 0x2b9   : > { %25534 = vmatmul.mubr.msk.f32.gmra.mrb[26].mxu1 %vm501_vm0, %v31205_v24  ;;  %v32054_v24 = vld [vmem:[%s30077_s30 + $0x148] sm:$0xff] }
 0x2ba   : > { %26882 = vmatmul.mubr.msk.f32.gmra.mrb[58].mxu0 %vm501_vm0, %v22062_v1  ;;  %25536 = vmatprep.mubr.msk.f32.mxu1 %vm501_vm0, %v31216_v26  ;;  %v22457_v26 = vld [vmem:[%s35895_s3 + $0x140] sm:$0xff]  ;;  %v20445_v1 = vld [vmem:[%s30236_s0 + $0x18] sm:$0xff] }
 0x2bb   : > { %26884 = vmatprep.mubr.msk.f32.mxu0 %vm501_vm0, %v22063_v54  ;;  %v20767_v54 = vld [vmem:[%s35895_s3 + $0x70] sm:$0xff] }
 0x2bd   : > { %25537 = vmatmul.mubr.msk.f32.gmra.mrb[28].mxu1 %vm501_vm0, %v31219_v59  ;;  %v22458_v59 = vld [vmem:[%s35895_s3 + $0x148] sm:$0xff] }
 0x2be   : > { %26885 = vmatmul.mubr.msk.f32.gmra.mrb[60].mxu0 %vm501_vm0, %v22064_v32  ;;  %25539 = vmatprep.mubr.msk.f32.mxu1 %vm501_vm0, %v31230_v34  ;;  %v32078_v34 = vpack.c.bf16 %v22458_v59, %v22457_v26  ;;  %v20768_v32 = vld [vmem:[%s35895_s3 + $0x78] sm:$0xff]  ;;  %v20447_v59 = vld [vmem:[%s30236_s0 + $0x28] sm:$0xff] }
 0x2bf   : > { %26887 = vmatprep.mubr.msk.f32.mxu0 %vm501_vm0, %v22065_v33  ;;  %v36259_v33 = vld [vmem:[#allocation57_spill] sm:$0xff]  ;;  %v36260_v26 = vld [vmem:[#allocation59_spill] sm:$0xff] }
 0x2c1   : > { %25540 = vmatmul.mubr.msk.f32.gmra.mrb[30].mxu1 %vm501_vm0, %v31233_v38  ;;  %v32098_v38 = vld [vmem:[%s30077_s30 + $0x198] sm:$0xff] }
 0x2c2   : > { %26888 = vmatmul.mubr.msk.f32.gmra.mrb[62].mxu0 %vm501_vm0, %v22066_v22  ;;  %25542 = vmatprep.mubr.msk.f32.mxu1 %vm501_vm0, %v32054_v24  ;;  %v20446_v22 = vld [vmem:[%s30236_s0 + $0x20] sm:$0xff] }
 0x2c3   : > { %26894 = vmatprep.mubr.msk.f32.mxu0 %vm501_vm0, %v22133_v28  ;;  %v32223_v28 = vpack.c.bf16 %v20768_v32, %v20767_v54  ;;  %v36283_v54 = vld [vmem:[#allocation50_spill] sm:$0xff] }
 0x2c4   : > { %v22186_v32 = vld [vmem:[%s30069_s27 + $0x2a8] sm:$0xff] }
 0x2c5   : > { %25543 = vmatmul.mubr.msk.f32.gmra.mrb[32].mxu1 %vm501_vm0, %v31246_v7  ;;  %v22141_v7 = vld [vmem:[%s30069_s27 + $0xf0] sm:$0xff] }
 0x2c6   : > { %26895 = vmatmul.mubr.msk.f32.vlgmr.msra.gmra.mrb[0].mxu0 %vm501_vm0, %v31414_v11  ;;  %25545 = vmatprep.mubr.msk.f32.mxu1 %vm501_vm0, %v31255_v36  ;;  %v32133_v36 = vld [vmem:[%s30077_s30 + $0x1e8] sm:$0xff]  ;;  %v36244_v11 = vld [vmem:[#allocation23_spill] sm:$0xff] }
 0x2c7   : > { %27869 = vmatpush3.bf16.msra.mxu0 %v31589_v48  ;;  %26897 = vmatprep.mubr.msk.f32.mxu0 %vm501_vm0, %v31425_v19  ;;  %v36246_v19 = vld [vmem:[#allocation24_spill] sm:$0xff]  ;;  %v36257_v48 = vld [vmem:[#allocation33_spill] sm:$0xff] }
 0x2c8   : > { %27871 = vmatprep.subr.bf16.mxu0 %v32078_v34 }
 0x2c9   : > { %25546 = vmatmul.mubr.msk.f32.gmra.mrb[34].mxu1 %vm501_vm0, %v31258_v10  ;;  %v22149_v10 = vld [vmem:[%s30069_s27 + $0x140] sm:$0xff] }
 0x2ca   : > { %26898 = vmatmul.mubr.msk.f32.gmra.mrb[2].mxu0 %vm501_vm0, %v31433_v25  ;;  %25548 = vmatprep.mubr.msk.f32.mxu1 %vm501_vm0, %v31269_v4  ;;  %v36234_v4 = vld [vmem:[#allocation18_spill] sm:$0xff]  ;;  %v36247_v25 = vld [vmem:[#allocation45_spill] sm:$0xff] }
 0x2cb   : > { %26900 = vmatprep.mubr.msk.f32.mxu0 %vm501_vm0, %v31445_v9  ;;  %v36248_v9 = vld [vmem:[#allocation25_spill] sm:$0xff] }
 0x2cd   : > { %25549 = vmatmul.mubr.msk.f32.gmra.mrb[36].mxu1 %vm501_vm0, %v31272_v47  ;;  %v36235_v47 = vld [vmem:[#allocation30_spill] sm:$0xff] }
 0x2ce   : > { %26901 = vmatmul.mubr.msk.f32.gmra.mrb[4].mxu0 %vm501_vm0, %v31453_v58  ;;  %25551 = vmatprep.mubr.msk.f32.mxu1 %vm501_vm0, %v31283_v16  ;;  %v36236_v16 = vld [vmem:[#allocation19_spill] sm:$0xff] }
 0x2cf   : > { %26903 = vmatprep.mubr.msk.f32.mxu0 %vm501_vm0, %v31465_v20  ;;  %v36250_v58 = vld [vmem:[#allocation47_spill] sm:$0xff] }
 0x2d0   : > { %v36251_v20 = vld [vmem:[#allocation27_spill] sm:$0xff] }
 0x2d1   : > { %25552 = vmatmul.mubr.msk.f32.gmra.mrb[38].mxu1 %vm501_vm0, %v31286_v55  ;;  %v36237_v55 = vld [vmem:[#allocation35_spill] sm:$0xff] }
 0x2d2   : > { %26904 = vmatmul.mubr.msk.f32.gmra.mrb[6].mxu0 %vm501_vm0, %v31473_v51  ;;  %25554 = vmatprep.mubr.msk.f32.mxu1 %vm501_vm0, %v32098_v38  ;;  %v36253_v51 = vld [vmem:[#allocation28_spill] sm:$0xff] }
 0x2d3   : > { %26906 = vmatprep.mubr.msk.f32.mxu0 %vm501_vm0, %v22141_v7  ;;  %v36261_v7 = vld [vmem:[#allocation61_spill] sm:$0xff] }
 0x2d5   : > { %25555 = vmatmul.mubr.msk.f32.gmra.mrb[40].mxu1 %vm501_vm0, %v31299_v0  ;;  %v36238_v0 = vld [vmem:[#allocation20_spill] sm:$0xff] }
 0x2d6   : > { %26907 = vmatmul.mubr.msk.f32.gmra.mrb[8].mxu0 %vm501_vm0, %v31488_v6  ;;  %25557 = vmatprep.mubr.msk.f32.mxu1 %vm501_vm0, %v31309_v8  ;;  %v36239_v8 = vld [vmem:[#allocation37_spill] sm:$0xff]  ;;  %v36254_v6 = vld [vmem:[#allocation51_spill] sm:$0xff] }
 0x2d7   : > { %26909 = vmatprep.mubr.msk.f32.mxu0 %vm501_vm0, %v31497_v53  ;;  %v36252_v53 = vld [vmem:[#allocation49_spill] sm:$0xff] }
 0x2d9   : > { %25558 = vmatmul.mubr.msk.f32.gmra.mrb[42].mxu1 %vm501_vm0, %v31313_v13  ;;  %v36240_v13 = vld [vmem:[#allocation21_spill] sm:$0xff] }
 0x2da   : > { %26910 = vmatmul.mubr.msk.f32.gmra.mrb[10].mxu0 %vm501_vm0, %v31502_v18  ;;  %25560 = vmatprep.mubr.msk.f32.mxu1 %vm501_vm0, %v31332_v23  ;;  %v36241_v23 = vld [vmem:[#allocation39_spill] sm:$0xff]  ;;  %v36249_v18 = vld [vmem:[#allocation26_spill] sm:$0xff] }
 0x2db   : > { %26912 = vmatprep.mubr.msk.f32.mxu0 %vm501_vm0, %v31511_v44  ;;  %v36255_v44 = vld [vmem:[#allocation32_spill] sm:$0xff] }
 0x2dd   : > { %25561 = vmatmul.mubr.msk.f32.gmra.mrb[44].mxu1 %vm501_vm0, %v31336_v35  ;;  %v36242_v35 = vld [vmem:[#allocation22_spill] sm:$0xff] }
 0x2de   : > { %26913 = vmatmul.mubr.msk.f32.gmra.mrb[12].mxu0 %vm501_vm0, %v31516_v17  ;;  %25563 = vmatprep.mubr.msk.f32.mxu1 %vm501_vm0, %v31347_v37  ;;  %v36243_v37 = vld [vmem:[#allocation41_spill] sm:$0xff] }
 0x2df   : > { %26915 = vmatprep.mubr.msk.f32.mxu0 %vm501_vm0, %v31525_v14  ;;  %v36256_v17 = vld [vmem:[#allocation53_spill] sm:$0xff] }
 0x2e0   : > { %v20443_v14 = vld [vmem:[%s30236_s0 + $0x8] sm:$0xff] }
 0x2e1   : > { %25564 = vmatmul.mubr.msk.f32.gmra.mrb[46].mxu1 %vm501_vm0, %v31351_v50  ;;  %v32168_v50 = vld [vmem:[%s30077_s30 + $0x238] sm:$0xff] }
 0x2e2   : > { %26916 = vmatmul.mubr.msk.f32.gmra.mrb[14].mxu0 %vm501_vm0, %v31530_v15  ;;  %25566 = vmatprep.mubr.msk.f32.mxu1 %vm501_vm0, %v32133_v36  ;;  %v36245_v15 = vld [vmem:[#allocation43_spill] sm:$0xff] }
 0x2e3   : > { %26918 = vmatprep.mubr.msk.f32.mxu0 %vm501_vm0, %v22149_v10  ;;  %v36262_v10 = vld [vmem:[#allocation63_spill] sm:$0xff] }
 0x2e5   : > { %25567 = vmatmul.mubr.msk.f32.gmra.mrb[48].mxu1 %vm501_vm0, %v31363_v41  ;;  %v22157_v41 = vld [vmem:[%s30069_s27 + $0x190] sm:$0xff] }
 0x2e6   : > { %26919 = vmatmul.mubr.msk.f32.gmra.mrb[16].mxu0 %vm501_vm0, %v31541_v27  ;;  %25569 = vmatprep.mubr.msk.f32.mxu1 %vm501_vm0, %v36234_v4  ;;  %v22165_v27 = vld [vmem:[%s30069_s27 + $0x1e0] sm:$0xff]  ;;  %v20449_v4 = vld [vmem:[%s30236_s0 + $0x38] sm:$0xff] }
 0x2e7   : > { %26921 = vmatprep.mubr.msk.f32.mxu0 %vm501_vm0, %v36235_v47  ;;  %v36263_v47 = vld [vmem:[#allocation65_spill] sm:$0xff] }
 0x2e9   : > { %25570 = vmatmul.mubr.msk.f32.gmra.mrb[50].mxu1 %vm501_vm0, %v36236_v16  ;;  %v20450_v16 = vld [vmem:[%s30236_s0 + $0x40] sm:$0xff] }
 0x2ea   : > { %26922 = vmatmul.mubr.msk.f32.gmra.mrb[18].mxu0 %vm501_vm0, %v36237_v55  ;;  %25572 = vmatprep.mubr.msk.f32.mxu1 %vm501_vm0, %v36238_v0  ;;  %v36264_v55 = vld [vmem:[#allocation67_spill] sm:$0xff] }
 0x2eb   : > { %26924 = vmatprep.mubr.msk.f32.mxu0 %vm501_vm0, %v36239_v8  ;;  %v20451_v0 = vld [vmem:[%s30236_s0 + $0x58] sm:$0xff]  ;;  %v22173_v8 = vld [vmem:[%s30069_s27 + $0x230] sm:$0xff] }
 0x2ed   : > { %25573 = vmatmul.mubr.msk.f32.gmra.mrb[52].mxu1 %vm501_vm0, %v36240_v13  ;;  %v36265_v13 = vld [vmem:[#allocation69_spill] sm:$0xff] }
 0x2ee   : > { %26925 = vmatmul.mubr.msk.f32.gmra.mrb[20].mxu0 %vm501_vm0, %v36241_v23  ;;  %25575 = vmatprep.mubr.msk.f32.mxu1 %vm501_vm0, %v36242_v35  ;;  %v36266_v23 = vld [vmem:[#allocation29_spill] sm:$0xff]  ;;  %v36267_v35 = vld [vmem:[#allocation71_spill] sm:$0xff] }
 0x2ef   : > { %26927 = vmatprep.mubr.msk.f32.mxu0 %vm501_vm0, %v36243_v37  ;;  %v36268_v37 = vld [vmem:[#allocation34_spill] sm:$0xff] }
 0x2f1   : > { %25576 = vmatmul.mubr.msk.f32.gmra.mrb[54].mxu1 %vm501_vm0, %v36244_v11  ;;  %v36270_v11 = vld [vmem:[#allocation36_spill] sm:$0xff] }
 0x2f2   : > { %26928 = vmatmul.mubr.msk.f32.gmra.mrb[22].mxu0 %vm501_vm0, %v36245_v15  ;;  %25578 = vmatprep.mubr.msk.f32.mxu1 %vm501_vm0, %v32168_v50  ;;  %v36271_v15 = vld [vmem:[#allocation75_spill] sm:$0xff] }
 0x2f3   : > { %26930 = vmatprep.mubr.msk.f32.mxu0 %vm501_vm0, %v22157_v41  ;;  %v36269_v41 = vld [vmem:[#allocation73_spill] sm:$0xff] }
 0x2f5   : > { %25579 = vmatmul.mubr.msk.f32.gmra.mrb[56].mxu1 %vm501_vm0, %v36246_v19  ;;  %v36272_v19 = vld [vmem:[#allocation38_spill] sm:$0xff] }
 0x2f6   : > { %26931 = vmatmul.mubr.msk.f32.gmra.mrb[24].mxu0 %vm501_vm0, %v36247_v25  ;;  %25581 = vmatprep.mubr.msk.f32.mxu1 %vm501_vm0, %v36248_v9  ;;  %v36273_v25 = vld [vmem:[#allocation77_spill] sm:$0xff]  ;;  %v36274_v9 = vld [vmem:[#allocation40_spill] sm:$0xff] }
 0x2f7   : > { %26933 = vmatprep.mubr.msk.f32.mxu0 %vm501_vm0, %v31636_v42  ;;  %v36258_v42 = vld [vmem:[#allocation55_spill] sm:$0xff] }
 0x2f9   : > { %25582 = vmatmul.mubr.msk.f32.gmra.mrb[58].mxu1 %vm501_vm0, %v36249_v18  ;;  %v36275_v18 = vld [vmem:[#allocation79_spill] sm:$0xff] }
 0x2fa   : > { %26934 = vmatmul.mubr.msk.f32.gmra.mrb[26].mxu0 %vm501_vm0, %v36250_v58  ;;  %25584 = vmatprep.mubr.msk.f32.mxu1 %vm501_vm0, %v36251_v20  ;;  %v36276_v58 = vld [vmem:[#allocation42_spill] sm:$0xff]  ;;  %v36277_v20 = vld [vmem:[#allocation81_spill] sm:$0xff] }
 0x2fb   : > { %26936 = vmatprep.mubr.msk.f32.mxu0 %vm501_vm0, %v36252_v53  ;;  %v32277_v53 = vld [vmem:[%s30236_s0 + $0xa8] sm:$0xff] }
 0x2fd   : > { %25585 = vmatmul.mubr.msk.f32.gmra.mrb[60].mxu1 %vm501_vm0, %v36253_v51  ;;  %v22181_v51 = vld [vmem:[%s30069_s27 + $0x280] sm:$0xff] }
 0x2fe   : > { %26937 = vmatmul.mubr.msk.f32.gmra.mrb[28].mxu0 %vm501_vm0, %v36254_v6  ;;  %25587 = vmatprep.mubr.msk.f32.mxu1 %vm501_vm0, %v36255_v44  ;;  %v36278_v6 = vld [vmem:[#allocation44_spill] sm:$0xff]  ;;  %v36279_v44 = vld [vmem:[#allocation83_spill] sm:$0xff] }
 0x2ff   : > { %26939 = vmatprep.mubr.msk.f32.mxu0 %vm501_vm0, %v36256_v17  ;;  %v22182_v17 = vld [vmem:[%s30069_s27 + $0x288] sm:$0xff] }
 0x301   : > { %25588 = vmatmul.mubr.msk.f32.gmra.mrb[62].mxu1 %vm501_vm0, %v36257_v48  ;;  %v36281_v48 = vld [vmem:[#allocation31_spill] sm:$0xff] }
 0x302   : > { %26940 = vmatmul.mubr.msk.f32.gmra.mrb[30].mxu0 %vm501_vm0, %v36258_v42  ;;  %25594 = vmatprep.mubr.msk.f32.mxu1 %vm501_vm0, %v20443_v14  ;;  %v22183_v14 = vld [vmem:[%s30069_s27 + $0x290] sm:$0xff]  ;;  %v22184_v42 = vld [vmem:[%s30069_s27 + $0x298] sm:$0xff] }
 0x303   : > { %26942 = vmatprep.mubr.msk.f32.mxu0 %vm501_vm0, %v22165_v27  ;;  %v36280_v27 = vld [vmem:[#allocation46_spill] sm:$0xff] }
 0x305   : > { %25595 = vmatmul.mubr.msk.f32.vlgmr.msra.gmra.mrb[0].mxu1 %vm501_vm0, %v20444_v60  ;;  %v22185_v60 = vld [vmem:[%s30069_s27 + $0x2a0] sm:$0xff] }
 0x306   : > { %26943 = vmatmul.mubr.msk.f32.gmra.mrb[32].mxu0 %vm501_vm0, %v36259_v33  ;;  %27817 = vmatpush3.bf16.msra.mxu1 %v31875_v40  ;;  %v20448_v40 = vld [vmem:[%s30236_s0 + $0x30] sm:$0xff] }
 0x307   : > { %25597 = vmatprep.mubr.msk.f32.mxu1 %vm501_vm0, %v20445_v1  ;;  %26945 = vmatprep.mubr.msk.f32.mxu0 %vm501_vm0, %v36260_v26  ;;  %v36282_v1 = vld [vmem:[#allocation48_spill] sm:$0xff]  ;;  %v22187_v33 = vld [vmem:[%s30069_s27 + $0x2b0] sm:$0xff] }
 0x308   : > { %27819 = vmatprep.subr.bf16.mxu1 %v32223_v28  ;;  %v36285_v26 = vld [vmem:[#allocation54_spill] sm:$0xff] }
 0x309   : > { %25598 = vmatmul.mubr.msk.f32.gmra.mrb[2].mxu1 %vm501_vm0, %v20446_v22  ;;  %v36284_v22 = vld [vmem:[#allocation52_spill] sm:$0xff] }
 0x30a   : > { %26946 = vmatmul.mubr.msk.f32.gmra.mrb[34].mxu0 %vm501_vm0, %v36261_v7  ;;  %25600 = vmatprep.mubr.msk.f32.mxu1 %vm501_vm0, %v20447_v59  ;;  %v22188_v59 = vld [vmem:[%s30069_s27 + $0x2b8] sm:$0xff] }
 0x30b   : > { %26948 = vmatprep.mubr.msk.f32.mxu0 %vm501_vm0, %v36262_v10  ;;  %v32313_v7 = vld [vmem:[%s30236_s0 + $0xf8] sm:$0xff] }
 0x30c   : > { %v36286_v10 = vld [vmem:[#allocation56_spill] sm:$0xff] }
 0x30d   : > { %25601 = vmatmul.mubr.msk.f32.gmra.mrb[4].mxu1 %vm501_vm0, %v20448_v40  ;;  %v22189_v40 = vld [vmem:[%s30069_s27 + $0x2d0] sm:$0xff] }
 0x30e   : > { %26949 = vmatmul.mubr.msk.f32.gmra.mrb[36].mxu0 %vm501_vm0, %v36263_v47  ;;  %25603 = vmatprep.mubr.msk.f32.mxu1 %vm501_vm0, %v20449_v4  ;;  %v22190_v4 = vld [vmem:[%s30069_s27 + $0x2d8] sm:$0xff]  ;;  %v22191_v47 = vld [vmem:[%s30069_s27 + $0x2e0] sm:$0xff] }
 0x30f   : > { %26951 = vmatprep.mubr.msk.f32.mxu0 %vm501_vm0, %v36264_v55  ;;  %v36288_v55 = vld [vmem:[#allocation60_spill] sm:$0xff] }
 0x311   : > { %25604 = vmatmul.mubr.msk.f32.gmra.mrb[6].mxu1 %vm501_vm0, %v20450_v16  ;;  %v36287_v16 = vld [vmem:[#allocation58_spill] sm:$0xff] }
 0x312   : > { %26952 = vmatmul.mubr.msk.f32.gmra.mrb[38].mxu0 %vm501_vm0, %v36265_v13  ;;  %25606 = vmatprep.mubr.msk.f32.mxu1 %vm501_vm0, %v20451_v0  ;;  %v22192_v0 = vld [vmem:[%s30069_s27 + $0x2e8] sm:$0xff] }
 0x313   : > { %26954 = vmatprep.mubr.msk.f32.mxu0 %vm501_vm0, %v22173_v8  ;;  %v22193_v8 = vld [vmem:[%s30069_s27 + $0x2f0] sm:$0xff] }
 0x314   : > { %v36289_v13 = vld [vmem:[#allocation62_spill] sm:$0xff] }
 0x315   : > { %25607 = vmatmul.mubr.msk.f32.gmra.mrb[8].mxu1 %vm501_vm0, %v36266_v23  ;;  %v36290_v23 = vld [vmem:[#allocation64_spill] sm:$0xff] }
 0x316   : > { %26955 = vmatmul.mubr.msk.f32.gmra.mrb[40].mxu0 %vm501_vm0, %v36267_v35  ;;  %25609 = vmatprep.mubr.msk.f32.mxu1 %vm501_vm0, %v36268_v37  ;;  %v22194_v35 = vld [vmem:[%s30069_s27 + $0x2f8] sm:$0xff]  ;;  %v22195_v37 = vld [vmem:[%s30069_s27 + $0x300] sm:$0xff] }
 0x317   : > { %26957 = vmatprep.mubr.msk.f32.mxu0 %vm501_vm0, %v36269_v41  ;;  %v36291_v41 = vld [vmem:[#allocation66_spill] sm:$0xff] }
 0x319   : > { %25610 = vmatmul.mubr.msk.f32.gmra.mrb[10].mxu1 %vm501_vm0, %v36270_v11  ;;  %v36292_v11 = vld [vmem:[#allocation68_spill] sm:$0xff] }
 0x31a   : > { %26958 = vmatmul.mubr.msk.f32.gmra.mrb[42].mxu0 %vm501_vm0, %v36271_v15  ;;  %25612 = vmatprep.mubr.msk.f32.mxu1 %vm501_vm0, %v36272_v19  ;;  %v22196_v15 = vld [vmem:[%s30069_s27 + $0x308] sm:$0xff] }
 0x31b   : > { %26960 = vmatprep.mubr.msk.f32.mxu0 %vm501_vm0, %v36273_v25  ;;  %v32348_v19 = vld [vmem:[%s30236_s0 + $0x148] sm:$0xff]  ;;  %v22263_v25 = vld [vmem:[%s30077_s30 + $0xa0] sm:$0xff] }
 0x31d   : > { %25613 = vmatmul.mubr.msk.f32.gmra.mrb[12].mxu1 %vm501_vm0, %v36274_v9  ;;  %v36293_v9 = vld [vmem:[#allocation70_spill] sm:$0xff] }
 0x31e   : > { %26961 = vmatmul.mubr.msk.f32.gmra.mrb[44].mxu0 %vm501_vm0, %v36275_v18  ;;  %25615 = vmatprep.mubr.msk.f32.mxu1 %vm501_vm0, %v36276_v58  ;;  %v32358_v18 = vld [vmem:[%s30077_s30 + $0xb0] sm:$0xff]  ;;  %v36294_v58 = vld [vmem:[#allocation72_spill] sm:$0xff] }
 0x31f   : > { %26963 = vmatprep.mubr.msk.f32.mxu0 %vm501_vm0, %v36277_v20  ;;  %v36295_v20 = vld [vmem:[#allocation74_spill] sm:$0xff] }
 0x321   : > { %25616 = vmatmul.mubr.msk.f32.gmra.mrb[14].mxu1 %vm501_vm0, %v36278_v6  ;;  %v22588_v6 = vld [vmem:[%s35895_s3 + $0x158] sm:$0xff] }
 0x322   : > { %26964 = vmatmul.mubr.msk.f32.gmra.mrb[46].mxu0 %vm501_vm0, %v36279_v44  ;;  %25618 = vmatprep.mubr.msk.f32.mxu1 %vm501_vm0, %v32277_v53  ;;  %v32376_v44 = vld [vmem:[%s30077_s30 + $0xb8] sm:$0xff] }
 0x323   : > { %26966 = vmatprep.mubr.msk.f32.mxu0 %vm501_vm0, %v22181_v51  ;;  %v22587_v51 = vld [vmem:[%s35895_s3 + $0x150] sm:$0xff] }
 0x325   : > { %25619 = vmatmul.mubr.msk.f32.gmra.mrb[16].mxu1 %vm501_vm0, %v36280_v27  ;;  %v32393_v27 = vld [vmem:[%s30077_s30 + $0xc8] sm:$0xff] }
 0x326   : > { %26967 = vmatmul.mubr.msk.f32.gmra.mrb[48].mxu0 %vm501_vm0, %v22182_v17  ;;  %25621 = vmatprep.mubr.msk.f32.mxu1 %vm501_vm0, %v36281_v48  ;;  %v32381_v17 = vld [vmem:[%s30077_s30 + $0xc0] sm:$0xff]  ;;  %v32396_v48 = vld [vmem:[%s30077_s30 + $0xd0] sm:$0xff] }
 0x327   : > { %26969 = vmatprep.mubr.msk.f32.mxu0 %vm501_vm0, %v22183_v14  ;;  %v36296_v14 = vld [vmem:[#allocation76_spill] sm:$0xff] }
 0x329   : > { %25622 = vmatmul.mubr.msk.f32.gmra.mrb[18].mxu1 %vm501_vm0, %v36282_v1  ;;  %v32407_v1 = vld [vmem:[%s30077_s30 + $0xd8] sm:$0xff] }
 0x32a   : > { %26970 = vmatmul.mubr.msk.f32.gmra.mrb[50].mxu0 %vm501_vm0, %v22184_v42  ;;  %25624 = vmatprep.mubr.msk.f32.mxu1 %vm501_vm0, %v36283_v54  ;;  %v36298_v42 = vld [vmem:[#allocation80_spill] sm:$0xff] }
 0x32b   : > { %26972 = vmatprep.mubr.msk.f32.mxu0 %vm501_vm0, %v22185_v60  ;;  %v36299_v60 = vld [vmem:[#allocation82_spill] sm:$0xff]  ;;  %v32410_v54 = vld [vmem:[%s30236_s0 + $0x198] sm:$0xff] }
 0x32d   : > { %25625 = vmatmul.mubr.msk.f32.gmra.mrb[20].mxu1 %vm501_vm0, %v36284_v22  ;;  %v32421_v22 = vld [vmem:[%s30077_s30 + $0x100] sm:$0xff] }
 0x32e   : > { %26973 = vmatmul.mubr.msk.f32.gmra.mrb[52].mxu0 %vm501_vm0, %v22186_v32  ;;  %25627 = vmatprep.mubr.msk.f32.mxu1 %vm501_vm0, %v36285_v26  ;;  %v22271_v32 = vld [vmem:[%s30077_s30 + $0xf0] sm:$0xff]  ;;  %v36301_v26 = vld [vmem:[#allocation85_spill] sm:$0xff] }
 0x32f   : > { %26975 = vmatprep.mubr.msk.f32.mxu0 %vm501_vm0, %v22187_v33  ;;  %v36300_v33 = vld [vmem:[#allocation84_spill] sm:$0xff] }
 0x331   : > { %25628 = vmatmul.mubr.msk.f32.gmra.mrb[22].mxu1 %vm501_vm0, %v36286_v10  ;;  %v36302_v10 = vld [vmem:[#allocation86_spill] sm:$0xff] }
 0x332   : > { %26976 = vmatmul.mubr.msk.f32.gmra.mrb[54].mxu0 %vm501_vm0, %v22188_v59  ;;  %25630 = vmatprep.mubr.msk.f32.mxu1 %vm501_vm0, %v32313_v7  ;;  %v32432_v59 = vld [vmem:[%s30077_s30 + $0x108] sm:$0xff] }
 0x333   : > { %26978 = vmatprep.mubr.msk.f32.mxu0 %vm501_vm0, %v22189_v40  ;;  %v32435_v40 = vld [vmem:[%s30077_s30 + $0x110] sm:$0xff] }
 0x335   : > { %25631 = vmatmul.mubr.msk.f32.gmra.mrb[24].mxu1 %vm501_vm0, %v36287_v16  ;;  %v22279_v16 = vld [vmem:[%s30077_s30 + $0x140] sm:$0xff] }
 0x336   : > { %26979 = vmatmul.mubr.msk.f32.gmra.mrb[56].mxu0 %vm501_vm0, %v22190_v4  ;;  %25633 = vmatprep.mubr.msk.f32.mxu1 %vm501_vm0, %v36288_v55  ;;  %v36303_v4 = vld [vmem:[#allocation87_spill] sm:$0xff]  ;;  %v32488_v55 = vld [vmem:[%s30077_s30 + $0x160] sm:$0xff] }
 0x337   : > { %26981 = vmatprep.mubr.msk.f32.mxu0 %vm501_vm0, %v22191_v47  ;;  %v32463_v47 = vld [vmem:[%s30236_s0 + $0x1e8] sm:$0xff] }
 0x339   : > { %25634 = vmatmul.mubr.msk.f32.gmra.mrb[26].mxu1 %vm501_vm0, %v36289_v13  ;;  %v32579_v13 = vld [vmem:[%s30077_s30 + $0x1f0] sm:$0xff] }
 0x33a   : > { %26982 = vmatmul.mubr.msk.f32.gmra.mrb[58].mxu0 %vm501_vm0, %v22192_v0  ;;  %25636 = vmatprep.mubr.msk.f32.mxu1 %vm501_vm0, %v36290_v23  ;;  %v22295_v0 = vld [vmem:[%s30077_s30 + $0x1e0] sm:$0xff]  ;;  %v20898_v23 = vld [vmem:[%s35895_s3 + $0x88] sm:$0xff] }
 0x33b   : > { %26984 = vmatprep.mubr.msk.f32.mxu0 %vm501_vm0, %v22193_v8  ;;  %v20575_v8 = vld [vmem:[%s30069_s27 + $0x20] sm:$0xff] }
 0x33d   : > { %25637 = vmatmul.mubr.msk.f32.gmra.mrb[28].mxu1 %vm501_vm0, %v36291_v41  ;;  %v32598_v41 = vld [vmem:[%s30077_s30 + $0x1f8] sm:$0xff] }
 0x33e   : > { %26985 = vmatmul.mubr.msk.f32.gmra.mrb[60].mxu0 %vm501_vm0, %v22194_v35  ;;  %25639 = vmatprep.mubr.msk.f32.mxu1 %vm501_vm0, %v36292_v11  ;;  %v20576_v35 = vld [vmem:[%s30069_s27 + $0x28] sm:$0xff]  ;;  %v20577_v11 = vld [vmem:[%s30069_s27 + $0x30] sm:$0xff] }
 0x33f   : > { %26987 = vmatprep.mubr.msk.f32.mxu0 %vm501_vm0, %v22195_v37 }
 0x341   : > { %25640 = vmatmul.mubr.msk.f32.gmra.mrb[30].mxu1 %vm501_vm0, %v36293_v9  ;;  %v32617_v9 = vld [vmem:[%s30077_s30 + $0x210] sm:$0xff] }
 0x342   : > { %26988 = vmatmul.mubr.msk.f32.gmra.mrb[62].mxu0 %vm501_vm0, %v22196_v15  ;;  %25642 = vmatprep.mubr.msk.f32.mxu1 %vm501_vm0, %v32348_v19  ;;  %v32602_v15 = vld [vmem:[%s30077_s30 + $0x200] sm:$0xff] }
 0x343   : > { %26994 = vmatprep.mubr.msk.f32.mxu0 %vm501_vm0, %v22263_v25  ;;  %v20579_v25 = vld [vmem:[%s30069_s27 + $0x40] sm:$0xff] }
 0x345   : > { %25643 = vmatmul.mubr.msk.f32.gmra.mrb[32].mxu1 %vm501_vm0, %v36294_v58  ;;  %v20580_v58 = vld [vmem:[%s30069_s27 + $0x48] sm:$0xff] }
 0x346   : > { %26995 = vmatmul.mubr.msk.f32.vlgmr.msra.gmra.mrb[0].mxu0 %vm501_vm0, %v31963_v39  ;;  %25645 = vmatprep.mubr.msk.f32.mxu1 %vm501_vm0, %v36295_v20  ;;  %v32378_v39 = vpack.c.bf16 %v22588_v6, %v22587_v51  ;;  %v32627_v20 = vld [vmem:[%s30077_s30 + $0x218] sm:$0xff]  ;;  %v20581_v51 = vld [vmem:[%s30069_s27 + $0x60] sm:$0xff]  ;;  %v22303_v6 = vld [vmem:[%s30077_s30 + $0x230] sm:$0xff] }
 0x347   : > { %27873 = vmatpush3.bf16.msra.mxu0 %v32078_v34  ;;  %26997 = vmatprep.mubr.msk.f32.mxu0 %vm501_vm0, %v32358_v18  ;;  %v36297_v34 = vld [vmem:[#allocation78_spill] sm:$0xff] }
 0x348   : > { %27875 = vmatprep.subr.bf16.mxu0 %v32378_v39 }
 0x349   : > { %25646 = vmatmul.mubr.msk.f32.gmra.mrb[34].mxu1 %vm501_vm0, %v36296_v14  ;;  %v20582_v14 = vld [vmem:[%s30069_s27 + $0x68] sm:$0xff] }
 0x34a   : > { %26998 = vmatmul.mubr.msk.f32.gmra.mrb[2].mxu0 %vm501_vm0, %v32376_v44  ;;  %25648 = vmatprep.mubr.msk.f32.mxu1 %vm501_vm0, %v36297_v34  ;;  %v20583_v34 = vld [vmem:[%s30069_s27 + $0x70] sm:$0xff] }
 0x34b   : > { %27000 = vmatprep.mubr.msk.f32.mxu0 %vm501_vm0, %v32381_v17 }
 0x34d   : > { %25649 = vmatmul.mubr.msk.f32.gmra.mrb[36].mxu1 %vm501_vm0, %v36298_v42  ;;  %v32639_v42 = vld [vmem:[%s30077_s30 + $0x240] sm:$0xff] }
 0x34e   : > { %27001 = vmatmul.mubr.msk.f32.gmra.mrb[4].mxu0 %vm501_vm0, %v32393_v27  ;;  %25651 = vmatprep.mubr.msk.f32.mxu1 %vm501_vm0, %v36299_v60  ;;  %36305 = vst [vmem:[#allocation18_spill] sm:$0xff] %v32639_v42  ;;  %v20584_v60 = vld [vmem:[%s30069_s27 + $0x78] sm:$0xff] }
 0x34f   : > { %27003 = vmatprep.mubr.msk.f32.mxu0 %vm501_vm0, %v32396_v48 }
 0x351   : > { %25652 = vmatmul.mubr.msk.f32.gmra.mrb[38].mxu1 %vm501_vm0, %v36300_v33  ;;  %v20585_v33 = vld [vmem:[%s30069_s27 + $0x80] sm:$0xff] }
 0x352   : > { %27004 = vmatmul.mubr.msk.f32.gmra.mrb[6].mxu0 %vm501_vm0, %v32407_v1  ;;  %25654 = vmatprep.mubr.msk.f32.mxu1 %vm501_vm0, %v32410_v54 }
 0x353   : > { %27006 = vmatprep.mubr.msk.f32.mxu0 %vm501_vm0, %v22271_v32  ;;  %v32649_v32 = vld [vmem:[%s30077_s30 + $0x248] sm:$0xff] }
 0x354   : > { %36306 = vst [vmem:[#allocation30_spill] sm:$0xff] %v32649_v32 }
 0x355   : > { %25655 = vmatmul.mubr.msk.f32.gmra.mrb[40].mxu1 %vm501_vm0, %v36301_v26  ;;  %v32653_v26 = vld [vmem:[%s30077_s30 + $0x250] sm:$0xff] }
 0x356   : > { %27007 = vmatmul.mubr.msk.f32.gmra.mrb[8].mxu0 %vm501_vm0, %v32019_v56  ;;  %25657 = vmatprep.mubr.msk.f32.mxu1 %vm501_vm0, %v31858_v62  ;;  %v32446_v62 = vld [vmem:[%s30077_s30 + $0x118] sm:$0xff]  ;;  %v32449_v56 = vld [vmem:[%s30077_s30 + $0x120] sm:$0xff]  ;;  %36307 = vst [vmem:[#allocation19_spill] sm:$0xff] %v32653_v26 }
 0x357   : > { %27009 = vmatprep.mubr.msk.f32.mxu0 %vm501_vm0, %v32421_v22 }
 0x359   : > { %25658 = vmatmul.mubr.msk.f32.gmra.mrb[42].mxu1 %vm501_vm0, %v31862_v43  ;;  %v32460_v43 = vld [vmem:[%s30077_s30 + $0x128] sm:$0xff] }
 0x35a   : > { %27010 = vmatmul.mubr.msk.f32.gmra.mrb[10].mxu0 %vm501_vm0, %v32432_v59  ;;  %25660 = vmatprep.mubr.msk.f32.mxu1 %vm501_vm0, %v36302_v10  ;;  %v32663_v10 = vld [vmem:[%s30077_s30 + $0x258] sm:$0xff] }
 0x35b   : > { %27012 = vmatprep.mubr.msk.f32.mxu0 %vm501_vm0, %v32435_v40  ;;  %36308 = vst [vmem:[#allocation35_spill] sm:$0xff] %v32663_v10 }
 0x35d   : > { %25661 = vmatmul.mubr.msk.f32.gmra.mrb[44].mxu1 %vm501_vm0, %v36303_v4  ;;  %v20587_v4 = vld [vmem:[%s30069_s27 + $0x90] sm:$0xff] }
 0x35e   : > { %27013 = vmatmul.mubr.msk.f32.gmra.mrb[12].mxu0 %vm501_vm0, %v32446_v62  ;;  %25663 = vmatprep.mubr.msk.f32.mxu1 %vm501_vm0, %v31896_v63  ;;  %v32474_v63 = vld [vmem:[%s30077_s30 + $0x150] sm:$0xff] }
 0x35f   : > { %27015 = vmatprep.mubr.msk.f32.mxu0 %vm501_vm0, %v32449_v56 }
 0x361   : > { %25664 = vmatmul.mubr.msk.f32.gmra.mrb[46].mxu1 %vm501_vm0, %v31900_v5  ;;  %v32485_v5 = vld [vmem:[%s30077_s30 + $0x158] sm:$0xff] }
 0x362   : > { %27016 = vmatmul.mubr.msk.f32.gmra.mrb[14].mxu0 %vm501_vm0, %v32460_v43  ;;  %25666 = vmatprep.mubr.msk.f32.mxu1 %vm501_vm0, %v32463_v47 }
 0x363   : > { %27018 = vmatprep.mubr.msk.f32.mxu0 %vm501_vm0, %v22279_v16  ;;  %v32667_v16 = vld [vmem:[%s30077_s30 + $0x260] sm:$0xff] }
 0x364   : > { %36309 = vst [vmem:[#allocation20_spill] sm:$0xff] %v32667_v16 }
 0x365   : > { %25667 = vmatmul.mubr.msk.f32.gmra.mrb[48].mxu1 %vm501_vm0, %v31912_v30  ;;  %v32499_v30 = vld [vmem:[%s30077_s30 + $0x168] sm:$0xff] }
 0x366   : > { %27019 = vmatmul.mubr.msk.f32.gmra.mrb[16].mxu0 %vm501_vm0, %v32054_v24  ;;  %25669 = vmatprep.mubr.msk.f32.mxu1 %vm501_vm0, %v31920_v21  ;;  %v32502_v21 = vld [vmem:[%s30077_s30 + $0x170] sm:$0xff] }
 0x367   : > { %27021 = vmatprep.mubr.msk.f32.mxu0 %vm501_vm0, %v32474_v63  ;;  %v22287_v24 = vld [vmem:[%s30077_s30 + $0x190] sm:$0xff] }
 0x369   : > { %25670 = vmatmul.mubr.msk.f32.gmra.mrb[50].mxu1 %vm501_vm0, %v31923_v3  ;;  %v32513_v3 = vld [vmem:[%s30077_s30 + $0x178] sm:$0xff] }
 0x36a   : > { %27022 = vmatmul.mubr.msk.f32.gmra.mrb[18].mxu0 %vm501_vm0, %v32485_v5  ;;  %25672 = vmatprep.mubr.msk.f32.mxu1 %vm501_vm0, %v31934_v12  ;;  %v32516_v12 = vld [vmem:[%s30236_s0 + $0x238] sm:$0xff] }
 0x36b   : > { %27024 = vmatprep.mubr.msk.f32.mxu0 %vm501_vm0, %v32488_v55 }
 0x36d   : > { %25673 = vmatmul.mubr.msk.f32.gmra.mrb[52].mxu1 %vm501_vm0, %v31937_v61  ;;  %v32527_v61 = vld [vmem:[%s30077_s30 + $0x1a0] sm:$0xff] }
 0x36e   : > { %27025 = vmatmul.mubr.msk.f32.gmra.mrb[20].mxu0 %vm501_vm0, %v32499_v30  ;;  %25675 = vmatprep.mubr.msk.f32.mxu1 %vm501_vm0, %v31948_v29  ;;  %v32538_v29 = vld [vmem:[%s30077_s30 + $0x1a8] sm:$0xff] }
 0x36f   : > { %27027 = vmatprep.mubr.msk.f32.mxu0 %vm501_vm0, %v32502_v21 }
 0x371   : > { %25676 = vmatmul.mubr.msk.f32.gmra.mrb[54].mxu1 %vm501_vm0, %v31951_v31  ;;  %v32541_v31 = vld [vmem:[%s30077_s30 + $0x1b0] sm:$0xff] }
 0x372   : > { %27028 = vmatmul.mubr.msk.f32.gmra.mrb[22].mxu0 %vm501_vm0, %v32513_v3  ;;  %25678 = vmatprep.mubr.msk.f32.mxu1 %vm501_vm0, %v32516_v12 }
 0x373   : > { %27030 = vmatprep.mubr.msk.f32.mxu0 %vm501_vm0, %v22287_v24  ;;  %v20588_v24 = vld [vmem:[%s30069_s27 + $0x98] sm:$0xff] }
 0x375   : > { %25679 = vmatmul.mubr.msk.f32.gmra.mrb[56].mxu1 %vm501_vm0, %v31966_v57  ;;  %v32552_v57 = vld [vmem:[%s30077_s30 + $0x1b8] sm:$0xff] }
 0x376   : > { %27031 = vmatmul.mubr.msk.f32.gmra.mrb[24].mxu0 %vm501_vm0, %v32098_v38  ;;  %25681 = vmatprep.mubr.msk.f32.mxu1 %vm501_vm0, %v31976_v45  ;;  %v32555_v45 = vld [vmem:[%s30077_s30 + $0x1c0] sm:$0xff] }
 0x377   : > { %27033 = vmatprep.mubr.msk.f32.mxu0 %vm501_vm0, %v32527_v61  ;;  %v36304_v38 = vld [vmem:[#allocation88_spill] sm:$0xff] }
 0x379   : > { %25682 = vmatmul.mubr.msk.f32.gmra.mrb[58].mxu1 %vm501_vm0, %v31979_v49  ;;  %v32566_v49 = vld [vmem:[%s30077_s30 + $0x1c8] sm:$0xff] }
 0x37a   : > { %27034 = vmatmul.mubr.msk.f32.gmra.mrb[26].mxu0 %vm501_vm0, %v32538_v29  ;;  %25684 = vmatprep.mubr.msk.f32.mxu1 %vm501_vm0, %v31990_v2  ;;  %v20573_v2 = vld [vmem:[%s30069_s27 + $0x10] sm:$0xff] }
 0x37b   : > { %27036 = vmatprep.mubr.msk.f32.mxu0 %vm501_vm0, %v32541_v31 }
 0x37d   : > { %25685 = vmatmul.mubr.msk.f32.gmra.mrb[60].mxu1 %vm501_vm0, %v36304_v38  ;;  %v32677_v38 = vld [vmem:[%s30077_s30 + $0x268] sm:$0xff] }
 0x37e   : > { %27037 = vmatmul.mubr.msk.f32.gmra.mrb[28].mxu0 %vm501_vm0, %v32552_v57  ;;  %25687 = vmatprep.mubr.msk.f32.mxu1 %vm501_vm0, %v32004_v46  ;;  %v20574_v46 = vld [vmem:[%s30069_s27 + $0x18] sm:$0xff]  ;;  %36310 = vst [vmem:[#allocation37_spill] sm:$0xff] %v32677_v38 }
 0x37f   : > { %27039 = vmatprep.mubr.msk.f32.mxu0 %vm501_vm0, %v32555_v45 }
 0x381   : > { %25688 = vmatmul.mubr.msk.f32.gmra.mrb[62].mxu1 %vm501_vm0, %v32007_v52  ;;  %v20897_v52 = vld [vmem:[%s35895_s3 + $0x80] sm:$0xff] }
 0x382   : > { %27040 = vmatmul.mubr.msk.f32.gmra.mrb[30].mxu0 %vm501_vm0, %v32566_v49  ;;  %25694 = vmatprep.mubr.msk.f32.mxu1 %vm501_vm0, %v20573_v2  ;;  %v32592_v37 = vpack.c.bf16 %v20898_v23, %v20897_v52  ;;  %v32680_v2 = vld [vmem:[%s30069_s27 + $0xb0] sm:$0xff]  ;;  %v32694_v52 = vld [vmem:[%s30069_s27 + $0xc0] sm:$0xff] }
 0x383   : > { %27042 = vmatprep.mubr.msk.f32.mxu0 %vm501_vm0, %v22295_v0  ;;  %v22311_v0 = vld [vmem:[%s30077_s30 + $0x280] sm:$0xff]  ;;  %v22313_v23 = vld [vmem:[%s30077_s30 + $0x290] sm:$0xff] }
 0x385   : > { %25695 = vmatmul.mubr.msk.f32.vlgmr.msra.gmra.mrb[0].mxu1 %vm501_vm0, %v20574_v46  ;;  %v32689_v46 = vld [vmem:[%s30069_s27 + $0xb8] sm:$0xff] }
 0x386   : > { %27043 = vmatmul.mubr.msk.f32.gmra.mrb[32].mxu0 %vm501_vm0, %v32133_v36  ;;  %27821 = vmatpush3.bf16.msra.mxu1 %v32223_v28  ;;  %v20578_v36 = vld [vmem:[%s30069_s27 + $0x38] sm:$0xff]  ;;  %v32613_v28 = vld [vmem:[%s30077_s30 + $0x208] sm:$0xff] }
 0x387   : > { %25697 = vmatprep.mubr.msk.f32.mxu1 %vm501_vm0, %v20575_v8  ;;  %27045 = vmatprep.mubr.msk.f32.mxu0 %vm501_vm0, %v32579_v13  ;;  %v22312_v8 = vld [vmem:[%s30077_s30 + $0x288] sm:$0xff] }
 0x388   : > { %27823 = vmatprep.subr.bf16.mxu1 %v32592_v37 }
 0x389   : > { %25698 = vmatmul.mubr.msk.f32.gmra.mrb[2].mxu1 %vm501_vm0, %v20576_v35  ;;  %v32703_v35 = vld [vmem:[%s30069_s27 + $0xc8] sm:$0xff] }
 0x38a   : > { %27046 = vmatmul.mubr.msk.f32.gmra.mrb[34].mxu0 %vm501_vm0, %v32598_v41  ;;  %25700 = vmatprep.mubr.msk.f32.mxu1 %vm501_vm0, %v20577_v11  ;;  %v22314_v11 = vld [vmem:[%s30077_s30 + $0x298] sm:$0xff] }
 0x38b   : > { %27048 = vmatprep.mubr.msk.f32.mxu0 %vm501_vm0, %v32602_v15 }
 0x38d   : > { %25701 = vmatmul.mubr.msk.f32.gmra.mrb[4].mxu1 %vm501_vm0, %v20578_v36  ;;  %v32708_v36 = vld [vmem:[%s30069_s27 + $0xd0] sm:$0xff] }
 0x38e   : > { %27049 = vmatmul.mubr.msk.f32.gmra.mrb[36].mxu0 %vm501_vm0, %v32613_v28  ;;  %25703 = vmatprep.mubr.msk.f32.mxu1 %vm501_vm0, %v20579_v25  ;;  %v22315_v25 = vld [vmem:[%s30077_s30 + $0x2a0] sm:$0xff] }
 0x38f   : > { %27051 = vmatprep.mubr.msk.f32.mxu0 %vm501_vm0, %v32617_v9 }
 0x391   : > { %25704 = vmatmul.mubr.msk.f32.gmra.mrb[6].mxu1 %vm501_vm0, %v20580_v58  ;;  %v32717_v58 = vld [vmem:[%s30069_s27 + $0xd8] sm:$0xff] }
 0x392   : > { %27052 = vmatmul.mubr.msk.f32.gmra.mrb[38].mxu0 %vm501_vm0, %v32627_v20  ;;  %25706 = vmatprep.mubr.msk.f32.mxu1 %vm501_vm0, %v20581_v51  ;;  %v22316_v51 = vld [vmem:[%s30077_s30 + $0x2a8] sm:$0xff] }
 0x393   : > { %27054 = vmatprep.mubr.msk.f32.mxu0 %vm501_vm0, %v22303_v6  ;;  %v32722_v6 = vld [vmem:[%s30069_s27 + $0xe0] sm:$0xff] }
 0x395   : > { %25707 = vmatmul.mubr.msk.f32.gmra.mrb[8].mxu1 %vm501_vm0, %v20582_v14  ;;  %v22317_v14 = vld [vmem:[%s30077_s30 + $0x2b0] sm:$0xff] }
 0x396   : > { %27055 = vmatmul.mubr.msk.f32.gmra.mrb[40].mxu0 %vm501_vm0, %v32168_v50  ;;  %25709 = vmatprep.mubr.msk.f32.mxu1 %vm501_vm0, %v20583_v34  ;;  %v20586_v50 = vld [vmem:[%s30069_s27 + $0x88] sm:$0xff] }
 0x397   : > { %27057 = vmatprep.mubr.msk.f32.mxu0 %vm501_vm0, %v32639_v42  ;;  %v20596_v34 = vld [vmem:[%s30069_s27 + $0xe8] sm:$0xff]  ;;  %v22401_v42 = vld [vmem:[%s30236_s0 + $0xf0] sm:$0xff] }
 0x399   : > { %25710 = vmatmul.mubr.msk.f32.gmra.mrb[10].mxu1 %vm501_vm0, %v20584_v60  ;;  %v22318_v60 = vld [vmem:[%s30077_s30 + $0x2b8] sm:$0xff] }
 0x39a   : > { %27058 = vmatmul.mubr.msk.f32.gmra.mrb[42].mxu0 %vm501_vm0, %v32649_v32  ;;  %25712 = vmatprep.mubr.msk.f32.mxu1 %vm501_vm0, %v20585_v33  ;;  %v32734_v33 = vld [vmem:[%s30069_s27 + $0x100] sm:$0xff] }
 0x39b   : > { %27060 = vmatprep.mubr.msk.f32.mxu0 %vm501_vm0, %v32653_v26  ;;  %v32831_v26 = vld [vmem:[%s30236_s0 + $0xc0] sm:$0xff] }
 0x39c   : > { %36313 = vst [vmem:[#allocation22_spill] sm:$0xff] %v32831_v26  ;;  %v32867_v32 = vld [vmem:[%s30069_s27 + $0x1a0] sm:$0xff] }
 0x39d   : > { %25713 = vmatmul.mubr.msk.f32.gmra.mrb[12].mxu1 %vm501_vm0, %v20586_v50  ;;  %v22319_v50 = vld [vmem:[%s30077_s30 + $0x2d0] sm:$0xff]  ;;  %36318 = vst [vmem:[#allocation45_spill] sm:$0xff] %v32867_v32 }
 0x39e   : > { %27061 = vmatmul.mubr.msk.f32.gmra.mrb[44].mxu0 %vm501_vm0, %v32663_v10  ;;  %25715 = vmatprep.mubr.msk.f32.mxu1 %vm501_vm0, %v20587_v4  ;;  %v32742_v4 = vld [vmem:[%s30069_s27 + $0x108] sm:$0xff] }
 0x39f   : > { %27063 = vmatprep.mubr.msk.f32.mxu0 %vm501_vm0, %v32667_v16  ;;  %v32826_v16 = vld [vmem:[%s30069_s27 + $0x170] sm:$0xff] }
 0x3a1   : > { %25716 = vmatmul.mubr.msk.f32.gmra.mrb[14].mxu1 %vm501_vm0, %v20588_v24  ;;  %v22320_v24 = vld [vmem:[%s30077_s30 + $0x2d8] sm:$0xff] }
 0x3a2   : > { %27064 = vmatmul.mubr.msk.f32.gmra.mrb[46].mxu0 %vm501_vm0, %v32677_v38  ;;  %25718 = vmatprep.mubr.msk.f32.mxu1 %vm501_vm0, %v32680_v2  ;;  %v32799_v38 = vld [vmem:[%s30069_s27 + $0x160] sm:$0xff] }
 0x3a3   : > { %27066 = vmatprep.mubr.msk.f32.mxu0 %vm501_vm0, %v22311_v0  ;;  %v32747_v0 = vld [vmem:[%s30069_s27 + $0x110] sm:$0xff] }
 0x3a5   : > { %25719 = vmatmul.mubr.msk.f32.gmra.mrb[16].mxu1 %vm501_vm0, %v32689_v46 }
 0x3a6   : > { %27067 = vmatmul.mubr.msk.f32.gmra.mrb[48].mxu0 %vm501_vm0, %v22312_v8  ;;  %25721 = vmatprep.mubr.msk.f32.mxu1 %vm501_vm0, %v32694_v52  ;;  %v22321_v8 = vld [vmem:[%s30077_s30 + $0x2e0] sm:$0xff] }
 0x3a7   : > { %27069 = vmatprep.mubr.msk.f32.mxu0 %vm501_vm0, %v22313_v23  ;;  %v32756_v23 = vld [vmem:[%s30069_s27 + $0x118] sm:$0xff] }
 0x3a9   : > { %25722 = vmatmul.mubr.msk.f32.gmra.mrb[18].mxu1 %vm501_vm0, %v32703_v35 }
 0x3aa   : > { %27070 = vmatmul.mubr.msk.f32.gmra.mrb[50].mxu0 %vm501_vm0, %v22314_v11  ;;  %25724 = vmatprep.mubr.msk.f32.mxu1 %vm501_vm0, %v32708_v36  ;;  %v22322_v11 = vld [vmem:[%s30077_s30 + $0x2e8] sm:$0xff] }
 0x3ab   : > { %27072 = vmatprep.mubr.msk.f32.mxu0 %vm501_vm0, %v22315_v25  ;;  %v32761_v25 = vld [vmem:[%s30069_s27 + $0x120] sm:$0xff] }
 0x3ad   : > { %25725 = vmatmul.mubr.msk.f32.gmra.mrb[20].mxu1 %vm501_vm0, %v32717_v58 }
 0x3ae   : > { %27073 = vmatmul.mubr.msk.f32.gmra.mrb[52].mxu0 %vm501_vm0, %v22316_v51  ;;  %25727 = vmatprep.mubr.msk.f32.mxu1 %vm501_vm0, %v32722_v6  ;;  %v22323_v51 = vld [vmem:[%s30077_s30 + $0x2f0] sm:$0xff] }
 0x3af   : > { %27075 = vmatprep.mubr.msk.f32.mxu0 %vm501_vm0, %v22317_v14  ;;  %v32770_v14 = vld [vmem:[%s30069_s27 + $0x128] sm:$0xff] }
 0x3b1   : > { %25728 = vmatmul.mubr.msk.f32.gmra.mrb[22].mxu1 %vm501_vm0, %v20596_v34  ;;  %v22324_v34 = vld [vmem:[%s30077_s30 + $0x2f8] sm:$0xff] }
 0x3b2   : > { %27076 = vmatmul.mubr.msk.f32.gmra.mrb[54].mxu0 %vm501_vm0, %v22318_v60  ;;  %25730 = vmatprep.mubr.msk.f32.mxu1 %vm501_vm0, %v32734_v33  ;;  %v32775_v60 = vld [vmem:[%s30069_s27 + $0x130] sm:$0xff] }
 0x3b3   : > { %27078 = vmatprep.mubr.msk.f32.mxu0 %vm501_vm0, %v22319_v50  ;;  %v22325_v50 = vld [vmem:[%s30077_s30 + $0x300] sm:$0xff] }
 0x3b5   : > { %25731 = vmatmul.mubr.msk.f32.gmra.mrb[24].mxu1 %vm501_vm0, %v32742_v4 }
 0x3b6   : > { %27079 = vmatmul.mubr.msk.f32.gmra.mrb[56].mxu0 %vm501_vm0, %v22320_v24  ;;  %25733 = vmatprep.mubr.msk.f32.mxu1 %vm501_vm0, %v32747_v0  ;;  %v20604_v24 = vld [vmem:[%s30069_s27 + $0x138] sm:$0xff] }
 0x3b7   : > { %27081 = vmatprep.mubr.msk.f32.mxu0 %vm501_vm0, %v22321_v8  ;;  %v22326_v8 = vld [vmem:[%s30077_s30 + $0x308] sm:$0xff] }
 0x3b9   : > { %25734 = vmatmul.mubr.msk.f32.gmra.mrb[26].mxu1 %vm501_vm0, %v32756_v23 }
 0x3ba   : > { %27082 = vmatmul.mubr.msk.f32.gmra.mrb[58].mxu0 %vm501_vm0, %v22322_v11  ;;  %25736 = vmatprep.mubr.msk.f32.mxu1 %vm501_vm0, %v32761_v25  ;;  %v32787_v11 = vld [vmem:[%s30069_s27 + $0x150] sm:$0xff] }
 0x3bb   : > { %27084 = vmatprep.mubr.msk.f32.mxu0 %vm501_vm0, %v22323_v51  ;;  %v22393_v51 = vld [vmem:[%s30236_s0 + $0xa0] sm:$0xff] }
 0x3bd   : > { %25737 = vmatmul.mubr.msk.f32.gmra.mrb[28].mxu1 %vm501_vm0, %v32770_v14 }
 0x3be   : > { %27085 = vmatmul.mubr.msk.f32.gmra.mrb[60].mxu0 %vm501_vm0, %v22324_v34  ;;  %25739 = vmatprep.mubr.msk.f32.mxu1 %vm501_vm0, %v32775_v60  ;;  %v32795_v34 = vld [vmem:[%s30069_s27 + $0x158] sm:$0xff] }
 0x3bf   : > { %27087 = vmatprep.mubr.msk.f32.mxu0 %vm501_vm0, %v22325_v50  ;;  %v32802_v50 = vld [vmem:[%s30236_s0 + $0xb0] sm:$0xff] }
 0x3c0   : > { %36311 = vst [vmem:[#allocation21_spill] sm:$0xff] %v32802_v50 }
 0x3c1   : > { %25740 = vmatmul.mubr.msk.f32.gmra.mrb[30].mxu1 %vm501_vm0, %v20604_v24  ;;  %v32811_v24 = vld [vmem:[%s30069_s27 + $0x168] sm:$0xff] }
 0x3c2   : > { %27088 = vmatmul.mubr.msk.f32.gmra.mrb[62].mxu0 %vm501_vm0, %v22326_v8  ;;  %25742 = vmatprep.mubr.msk.f32.mxu1 %vm501_vm0, %v32787_v11  ;;  %v22717_v8 = vld [vmem:[%s35895_s3 + $0x160] sm:$0xff] }
 0x3c3   : > { %27094 = vmatprep.mubr.msk.f32.mxu0 %vm501_vm0, %v22393_v51  ;;  %v22718_v51 = vld [vmem:[%s35895_s3 + $0x168] sm:$0xff] }
 0x3c4   : > { %v32828_v10 = vpack.c.bf16 %v22718_v51, %v22717_v8  ;;  %v32846_v8 = vld [vmem:[%s30236_s0 + $0xc8] sm:$0xff]  ;;  %v32849_v51 = vld [vmem:[%s30069_s27 + $0x180] sm:$0xff] }
 0x3c5   : > { %25743 = vmatmul.mubr.msk.f32.gmra.mrb[32].mxu1 %vm501_vm0, %v32795_v34  ;;  %36314 = vst [vmem:[#allocation41_spill] sm:$0xff] %v32846_v8  ;;  %36315 = vst [vmem:[#allocation23_spill] sm:$0xff] %v32849_v51 }
 0x3c6   : > { %27095 = vmatmul.mubr.msk.f32.vlgmr.msra.gmra.mrb[0].mxu0 %vm501_vm0, %v32277_v53  ;;  %25745 = vmatprep.mubr.msk.f32.mxu1 %vm501_vm0, %v32799_v38  ;;  %v32823_v53 = vld [vmem:[%s30236_s0 + $0xb8] sm:$0xff] }
 0x3c7   : > { %27877 = vmatpush3.bf16.msra.mxu0 %v32378_v39  ;;  %27097 = vmatprep.mubr.msk.f32.mxu0 %vm501_vm0, %v32802_v50  ;;  %36312 = vst [vmem:[#allocation39_spill] sm:$0xff] %v32823_v53  ;;  %v32841_v39 = vld [vmem:[%s30069_s27 + $0x178] sm:$0xff]  ;;  %v32852_v50 = vld [vmem:[%s30236_s0 + $0xd0] sm:$0xff] }
 0x3c8   : > { %27879 = vmatprep.subr.bf16.mxu0 %v32828_v10  ;;  %36316 = vst [vmem:[#allocation43_spill] sm:$0xff] %v32852_v50 }
 0x3c9   : > { %25746 = vmatmul.mubr.msk.f32.gmra.mrb[34].mxu1 %vm501_vm0, %v32811_v24 }
 0x3ca   : > { %27098 = vmatmul.mubr.msk.f32.gmra.mrb[2].mxu0 %vm501_vm0, %v32823_v53  ;;  %25748 = vmatprep.mubr.msk.f32.mxu1 %vm501_vm0, %v32826_v16  ;;  %v20612_v53 = vld [vmem:[%s30069_s27 + $0x188] sm:$0xff] }
 0x3cb   : > { %27100 = vmatprep.mubr.msk.f32.mxu0 %vm501_vm0, %v32831_v26  ;;  %v32864_v26 = vld [vmem:[%s30236_s0 + $0xd8] sm:$0xff] }
 0x3cc   : > { %36317 = vst [vmem:[#allocation24_spill] sm:$0xff] %v32864_v26 }
 0x3cd   : > { %25749 = vmatmul.mubr.msk.f32.gmra.mrb[36].mxu1 %vm501_vm0, %v32841_v39 }
 0x3ce   : > { %27101 = vmatmul.mubr.msk.f32.gmra.mrb[4].mxu0 %vm501_vm0, %v32846_v8  ;;  %25751 = vmatprep.mubr.msk.f32.mxu1 %vm501_vm0, %v32849_v51  ;;  %v32876_v8 = vld [vmem:[%s30069_s27 + $0x1a8] sm:$0xff]  ;;  %v32883_v51 = vld [vmem:[%s30236_s0 + $0x100] sm:$0xff] }
 0x3cf   : > { %27103 = vmatprep.mubr.msk.f32.mxu0 %vm501_vm0, %v32852_v50  ;;  %36319 = vst [vmem:[#allocation25_spill] sm:$0xff] %v32876_v8  ;;  %v32880_v50 = vld [vmem:[%s30069_s27 + $0x1b0] sm:$0xff]  ;;  %36321 = vst [vmem:[#allocation47_spill] sm:$0xff] %v32883_v51 }
 0x3d0   : > { %36320 = vst [vmem:[#allocation26_spill] sm:$0xff] %v32880_v50 }
 0x3d1   : > { %25752 = vmatmul.mubr.msk.f32.gmra.mrb[38].mxu1 %vm501_vm0, %v20612_v53  ;;  %v32892_v53 = vld [vmem:[%s30069_s27 + $0x1b8] sm:$0xff] }
 0x3d2   : > { %27104 = vmatmul.mubr.msk.f32.gmra.mrb[6].mxu0 %vm501_vm0, %v32864_v26  ;;  %25754 = vmatprep.mubr.msk.f32.mxu1 %vm501_vm0, %v32867_v32  ;;  %36322 = vst [vmem:[#allocation27_spill] sm:$0xff] %v32892_v53  ;;  %v32900_v26 = vld [vmem:[%s30069_s27 + $0x1c0] sm:$0xff]  ;;  %v32903_v32 = vld [vmem:[%s30236_s0 + $0x110] sm:$0xff] }
 0x3d3   : > { %27106 = vmatprep.mubr.msk.f32.mxu0 %vm501_vm0, %v22401_v42  ;;  %v32897_v42 = vld [vmem:[%s30236_s0 + $0x108] sm:$0xff]  ;;  %36324 = vst [vmem:[#allocation28_spill] sm:$0xff] %v32900_v26  ;;  %36325 = vst [vmem:[#allocation51_spill] sm:$0xff] %v32903_v32 }
 0x3d4   : > { %36323 = vst [vmem:[#allocation49_spill] sm:$0xff] %v32897_v42 }
 0x3d5   : > { %25755 = vmatmul.mubr.msk.f32.gmra.mrb[40].mxu1 %vm501_vm0, %v32876_v8  ;;  %v32923_v8 = vld [vmem:[%s30236_s0 + $0x120] sm:$0xff] }
 0x3d6   : > { %27107 = vmatmul.mubr.msk.f32.gmra.mrb[8].mxu0 %vm501_vm0, %v32313_v7  ;;  %25757 = vmatprep.mubr.msk.f32.mxu1 %vm501_vm0, %v32880_v50  ;;  %v32912_v7 = vld [vmem:[%s30069_s27 + $0x1c8] sm:$0xff]  ;;  %v32920_v50 = vld [vmem:[%s30069_s27 + $0x1d0] sm:$0xff]  ;;  %36328 = vst [vmem:[#allocation33_spill] sm:$0xff] %v32923_v8 }
 0x3d7   : > { %27109 = vmatprep.mubr.msk.f32.mxu0 %vm501_vm0, %v32883_v51  ;;  %v32917_v51 = vld [vmem:[%s30236_s0 + $0x118] sm:$0xff]  ;;  %36327 = vst [vmem:[#allocation53_spill] sm:$0xff] %v32920_v50 }
 0x3d8   : > { %36326 = vst [vmem:[#allocation32_spill] sm:$0xff] %v32917_v51 }
 0x3d9   : > { %25758 = vmatmul.mubr.msk.f32.gmra.mrb[42].mxu1 %vm501_vm0, %v32892_v53  ;;  %v22409_v53 = vld [vmem:[%s30236_s0 + $0x140] sm:$0xff] }
 0x3da   : > { %27110 = vmatmul.mubr.msk.f32.gmra.mrb[10].mxu0 %vm501_vm0, %v32897_v42  ;;  %25760 = vmatprep.mubr.msk.f32.mxu1 %vm501_vm0, %v32900_v26  ;;  %v20620_v42 = vld [vmem:[%s30069_s27 + $0x1d8] sm:$0xff]  ;;  %v32938_v26 = vld [vmem:[%s30069_s27 + $0x1f0] sm:$0xff] }
 0x3db   : > { %27112 = vmatprep.mubr.msk.f32.mxu0 %vm501_vm0, %v32903_v32  ;;  %v32935_v32 = vld [vmem:[%s30236_s0 + $0x128] sm:$0xff]  ;;  %36330 = vst [vmem:[#allocation57_spill] sm:$0xff] %v32938_v26 }
 0x3dc   : > { %36329 = vst [vmem:[#allocation55_spill] sm:$0xff] %v32935_v32 }
 0x3dd   : > { %25761 = vmatmul.mubr.msk.f32.gmra.mrb[44].mxu1 %vm501_vm0, %v32912_v7 }
 0x3de   : > { %27113 = vmatmul.mubr.msk.f32.gmra.mrb[12].mxu0 %vm501_vm0, %v32917_v51  ;;  %25763 = vmatprep.mubr.msk.f32.mxu1 %vm501_vm0, %v32920_v50  ;;  %v32947_v51 = vld [vmem:[%s30069_s27 + $0x1f8] sm:$0xff]  ;;  %v32954_v50 = vld [vmem:[%s30236_s0 + $0x150] sm:$0xff] }
 0x3df   : > { %27115 = vmatprep.mubr.msk.f32.mxu0 %vm501_vm0, %v32923_v8  ;;  %36331 = vst [vmem:[#allocation59_spill] sm:$0xff] %v32947_v51  ;;  %v32951_v8 = vld [vmem:[%s30069_s27 + $0x200] sm:$0xff]  ;;  %36333 = vst [vmem:[#allocation63_spill] sm:$0xff] %v32954_v50 }
 0x3e0   : > { %36332 = vst [vmem:[#allocation61_spill] sm:$0xff] %v32951_v8 }
 0x3e1   : > { %25764 = vmatmul.mubr.msk.f32.gmra.mrb[46].mxu1 %vm501_vm0, %v20620_v42  ;;  %v32963_v42 = vld [vmem:[%s30069_s27 + $0x208] sm:$0xff] }
 0x3e2   : > { %27116 = vmatmul.mubr.msk.f32.gmra.mrb[14].mxu0 %vm501_vm0, %v32935_v32  ;;  %25766 = vmatprep.mubr.msk.f32.mxu1 %vm501_vm0, %v32938_v26  ;;  %36334 = vst [vmem:[#allocation65_spill] sm:$0xff] %v32963_v42  ;;  %v32971_v32 = vld [vmem:[%s30069_s27 + $0x210] sm:$0xff]  ;;  %v32974_v26 = vld [vmem:[%s30236_s0 + $0x160] sm:$0xff] }
 0x3e3   : > { %27118 = vmatprep.mubr.msk.f32.mxu0 %vm501_vm0, %v22409_v53  ;;  %v32968_v53 = vld [vmem:[%s30236_s0 + $0x158] sm:$0xff]  ;;  %36336 = vst [vmem:[#allocation69_spill] sm:$0xff] %v32971_v32  ;;  %36337 = vst [vmem:[#allocation29_spill] sm:$0xff] %v32974_v26 }
 0x3e4   : > { %36335 = vst [vmem:[#allocation67_spill] sm:$0xff] %v32968_v53 }
 0x3e5   : > { %25767 = vmatmul.mubr.msk.f32.gmra.mrb[48].mxu1 %vm501_vm0, %v32947_v51  ;;  %v32994_v51 = vld [vmem:[%s30236_s0 + $0x170] sm:$0xff] }
 0x3e6   : > { %27119 = vmatmul.mubr.msk.f32.gmra.mrb[16].mxu0 %vm501_vm0, %v32348_v19  ;;  %25769 = vmatprep.mubr.msk.f32.mxu1 %vm501_vm0, %v32951_v8  ;;  %v32983_v19 = vld [vmem:[%s30069_s27 + $0x218] sm:$0xff]  ;;  %v32991_v8 = vld [vmem:[%s30069_s27 + $0x220] sm:$0xff]  ;;  %36341 = vst [vmem:[#allocation36_spill] sm:$0xff] %v32994_v51 }
 0x3e7   : > { %27121 = vmatprep.mubr.msk.f32.mxu0 %vm501_vm0, %v32954_v50  ;;  %36338 = vst [vmem:[#allocation71_spill] sm:$0xff] %v32983_v19  ;;  %v32988_v50 = vld [vmem:[%s30236_s0 + $0x168] sm:$0xff]  ;;  %36340 = vst [vmem:[#allocation73_spill] sm:$0xff] %v32991_v8 }
 0x3e8   : > { %36339 = vst [vmem:[#allocation34_spill] sm:$0xff] %v32988_v50 }
 0x3e9   : > { %25770 = vmatmul.mubr.msk.f32.gmra.mrb[50].mxu1 %vm501_vm0, %v32963_v42  ;;  %v22417_v42 = vld [vmem:[%s30236_s0 + $0x190] sm:$0xff] }
 0x3ea   : > { %27122 = vmatmul.mubr.msk.f32.gmra.mrb[18].mxu0 %vm501_vm0, %v32968_v53  ;;  %25772 = vmatprep.mubr.msk.f32.mxu1 %vm501_vm0, %v32971_v32  ;;  %v20628_v53 = vld [vmem:[%s30069_s27 + $0x228] sm:$0xff]  ;;  %v33009_v32 = vld [vmem:[%s30069_s27 + $0x240] sm:$0xff] }
 0x3eb   : > { %27124 = vmatprep.mubr.msk.f32.mxu0 %vm501_vm0, %v32974_v26  ;;  %v33006_v26 = vld [vmem:[%s30236_s0 + $0x178] sm:$0xff]  ;;  %36343 = vst [vmem:[#allocation38_spill] sm:$0xff] %v33009_v32 }
 0x3ec   : > { %36342 = vst [vmem:[#allocation75_spill] sm:$0xff] %v33006_v26 }
 0x3ed   : > { %25773 = vmatmul.mubr.msk.f32.gmra.mrb[52].mxu1 %vm501_vm0, %v32983_v19  ;;  %v33112_v19 = vld [vmem:[%s30236_s0 + $0x200] sm:$0xff] }
 0x3ee   : > { %27125 = vmatmul.mubr.msk.f32.gmra.mrb[20].mxu0 %vm501_vm0, %v32988_v50  ;;  %25775 = vmatprep.mubr.msk.f32.mxu1 %vm501_vm0, %v32991_v8  ;;  %v33018_v50 = vld [vmem:[%s30069_s27 + $0x248] sm:$0xff]  ;;  %v33025_v8 = vld [vmem:[%s30236_s0 + $0x1a0] sm:$0xff]  ;;  %36356 = vst [vmem:[#allocation54_spill] sm:$0xff] %v33112_v19 }
 0x3ef   : > { %27127 = vmatprep.mubr.msk.f32.mxu0 %vm501_vm0, %v32994_v51  ;;  %36344 = vst [vmem:[#allocation77_spill] sm:$0xff] %v33018_v50  ;;  %v33022_v51 = vld [vmem:[%s30069_s27 + $0x250] sm:$0xff]  ;;  %36346 = vst [vmem:[#allocation79_spill] sm:$0xff] %v33025_v8 }
 0x3f0   : > { %36345 = vst [vmem:[#allocation40_spill] sm:$0xff] %v33022_v51 }
 0x3f1   : > { %25776 = vmatmul.mubr.msk.f32.gmra.mrb[54].mxu1 %vm501_vm0, %v20628_v53  ;;  %v33034_v53 = vld [vmem:[%s30069_s27 + $0x258] sm:$0xff] }
 0x3f2   : > { %27128 = vmatmul.mubr.msk.f32.gmra.mrb[22].mxu0 %vm501_vm0, %v33006_v26  ;;  %25778 = vmatprep.mubr.msk.f32.mxu1 %vm501_vm0, %v33009_v32  ;;  %36347 = vst [vmem:[#allocation42_spill] sm:$0xff] %v33034_v53  ;;  %v33042_v26 = vld [vmem:[%s30069_s27 + $0x260] sm:$0xff]  ;;  %v33045_v32 = vld [vmem:[%s30236_s0 + $0x1b0] sm:$0xff] }
 0x3f3   : > { %27130 = vmatprep.mubr.msk.f32.mxu0 %vm501_vm0, %v22417_v42  ;;  %v33039_v42 = vld [vmem:[%s30236_s0 + $0x1a8] sm:$0xff]  ;;  %36349 = vst [vmem:[#allocation44_spill] sm:$0xff] %v33042_v26  ;;  %36350 = vst [vmem:[#allocation83_spill] sm:$0xff] %v33045_v32 }
 0x3f4   : > { %36348 = vst [vmem:[#allocation81_spill] sm:$0xff] %v33039_v42 }
 0x3f5   : > { %25779 = vmatmul.mubr.msk.f32.gmra.mrb[56].mxu1 %vm501_vm0, %v33018_v50  ;;  %v33065_v50 = vld [vmem:[%s30236_s0 + $0x1c0] sm:$0xff] }
 0x3f6   : > { %27131 = vmatmul.mubr.msk.f32.gmra.mrb[24].mxu0 %vm501_vm0, %v32410_v54  ;;  %25781 = vmatprep.mubr.msk.f32.mxu1 %vm501_vm0, %v33022_v51  ;;  %v33054_v54 = vld [vmem:[%s30069_s27 + $0x268] sm:$0xff]  ;;  %v33062_v51 = vld [vmem:[%s30069_s27 + $0x270] sm:$0xff]  ;;  %36354 = vst [vmem:[#allocation50_spill] sm:$0xff] %v33065_v50 }
 0x3f7   : > { %27133 = vmatprep.mubr.msk.f32.mxu0 %vm501_vm0, %v33025_v8  ;;  %36351 = vst [vmem:[#allocation46_spill] sm:$0xff] %v33054_v54  ;;  %v33059_v8 = vld [vmem:[%s30236_s0 + $0x1b8] sm:$0xff]  ;;  %36353 = vst [vmem:[#allocation48_spill] sm:$0xff] %v33062_v51 }
 0x3f8   : > { %36352 = vst [vmem:[#allocation31_spill] sm:$0xff] %v33059_v8 }
 0x3f9   : > { %25782 = vmatmul.mubr.msk.f32.gmra.mrb[58].mxu1 %vm501_vm0, %v33034_v53  ;;  %v22425_v53 = vld [vmem:[%s30236_s0 + $0x1e0] sm:$0xff] }
 0x3fa   : > { %27134 = vmatmul.mubr.msk.f32.gmra.mrb[26].mxu0 %vm501_vm0, %v33039_v42  ;;  %25784 = vmatprep.mubr.msk.f32.mxu1 %vm501_vm0, %v33042_v26  ;;  %v20636_v42 = vld [vmem:[%s30069_s27 + $0x278] sm:$0xff]  ;;  %v20703_v26 = vld [vmem:[%s30077_s30 + $0x10] sm:$0xff] }
 0x3fb   : > { %27136 = vmatprep.mubr.msk.f32.mxu0 %vm501_vm0, %v33045_v32  ;;  %v33077_v32 = vld [vmem:[%s30236_s0 + $0x1c8] sm:$0xff] }
 0x3fc   : > { %36355 = vst [vmem:[#allocation52_spill] sm:$0xff] %v33077_v32 }
 0x3fd   : > { %25785 = vmatmul.mubr.msk.f32.gmra.mrb[60].mxu1 %vm501_vm0, %v33054_v54  ;;  %v20707_v54 = vld [vmem:[%s30077_s30 + $0x30] sm:$0xff] }
 0x3fe   : > { %27137 = vmatmul.mubr.msk.f32.gmra.mrb[28].mxu0 %vm501_vm0, %v33059_v8  ;;  %25787 = vmatprep.mubr.msk.f32.mxu1 %vm501_vm0, %v33062_v51  ;;  %v20704_v8 = vld [vmem:[%s30077_s30 + $0x18] sm:$0xff]  ;;  %v20705_v51 = vld [vmem:[%s30077_s30 + $0x20] sm:$0xff] }
 0x3ff   : > { %27139 = vmatprep.mubr.msk.f32.mxu0 %vm501_vm0, %v33065_v50  ;;  %v33089_v50 = vld [vmem:[%s30236_s0 + $0x1f0] sm:$0xff] }
 0x401   : > { %25788 = vmatmul.mubr.msk.f32.gmra.mrb[62].mxu1 %vm501_vm0, %v20636_v42  ;;  %v21027_v42 = vld [vmem:[%s35895_s3 + $0x90] sm:$0xff] }
 0x402   : > { %27140 = vmatmul.mubr.msk.f32.gmra.mrb[30].mxu0 %vm501_vm0, %v33077_v32  ;;  %25794 = vmatprep.mubr.msk.f32.mxu1 %vm501_vm0, %v20703_v26  ;;  %v21028_v32 = vld [vmem:[%s35895_s3 + $0x98] sm:$0xff]  ;;  %v20706_v26 = vld [vmem:[%s30077_s30 + $0x28] sm:$0xff] }
 0x403   : > { %27142 = vmatprep.mubr.msk.f32.mxu0 %vm501_vm0, %v22425_v53  ;;  %v33102_v53 = vpack.c.bf16 %v21028_v32, %v21027_v42  ;;  %v20709_v32 = vld [vmem:[%s30077_s30 + $0x40] sm:$0xff]  ;;  %v33137_v42 = vld [vmem:[%s30236_s0 + $0x218] sm:$0xff] }
 0x404   : > { %36358 = vst [vmem:[#allocation58_spill] sm:$0xff] %v33137_v42 }
 0x405   : > { %25795 = vmatmul.mubr.msk.f32.vlgmr.msra.gmra.mrb[0].mxu1 %vm501_vm0, %v20704_v8  ;;  %v33108_v8 = vld [vmem:[%s30236_s0 + $0x1f8] sm:$0xff] }
 0x406   : > { %27143 = vmatmul.mubr.msk.f32.gmra.mrb[32].mxu0 %vm501_vm0, %v32463_v47  ;;  %27825 = vmatpush3.bf16.msra.mxu1 %v32592_v37  ;;  %v20708_v47 = vld [vmem:[%s30077_s30 + $0x38] sm:$0xff]  ;;  %v33123_v37 = vld [vmem:[%s30236_s0 + $0x208] sm:$0xff] }
 0x407   : > { %25797 = vmatprep.mubr.msk.f32.mxu1 %vm501_vm0, %v20705_v51  ;;  %27145 = vmatprep.mubr.msk.f32.mxu0 %vm501_vm0, %v33089_v50  ;;  %v33127_v51 = vld [vmem:[%s30236_s0 + $0x210] sm:$0xff] }
 0x408   : > { %27827 = vmatprep.subr.bf16.mxu1 %v33102_v53  ;;  %36357 = vst [vmem:[#allocation56_spill] sm:$0xff] %v33127_v51 }
 0x409   : > { %25798 = vmatmul.mubr.msk.f32.gmra.mrb[2].mxu1 %vm501_vm0, %v20706_v26  ;;  %v20711_v26 = vld [vmem:[%s30077_s30 + $0x60] sm:$0xff] }
 0x40a   : > { %27146 = vmatmul.mubr.msk.f32.gmra.mrb[34].mxu0 %vm501_vm0, %v33108_v8  ;;  %25800 = vmatprep.mubr.msk.f32.mxu1 %vm501_vm0, %v20707_v54  ;;  %v20710_v54 = vld [vmem:[%s30077_s30 + $0x48] sm:$0xff] }
 0x40b   : > { %27148 = vmatprep.mubr.msk.f32.mxu0 %vm501_vm0, %v33112_v19  ;;  %v22433_v19 = vld [vmem:[%s30236_s0 + $0x230] sm:$0xff] }
 0x40d   : > { %25801 = vmatmul.mubr.msk.f32.gmra.mrb[4].mxu1 %vm501_vm0, %v20708_v47  ;;  %v20712_v47 = vld [vmem:[%s30077_s30 + $0x68] sm:$0xff] }
 0x40e   : > { %27149 = vmatmul.mubr.msk.f32.gmra.mrb[36].mxu0 %vm501_vm0, %v33123_v37  ;;  %25803 = vmatprep.mubr.msk.f32.mxu1 %vm501_vm0, %v20709_v32  ;;  %v20713_v32 = vld [vmem:[%s30077_s30 + $0x70] sm:$0xff] }
 0x40f   : > { %27151 = vmatprep.mubr.msk.f32.mxu0 %vm501_vm0, %v33127_v51  ;;  %v33149_v51 = vld [vmem:[%s30236_s0 + $0x240] sm:$0xff] }
 0x410   : > { %36359 = vst [vmem:[#allocation60_spill] sm:$0xff] %v33149_v51 }
 0x411   : > { %25804 = vmatmul.mubr.msk.f32.gmra.mrb[6].mxu1 %vm501_vm0, %v20710_v54  ;;  %v20714_v54 = vld [vmem:[%s30077_s30 + $0x78] sm:$0xff] }
 0x412   : > { %27152 = vmatmul.mubr.msk.f32.gmra.mrb[38].mxu0 %vm501_vm0, %v33137_v42  ;;  %25806 = vmatprep.mubr.msk.f32.mxu1 %vm501_vm0, %v20711_v26  ;;  %v33159_v26 = vld [vmem:[%s30236_s0 + $0x248] sm:$0xff]  ;;  %v33163_v42 = vld [vmem:[%s30236_s0 + $0x250] sm:$0xff] }
 0x413   : > { %27154 = vmatprep.mubr.msk.f32.mxu0 %vm501_vm0, %v22433_v19  ;;  %v20715_v19 = vld [vmem:[%s30077_s30 + $0x80] sm:$0xff]  ;;  %36360 = vst [vmem:[#allocation62_spill] sm:$0xff] %v33163_v42 }
 0x415   : > { %25807 = vmatmul.mubr.msk.f32.gmra.mrb[8].mxu1 %vm501_vm0, %v20712_v47  ;;  %v33173_v47 = vld [vmem:[%s30236_s0 + $0x258] sm:$0xff] }
 0x416   : > { %27155 = vmatmul.mubr.msk.f32.gmra.mrb[40].mxu0 %vm501_vm0, %v32516_v12  ;;  %25809 = vmatprep.mubr.msk.f32.mxu1 %vm501_vm0, %v20713_v32  ;;  %v20716_v12 = vld [vmem:[%s30077_s30 + $0x88] sm:$0xff]  ;;  %v20717_v32 = vld [vmem:[%s30077_s30 + $0x90] sm:$0xff] }
 0x417   : > { %27157 = vmatprep.mubr.msk.f32.mxu0 %vm501_vm0, %v33149_v51  ;;  %v33177_v51 = vld [vmem:[%s30236_s0 + $0x260] sm:$0xff] }
 0x419   : > { %25810 = vmatmul.mubr.msk.f32.gmra.mrb[10].mxu1 %vm501_vm0, %v20714_v54  ;;  %v20718_v54 = vld [vmem:[%s30077_s30 + $0x98] sm:$0xff] }
 0x41a   : > { %27158 = vmatmul.mubr.msk.f32.gmra.mrb[42].mxu0 %vm501_vm0, %v33159_v26  ;;  %25812 = vmatprep.mubr.msk.f32.mxu1 %vm501_vm0, %v20715_v19  ;;  %v33187_v19 = vld [vmem:[%s30236_s0 + $0x268] sm:$0xff] }
 0x41b   : > { %27160 = vmatprep.mubr.msk.f32.mxu0 %vm501_vm0, %v33163_v42  ;;  %v22441_v42 = vld [vmem:[%s30236_s0 + $0x280] sm:$0xff] }
 0x41d   : > { %25813 = vmatmul.mubr.msk.f32.gmra.mrb[12].mxu1 %vm501_vm0, %v20716_v12  ;;  %v22442_v12 = vld [vmem:[%s30236_s0 + $0x288] sm:$0xff] }
 0x41e   : > { %27161 = vmatmul.mubr.msk.f32.gmra.mrb[44].mxu0 %vm501_vm0, %v33173_v47  ;;  %25815 = vmatprep.mubr.msk.f32.mxu1 %vm501_vm0, %v20717_v32  ;;  %v22443_v32 = vld [vmem:[%s30236_s0 + $0x290] sm:$0xff] }
 0x41f   : > { %27163 = vmatprep.mubr.msk.f32.mxu0 %vm501_vm0, %v33177_v51 }
 0x421   : > { %25816 = vmatmul.mubr.msk.f32.gmra.mrb[14].mxu1 %vm501_vm0, %v20718_v54  ;;  %v22444_v54 = vld [vmem:[%s30236_s0 + $0x298] sm:$0xff] }
 0x422   : > { %27164 = vmatmul.mubr.msk.f32.gmra.mrb[46].mxu0 %vm501_vm0, %v33187_v19  ;;  %25818 = vmatprep.mubr.msk.f32.mxu1 %vm501_vm0, %v32358_v18  ;;  %v22445_v18 = vld [vmem:[%s30236_s0 + $0x2a0] sm:$0xff] }
 0x423   : > { %27166 = vmatprep.mubr.msk.f32.mxu0 %vm501_vm0, %v22441_v42  ;;  %v22447_v42 = vld [vmem:[%s30236_s0 + $0x2b0] sm:$0xff] }
 0x425   : > { %25819 = vmatmul.mubr.msk.f32.gmra.mrb[16].mxu1 %vm501_vm0, %v32376_v44  ;;  %v22446_v44 = vld [vmem:[%s30236_s0 + $0x2a8] sm:$0xff] }
 0x426   : > { %27167 = vmatmul.mubr.msk.f32.gmra.mrb[48].mxu0 %vm501_vm0, %v22442_v12  ;;  %25821 = vmatprep.mubr.msk.f32.mxu1 %vm501_vm0, %v32381_v17  ;;  %v33214_v17 = vld [vmem:[%s30077_s30 + $0xe0] sm:$0xff]  ;;  %v22449_v12 = vld [vmem:[%s30236_s0 + $0x2d0] sm:$0xff] }
 0x427   : > { %27169 = vmatprep.mubr.msk.f32.mxu0 %vm501_vm0, %v22443_v32  ;;  %v22451_v32 = vld [vmem:[%s30236_s0 + $0x2e0] sm:$0xff] }
 0x429   : > { %25822 = vmatmul.mubr.msk.f32.gmra.mrb[18].mxu1 %vm501_vm0, %v32393_v27  ;;  %v20726_v27 = vld [vmem:[%s30077_s30 + $0xe8] sm:$0xff] }
 0x42a   : > { %27170 = vmatmul.mubr.msk.f32.gmra.mrb[50].mxu0 %vm501_vm0, %v22444_v54  ;;  %25824 = vmatprep.mubr.msk.f32.mxu1 %vm501_vm0, %v32396_v48  ;;  %v22448_v48 = vld [vmem:[%s30236_s0 + $0x2b8] sm:$0xff]  ;;  %v22452_v54 = vld [vmem:[%s30236_s0 + $0x2e8] sm:$0xff] }
 0x42b   : > { %27172 = vmatprep.mubr.msk.f32.mxu0 %vm501_vm0, %v22445_v18  ;;  %v33249_v18 = vld [vmem:[%s30077_s30 + $0x130] sm:$0xff] }
 0x42d   : > { %25825 = vmatmul.mubr.msk.f32.gmra.mrb[20].mxu1 %vm501_vm0, %v32407_v1  ;;  %v22450_v1 = vld [vmem:[%s30236_s0 + $0x2d8] sm:$0xff] }
 0x42e   : > { %27173 = vmatmul.mubr.msk.f32.gmra.mrb[52].mxu0 %vm501_vm0, %v22446_v44  ;;  %25827 = vmatprep.mubr.msk.f32.mxu1 %vm501_vm0, %v33214_v17  ;;  %v22456_v44 = vld [vmem:[%s30236_s0 + $0x308] sm:$0xff] }
 0x42f   : > { %27175 = vmatprep.mubr.msk.f32.mxu0 %vm501_vm0, %v22447_v42  ;;  %v33261_v42 = vld [vmem:[%s30069_s27 + $0xa8] sm:$0xff] }
 0x431   : > { %25828 = vmatmul.mubr.msk.f32.gmra.mrb[22].mxu1 %vm501_vm0, %v20726_v27  ;;  %v20840_v27 = vld [vmem:[%s30236_s0 + $0x48] sm:$0xff] }
 0x432   : > { %27176 = vmatmul.mubr.msk.f32.gmra.mrb[54].mxu0 %vm501_vm0, %v22448_v48  ;;  %25830 = vmatprep.mubr.msk.f32.mxu1 %vm501_vm0, %v32421_v22  ;;  %v22453_v22 = vld [vmem:[%s30236_s0 + $0x2f0] sm:$0xff] }
 0x433   : > { %27178 = vmatprep.mubr.msk.f32.mxu0 %vm501_vm0, %v22449_v12  ;;  %v36379_v48 = vld [vmem:[#allocation71_spill] sm:$0xff]  ;;  %v20841_v12 = vld [vmem:[%s30236_s0 + $0x60] sm:$0xff] }
 0x435   : > { %25831 = vmatmul.mubr.msk.f32.gmra.mrb[24].mxu1 %vm501_vm0, %v32432_v59  ;;  %v22454_v59 = vld [vmem:[%s30236_s0 + $0x2f8] sm:$0xff] }
 0x436   : > { %27179 = vmatmul.mubr.msk.f32.gmra.mrb[56].mxu0 %vm501_vm0, %v22450_v1  ;;  %25833 = vmatprep.mubr.msk.f32.mxu1 %vm501_vm0, %v32435_v40  ;;  %v22455_v40 = vld [vmem:[%s30236_s0 + $0x300] sm:$0xff]  ;;  %v33468_v1 = vld [vmem:[%s30069_s27 + $0x238] sm:$0xff] }
 0x437   : > { %27181 = vmatprep.mubr.msk.f32.mxu0 %vm501_vm0, %v22451_v32  ;;  %v36380_v32 = vld [vmem:[#allocation73_spill] sm:$0xff] }
 0x439   : > { %25834 = vmatmul.mubr.msk.f32.gmra.mrb[26].mxu1 %vm501_vm0, %v32446_v62  ;;  %v20734_v62 = vld [vmem:[%s30077_s30 + $0x138] sm:$0xff] }
 0x43a   : > { %27182 = vmatmul.mubr.msk.f32.gmra.mrb[58].mxu0 %vm501_vm0, %v22452_v54  ;;  %25836 = vmatprep.mubr.msk.f32.mxu1 %vm501_vm0, %v32449_v56  ;;  %v22847_v56 = vld [vmem:[%s35895_s3 + $0x170] sm:$0xff]  ;;  %v20842_v54 = vld [vmem:[%s30236_s0 + $0x68] sm:$0xff] }
 0x43b   : > { %27184 = vmatprep.mubr.msk.f32.mxu0 %vm501_vm0, %v22453_v22  ;;  %v20843_v22 = vld [vmem:[%s30236_s0 + $0x70] sm:$0xff] }
 0x43d   : > { %25837 = vmatmul.mubr.msk.f32.gmra.mrb[28].mxu1 %vm501_vm0, %v32460_v43  ;;  %v22848_v43 = vld [vmem:[%s35895_s3 + $0x178] sm:$0xff] }
 0x43e   : > { %27185 = vmatmul.mubr.msk.f32.gmra.mrb[60].mxu0 %vm501_vm0, %v22454_v59  ;;  %25839 = vmatprep.mubr.msk.f32.mxu1 %vm501_vm0, %v33249_v18  ;;  %v36381_v59 = vld [vmem:[#allocation38_spill] sm:$0xff] }
 0x43f   : > { %27187 = vmatprep.mubr.msk.f32.mxu0 %vm501_vm0, %v22455_v40  ;;  %v20844_v40 = vld [vmem:[%s30236_s0 + $0x78] sm:$0xff] }
 0x441   : > { %25840 = vmatmul.mubr.msk.f32.gmra.mrb[30].mxu1 %vm501_vm0, %v20734_v62  ;;  %v36382_v62 = vld [vmem:[#allocation77_spill] sm:$0xff] }
 0x442   : > { %27188 = vmatmul.mubr.msk.f32.gmra.mrb[62].mxu0 %vm501_vm0, %v22456_v44  ;;  %25842 = vmatprep.mubr.msk.f32.mxu1 %vm501_vm0, %v32474_v63  ;;  %v33284_v63 = vpack.c.bf16 %v22848_v43, %v22847_v56  ;;  %v20845_v44 = vld [vmem:[%s30236_s0 + $0x80] sm:$0xff]  ;;  %v20846_v43 = vld [vmem:[%s30236_s0 + $0x88] sm:$0xff] }
 0x443   : > { %27194 = vmatprep.mubr.msk.f32.mxu0 %vm501_vm0, %v33261_v42  ;;  %v36383_v56 = vld [vmem:[#allocation40_spill] sm:$0xff] }
 0x445   : > { %25843 = vmatmul.mubr.msk.f32.gmra.mrb[32].mxu1 %vm501_vm0, %v32485_v5  ;;  %v33296_v5 = vld [vmem:[%s30077_s30 + $0x180] sm:$0xff] }
 0x446   : > { %27195 = vmatmul.mubr.msk.f32.vlgmr.msra.gmra.mrb[0].mxu0 %vm501_vm0, %v32680_v2  ;;  %25845 = vmatprep.mubr.msk.f32.mxu1 %vm501_vm0, %v32488_v55  ;;  %v20742_v55 = vld [vmem:[%s30077_s30 + $0x188] sm:$0xff] }
 0x447   : > { %27881 = vmatpush3.bf16.msra.mxu0 %v32828_v10  ;;  %27197 = vmatprep.mubr.msk.f32.mxu0 %vm501_vm0, %v32689_v46  ;;  %v36369_v10 = vld [vmem:[#allocation20_spill] sm:$0xff]  ;;  %v36371_v2 = vld [vmem:[#allocation37_spill] sm:$0xff] }
 0x448   : > { %27883 = vmatprep.subr.bf16.mxu0 %v33284_v63  ;;  %v36372_v46 = vld [vmem:[#allocation28_spill] sm:$0xff] }
 0x449   : > { %25846 = vmatmul.mubr.msk.f32.gmra.mrb[34].mxu1 %vm501_vm0, %v32499_v30  ;;  %v33308_v30 = vld [vmem:[%s30069_s27 + $0xf8] sm:$0xff] }
 0x44a   : > { %27198 = vmatmul.mubr.msk.f32.gmra.mrb[2].mxu0 %vm501_vm0, %v32694_v52  ;;  %25848 = vmatprep.mubr.msk.f32.mxu1 %vm501_vm0, %v32502_v21  ;;  %v33334_v21 = vld [vmem:[%s30077_s30 + $0x1d0] sm:$0xff]  ;;  %v20766_v52 = vld [vmem:[%s30077_s30 + $0x278] sm:$0xff] }
 0x44b   : > { %27200 = vmatprep.mubr.msk.f32.mxu0 %vm501_vm0, %v32703_v35  ;;  %v20833_v35 = vld [vmem:[%s30236_s0 + $0x10] sm:$0xff] }
 0x44d   : > { %25849 = vmatmul.mubr.msk.f32.gmra.mrb[36].mxu1 %vm501_vm0, %v32513_v3  ;;  %v20750_v3 = vld [vmem:[%s30077_s30 + $0x1d8] sm:$0xff] }
 0x44e   : > { %27201 = vmatmul.mubr.msk.f32.gmra.mrb[4].mxu0 %vm501_vm0, %v32708_v36  ;;  %25851 = vmatprep.mubr.msk.f32.mxu1 %vm501_vm0, %v33296_v5  ;;  %v33423_v36 = vld [vmem:[%s30069_s27 + $0x1e8] sm:$0xff] }
 0x44f   : > { %27203 = vmatprep.mubr.msk.f32.mxu0 %vm501_vm0, %v32717_v58  ;;  %v36373_v58 = vld [vmem:[#allocation53_spill] sm:$0xff] }
 0x451   : > { %25852 = vmatmul.mubr.msk.f32.gmra.mrb[38].mxu1 %vm501_vm0, %v20742_v55  ;;  %v36384_v55 = vld [vmem:[#allocation42_spill] sm:$0xff] }
 0x452   : > { %27204 = vmatmul.mubr.msk.f32.gmra.mrb[6].mxu0 %vm501_vm0, %v32722_v6  ;;  %25854 = vmatprep.mubr.msk.f32.mxu1 %vm501_vm0, %v32527_v61  ;;  %v33346_v61 = vld [vmem:[%s30069_s27 + $0x148] sm:$0xff]  ;;  %v20834_v6 = vld [vmem:[%s30236_s0 + $0x18] sm:$0xff] }
 0x453   : > { %27206 = vmatprep.mubr.msk.f32.mxu0 %vm501_vm0, %v33308_v30 }
 0x455   : > { %25855 = vmatmul.mubr.msk.f32.gmra.mrb[40].mxu1 %vm501_vm0, %v32538_v29  ;;  %v33372_v29 = vld [vmem:[%s30077_s30 + $0x220] sm:$0xff] }
 0x456   : > { %27207 = vmatmul.mubr.msk.f32.gmra.mrb[8].mxu0 %vm501_vm0, %v32734_v33  ;;  %25857 = vmatprep.mubr.msk.f32.mxu1 %vm501_vm0, %v32541_v31  ;;  %v20758_v31 = vld [vmem:[%s30077_s30 + $0x228] sm:$0xff]  ;;  %v20835_v33 = vld [vmem:[%s30236_s0 + $0x20] sm:$0xff] }
 0x457   : > { %27209 = vmatprep.mubr.msk.f32.mxu0 %vm501_vm0, %v32742_v4  ;;  %v21157_v4 = vld [vmem:[%s35895_s3 + $0xa0] sm:$0xff] }
 0x459   : > { %25858 = vmatmul.mubr.msk.f32.gmra.mrb[42].mxu1 %vm501_vm0, %v32552_v57  ;;  %v33384_v57 = vld [vmem:[%s30069_s27 + $0x198] sm:$0xff] }
 0x45a   : > { %27210 = vmatmul.mubr.msk.f32.gmra.mrb[10].mxu0 %vm501_vm0, %v32747_v0  ;;  %25860 = vmatprep.mubr.msk.f32.mxu1 %vm501_vm0, %v32555_v45  ;;  %v36361_v45 = vld [vmem:[#allocation23_spill] sm:$0xff]  ;;  %v21158_v0 = vld [vmem:[%s35895_s3 + $0xa8] sm:$0xff] }
 0x45b   : > { %27212 = vmatprep.mubr.msk.f32.mxu0 %vm501_vm0, %v32756_v23  ;;  %v36374_v23 = vld [vmem:[#allocation57_spill] sm:$0xff] }
 0x45d   : > { %25861 = vmatmul.mubr.msk.f32.gmra.mrb[44].mxu1 %vm501_vm0, %v32566_v49  ;;  %v36362_v49 = vld [vmem:[#allocation18_spill] sm:$0xff] }
 0x45e   : > { %27213 = vmatmul.mubr.msk.f32.gmra.mrb[12].mxu0 %vm501_vm0, %v32761_v25  ;;  %25863 = vmatprep.mubr.msk.f32.mxu1 %vm501_vm0, %v33334_v21  ;;  %v20836_v25 = vld [vmem:[%s30236_s0 + $0x28] sm:$0xff] }
 0x45f   : > { %27215 = vmatprep.mubr.msk.f32.mxu0 %vm501_vm0, %v32770_v14  ;;  %v33444_v14 = vpack.c.bf16 %v21158_v0, %v21157_v4  ;;  %v20856_v4 = vld [vmem:[%s30236_s0 + $0xe8] sm:$0xff]  ;;  %v22578_v0 = vld [vmem:[%s30069_s27 + $0x2c0] sm:$0xff] }
 0x461   : > { %25864 = vmatmul.mubr.msk.f32.gmra.mrb[46].mxu1 %vm501_vm0, %v20750_v3  ;;  %v20847_v3 = vld [vmem:[%s30236_s0 + $0x90] sm:$0xff] }
 0x462   : > { %27216 = vmatmul.mubr.msk.f32.gmra.mrb[14].mxu0 %vm501_vm0, %v32775_v60  ;;  %25866 = vmatprep.mubr.msk.f32.mxu1 %vm501_vm0, %v32579_v13  ;;  %v36363_v13 = vld [vmem:[#allocation30_spill] sm:$0xff]  ;;  %v36375_v60 = vld [vmem:[#allocation59_spill] sm:$0xff] }
 0x463   : > { %27218 = vmatprep.mubr.msk.f32.mxu0 %vm501_vm0, %v33346_v61 }
 0x465   : > { %25867 = vmatmul.mubr.msk.f32.gmra.mrb[48].mxu1 %vm501_vm0, %v32598_v41  ;;  %v36364_v41 = vld [vmem:[#allocation45_spill] sm:$0xff] }
 0x466   : > { %27219 = vmatmul.mubr.msk.f32.gmra.mrb[16].mxu0 %vm501_vm0, %v32787_v11  ;;  %25869 = vmatprep.mubr.msk.f32.mxu1 %vm501_vm0, %v32602_v15  ;;  %v36365_v15 = vld [vmem:[#allocation19_spill] sm:$0xff] }
 0x467   : > { %27221 = vmatprep.mubr.msk.f32.mxu0 %vm501_vm0, %v32795_v34  ;;  %v20837_v11 = vld [vmem:[%s30236_s0 + $0x30] sm:$0xff]  ;;  %v36376_v34 = vld [vmem:[#allocation61_spill] sm:$0xff] }
 0x469   : > { %25870 = vmatmul.mubr.msk.f32.gmra.mrb[50].mxu1 %vm501_vm0, %v32613_v28  ;;  %v36366_v28 = vld [vmem:[#allocation25_spill] sm:$0xff] }
 0x46a   : > { %27222 = vmatmul.mubr.msk.f32.gmra.mrb[18].mxu0 %vm501_vm0, %v32799_v38  ;;  %25872 = vmatprep.mubr.msk.f32.mxu1 %vm501_vm0, %v32617_v9  ;;  %v36367_v9 = vld [vmem:[#allocation35_spill] sm:$0xff] }
 0x46b   : > { %27224 = vmatprep.mubr.msk.f32.mxu0 %vm501_vm0, %v32811_v24  ;;  %v33410_v38 = vld [vmem:[%s30077_s30 + $0x270] sm:$0xff]  ;;  %v20838_v24 = vld [vmem:[%s30236_s0 + $0x38] sm:$0xff] }
 0x46d   : > { %25873 = vmatmul.mubr.msk.f32.gmra.mrb[52].mxu1 %vm501_vm0, %v32627_v20  ;;  %v36368_v20 = vld [vmem:[#allocation26_spill] sm:$0xff] }
 0x46e   : > { %27225 = vmatmul.mubr.msk.f32.gmra.mrb[20].mxu0 %vm501_vm0, %v32826_v16  ;;  %25875 = vmatprep.mubr.msk.f32.mxu1 %vm501_vm0, %v33372_v29  ;;  %v36370_v16 = vld [vmem:[#allocation27_spill] sm:$0xff] }
 0x46f   : > { %27227 = vmatprep.mubr.msk.f32.mxu0 %vm501_vm0, %v32841_v39  ;;  %v36377_v39 = vld [vmem:[#allocation65_spill] sm:$0xff] }
 0x471   : > { %25876 = vmatmul.mubr.msk.f32.gmra.mrb[54].mxu1 %vm501_vm0, %v20758_v31  ;;  %v36385_v31 = vld [vmem:[#allocation44_spill] sm:$0xff] }
 0x472   : > { %27228 = vmatmul.mubr.msk.f32.gmra.mrb[22].mxu0 %vm501_vm0, %v36361_v45  ;;  %25878 = vmatprep.mubr.msk.f32.mxu1 %vm501_vm0, %v36362_v49  ;;  %v20848_v45 = vld [vmem:[%s30236_s0 + $0x98] sm:$0xff]  ;;  %v36386_v49 = vld [vmem:[#allocation46_spill] sm:$0xff] }
 0x473   : > { %27230 = vmatprep.mubr.msk.f32.mxu0 %vm501_vm0, %v33384_v57 }
 0x475   : > { %25879 = vmatmul.mubr.msk.f32.gmra.mrb[56].mxu1 %vm501_vm0, %v36363_v13  ;;  %v33502_v13 = vld [vmem:[%s30069_s27 + $0x288] sm:$0xff] }
 0x476   : > { %27231 = vmatmul.mubr.msk.f32.gmra.mrb[24].mxu0 %vm501_vm0, %v36364_v41  ;;  %25881 = vmatprep.mubr.msk.f32.mxu1 %vm501_vm0, %v36365_v15  ;;  %v36387_v41 = vld [vmem:[#allocation48_spill] sm:$0xff]  ;;  %v36388_v15 = vld [vmem:[#allocation21_spill] sm:$0xff] }
 0x477   : > { %27233 = vmatprep.mubr.msk.f32.mxu0 %vm501_vm0, %v36366_v28  ;;  %v33512_v28 = vld [vmem:[%s30069_s27 + $0x290] sm:$0xff] }
 0x479   : > { %25882 = vmatmul.mubr.msk.f32.gmra.mrb[58].mxu1 %vm501_vm0, %v36367_v9  ;;  %v33515_v9 = vld [vmem:[%s30069_s27 + $0x298] sm:$0xff] }
 0x47a   : > { %27234 = vmatmul.mubr.msk.f32.gmra.mrb[26].mxu0 %vm501_vm0, %v36368_v20  ;;  %25884 = vmatprep.mubr.msk.f32.mxu1 %vm501_vm0, %v36369_v10  ;;  %v36389_v20 = vld [vmem:[#allocation39_spill] sm:$0xff]  ;;  %v36390_v10 = vld [vmem:[#allocation22_spill] sm:$0xff] }
 0x47b   : > { %27236 = vmatprep.mubr.msk.f32.mxu0 %vm501_vm0, %v36370_v16  ;;  %v33526_v16 = vld [vmem:[%s30069_s27 + $0x2a0] sm:$0xff] }
 0x47d   : > { %25885 = vmatmul.mubr.msk.f32.gmra.mrb[60].mxu1 %vm501_vm0, %v36371_v2  ;;  %v33529_v2 = vld [vmem:[%s30069_s27 + $0x2a8] sm:$0xff] }
 0x47e   : > { %27237 = vmatmul.mubr.msk.f32.gmra.mrb[28].mxu0 %vm501_vm0, %v36372_v46  ;;  %25887 = vmatprep.mubr.msk.f32.mxu1 %vm501_vm0, %v33410_v38  ;;  %v36391_v46 = vld [vmem:[#allocation41_spill] sm:$0xff] }
 0x47f   : > { %27239 = vmatprep.mubr.msk.f32.mxu0 %vm501_vm0, %v32912_v7  ;;  %v20839_v7 = vld [vmem:[%s30236_s0 + $0x40] sm:$0xff] }
 0x481   : > { %25888 = vmatmul.mubr.msk.f32.gmra.mrb[62].mxu1 %vm501_vm0, %v20766_v52  ;;  %v36392_v52 = vld [vmem:[#allocation43_spill] sm:$0xff] }
 0x482   : > { %27240 = vmatmul.mubr.msk.f32.gmra.mrb[30].mxu0 %vm501_vm0, %v36373_v58  ;;  %25894 = vmatprep.mubr.msk.f32.mxu1 %vm501_vm0, %v20833_v35  ;;  %v33540_v35 = vld [vmem:[%s30069_s27 + $0x2b0] sm:$0xff]  ;;  %v33543_v58 = vld [vmem:[%s30236_s0 + $0xe0] sm:$0xff] }
 0x483   : > { %27242 = vmatprep.mubr.msk.f32.mxu0 %vm501_vm0, %v33423_v36 }
 0x485   : > { %25895 = vmatmul.mubr.msk.f32.vlgmr.msra.gmra.mrb[0].mxu1 %vm501_vm0, %v20834_v6  ;;  %v33546_v6 = vld [vmem:[%s30069_s27 + $0x2b8] sm:$0xff] }
 0x486   : > { %27243 = vmatmul.mubr.msk.f32.gmra.mrb[32].mxu0 %vm501_vm0, %v36374_v23  ;;  %27829 = vmatpush3.bf16.msra.mxu1 %v33102_v53  ;;  %v36378_v53 = vld [vmem:[#allocation69_spill] sm:$0xff]  ;;  %v22579_v23 = vld [vmem:[%s30069_s27 + $0x2d8] sm:$0xff] }
 0x487   : > { %25897 = vmatprep.mubr.msk.f32.mxu1 %vm501_vm0, %v20835_v33  ;;  %27245 = vmatprep.mubr.msk.f32.mxu0 %vm501_vm0, %v36375_v60  ;;  %v36393_v33 = vld [vmem:[#allocation24_spill] sm:$0xff] }
 0x488   : > { %27831 = vmatprep.subr.bf16.mxu1 %v33444_v14  ;;  %v22580_v60 = vld [vmem:[%s30069_s27 + $0x2e0] sm:$0xff] }
 0x489   : > { %25898 = vmatmul.mubr.msk.f32.gmra.mrb[2].mxu1 %vm501_vm0, %v20836_v25  ;;  %v36394_v25 = vld [vmem:[#allocation47_spill] sm:$0xff] }
 0x48a   : > { %27246 = vmatmul.mubr.msk.f32.gmra.mrb[34].mxu0 %vm501_vm0, %v36376_v34  ;;  %25900 = vmatprep.mubr.msk.f32.mxu1 %vm501_vm0, %v20837_v11  ;;  %v22581_v11 = vld [vmem:[%s30069_s27 + $0x2e8] sm:$0xff] }
 0x48b   : > { %27248 = vmatprep.mubr.msk.f32.mxu0 %vm501_vm0, %v36377_v39  ;;  %v36395_v34 = vld [vmem:[#allocation49_spill] sm:$0xff]  ;;  %v22582_v39 = vld [vmem:[%s30069_s27 + $0x2f0] sm:$0xff] }
 0x48d   : > { %25901 = vmatmul.mubr.msk.f32.gmra.mrb[4].mxu1 %vm501_vm0, %v20838_v24  ;;  %v36396_v24 = vld [vmem:[#allocation51_spill] sm:$0xff] }
 0x48e   : > { %27249 = vmatmul.mubr.msk.f32.gmra.mrb[36].mxu0 %vm501_vm0, %v36378_v53  ;;  %25903 = vmatprep.mubr.msk.f32.mxu1 %vm501_vm0, %v20839_v7  ;;  %v22583_v7 = vld [vmem:[%s30069_s27 + $0x2f8] sm:$0xff] }
 0x48f   : > { %27251 = vmatprep.mubr.msk.f32.mxu0 %vm501_vm0, %v36379_v48  ;;  %v36397_v53 = vld [vmem:[#allocation32_spill] sm:$0xff] }
 0x490   : > { %v22584_v48 = vld [vmem:[%s30069_s27 + $0x300] sm:$0xff] }
 0x491   : > { %25904 = vmatmul.mubr.msk.f32.gmra.mrb[6].mxu1 %vm501_vm0, %v20840_v27  ;;  %v36398_v27 = vld [vmem:[#allocation33_spill] sm:$0xff] }
 0x492   : > { %27252 = vmatmul.mubr.msk.f32.gmra.mrb[38].mxu0 %vm501_vm0, %v36380_v32  ;;  %25906 = vmatprep.mubr.msk.f32.mxu1 %vm501_vm0, %v20841_v12  ;;  %v33582_v12 = vld [vmem:[%s30236_s0 + $0x130] sm:$0xff]  ;;  %v22585_v32 = vld [vmem:[%s30069_s27 + $0x308] sm:$0xff] }
 0x493   : > { %27254 = vmatprep.mubr.msk.f32.mxu0 %vm501_vm0, %v33468_v1 }
 0x495   : > { %25907 = vmatmul.mubr.msk.f32.gmra.mrb[8].mxu1 %vm501_vm0, %v20842_v54  ;;  %v36399_v54 = vld [vmem:[#allocation55_spill] sm:$0xff] }
 0x496   : > { %27255 = vmatmul.mubr.msk.f32.gmra.mrb[40].mxu0 %vm501_vm0, %v36381_v59  ;;  %25909 = vmatprep.mubr.msk.f32.mxu1 %vm501_vm0, %v20843_v22  ;;  %v20864_v22 = vld [vmem:[%s30236_s0 + $0x138] sm:$0xff]  ;;  %v22586_v59 = vld [vmem:[%s30069_s27 + $0x310] sm:$0xff] }
 0x497   : > { %27257 = vmatprep.mubr.msk.f32.mxu0 %vm501_vm0, %v36382_v62  ;;  %v36400_v62 = vld [vmem:[#allocation63_spill] sm:$0xff] }
 0x499   : > { %25910 = vmatmul.mubr.msk.f32.gmra.mrb[10].mxu1 %vm501_vm0, %v20844_v40  ;;  %v33594_v40 = vld [vmem:[%s30077_s30 + $0xa8] sm:$0xff] }
 0x49a   : > { %27258 = vmatmul.mubr.msk.f32.gmra.mrb[42].mxu0 %vm501_vm0, %v36383_v56  ;;  %25912 = vmatprep.mubr.msk.f32.mxu1 %vm501_vm0, %v20845_v44  ;;  %v33603_v44 = vld [vmem:[%s30077_s30 + $0xb0] sm:$0xff]  ;;  %v33606_v56 = vld [vmem:[%s30077_s30 + $0xb8] sm:$0xff] }
 0x49b   : > { %27260 = vmatprep.mubr.msk.f32.mxu0 %vm501_vm0, %v36384_v55  ;;  %v36402_v55 = vld [vmem:[#allocation29_spill] sm:$0xff] }
 0x49d   : > { %25913 = vmatmul.mubr.msk.f32.gmra.mrb[12].mxu1 %vm501_vm0, %v20846_v43  ;;  %v36401_v43 = vld [vmem:[#allocation67_spill] sm:$0xff] }
 0x49e   : > { %27261 = vmatmul.mubr.msk.f32.gmra.mrb[44].mxu0 %vm501_vm0, %v36385_v31  ;;  %25915 = vmatprep.mubr.msk.f32.mxu1 %vm501_vm0, %v20847_v3  ;;  %v22977_v3 = vld [vmem:[%s35895_s3 + $0x180] sm:$0xff]  ;;  %v22978_v31 = vld [vmem:[%s35895_s3 + $0x188] sm:$0xff] }
 0x49f   : > { %27263 = vmatprep.mubr.msk.f32.mxu0 %vm501_vm0, %v36386_v49  ;;  %v33626_v49 = vpack.c.bf16 %v22978_v31, %v22977_v3  ;;  %v33759_v3 = vld [vmem:[%s30077_s30 + $0x178] sm:$0xff]  ;;  %v36414_v31 = vld [vmem:[#allocation58_spill] sm:$0xff] }
 0x4a1   : > { %25916 = vmatmul.mubr.msk.f32.gmra.mrb[14].mxu1 %vm501_vm0, %v20848_v45  ;;  %v33624_v45 = vld [vmem:[%s30077_s30 + $0xc0] sm:$0xff] }
 0x4a2   : > { %27264 = vmatmul.mubr.msk.f32.gmra.mrb[46].mxu0 %vm501_vm0, %v36387_v41  ;;  %25918 = vmatprep.mubr.msk.f32.mxu1 %vm501_vm0, %v36388_v15  ;;  %v33629_v41 = vld [vmem:[%s30077_s30 + $0xc8] sm:$0xff] }
 0x4a3   : > { %27266 = vmatprep.mubr.msk.f32.mxu0 %vm501_vm0, %v33502_v13  ;;  %v36403_v15 = vld [vmem:[#allocation34_spill] sm:$0xff] }
 0x4a5   : > { %25919 = vmatmul.mubr.msk.f32.gmra.mrb[16].mxu1 %vm501_vm0, %v36389_v20  ;;  %v33641_v20 = vld [vmem:[%s30077_s30 + $0xd0] sm:$0xff] }
 0x4a6   : > { %27267 = vmatmul.mubr.msk.f32.gmra.mrb[48].mxu0 %vm501_vm0, %v33512_v28  ;;  %25921 = vmatprep.mubr.msk.f32.mxu1 %vm501_vm0, %v36390_v10  ;;  %v33644_v10 = vld [vmem:[%s30236_s0 + $0x180] sm:$0xff] }
 0x4a7   : > { %27269 = vmatprep.mubr.msk.f32.mxu0 %vm501_vm0, %v33515_v9 }
 0x4a9   : > { %25922 = vmatmul.mubr.msk.f32.gmra.mrb[18].mxu1 %vm501_vm0, %v36391_v46  ;;  %v33647_v46 = vld [vmem:[%s30077_s30 + $0xd8] sm:$0xff] }
 0x4aa   : > { %27270 = vmatmul.mubr.msk.f32.gmra.mrb[50].mxu0 %vm501_vm0, %v33526_v16  ;;  %25924 = vmatprep.mubr.msk.f32.mxu1 %vm501_vm0, %v36392_v52  ;;  %v36405_v52 = vld [vmem:[#allocation75_spill] sm:$0xff] }
 0x4ab   : > { %27272 = vmatprep.mubr.msk.f32.mxu0 %vm501_vm0, %v33529_v2 }
 0x4ad   : > { %25925 = vmatmul.mubr.msk.f32.gmra.mrb[20].mxu1 %vm501_vm0, %v36393_v33  ;;  %v20872_v33 = vld [vmem:[%s30236_s0 + $0x188] sm:$0xff] }
 0x4ae   : > { %27273 = vmatmul.mubr.msk.f32.gmra.mrb[52].mxu0 %vm501_vm0, %v33540_v35  ;;  %25927 = vmatprep.mubr.msk.f32.mxu1 %vm501_vm0, %v33543_v58 }
 0x4af   : > { %27275 = vmatprep.mubr.msk.f32.mxu0 %vm501_vm0, %v33546_v6 }
 0x4b1   : > { %25928 = vmatmul.mubr.msk.f32.gmra.mrb[22].mxu1 %vm501_vm0, %v20856_v4  ;;  %v33659_v4 = vld [vmem:[%s30077_s30 + $0xf8] sm:$0xff] }
 0x4b2   : > { %27276 = vmatmul.mubr.msk.f32.gmra.mrb[54].mxu0 %vm501_vm0, %v22578_v0  ;;  %25930 = vmatprep.mubr.msk.f32.mxu1 %vm501_vm0, %v36394_v25  ;;  %v36406_v0 = vld [vmem:[#allocation79_spill] sm:$0xff]  ;;  %v33672_v25 = vld [vmem:[%s30077_s30 + $0x108] sm:$0xff] }
 0x4b3   : > { %27278 = vmatprep.mubr.msk.f32.mxu0 %vm501_vm0, %v22579_v23  ;;  %v33669_v23 = vld [vmem:[%s30077_s30 + $0x100] sm:$0xff] }
 0x4b5   : > { %25931 = vmatmul.mubr.msk.f32.gmra.mrb[24].mxu1 %vm501_vm0, %v36395_v34  ;;  %v33686_v34 = vld [vmem:[%s30077_s30 + $0x118] sm:$0xff] }
 0x4b6   : > { %27279 = vmatmul.mubr.msk.f32.gmra.mrb[56].mxu0 %vm501_vm0, %v22580_v60  ;;  %25933 = vmatprep.mubr.msk.f32.mxu1 %vm501_vm0, %v36396_v24  ;;  %v36407_v60 = vld [vmem:[#allocation81_spill] sm:$0xff]  ;;  %v36409_v24 = vld [vmem:[#allocation31_spill] sm:$0xff] }
 0x4b7   : > { %27281 = vmatprep.mubr.msk.f32.mxu0 %vm501_vm0, %v22581_v11  ;;  %v33683_v11 = vld [vmem:[%s30077_s30 + $0x110] sm:$0xff] }
 0x4b9   : > { %25934 = vmatmul.mubr.msk.f32.gmra.mrb[26].mxu1 %vm501_vm0, %v36397_v53  ;;  %v33700_v53 = vld [vmem:[%s30236_s0 + $0x1d0] sm:$0xff] }
 0x4ba   : > { %27282 = vmatmul.mubr.msk.f32.gmra.mrb[58].mxu0 %vm501_vm0, %v22582_v39  ;;  %25936 = vmatprep.mubr.msk.f32.mxu1 %vm501_vm0, %v36398_v27  ;;  %v36410_v39 = vld [vmem:[#allocation50_spill] sm:$0xff] }
 0x4bb   : > { %27284 = vmatprep.mubr.msk.f32.mxu0 %vm501_vm0, %v22583_v7  ;;  %v33697_v7 = vld [vmem:[%s30077_s30 + $0x120] sm:$0xff]  ;;  %v33703_v27 = vld [vmem:[%s30077_s30 + $0x128] sm:$0xff] }
 0x4bd   : > { %25937 = vmatmul.mubr.msk.f32.gmra.mrb[28].mxu1 %vm501_vm0, %v36399_v54  ;;  %v33715_v54 = vld [vmem:[%s30077_s30 + $0x148] sm:$0xff] }
 0x4be   : > { %27285 = vmatmul.mubr.msk.f32.gmra.mrb[60].mxu0 %vm501_vm0, %v22584_v48  ;;  %25939 = vmatprep.mubr.msk.f32.mxu1 %vm501_vm0, %v33582_v12  ;;  %v36411_v48 = vld [vmem:[#allocation52_spill] sm:$0xff] }
 0x4bf   : > { %27287 = vmatprep.mubr.msk.f32.mxu0 %vm501_vm0, %v22585_v32  ;;  %v20880_v32 = vld [vmem:[%s30236_s0 + $0x1d8] sm:$0xff] }
 0x4c1   : > { %25940 = vmatmul.mubr.msk.f32.gmra.mrb[30].mxu1 %vm501_vm0, %v20864_v22  ;;  %v33725_v22 = vld [vmem:[%s30077_s30 + $0x150] sm:$0xff] }
 0x4c2   : > { %27288 = vmatmul.mubr.msk.f32.gmra.mrb[62].mxu0 %vm501_vm0, %v22586_v59  ;;  %25942 = vmatprep.mubr.msk.f32.mxu1 %vm501_vm0, %v36400_v62  ;;  %v33728_v59 = vld [vmem:[%s30077_s30 + $0x158] sm:$0xff]  ;;  %v33742_v62 = vld [vmem:[%s30077_s30 + $0x168] sm:$0xff] }
 0x4c3   : > { %27294 = vmatprep.mubr.msk.f32.mxu0 %vm501_vm0, %v33594_v40 }
 0x4c5   : > { %25943 = vmatmul.mubr.msk.f32.gmra.mrb[32].mxu1 %vm501_vm0, %v36401_v43  ;;  %v33753_v43 = vld [vmem:[%s30077_s30 + $0x170] sm:$0xff] }
 0x4c6   : > { %27295 = vmatmul.mubr.msk.f32.vlgmr.msra.gmra.mrb[0].mxu0 %vm501_vm0, %v33603_v44  ;;  %25945 = vmatprep.mubr.msk.f32.mxu1 %vm501_vm0, %v36402_v55  ;;  %v33756_v55 = vld [vmem:[%s30236_s0 + $0x220] sm:$0xff] }
 0x4c7   : > { %27885 = vmatpush3.bf16.msra.mxu0 %v33284_v63  ;;  %27297 = vmatprep.mubr.msk.f32.mxu0 %vm501_vm0, %v33606_v56  ;;  %v36404_v63 = vld [vmem:[#allocation36_spill] sm:$0xff] }
 0x4c8   : > { %27887 = vmatprep.subr.bf16.mxu0 %v33626_v49 }
 0x4c9   : > { %25946 = vmatmul.mubr.msk.f32.gmra.mrb[34].mxu1 %vm501_vm0, %v36403_v15  ;;  %v33771_v15 = vld [vmem:[%s30077_s30 + $0x198] sm:$0xff] }
 0x4ca   : > { %27298 = vmatmul.mubr.msk.f32.gmra.mrb[2].mxu0 %vm501_vm0, %v33624_v45  ;;  %25948 = vmatprep.mubr.msk.f32.mxu1 %vm501_vm0, %v36404_v63  ;;  %v36415_v63 = vld [vmem:[#allocation60_spill] sm:$0xff] }
 0x4cb   : > { %27300 = vmatprep.mubr.msk.f32.mxu0 %vm501_vm0, %v33629_v41 }
 0x4cd   : > { %25949 = vmatmul.mubr.msk.f32.gmra.mrb[36].mxu1 %vm501_vm0, %v36405_v52  ;;  %v33781_v52 = vld [vmem:[%s30077_s30 + $0x1a0] sm:$0xff] }
 0x4ce   : > { %27301 = vmatmul.mubr.msk.f32.gmra.mrb[4].mxu0 %vm501_vm0, %v33641_v20  ;;  %25951 = vmatprep.mubr.msk.f32.mxu1 %vm501_vm0, %v33644_v10 }
 0x4cf   : > { %27303 = vmatprep.mubr.msk.f32.mxu0 %vm501_vm0, %v33647_v46 }
 0x4d1   : > { %25952 = vmatmul.mubr.msk.f32.gmra.mrb[38].mxu1 %vm501_vm0, %v20872_v33  ;;  %v33784_v33 = vld [vmem:[%s30077_s30 + $0x1a8] sm:$0xff] }
 0x4d2   : > { %27304 = vmatmul.mubr.msk.f32.gmra.mrb[6].mxu0 %vm501_vm0, %v33214_v17  ;;  %25954 = vmatprep.mubr.msk.f32.mxu1 %vm501_vm0, %v36406_v0  ;;  %v36408_v17 = vld [vmem:[#allocation83_spill] sm:$0xff] }
 0x4d3   : > { %27306 = vmatprep.mubr.msk.f32.mxu0 %vm501_vm0, %v33659_v4  ;;  %v33795_v0 = vld [vmem:[%s30077_s30 + $0x1b0] sm:$0xff] }
 0x4d5   : > { %25955 = vmatmul.mubr.msk.f32.gmra.mrb[40].mxu1 %vm501_vm0, %v36407_v60  ;;  %v33798_v60 = vld [vmem:[%s30077_s30 + $0x1b8] sm:$0xff] }
 0x4d6   : > { %27307 = vmatmul.mubr.msk.f32.gmra.mrb[8].mxu0 %vm501_vm0, %v33669_v23  ;;  %25957 = vmatprep.mubr.msk.f32.mxu1 %vm501_vm0, %v36408_v17  ;;  %v33812_v17 = vld [vmem:[%s30236_s0 + $0x270] sm:$0xff] }
 0x4d7   : > { %27309 = vmatprep.mubr.msk.f32.mxu0 %vm501_vm0, %v33672_v25 }
 0x4d9   : > { %25958 = vmatmul.mubr.msk.f32.gmra.mrb[42].mxu1 %vm501_vm0, %v36409_v24  ;;  %v33815_v24 = vld [vmem:[%s30077_s30 + $0x1c8] sm:$0xff] }
 0x4da   : > { %27310 = vmatmul.mubr.msk.f32.gmra.mrb[10].mxu0 %vm501_vm0, %v33683_v11  ;;  %25960 = vmatprep.mubr.msk.f32.mxu1 %vm501_vm0, %v36410_v39  ;;  %v33828_v39 = vld [vmem:[%s30077_s30 + $0x1e8] sm:$0xff] }
 0x4db   : > { %27312 = vmatprep.mubr.msk.f32.mxu0 %vm501_vm0, %v33686_v34 }
 0x4dd   : > { %25961 = vmatmul.mubr.msk.f32.gmra.mrb[44].mxu1 %vm501_vm0, %v36411_v48  ;;  %v33838_v48 = vld [vmem:[%s30077_s30 + $0x1f0] sm:$0xff] }
 0x4de   : > { %27313 = vmatmul.mubr.msk.f32.gmra.mrb[12].mxu0 %vm501_vm0, %v33697_v7  ;;  %25963 = vmatprep.mubr.msk.f32.mxu1 %vm501_vm0, %v33700_v53  ;;  %36417 = vst [vmem:[#allocation64_spill] sm:$0xff] %v33838_v48 }
 0x4df   : > { %27315 = vmatprep.mubr.msk.f32.mxu0 %vm501_vm0, %v33703_v27 }
 0x4e1   : > { %25964 = vmatmul.mubr.msk.f32.gmra.mrb[46].mxu1 %vm501_vm0, %v20880_v32  ;;  %v20965_v32 = vld [vmem:[%s30069_s27 + $0x60] sm:$0xff] }
 0x4e2   : > { %27316 = vmatmul.mubr.msk.f32.gmra.mrb[14].mxu0 %vm501_vm0, %v33249_v18  ;;  %25966 = vmatprep.mubr.msk.f32.mxu1 %vm501_vm0, %v33089_v50  ;;  %v36412_v18 = vld [vmem:[#allocation54_spill] sm:$0xff]  ;;  %v33739_v50 = vld [vmem:[%s30077_s30 + $0x160] sm:$0xff] }
 0x4e3   : > { %27318 = vmatprep.mubr.msk.f32.mxu0 %vm501_vm0, %v33715_v54 }
 0x4e5   : > { %25967 = vmatmul.mubr.msk.f32.gmra.mrb[48].mxu1 %vm501_vm0, %v33108_v8  ;;  %v36413_v8 = vld [vmem:[#allocation56_spill] sm:$0xff] }
 0x4e6   : > { %27319 = vmatmul.mubr.msk.f32.gmra.mrb[16].mxu0 %vm501_vm0, %v33725_v22  ;;  %25969 = vmatprep.mubr.msk.f32.mxu1 %vm501_vm0, %v36412_v18  ;;  %v33842_v18 = vld [vmem:[%s30077_s30 + $0x1f8] sm:$0xff] }
 0x4e7   : > { %27321 = vmatprep.mubr.msk.f32.mxu0 %vm501_vm0, %v33728_v59  ;;  %36418 = vst [vmem:[#allocation66_spill] sm:$0xff] %v33842_v18 }
 0x4e9   : > { %25970 = vmatmul.mubr.msk.f32.gmra.mrb[50].mxu1 %vm501_vm0, %v33123_v37  ;;  %v20888_v37 = vld [vmem:[%s30236_s0 + $0x228] sm:$0xff] }
 0x4ea   : > { %27322 = vmatmul.mubr.msk.f32.gmra.mrb[18].mxu0 %vm501_vm0, %v33739_v50  ;;  %25972 = vmatprep.mubr.msk.f32.mxu1 %vm501_vm0, %v36413_v8  ;;  %v21288_v8 = vld [vmem:[%s35895_s3 + $0xb8] sm:$0xff] }
 0x4eb   : > { %27324 = vmatprep.mubr.msk.f32.mxu0 %vm501_vm0, %v33742_v62 }
 0x4ed   : > { %25973 = vmatmul.mubr.msk.f32.gmra.mrb[52].mxu1 %vm501_vm0, %v36414_v31  ;;  %v20966_v31 = vld [vmem:[%s30069_s27 + $0x68] sm:$0xff] }
 0x4ee   : > { %27325 = vmatmul.mubr.msk.f32.gmra.mrb[20].mxu0 %vm501_vm0, %v33753_v43  ;;  %25975 = vmatprep.mubr.msk.f32.mxu1 %vm501_vm0, %v33756_v55 }
 0x4ef   : > { %27327 = vmatprep.mubr.msk.f32.mxu0 %vm501_vm0, %v33759_v3 }
 0x4f1   : > { %25976 = vmatmul.mubr.msk.f32.gmra.mrb[54].mxu1 %vm501_vm0, %v20888_v37 }
 0x4f2   : > { %27328 = vmatmul.mubr.msk.f32.gmra.mrb[22].mxu0 %vm501_vm0, %v33296_v5  ;;  %25978 = vmatprep.mubr.msk.f32.mxu1 %vm501_vm0, %v36415_v63  ;;  %v36416_v5 = vld [vmem:[#allocation62_spill] sm:$0xff]  ;;  %v33861_v63 = vld [vmem:[%s30077_s30 + $0x200] sm:$0xff] }
 0x4f3   : > { %27330 = vmatprep.mubr.msk.f32.mxu0 %vm501_vm0, %v33771_v15  ;;  %36419 = vst [vmem:[#allocation68_spill] sm:$0xff] %v33861_v63 }
 0x4f5   : > { %25979 = vmatmul.mubr.msk.f32.gmra.mrb[56].mxu1 %vm501_vm0, %v33159_v26  ;;  %v33809_v26 = vld [vmem:[%s30077_s30 + $0x1c0] sm:$0xff] }
 0x4f6   : > { %27331 = vmatmul.mubr.msk.f32.gmra.mrb[24].mxu0 %vm501_vm0, %v33781_v52  ;;  %25981 = vmatprep.mubr.msk.f32.mxu1 %vm501_vm0, %v36416_v5  ;;  %v20967_v5 = vld [vmem:[%s30069_s27 + $0x70] sm:$0xff] }
 0x4f7   : > { %27333 = vmatprep.mubr.msk.f32.mxu0 %vm501_vm0, %v33784_v33 }
 0x4f9   : > { %25982 = vmatmul.mubr.msk.f32.gmra.mrb[58].mxu1 %vm501_vm0, %v33173_v47  ;;  %v20963_v47 = vld [vmem:[%s30069_s27 + $0x50] sm:$0xff] }
 0x4fa   : > { %27334 = vmatmul.mubr.msk.f32.gmra.mrb[26].mxu0 %vm501_vm0, %v33795_v0  ;;  %25984 = vmatprep.mubr.msk.f32.mxu1 %vm501_vm0, %v33177_v51  ;;  %v20896_v51 = vld [vmem:[%s30236_s0 + $0x278] sm:$0xff] }
 0x4fb   : > { %27336 = vmatprep.mubr.msk.f32.mxu0 %vm501_vm0, %v33798_v60 }
 0x4fd   : > { %25985 = vmatmul.mubr.msk.f32.gmra.mrb[60].mxu1 %vm501_vm0, %v33187_v19  ;;  %v20964_v19 = vld [vmem:[%s30069_s27 + $0x58] sm:$0xff] }
 0x4fe   : > { %27337 = vmatmul.mubr.msk.f32.gmra.mrb[28].mxu0 %vm501_vm0, %v33809_v26  ;;  %25987 = vmatprep.mubr.msk.f32.mxu1 %vm501_vm0, %v33812_v17 }
 0x4ff   : > { %27339 = vmatprep.mubr.msk.f32.mxu0 %vm501_vm0, %v33815_v24 }
 0x501   : > { %25988 = vmatmul.mubr.msk.f32.gmra.mrb[62].mxu1 %vm501_vm0, %v20896_v51  ;;  %v33865_v51 = vld [vmem:[%s30077_s30 + $0x208] sm:$0xff] }
 0x502   : > { %27340 = vmatmul.mubr.msk.f32.gmra.mrb[30].mxu0 %vm501_vm0, %v33334_v21  ;;  %25994 = vmatprep.mubr.msk.f32.mxu1 %vm501_vm0, %v20963_v47  ;;  %v21287_v21 = vld [vmem:[%s35895_s3 + $0xb0] sm:$0xff]  ;;  %36420 = vst [vmem:[#allocation70_spill] sm:$0xff] %v33865_v51 }
 0x503   : > { %27342 = vmatprep.mubr.msk.f32.mxu0 %vm501_vm0, %v33828_v39  ;;  %v33855_v37 = vpack.c.bf16 %v21288_v8, %v21287_v21  ;;  %v33876_v47 = vld [vmem:[%s30077_s30 + $0x210] sm:$0xff]  ;;  %v20970_v21 = vld [vmem:[%s30069_s27 + $0x88] sm:$0xff]  ;;  %v20971_v8 = vld [vmem:[%s30069_s27 + $0xa0] sm:$0xff] }
 0x504   : > { %36421 = vst [vmem:[#allocation72_spill] sm:$0xff] %v33876_v47 }
 0x505   : > { %25995 = vmatmul.mubr.msk.f32.vlgmr.msra.gmra.mrb[0].mxu1 %vm501_vm0, %v20964_v19  ;;  %v20969_v19 = vld [vmem:[%s30069_s27 + $0x80] sm:$0xff] }
 0x506   : > { %27343 = vmatmul.mubr.msk.f32.gmra.mrb[32].mxu0 %vm501_vm0, %v33838_v48  ;;  %27833 = vmatpush3.bf16.msra.mxu1 %v33444_v14  ;;  %v20968_v14 = vld [vmem:[%s30069_s27 + $0x78] sm:$0xff] }
 0x507   : > { %25997 = vmatprep.mubr.msk.f32.mxu1 %vm501_vm0, %v20965_v32  ;;  %27345 = vmatprep.mubr.msk.f32.mxu0 %vm501_vm0, %v33842_v18  ;;  %v33880_v32 = vld [vmem:[%s30077_s30 + $0x218] sm:$0xff] }
 0x508   : > { %27835 = vmatprep.subr.bf16.mxu1 %v33855_v37  ;;  %36422 = vst [vmem:[#allocation74_spill] sm:$0xff] %v33880_v32  ;;  %v34017_v18 = vld [vmem:[%s30077_s30 + $0x2b8] sm:$0xff] }
 0x509   : > { %25998 = vmatmul.mubr.msk.f32.gmra.mrb[2].mxu1 %vm501_vm0, %v20966_v31  ;;  %v33891_v31 = vld [vmem:[%s30077_s30 + $0x238] sm:$0xff]  ;;  %36438 = vst [vmem:[#allocation35_spill] sm:$0xff] %v34017_v18 }
 0x50a   : > { %27346 = vmatmul.mubr.msk.f32.gmra.mrb[34].mxu0 %vm501_vm0, %v33861_v63  ;;  %26000 = vmatprep.mubr.msk.f32.mxu1 %vm501_vm0, %v20967_v5  ;;  %36423 = vst [vmem:[#allocation76_spill] sm:$0xff] %v33891_v31  ;;  %v33900_v5 = vld [vmem:[%s30077_s30 + $0x240] sm:$0xff]  ;;  %v33997_v63 = vld [vmem:[%s30077_s30 + $0x2a8] sm:$0xff]  ;;  %v22709_v48 = vld [vmem:[%s30077_s30 + $0x2d8] sm:$0xff] }
 0x50b   : > { %27348 = vmatprep.mubr.msk.f32.mxu0 %vm501_vm0, %v33865_v51  ;;  %36424 = vst [vmem:[#allocation78_spill] sm:$0xff] %v33900_v5  ;;  %v33977_v51 = vld [vmem:[%s30077_s30 + $0x298] sm:$0xff]  ;;  %36435 = vst [vmem:[#allocation45_spill] sm:$0xff] %v33997_v63 }
 0x50c   : > { %36432 = vst [vmem:[#allocation23_spill] sm:$0xff] %v33977_v51 }
 0x50d   : > { %26001 = vmatmul.mubr.msk.f32.gmra.mrb[4].mxu1 %vm501_vm0, %v20968_v14  ;;  %v33903_v14 = vld [vmem:[%s30069_s27 + $0xb0] sm:$0xff] }
 0x50e   : > { %27349 = vmatmul.mubr.msk.f32.gmra.mrb[36].mxu0 %vm501_vm0, %v33876_v47  ;;  %26003 = vmatprep.mubr.msk.f32.mxu1 %vm501_vm0, %v20969_v19  ;;  %v33906_v19 = vld [vmem:[%s30077_s30 + $0x248] sm:$0xff] }
 0x50f   : > { %27351 = vmatprep.mubr.msk.f32.mxu0 %vm501_vm0, %v33880_v32  ;;  %36425 = vst [vmem:[#allocation80_spill] sm:$0xff] %v33906_v19  ;;  %v33946_v32 = vld [vmem:[%s30077_s30 + $0x268] sm:$0xff] }
 0x510   : > { %36429 = vst [vmem:[#allocation86_spill] sm:$0xff] %v33946_v32  ;;  %v33961_v47 = vld [vmem:[%s30077_s30 + $0x288] sm:$0xff] }
 0x511   : > { %26004 = vmatmul.mubr.msk.f32.gmra.mrb[6].mxu1 %vm501_vm0, %v20970_v21  ;;  %v33920_v21 = vld [vmem:[%s30077_s30 + $0x250] sm:$0xff]  ;;  %36430 = vst [vmem:[#allocation87_spill] sm:$0xff] %v33961_v47 }
 0x512   : > { %27352 = vmatmul.mubr.msk.f32.gmra.mrb[38].mxu0 %vm501_vm0, %v33372_v29  ;;  %26006 = vmatprep.mubr.msk.f32.mxu1 %vm501_vm0, %v20971_v8  ;;  %v33915_v29 = vld [vmem:[%s30069_s27 + $0xb8] sm:$0xff]  ;;  %36426 = vst [vmem:[#allocation82_spill] sm:$0xff] %v33920_v21  ;;  %v33923_v8 = vld [vmem:[%s30069_s27 + $0xc0] sm:$0xff] }
 0x513   : > { %27354 = vmatprep.mubr.msk.f32.mxu0 %vm501_vm0, %v33891_v31  ;;  %v33926_v31 = vld [vmem:[%s30077_s30 + $0x258] sm:$0xff] }
 0x514   : > { %36427 = vst [vmem:[#allocation84_spill] sm:$0xff] %v33926_v31 }
 0x515   : > { %26007 = vmatmul.mubr.msk.f32.gmra.mrb[8].mxu1 %vm501_vm0, %v33261_v42  ;;  %v33935_v42 = vld [vmem:[%s30069_s27 + $0xc8] sm:$0xff] }
 0x516   : > { %27355 = vmatmul.mubr.msk.f32.gmra.mrb[40].mxu0 %vm501_vm0, %v33900_v5  ;;  %26009 = vmatprep.mubr.msk.f32.mxu1 %vm501_vm0, %v33903_v14  ;;  %v33943_v5 = vld [vmem:[%s30069_s27 + $0xd0] sm:$0xff] }
 0x517   : > { %27357 = vmatprep.mubr.msk.f32.mxu0 %vm501_vm0, %v33906_v19  ;;  %v33940_v19 = vld [vmem:[%s30077_s30 + $0x260] sm:$0xff] }
 0x518   : > { %36428 = vst [vmem:[#allocation85_spill] sm:$0xff] %v33940_v19 }
 0x519   : > { %26010 = vmatmul.mubr.msk.f32.gmra.mrb[10].mxu1 %vm501_vm0, %v33915_v29 }
 0x51a   : > { %27358 = vmatmul.mubr.msk.f32.gmra.mrb[42].mxu0 %vm501_vm0, %v33920_v21  ;;  %26012 = vmatprep.mubr.msk.f32.mxu1 %vm501_vm0, %v33923_v8  ;;  %v33955_v21 = vld [vmem:[%s30069_s27 + $0xd8] sm:$0xff] }
 0x51b   : > { %27360 = vmatprep.mubr.msk.f32.mxu0 %vm501_vm0, %v33926_v31  ;;  %v20979_v31 = vld [vmem:[%s30069_s27 + $0xf0] sm:$0xff] }
 0x51d   : > { %26013 = vmatmul.mubr.msk.f32.gmra.mrb[12].mxu1 %vm501_vm0, %v33935_v42 }
 0x51e   : > { %27361 = vmatmul.mubr.msk.f32.gmra.mrb[44].mxu0 %vm501_vm0, %v33940_v19  ;;  %26015 = vmatprep.mubr.msk.f32.mxu1 %vm501_vm0, %v33943_v5  ;;  %v33971_v19 = vld [vmem:[%s30077_s30 + $0x290] sm:$0xff] }
 0x51f   : > { %27363 = vmatprep.mubr.msk.f32.mxu0 %vm501_vm0, %v33946_v32  ;;  %36431 = vst [vmem:[#allocation88_spill] sm:$0xff] %v33971_v19  ;;  %v33974_v32 = vld [vmem:[%s30069_s27 + $0x100] sm:$0xff] }
 0x521   : > { %26016 = vmatmul.mubr.msk.f32.gmra.mrb[14].mxu1 %vm501_vm0, %v33955_v21 }
 0x522   : > { %27364 = vmatmul.mubr.msk.f32.gmra.mrb[46].mxu0 %vm501_vm0, %v33410_v38  ;;  %26018 = vmatprep.mubr.msk.f32.mxu1 %vm501_vm0, %v20979_v31  ;;  %v33986_v38 = vld [vmem:[%s30069_s27 + $0x108] sm:$0xff]  ;;  %v33991_v31 = vld [vmem:[%s30077_s30 + $0x2a0] sm:$0xff] }
 0x523   : > { %27366 = vmatprep.mubr.msk.f32.mxu0 %vm501_vm0, %v33961_v47  ;;  %36433 = vst [vmem:[#allocation18_spill] sm:$0xff] %v33991_v31  ;;  %v33994_v47 = vld [vmem:[%s30069_s27 + $0x110] sm:$0xff] }
 0x524   : > { %36434 = vst [vmem:[#allocation30_spill] sm:$0xff] %v33994_v47 }
 0x525   : > { %26019 = vmatmul.mubr.msk.f32.gmra.mrb[16].mxu1 %vm501_vm0, %v33308_v30  ;;  %v34006_v30 = vld [vmem:[%s30069_s27 + $0x118] sm:$0xff] }
 0x526   : > { %27367 = vmatmul.mubr.msk.f32.gmra.mrb[48].mxu0 %vm501_vm0, %v33971_v19  ;;  %26021 = vmatprep.mubr.msk.f32.mxu1 %vm501_vm0, %v33974_v32  ;;  %v34014_v19 = vld [vmem:[%s30069_s27 + $0x120] sm:$0xff] }
 0x527   : > { %27369 = vmatprep.mubr.msk.f32.mxu0 %vm501_vm0, %v33977_v51  ;;  %v34011_v51 = vld [vmem:[%s30077_s30 + $0x2b0] sm:$0xff]  ;;  %36437 = vst [vmem:[#allocation25_spill] sm:$0xff] %v34014_v19 }
 0x528   : > { %36436 = vst [vmem:[#allocation19_spill] sm:$0xff] %v34011_v51 }
 0x529   : > { %26022 = vmatmul.mubr.msk.f32.gmra.mrb[18].mxu1 %vm501_vm0, %v33986_v38 }
 0x52a   : > { %27370 = vmatmul.mubr.msk.f32.gmra.mrb[50].mxu0 %vm501_vm0, %v33991_v31  ;;  %26024 = vmatprep.mubr.msk.f32.mxu1 %vm501_vm0, %v33994_v47  ;;  %v22708_v31 = vld [vmem:[%s30077_s30 + $0x2c0] sm:$0xff] }
 0x52b   : > { %27372 = vmatprep.mubr.msk.f32.mxu0 %vm501_vm0, %v33997_v63  ;;  %v34026_v63 = vld [vmem:[%s30069_s27 + $0x128] sm:$0xff]  ;;  %v20987_v47 = vld [vmem:[%s30069_s27 + $0x140] sm:$0xff] }
 0x52c   : > { %36439 = vst [vmem:[#allocation26_spill] sm:$0xff] %v34026_v63 }
 0x52d   : > { %26025 = vmatmul.mubr.msk.f32.gmra.mrb[20].mxu1 %vm501_vm0, %v34006_v30 }
 0x52e   : > { %27373 = vmatmul.mubr.msk.f32.gmra.mrb[52].mxu0 %vm501_vm0, %v34011_v51  ;;  %26027 = vmatprep.mubr.msk.f32.mxu1 %vm501_vm0, %v34014_v19  ;;  %v22710_v51 = vld [vmem:[%s30077_s30 + $0x2e0] sm:$0xff]  ;;  %v34040_v19 = vld [vmem:[%s30069_s27 + $0x150] sm:$0xff] }
 0x52f   : > { %27375 = vmatprep.mubr.msk.f32.mxu0 %vm501_vm0, %v34017_v18  ;;  %36440 = vst [vmem:[#allocation20_spill] sm:$0xff] %v34040_v19  ;;  %v22711_v18 = vld [vmem:[%s30077_s30 + $0x2e8] sm:$0xff] }
 0x531   : > { %26028 = vmatmul.mubr.msk.f32.gmra.mrb[22].mxu1 %vm501_vm0, %v34026_v63  ;;  %v22713_v63 = vld [vmem:[%s30077_s30 + $0x2f8] sm:$0xff] }
 0x532   : > { %27376 = vmatmul.mubr.msk.f32.gmra.mrb[54].mxu0 %vm501_vm0, %v22708_v31  ;;  %26030 = vmatprep.mubr.msk.f32.mxu1 %vm501_vm0, %v20987_v47  ;;  %v34049_v31 = vld [vmem:[%s30069_s27 + $0x158] sm:$0xff]  ;;  %v34054_v47 = vld [vmem:[%s30069_s27 + $0x160] sm:$0xff] }
 0x533   : > { %27378 = vmatprep.mubr.msk.f32.mxu0 %vm501_vm0, %v22709_v48  ;;  %36441 = vst [vmem:[#allocation27_spill] sm:$0xff] %v34049_v31  ;;  %v22712_v48 = vld [vmem:[%s30077_s30 + $0x2f0] sm:$0xff]  ;;  %36442 = vst [vmem:[#allocation37_spill] sm:$0xff] %v34054_v47 }
 0x535   : > { %26031 = vmatmul.mubr.msk.f32.gmra.mrb[24].mxu1 %vm501_vm0, %v33346_v61  ;;  %v34063_v61 = vld [vmem:[%s30069_s27 + $0x168] sm:$0xff] }
 0x536   : > { %27379 = vmatmul.mubr.msk.f32.gmra.mrb[56].mxu0 %vm501_vm0, %v22710_v51  ;;  %26033 = vmatprep.mubr.msk.f32.mxu1 %vm501_vm0, %v34040_v19  ;;  %v34068_v51 = vld [vmem:[%s30069_s27 + $0x170] sm:$0xff]  ;;  %v22715_v19 = vld [vmem:[%s30077_s30 + $0x308] sm:$0xff] }
 0x537   : > { %27381 = vmatprep.mubr.msk.f32.mxu0 %vm501_vm0, %v22711_v18  ;;  %v22714_v18 = vld [vmem:[%s30077_s30 + $0x300] sm:$0xff]  ;;  %36443 = vst [vmem:[#allocation28_spill] sm:$0xff] %v34068_v51 }
 0x539   : > { %26034 = vmatmul.mubr.msk.f32.gmra.mrb[26].mxu1 %vm501_vm0, %v34049_v31  ;;  %v34083_v31 = vld [vmem:[%s30236_s0 + $0xa8] sm:$0xff] }
 0x53a   : > { %27382 = vmatmul.mubr.msk.f32.gmra.mrb[58].mxu0 %vm501_vm0, %v22712_v48  ;;  %26036 = vmatprep.mubr.msk.f32.mxu1 %vm501_vm0, %v34054_v47  ;;  %v34077_v48 = vld [vmem:[%s30069_s27 + $0x178] sm:$0xff]  ;;  %v20995_v47 = vld [vmem:[%s30069_s27 + $0x190] sm:$0xff]  ;;  %36445 = vst [vmem:[#allocation57_spill] sm:$0xff] %v34083_v31 }
 0x53b   : > { %27384 = vmatprep.mubr.msk.f32.mxu0 %vm501_vm0, %v22713_v63  ;;  %36444 = vst [vmem:[#allocation53_spill] sm:$0xff] %v34077_v48  ;;  %v22716_v63 = vld [vmem:[%s30077_s30 + $0x310] sm:$0xff] }
 0x53d   : > { %26037 = vmatmul.mubr.msk.f32.gmra.mrb[28].mxu1 %vm501_vm0, %v34063_v61 }
 0x53e   : > { %27385 = vmatmul.mubr.msk.f32.gmra.mrb[60].mxu0 %vm501_vm0, %v22714_v18  ;;  %26039 = vmatprep.mubr.msk.f32.mxu1 %vm501_vm0, %v34068_v51  ;;  %v34092_v18 = vld [vmem:[%s30236_s0 + $0xb0] sm:$0xff]  ;;  %v34098_v51 = vld [vmem:[%s30236_s0 + $0xb8] sm:$0xff] }
 0x53f   : > { %27387 = vmatprep.mubr.msk.f32.mxu0 %vm501_vm0, %v22715_v19  ;;  %36446 = vst [vmem:[#allocation59_spill] sm:$0xff] %v34092_v18  ;;  %v34095_v19 = vld [vmem:[%s30069_s27 + $0x1a0] sm:$0xff]  ;;  %36448 = vst [vmem:[#allocation65_spill] sm:$0xff] %v34098_v51 }
 0x540   : > { %36447 = vst [vmem:[#allocation61_spill] sm:$0xff] %v34095_v19 }
 0x541   : > { %26040 = vmatmul.mubr.msk.f32.gmra.mrb[30].mxu1 %vm501_vm0, %v34077_v48  ;;  %v34127_v48 = vld [vmem:[%s30236_s0 + $0xc8] sm:$0xff] }
 0x542   : > { %27388 = vmatmul.mubr.msk.f32.gmra.mrb[62].mxu0 %vm501_vm0, %v22716_v63  ;;  %26042 = vmatprep.mubr.msk.f32.mxu1 %vm501_vm0, %v20995_v47  ;;  %v34107_v47 = vld [vmem:[%s30069_s27 + $0x1a8] sm:$0xff]  ;;  %v23107_v63 = vld [vmem:[%s35895_s3 + $0x190] sm:$0xff]  ;;  %36451 = vst [vmem:[#allocation73_spill] sm:$0xff] %v34127_v48 }
 0x543   : > { %27394 = vmatprep.mubr.msk.f32.mxu0 %vm501_vm0, %v34083_v31  ;;  %v34122_v31 = vld [vmem:[%s30069_s27 + $0x1b0] sm:$0xff] }
 0x544   : > { %36450 = vst [vmem:[#allocation71_spill] sm:$0xff] %v34122_v31 }
 0x545   : > { %26043 = vmatmul.mubr.msk.f32.gmra.mrb[32].mxu1 %vm501_vm0, %v33384_v57  ;;  %v23108_v57 = vld [vmem:[%s35895_s3 + $0x198] sm:$0xff] }
 0x546   : > { %27395 = vmatmul.mubr.msk.f32.vlgmr.msra.gmra.mrb[0].mxu0 %vm501_vm0, %v34092_v18  ;;  %26045 = vmatprep.mubr.msk.f32.mxu1 %vm501_vm0, %v34095_v19  ;;  %v34119_v18 = vld [vmem:[%s30236_s0 + $0xc0] sm:$0xff]  ;;  %v34124_v19 = vpack.c.bf16 %v23108_v57, %v23107_v63  ;;  %v34142_v63 = vld [vmem:[%s30236_s0 + $0xd0] sm:$0xff] }
 0x547   : > { %27889 = vmatpush3.bf16.msra.mxu0 %v33626_v49  ;;  %27397 = vmatprep.mubr.msk.f32.mxu0 %vm501_vm0, %v34098_v51  ;;  %36449 = vst [vmem:[#allocation69_spill] sm:$0xff] %v34119_v18  ;;  %v34137_v49 = vld [vmem:[%s30069_s27 + $0x1b8] sm:$0xff]  ;;  %36452 = vst [vmem:[#allocation38_spill] sm:$0xff] %v34142_v63  ;;  %v34145_v57 = vld [vmem:[%s30069_s27 + $0x1c0] sm:$0xff] }
 0x548   : > { %27891 = vmatprep.subr.bf16.mxu0 %v34124_v19  ;;  %36453 = vst [vmem:[#allocation77_spill] sm:$0xff] %v34145_v57  ;;  %v34148_v51 = vld [vmem:[%s30236_s0 + $0xd8] sm:$0xff] }
 0x549   : > { %26046 = vmatmul.mubr.msk.f32.gmra.mrb[34].mxu1 %vm501_vm0, %v34107_v47  ;;  %36454 = vst [vmem:[#allocation40_spill] sm:$0xff] %v34148_v51 }
 0x54a   : > { %27398 = vmatmul.mubr.msk.f32.gmra.mrb[2].mxu0 %vm501_vm0, %v34119_v18  ;;  %26048 = vmatprep.mubr.msk.f32.mxu1 %vm501_vm0, %v34122_v31  ;;  %v34157_v18 = vld [vmem:[%s30069_s27 + $0x1c8] sm:$0xff]  ;;  %v34163_v31 = vld [vmem:[%s30236_s0 + $0xf8] sm:$0xff] }
 0x54b   : > { %27400 = vmatprep.mubr.msk.f32.mxu0 %vm501_vm0, %v34127_v48  ;;  %36455 = vst [vmem:[#allocation42_spill] sm:$0xff] %v34157_v18  ;;  %v21003_v48 = vld [vmem:[%s30069_s27 + $0x1e0] sm:$0xff]  ;;  %36456 = vst [vmem:[#allocation44_spill] sm:$0xff] %v34163_v31 }
 0x54d   : > { %26049 = vmatmul.mubr.msk.f32.gmra.mrb[36].mxu1 %vm501_vm0, %v34137_v49 }
 0x54e   : > { %27401 = vmatmul.mubr.msk.f32.gmra.mrb[4].mxu0 %vm501_vm0, %v34142_v63  ;;  %26051 = vmatprep.mubr.msk.f32.mxu1 %vm501_vm0, %v34145_v57  ;;  %v34173_v63 = vld [vmem:[%s30236_s0 + $0x100] sm:$0xff]  ;;  %v34179_v57 = vld [vmem:[%s30236_s0 + $0x108] sm:$0xff] }
 0x54f   : > { %27403 = vmatprep.mubr.msk.f32.mxu0 %vm501_vm0, %v34148_v51  ;;  %36457 = vst [vmem:[#allocation46_spill] sm:$0xff] %v34173_v63  ;;  %v34176_v51 = vld [vmem:[%s30069_s27 + $0x1f0] sm:$0xff]  ;;  %36459 = vst [vmem:[#allocation21_spill] sm:$0xff] %v34179_v57 }
 0x550   : > { %36458 = vst [vmem:[#allocation48_spill] sm:$0xff] %v34176_v51 }
 0x551   : > { %26052 = vmatmul.mubr.msk.f32.gmra.mrb[38].mxu1 %vm501_vm0, %v34157_v18  ;;  %v34199_v18 = vld [vmem:[%s30236_s0 + $0x118] sm:$0xff] }
 0x552   : > { %27404 = vmatmul.mubr.msk.f32.gmra.mrb[6].mxu0 %vm501_vm0, %v33543_v58  ;;  %26054 = vmatprep.mubr.msk.f32.mxu1 %vm501_vm0, %v21003_v48  ;;  %v34188_v58 = vld [vmem:[%s30069_s27 + $0x1f8] sm:$0xff]  ;;  %v34193_v48 = vld [vmem:[%s30236_s0 + $0x110] sm:$0xff]  ;;  %36462 = vst [vmem:[#allocation41_spill] sm:$0xff] %v34199_v18 }
 0x553   : > { %27406 = vmatprep.mubr.msk.f32.mxu0 %vm501_vm0, %v34163_v31  ;;  %36460 = vst [vmem:[#allocation39_spill] sm:$0xff] %v34193_v48  ;;  %v34196_v31 = vld [vmem:[%s30069_s27 + $0x200] sm:$0xff] }
 0x554   : > { %36461 = vst [vmem:[#allocation22_spill] sm:$0xff] %v34196_v31 }
 0x555   : > { %26055 = vmatmul.mubr.msk.f32.gmra.mrb[40].mxu1 %vm501_vm0, %v33423_v36  ;;  %v34208_v36 = vld [vmem:[%s30069_s27 + $0x208] sm:$0xff] }
 0x556   : > { %27407 = vmatmul.mubr.msk.f32.gmra.mrb[8].mxu0 %vm501_vm0, %v34173_v63  ;;  %26057 = vmatprep.mubr.msk.f32.mxu1 %vm501_vm0, %v34176_v51  ;;  %v34216_v63 = vld [vmem:[%s30069_s27 + $0x210] sm:$0xff]  ;;  %v34219_v51 = vld [vmem:[%s30236_s0 + $0x128] sm:$0xff] }
 0x557   : > { %27409 = vmatprep.mubr.msk.f32.mxu0 %vm501_vm0, %v34179_v57  ;;  %v34213_v57 = vld [vmem:[%s30236_s0 + $0x120] sm:$0xff]  ;;  %36464 = vst [vmem:[#allocation24_spill] sm:$0xff] %v34216_v63  ;;  %36465 = vst [vmem:[#allocation47_spill] sm:$0xff] %v34219_v51 }
 0x558   : > { %36463 = vst [vmem:[#allocation43_spill] sm:$0xff] %v34213_v57 }
 0x559   : > { %26058 = vmatmul.mubr.msk.f32.gmra.mrb[42].mxu1 %vm501_vm0, %v34188_v58 }
 0x55a   : > { %27410 = vmatmul.mubr.msk.f32.gmra.mrb[10].mxu0 %vm501_vm0, %v34193_v48  ;;  %26060 = vmatprep.mubr.msk.f32.mxu1 %vm501_vm0, %v34196_v31  ;;  %v34228_v48 = vld [vmem:[%s30069_s27 + $0x218] sm:$0xff]  ;;  %v34234_v31 = vld [vmem:[%s30236_s0 + $0x148] sm:$0xff] }
 0x55b   : > { %27412 = vmatprep.mubr.msk.f32.mxu0 %vm501_vm0, %v34199_v18  ;;  %36466 = vst [vmem:[#allocation49_spill] sm:$0xff] %v34228_v48  ;;  %v21011_v18 = vld [vmem:[%s30069_s27 + $0x230] sm:$0xff]  ;;  %36467 = vst [vmem:[#allocation51_spill] sm:$0xff] %v34234_v31 }
 0x55d   : > { %26061 = vmatmul.mubr.msk.f32.gmra.mrb[44].mxu1 %vm501_vm0, %v34208_v36 }
 0x55e   : > { %27413 = vmatmul.mubr.msk.f32.gmra.mrb[12].mxu0 %vm501_vm0, %v34213_v57  ;;  %26063 = vmatprep.mubr.msk.f32.mxu1 %vm501_vm0, %v34216_v63  ;;  %v34244_v57 = vld [vmem:[%s30236_s0 + $0x150] sm:$0xff]  ;;  %v34250_v63 = vld [vmem:[%s30236_s0 + $0x158] sm:$0xff] }
 0x55f   : > { %27415 = vmatprep.mubr.msk.f32.mxu0 %vm501_vm0, %v34219_v51  ;;  %36468 = vst [vmem:[#allocation32_spill] sm:$0xff] %v34244_v57  ;;  %v34247_v51 = vld [vmem:[%s30069_s27 + $0x240] sm:$0xff]  ;;  %36470 = vst [vmem:[#allocation55_spill] sm:$0xff] %v34250_v63 }
 0x560   : > { %36469 = vst [vmem:[#allocation33_spill] sm:$0xff] %v34247_v51 }
 0x561   : > { %26064 = vmatmul.mubr.msk.f32.gmra.mrb[46].mxu1 %vm501_vm0, %v34228_v48  ;;  %v34270_v48 = vld [vmem:[%s30236_s0 + $0x168] sm:$0xff] }
 0x562   : > { %27416 = vmatmul.mubr.msk.f32.gmra.mrb[14].mxu0 %vm501_vm0, %v33582_v12  ;;  %26066 = vmatprep.mubr.msk.f32.mxu1 %vm501_vm0, %v21011_v18  ;;  %v34259_v12 = vld [vmem:[%s30069_s27 + $0x248] sm:$0xff]  ;;  %v34264_v18 = vld [vmem:[%s30236_s0 + $0x160] sm:$0xff]  ;;  %36473 = vst [vmem:[#allocation29_spill] sm:$0xff] %v34270_v48 }
 0x563   : > { %27418 = vmatprep.mubr.msk.f32.mxu0 %vm501_vm0, %v34234_v31  ;;  %36471 = vst [vmem:[#allocation63_spill] sm:$0xff] %v34264_v18  ;;  %v34267_v31 = vld [vmem:[%s30069_s27 + $0x250] sm:$0xff] }
 0x564   : > { %36472 = vst [vmem:[#allocation67_spill] sm:$0xff] %v34267_v31 }
 0x565   : > { %26067 = vmatmul.mubr.msk.f32.gmra.mrb[48].mxu1 %vm501_vm0, %v33468_v1  ;;  %v34279_v1 = vld [vmem:[%s30069_s27 + $0x258] sm:$0xff] }
 0x566   : > { %27419 = vmatmul.mubr.msk.f32.gmra.mrb[16].mxu0 %vm501_vm0, %v34244_v57  ;;  %26069 = vmatprep.mubr.msk.f32.mxu1 %vm501_vm0, %v34247_v51  ;;  %v34287_v57 = vld [vmem:[%s30069_s27 + $0x260] sm:$0xff]  ;;  %v34290_v51 = vld [vmem:[%s30236_s0 + $0x178] sm:$0xff] }
 0x567   : > { %27421 = vmatprep.mubr.msk.f32.mxu0 %vm501_vm0, %v34250_v63  ;;  %v34284_v63 = vld [vmem:[%s30236_s0 + $0x170] sm:$0xff]  ;;  %36475 = vst [vmem:[#allocation36_spill] sm:$0xff] %v34287_v57 }
 0x568   : > { %36474 = vst [vmem:[#allocation34_spill] sm:$0xff] %v34284_v63 }
 0x569   : > { %26070 = vmatmul.mubr.msk.f32.gmra.mrb[50].mxu1 %vm501_vm0, %v34259_v12 }
 0x56a   : > { %27422 = vmatmul.mubr.msk.f32.gmra.mrb[18].mxu0 %vm501_vm0, %v34264_v18  ;;  %26072 = vmatprep.mubr.msk.f32.mxu1 %vm501_vm0, %v34267_v31  ;;  %v34299_v18 = vld [vmem:[%s30069_s27 + $0x268] sm:$0xff]  ;;  %v34305_v31 = vld [vmem:[%s30236_s0 + $0x198] sm:$0xff] }
 0x56b   : > { %27424 = vmatprep.mubr.msk.f32.mxu0 %vm501_vm0, %v34270_v48  ;;  %v21019_v48 = vld [vmem:[%s30069_s27 + $0x280] sm:$0xff] }
 0x56d   : > { %26073 = vmatmul.mubr.msk.f32.gmra.mrb[52].mxu1 %vm501_vm0, %v34279_v1 }
 0x56e   : > { %27425 = vmatmul.mubr.msk.f32.gmra.mrb[20].mxu0 %vm501_vm0, %v34284_v63  ;;  %26075 = vmatprep.mubr.msk.f32.mxu1 %vm501_vm0, %v34287_v57  ;;  %v34315_v63 = vld [vmem:[%s30236_s0 + $0x1a0] sm:$0xff]  ;;  %v34318_v57 = vld [vmem:[%s30236_s0 + $0x1a8] sm:$0xff] }
 0x56f   : > { %27427 = vmatprep.mubr.msk.f32.mxu0 %vm501_vm0, %v34290_v51 }
 0x571   : > { %26076 = vmatmul.mubr.msk.f32.gmra.mrb[54].mxu1 %vm501_vm0, %v34299_v18 }
 0x572   : > { %27428 = vmatmul.mubr.msk.f32.gmra.mrb[22].mxu0 %vm501_vm0, %v33644_v10  ;;  %26078 = vmatprep.mubr.msk.f32.mxu1 %vm501_vm0, %v21019_v48  ;;  %v34329_v10 = vld [vmem:[%s30236_s0 + $0x1b0] sm:$0xff]  ;;  %v34332_v48 = vld [vmem:[%s30236_s0 + $0x1b8] sm:$0xff] }
 0x573   : > { %27430 = vmatprep.mubr.msk.f32.mxu0 %vm501_vm0, %v34305_v31  ;;  %36476 = vst [vmem:[#allocation75_spill] sm:$0xff] %v34329_v10  ;;  %36477 = vst [vmem:[#allocation79_spill] sm:$0xff] %v34332_v48 }
 0x575   : > { %26079 = vmatmul.mubr.msk.f32.gmra.mrb[56].mxu1 %vm501_vm0, %v33502_v13  ;;  %v34343_v13 = vld [vmem:[%s30236_s0 + $0x1c0] sm:$0xff] }
 0x576   : > { %27431 = vmatmul.mubr.msk.f32.gmra.mrb[24].mxu0 %vm501_vm0, %v34315_v63  ;;  %26081 = vmatprep.mubr.msk.f32.mxu1 %vm501_vm0, %v33512_v28  ;;  %36478 = vst [vmem:[#allocation81_spill] sm:$0xff] %v34343_v13  ;;  %v34346_v28 = vld [vmem:[%s30236_s0 + $0x1c8] sm:$0xff] }
 0x577   : > { %27433 = vmatprep.mubr.msk.f32.mxu0 %vm501_vm0, %v34318_v57  ;;  %36479 = vst [vmem:[#allocation83_spill] sm:$0xff] %v34346_v28 }
 0x579   : > { %26082 = vmatmul.mubr.msk.f32.gmra.mrb[58].mxu1 %vm501_vm0, %v33515_v9  ;;  %v21093_v9 = vld [vmem:[%s30077_s30 + $0x50] sm:$0xff] }
 0x57a   : > { %27434 = vmatmul.mubr.msk.f32.gmra.mrb[26].mxu0 %vm501_vm0, %v34329_v10  ;;  %26084 = vmatprep.mubr.msk.f32.mxu1 %vm501_vm0, %v33526_v16  ;;  %v34358_v16 = vld [vmem:[%s30236_s0 + $0x1e8] sm:$0xff] }
 0x57b   : > { %27436 = vmatprep.mubr.msk.f32.mxu0 %vm501_vm0, %v34332_v48  ;;  %36480 = vst [vmem:[#allocation31_spill] sm:$0xff] %v34358_v16  ;;  %v21097_v48 = vld [vmem:[%s30077_s30 + $0x70] sm:$0xff]  ;;  %v34396_v10 = vld [vmem:[%s30236_s0 + $0x208] sm:$0xff] }
 0x57c   : > { %36481 = vst [vmem:[#allocation50_spill] sm:$0xff] %v34396_v10 }
 0x57d   : > { %26085 = vmatmul.mubr.msk.f32.gmra.mrb[60].mxu1 %vm501_vm0, %v33529_v2  ;;  %v21094_v2 = vld [vmem:[%s30077_s30 + $0x58] sm:$0xff] }
 0x57e   : > { %27437 = vmatmul.mubr.msk.f32.gmra.mrb[28].mxu0 %vm501_vm0, %v34343_v13  ;;  %26087 = vmatprep.mubr.msk.f32.mxu1 %vm501_vm0, %v33540_v35  ;;  %v34369_v35 = vld [vmem:[%s30236_s0 + $0x1f0] sm:$0xff]  ;;  %v34373_v13 = vld [vmem:[%s30236_s0 + $0x1f8] sm:$0xff] }
 0x57f   : > { %27439 = vmatprep.mubr.msk.f32.mxu0 %vm501_vm0, %v34346_v28  ;;  %v21095_v28 = vld [vmem:[%s30077_s30 + $0x60] sm:$0xff] }
 0x581   : > { %26088 = vmatmul.mubr.msk.f32.gmra.mrb[62].mxu1 %vm501_vm0, %v33546_v6  ;;  %v21417_v6 = vld [vmem:[%s35895_s3 + $0xc0] sm:$0xff] }
 0x582   : > { %27440 = vmatmul.mubr.msk.f32.gmra.mrb[30].mxu0 %vm501_vm0, %v33700_v53  ;;  %26094 = vmatprep.mubr.msk.f32.mxu1 %vm501_vm0, %v21093_v9  ;;  %v21418_v53 = vld [vmem:[%s35895_s3 + $0xc8] sm:$0xff] }
 0x583   : > { %27442 = vmatprep.mubr.msk.f32.mxu0 %vm501_vm0, %v34358_v16  ;;  %v21096_v9 = vld [vmem:[%s30077_s30 + $0x68] sm:$0xff]  ;;  %v34386_v16 = vpack.c.bf16 %v21418_v53, %v21417_v6  ;;  %v21099_v6 = vld [vmem:[%s30077_s30 + $0x80] sm:$0xff]  ;;  %v34411_v53 = vld [vmem:[%s30236_s0 + $0x218] sm:$0xff] }
 0x585   : > { %26095 = vmatmul.mubr.msk.f32.vlgmr.msra.gmra.mrb[0].mxu1 %vm501_vm0, %v21094_v2  ;;  %v34392_v2 = vld [vmem:[%s30236_s0 + $0x200] sm:$0xff] }
 0x586   : > { %27443 = vmatmul.mubr.msk.f32.gmra.mrb[32].mxu0 %vm501_vm0, %v34369_v35  ;;  %27837 = vmatpush3.bf16.msra.mxu1 %v33855_v37  ;;  %v21098_v37 = vld [vmem:[%s30077_s30 + $0x78] sm:$0xff] }
 0x587   : > { %26097 = vmatprep.mubr.msk.f32.mxu1 %vm501_vm0, %v21095_v28  ;;  %27445 = vmatprep.mubr.msk.f32.mxu0 %vm501_vm0, %v34373_v13  ;;  %v34407_v28 = vld [vmem:[%s30236_s0 + $0x210] sm:$0xff] }
 0x588   : > { %27839 = vmatprep.subr.bf16.mxu1 %v34386_v16 }
 0x589   : > { %26098 = vmatmul.mubr.msk.f32.gmra.mrb[2].mxu1 %vm501_vm0, %v21096_v9  ;;  %v21101_v9 = vld [vmem:[%s30077_s30 + $0xa0] sm:$0xff] }
 0x58a   : > { %27446 = vmatmul.mubr.msk.f32.gmra.mrb[34].mxu0 %vm501_vm0, %v34392_v2  ;;  %26100 = vmatprep.mubr.msk.f32.mxu1 %vm501_vm0, %v21097_v48  ;;  %v21100_v48 = vld [vmem:[%s30077_s30 + $0x88] sm:$0xff] }
 0x58b   : > { %27448 = vmatprep.mubr.msk.f32.mxu0 %vm501_vm0, %v34396_v10  ;;  %v34422_v10 = vld [vmem:[%s30236_s0 + $0x238] sm:$0xff] }
 0x58d   : > { %26101 = vmatmul.mubr.msk.f32.gmra.mrb[4].mxu1 %vm501_vm0, %v21098_v37  ;;  %v34431_v37 = vld [vmem:[%s30236_s0 + $0x240] sm:$0xff] }
 0x58e   : > { %27449 = vmatmul.mubr.msk.f32.gmra.mrb[36].mxu0 %vm501_vm0, %v34407_v28  ;;  %26103 = vmatprep.mubr.msk.f32.mxu1 %vm501_vm0, %v21099_v6  ;;  %v34434_v6 = vld [vmem:[%s30236_s0 + $0x248] sm:$0xff] }
 0x58f   : > { %27451 = vmatprep.mubr.msk.f32.mxu0 %vm501_vm0, %v34411_v53 }
 0x591   : > { %26104 = vmatmul.mubr.msk.f32.gmra.mrb[6].mxu1 %vm501_vm0, %v21100_v48  ;;  %v34448_v48 = vld [vmem:[%s30236_s0 + $0x258] sm:$0xff] }
 0x592   : > { %27452 = vmatmul.mubr.msk.f32.gmra.mrb[38].mxu0 %vm501_vm0, %v33756_v55  ;;  %26106 = vmatprep.mubr.msk.f32.mxu1 %vm501_vm0, %v21101_v9  ;;  %v34445_v55 = vld [vmem:[%s30236_s0 + $0x250] sm:$0xff]  ;;  %v22839_v9 = vld [vmem:[%s30236_s0 + $0x2d8] sm:$0xff] }
 0x593   : > { %27454 = vmatprep.mubr.msk.f32.mxu0 %vm501_vm0, %v34422_v10 }
 0x595   : > { %26107 = vmatmul.mubr.msk.f32.gmra.mrb[8].mxu1 %vm501_vm0, %v33594_v40  ;;  %v34459_v40 = vld [vmem:[%s30236_s0 + $0x260] sm:$0xff] }
 0x596   : > { %27455 = vmatmul.mubr.msk.f32.gmra.mrb[40].mxu0 %vm501_vm0, %v34431_v37  ;;  %26109 = vmatprep.mubr.msk.f32.mxu1 %vm501_vm0, %v33603_v44  ;;  %v34462_v44 = vld [vmem:[%s30236_s0 + $0x268] sm:$0xff] }
 0x597   : > { %27457 = vmatprep.mubr.msk.f32.mxu0 %vm501_vm0, %v34434_v6 }
 0x599   : > { %26110 = vmatmul.mubr.msk.f32.gmra.mrb[10].mxu1 %vm501_vm0, %v33606_v56  ;;  %v21109_v56 = vld [vmem:[%s30077_s30 + $0xf0] sm:$0xff] }
 0x59a   : > { %27458 = vmatmul.mubr.msk.f32.gmra.mrb[42].mxu0 %vm501_vm0, %v34445_v55  ;;  %26112 = vmatprep.mubr.msk.f32.mxu1 %vm501_vm0, %v33624_v45  ;;  %v34474_v45 = vld [vmem:[%s30236_s0 + $0x288] sm:$0xff] }
 0x59b   : > { %27460 = vmatprep.mubr.msk.f32.mxu0 %vm501_vm0, %v34448_v48 }
 0x59d   : > { %26113 = vmatmul.mubr.msk.f32.gmra.mrb[12].mxu1 %vm501_vm0, %v33629_v41  ;;  %v34484_v41 = vld [vmem:[%s30236_s0 + $0x290] sm:$0xff] }
 0x59e   : > { %27461 = vmatmul.mubr.msk.f32.gmra.mrb[44].mxu0 %vm501_vm0, %v34459_v40  ;;  %26115 = vmatprep.mubr.msk.f32.mxu1 %vm501_vm0, %v33641_v20  ;;  %v34487_v20 = vld [vmem:[%s30236_s0 + $0x298] sm:$0xff] }
 0x59f   : > { %27463 = vmatprep.mubr.msk.f32.mxu0 %vm501_vm0, %v34462_v44 }
 0x5a1   : > { %26116 = vmatmul.mubr.msk.f32.gmra.mrb[14].mxu1 %vm501_vm0, %v33647_v46  ;;  %v34498_v46 = vld [vmem:[%s30236_s0 + $0x2a0] sm:$0xff] }
 0x5a2   : > { %27464 = vmatmul.mubr.msk.f32.gmra.mrb[46].mxu0 %vm501_vm0, %v33812_v17  ;;  %26118 = vmatprep.mubr.msk.f32.mxu1 %vm501_vm0, %v21109_v56  ;;  %v34501_v17 = vld [vmem:[%s30236_s0 + $0x2a8] sm:$0xff]  ;;  %v22843_v56 = vld [vmem:[%s30236_s0 + $0x2f8] sm:$0xff] }
 0x5a3   : > { %27466 = vmatprep.mubr.msk.f32.mxu0 %vm501_vm0, %v34474_v45 }
 0x5a5   : > { %26119 = vmatmul.mubr.msk.f32.gmra.mrb[16].mxu1 %vm501_vm0, %v33659_v4  ;;  %v34512_v4 = vld [vmem:[%s30236_s0 + $0x2b0] sm:$0xff] }
 0x5a6   : > { %27467 = vmatmul.mubr.msk.f32.gmra.mrb[48].mxu0 %vm501_vm0, %v34484_v41  ;;  %26121 = vmatprep.mubr.msk.f32.mxu1 %vm501_vm0, %v33669_v23  ;;  %v34515_v23 = vld [vmem:[%s30236_s0 + $0x2b8] sm:$0xff] }
 0x5a7   : > { %27469 = vmatprep.mubr.msk.f32.mxu0 %vm501_vm0, %v34487_v20 }
 0x5a9   : > { %26122 = vmatmul.mubr.msk.f32.gmra.mrb[18].mxu1 %vm501_vm0, %v33672_v25  ;;  %v22838_v25 = vld [vmem:[%s30236_s0 + $0x2c0] sm:$0xff] }
 0x5aa   : > { %27470 = vmatmul.mubr.msk.f32.gmra.mrb[50].mxu0 %vm501_vm0, %v34498_v46  ;;  %26124 = vmatprep.mubr.msk.f32.mxu1 %vm501_vm0, %v33683_v11  ;;  %v21117_v11 = vld [vmem:[%s30077_s30 + $0x140] sm:$0xff] }
 0x5ab   : > { %27472 = vmatprep.mubr.msk.f32.mxu0 %vm501_vm0, %v34501_v17 }
 0x5ad   : > { %26125 = vmatmul.mubr.msk.f32.gmra.mrb[20].mxu1 %vm501_vm0, %v33686_v34  ;;  %v22840_v34 = vld [vmem:[%s30236_s0 + $0x2e0] sm:$0xff] }
 0x5ae   : > { %27473 = vmatmul.mubr.msk.f32.gmra.mrb[52].mxu0 %vm501_vm0, %v34512_v4  ;;  %26127 = vmatprep.mubr.msk.f32.mxu1 %vm501_vm0, %v33697_v7  ;;  %v22841_v7 = vld [vmem:[%s30236_s0 + $0x2e8] sm:$0xff] }
 0x5af   : > { %27475 = vmatprep.mubr.msk.f32.mxu0 %vm501_vm0, %v34515_v23 }
 0x5b1   : > { %26128 = vmatmul.mubr.msk.f32.gmra.mrb[22].mxu1 %vm501_vm0, %v33703_v27  ;;  %v22842_v27 = vld [vmem:[%s30236_s0 + $0x2f0] sm:$0xff] }
 0x5b2   : > { %27476 = vmatmul.mubr.msk.f32.gmra.mrb[54].mxu0 %vm501_vm0, %v22838_v25  ;;  %26130 = vmatprep.mubr.msk.f32.mxu1 %vm501_vm0, %v21117_v11  ;;  %v22845_v25 = vld [vmem:[%s30236_s0 + $0x308] sm:$0xff] }
 0x5b3   : > { %27478 = vmatprep.mubr.msk.f32.mxu0 %vm501_vm0, %v22839_v9  ;;  %v36495_v11 = vld [vmem:[#allocation37_spill] sm:$0xff]  ;;  %v36496_v9 = vld [vmem:[#allocation80_spill] sm:$0xff] }
 0x5b5   : > { %26131 = vmatmul.mubr.msk.f32.gmra.mrb[24].mxu1 %vm501_vm0, %v33715_v54  ;;  %v22844_v54 = vld [vmem:[%s30236_s0 + $0x300] sm:$0xff] }
 0x5b6   : > { %27479 = vmatmul.mubr.msk.f32.gmra.mrb[56].mxu0 %vm501_vm0, %v22840_v34  ;;  %26133 = vmatprep.mubr.msk.f32.mxu1 %vm501_vm0, %v33725_v22  ;;  %v22846_v22 = vld [vmem:[%s30236_s0 + $0x310] sm:$0xff] }
 0x5b7   : > { %27481 = vmatprep.mubr.msk.f32.mxu0 %vm501_vm0, %v22841_v7  ;;  %v36497_v34 = vld [vmem:[#allocation82_spill] sm:$0xff]  ;;  %v36498_v7 = vld [vmem:[#allocation28_spill] sm:$0xff] }
 0x5b9   : > { %26134 = vmatmul.mubr.msk.f32.gmra.mrb[26].mxu1 %vm501_vm0, %v33728_v59  ;;  %v21125_v59 = vld [vmem:[%s30077_s30 + $0x190] sm:$0xff] }
 0x5ba   : > { %27482 = vmatmul.mubr.msk.f32.gmra.mrb[58].mxu0 %vm501_vm0, %v22842_v27  ;;  %26136 = vmatprep.mubr.msk.f32.mxu1 %vm501_vm0, %v33739_v50  ;;  %v23237_v50 = vld [vmem:[%s35895_s3 + $0x1a0] sm:$0xff] }
 0x5bb   : > { %27484 = vmatprep.mubr.msk.f32.mxu0 %vm501_vm0, %v22843_v56  ;;  %v34662_v27 = vld [vmem:[%s30069_s27 + $0x180] sm:$0xff] }
 0x5bc   : > { %v36499_v56 = vld [vmem:[#allocation84_spill] sm:$0xff] }
 0x5bd   : > { %26137 = vmatmul.mubr.msk.f32.gmra.mrb[28].mxu1 %vm501_vm0, %v33742_v62  ;;  %v23238_v62 = vld [vmem:[%s35895_s3 + $0x1a8] sm:$0xff] }
 0x5be   : > { %27485 = vmatmul.mubr.msk.f32.gmra.mrb[60].mxu0 %vm501_vm0, %v22844_v54  ;;  %26139 = vmatprep.mubr.msk.f32.mxu1 %vm501_vm0, %v33753_v43  ;;  %v34580_v43 = vpack.c.bf16 %v23238_v62, %v23237_v50  ;;  %v36500_v54 = vld [vmem:[#allocation53_spill] sm:$0xff]  ;;  %v36504_v62 = vld [vmem:[#allocation87_spill] sm:$0xff] }
 0x5bf   : > { %27487 = vmatprep.mubr.msk.f32.mxu0 %vm501_vm0, %v22845_v25  ;;  %v36501_v25 = vld [vmem:[#allocation85_spill] sm:$0xff] }
 0x5c0   : > { %v36503_v50 = vld [vmem:[#allocation61_spill] sm:$0xff] }
 0x5c1   : > { %26140 = vmatmul.mubr.msk.f32.gmra.mrb[30].mxu1 %vm501_vm0, %v33759_v3  ;;  %v34592_v3 = vld [vmem:[%s30069_s27 + $0xe0] sm:$0xff] }
 0x5c2   : > { %27488 = vmatmul.mubr.msk.f32.gmra.mrb[62].mxu0 %vm501_vm0, %v22846_v22  ;;  %26142 = vmatprep.mubr.msk.f32.mxu1 %vm501_vm0, %v21125_v59  ;;  %v21149_v22 = vld [vmem:[%s30077_s30 + $0x280] sm:$0xff]  ;;  %v36502_v59 = vld [vmem:[#allocation86_spill] sm:$0xff] }
 0x5c3   : > { %27494 = vmatprep.mubr.msk.f32.mxu0 %vm501_vm0, %v33903_v14  ;;  %v36489_v14 = vld [vmem:[#allocation72_spill] sm:$0xff] }
 0x5c5   : > { %26143 = vmatmul.mubr.msk.f32.gmra.mrb[32].mxu1 %vm501_vm0, %v33771_v15  ;;  %v22920_v15 = vld [vmem:[%s30069_s27 + $0xe8] sm:$0xff] }
 0x5c6   : > { %27495 = vmatmul.mubr.msk.f32.vlgmr.msra.gmra.mrb[0].mxu0 %vm501_vm0, %v33915_v29  ;;  %26145 = vmatprep.mubr.msk.f32.mxu1 %vm501_vm0, %v33781_v52  ;;  %v21133_v52 = vld [vmem:[%s30077_s30 + $0x1e0] sm:$0xff]  ;;  %v22928_v29 = vld [vmem:[%s30069_s27 + $0x138] sm:$0xff] }
 0x5c7   : > { %27893 = vmatpush3.bf16.msra.mxu0 %v34124_v19  ;;  %27497 = vmatprep.mubr.msk.f32.mxu0 %vm501_vm0, %v33923_v8  ;;  %v36490_v8 = vld [vmem:[#allocation74_spill] sm:$0xff] }
 0x5c8   : > { %27895 = vmatprep.subr.bf16.mxu0 %v34580_v43  ;;  %v36494_v19 = vld [vmem:[#allocation78_spill] sm:$0xff] }
 0x5c9   : > { %26146 = vmatmul.mubr.msk.f32.gmra.mrb[34].mxu1 %vm501_vm0, %v33784_v33  ;;  %v36482_v33 = vld [vmem:[#allocation64_spill] sm:$0xff] }
 0x5ca   : > { %27498 = vmatmul.mubr.msk.f32.gmra.mrb[2].mxu0 %vm501_vm0, %v33935_v42  ;;  %26148 = vmatprep.mubr.msk.f32.mxu1 %vm501_vm0, %v33795_v0  ;;  %v36483_v0 = vld [vmem:[#allocation30_spill] sm:$0xff]  ;;  %v36491_v42 = vld [vmem:[#allocation20_spill] sm:$0xff] }
 0x5cb   : > { %27500 = vmatprep.mubr.msk.f32.mxu0 %vm501_vm0, %v33943_v5  ;;  %v36488_v5 = vld [vmem:[#allocation26_spill] sm:$0xff] }
 0x5cd   : > { %26149 = vmatmul.mubr.msk.f32.gmra.mrb[36].mxu1 %vm501_vm0, %v33798_v60  ;;  %v36484_v60 = vld [vmem:[#allocation66_spill] sm:$0xff] }
 0x5ce   : > { %27501 = vmatmul.mubr.msk.f32.gmra.mrb[4].mxu0 %vm501_vm0, %v33955_v21  ;;  %26151 = vmatprep.mubr.msk.f32.mxu1 %vm501_vm0, %v33809_v26  ;;  %v36485_v26 = vld [vmem:[#allocation68_spill] sm:$0xff]  ;;  %v21141_v21 = vld [vmem:[%s30077_s30 + $0x230] sm:$0xff] }
 0x5cf   : > { %27503 = vmatprep.mubr.msk.f32.mxu0 %vm501_vm0, %v34592_v3 }
 0x5d1   : > { %26152 = vmatmul.mubr.msk.f32.gmra.mrb[38].mxu1 %vm501_vm0, %v33815_v24  ;;  %v36486_v24 = vld [vmem:[#allocation25_spill] sm:$0xff] }
 0x5d2   : > { %27504 = vmatmul.mubr.msk.f32.gmra.mrb[6].mxu0 %vm501_vm0, %v22920_v15  ;;  %26154 = vmatprep.mubr.msk.f32.mxu1 %vm501_vm0, %v21133_v52  ;;  %v36505_v15 = vld [vmem:[#allocation88_spill] sm:$0xff]  ;;  %v36506_v52 = vld [vmem:[#allocation71_spill] sm:$0xff] }
 0x5d3   : > { %27506 = vmatprep.mubr.msk.f32.mxu0 %vm501_vm0, %v33974_v32  ;;  %v36487_v32 = vld [vmem:[#allocation70_spill] sm:$0xff] }
 0x5d5   : > { %26155 = vmatmul.mubr.msk.f32.gmra.mrb[40].mxu1 %vm501_vm0, %v33828_v39  ;;  %v34627_v39 = vld [vmem:[%s30069_s27 + $0x130] sm:$0xff] }
 0x5d6   : > { %27507 = vmatmul.mubr.msk.f32.gmra.mrb[8].mxu0 %vm501_vm0, %v33986_v38  ;;  %26157 = vmatprep.mubr.msk.f32.mxu1 %vm501_vm0, %v36482_v33  ;;  %v36492_v38 = vld [vmem:[#allocation76_spill] sm:$0xff]  ;;  %v36507_v33 = vld [vmem:[#allocation23_spill] sm:$0xff] }
 0x5d7   : > { %27509 = vmatprep.mubr.msk.f32.mxu0 %vm501_vm0, %v36483_v0  ;;  %v36508_v0 = vld [vmem:[#allocation18_spill] sm:$0xff] }
 0x5d9   : > { %26158 = vmatmul.mubr.msk.f32.gmra.mrb[42].mxu1 %vm501_vm0, %v36484_v60  ;;  %v36509_v60 = vld [vmem:[#allocation77_spill] sm:$0xff] }
 0x5da   : > { %27510 = vmatmul.mubr.msk.f32.gmra.mrb[10].mxu0 %vm501_vm0, %v34006_v30  ;;  %26160 = vmatprep.mubr.msk.f32.mxu1 %vm501_vm0, %v36485_v26  ;;  %v36493_v30 = vld [vmem:[#allocation27_spill] sm:$0xff]  ;;  %v36510_v26 = vld [vmem:[#allocation45_spill] sm:$0xff] }
 0x5db   : > { %27512 = vmatprep.mubr.msk.f32.mxu0 %vm501_vm0, %v36486_v24  ;;  %v36511_v24 = vld [vmem:[#allocation42_spill] sm:$0xff] }
 0x5dd   : > { %26161 = vmatmul.mubr.msk.f32.gmra.mrb[44].mxu1 %vm501_vm0, %v36487_v32  ;;  %v36512_v32 = vld [vmem:[#allocation19_spill] sm:$0xff] }
 0x5de   : > { %27513 = vmatmul.mubr.msk.f32.gmra.mrb[12].mxu0 %vm501_vm0, %v36488_v5  ;;  %26163 = vmatprep.mubr.msk.f32.mxu1 %vm501_vm0, %v36489_v14  ;;  %v21223_v5 = vld [vmem:[%s30236_s0 + $0x50] sm:$0xff] }
 0x5df   : > { %27515 = vmatprep.mubr.msk.f32.mxu0 %vm501_vm0, %v34627_v39  ;;  %v36513_v14 = vld [vmem:[#allocation35_spill] sm:$0xff] }
 0x5e1   : > { %26164 = vmatmul.mubr.msk.f32.gmra.mrb[46].mxu1 %vm501_vm0, %v36490_v8  ;;  %v21225_v8 = vld [vmem:[%s30236_s0 + $0x60] sm:$0xff] }
 0x5e2   : > { %27516 = vmatmul.mubr.msk.f32.gmra.mrb[14].mxu0 %vm501_vm0, %v22928_v29  ;;  %26166 = vmatprep.mubr.msk.f32.mxu1 %vm501_vm0, %v21141_v21  ;;  %v21224_v29 = vld [vmem:[%s30236_s0 + $0x58] sm:$0xff] }
 0x5e3   : > { %27518 = vmatprep.mubr.msk.f32.mxu0 %vm501_vm0, %v36491_v42  ;;  %v36514_v21 = vld [vmem:[#allocation48_spill] sm:$0xff]  ;;  %v21226_v42 = vld [vmem:[%s30236_s0 + $0x68] sm:$0xff] }
 0x5e5   : > { %26167 = vmatmul.mubr.msk.f32.gmra.mrb[48].mxu1 %vm501_vm0, %v36492_v38  ;;  %v36515_v38 = vld [vmem:[#allocation22_spill] sm:$0xff] }
 0x5e6   : > { %27519 = vmatmul.mubr.msk.f32.gmra.mrb[16].mxu0 %vm501_vm0, %v36493_v30  ;;  %26169 = vmatprep.mubr.msk.f32.mxu1 %vm501_vm0, %v36494_v19  ;;  %v21227_v30 = vld [vmem:[%s30236_s0 + $0x70] sm:$0xff]  ;;  %v36516_v19 = vld [vmem:[#allocation17_spill] sm:$0xff] }
 0x5e7   : > { %27521 = vmatprep.mubr.msk.f32.mxu0 %vm501_vm0, %v36495_v11  ;;  %v21229_v11 = vld [vmem:[%s30236_s0 + $0x80] sm:$0xff] }
 0x5e9   : > { %26170 = vmatmul.mubr.msk.f32.gmra.mrb[50].mxu1 %vm501_vm0, %v36496_v9  ;;  %v34736_v9 = vld [vmem:[%s30069_s27 + $0x220] sm:$0xff] }
 0x5ea   : > { %27522 = vmatmul.mubr.msk.f32.gmra.mrb[18].mxu0 %vm501_vm0, %v34063_v61  ;;  %26172 = vmatprep.mubr.msk.f32.mxu1 %vm501_vm0, %v36497_v34  ;;  %v22936_v61 = vld [vmem:[%s30069_s27 + $0x188] sm:$0xff] }
 0x5eb   : > { %27524 = vmatprep.mubr.msk.f32.mxu0 %vm501_vm0, %v36498_v7  ;;  %v36518_v34 = vld [vmem:[#allocation49_spill] sm:$0xff] }
 0x5ec   : > { %v21230_v7 = vld [vmem:[%s30236_s0 + $0x88] sm:$0xff] }
 0x5ed   : > { %26173 = vmatmul.mubr.msk.f32.gmra.mrb[52].mxu1 %vm501_vm0, %v36499_v56  ;;  %v21231_v56 = vld [vmem:[%s30236_s0 + $0xa0] sm:$0xff] }
 0x5ee   : > { %27525 = vmatmul.mubr.msk.f32.gmra.mrb[20].mxu0 %vm501_vm0, %v36500_v54  ;;  %26175 = vmatprep.mubr.msk.f32.mxu1 %vm501_vm0, %v36501_v25  ;;  %v36519_v54 = vld [vmem:[#allocation33_spill] sm:$0xff] }
 0x5ef   : > { %27527 = vmatprep.mubr.msk.f32.mxu0 %vm501_vm0, %v34662_v27  ;;  %v36520_v25 = vld [vmem:[#allocation57_spill] sm:$0xff] }
 0x5f1   : > { %26176 = vmatmul.mubr.msk.f32.gmra.mrb[54].mxu1 %vm501_vm0, %v36502_v59  ;;  %v36523_v59 = vld [vmem:[#allocation65_spill] sm:$0xff] }
 0x5f2   : > { %27528 = vmatmul.mubr.msk.f32.gmra.mrb[22].mxu0 %vm501_vm0, %v22936_v61  ;;  %26178 = vmatprep.mubr.msk.f32.mxu1 %vm501_vm0, %v21149_v22  ;;  %v36521_v61 = vld [vmem:[#allocation59_spill] sm:$0xff] }
 0x5f3   : > { %27530 = vmatprep.mubr.msk.f32.mxu0 %vm501_vm0, %v36503_v50  ;;  %v36522_v22 = vld [vmem:[#allocation67_spill] sm:$0xff]  ;;  %v36524_v50 = vld [vmem:[#allocation69_spill] sm:$0xff] }
 0x5f5   : > { %26179 = vmatmul.mubr.msk.f32.gmra.mrb[56].mxu1 %vm501_vm0, %v36504_v62  ;;  %v36525_v62 = vld [vmem:[#allocation36_spill] sm:$0xff] }
 0x5f6   : > { %27531 = vmatmul.mubr.msk.f32.gmra.mrb[24].mxu0 %vm501_vm0, %v34107_v47  ;;  %26181 = vmatprep.mubr.msk.f32.mxu1 %vm501_vm0, %v36505_v15  ;;  %v34697_v47 = vld [vmem:[%s30069_s27 + $0x1d0] sm:$0xff]  ;;  %v36526_v15 = vld [vmem:[#allocation73_spill] sm:$0xff] }
 0x5f7   : > { %27533 = vmatprep.mubr.msk.f32.mxu0 %vm501_vm0, %v36506_v52  ;;  %v36527_v52 = vld [vmem:[#allocation38_spill] sm:$0xff] }
 0x5f9   : > { %26182 = vmatmul.mubr.msk.f32.gmra.mrb[58].mxu1 %vm501_vm0, %v36507_v33  ;;  %v21239_v33 = vld [vmem:[%s30236_s0 + $0xf0] sm:$0xff] }
 0x5fa   : > { %27534 = vmatmul.mubr.msk.f32.gmra.mrb[26].mxu0 %vm501_vm0, %v34137_v49  ;;  %26184 = vmatprep.mubr.msk.f32.mxu1 %vm501_vm0, %v36508_v0  ;;  %v22944_v49 = vld [vmem:[%s30069_s27 + $0x1d8] sm:$0xff]  ;;  %v34782_v0 = vld [vmem:[%s30069_s27 + $0x290] sm:$0xff] }
 0x5fb   : > { %27536 = vmatprep.mubr.msk.f32.mxu0 %vm501_vm0, %v36509_v60  ;;  %v36528_v60 = vld [vmem:[#allocation40_spill] sm:$0xff] }
 0x5fd   : > { %26185 = vmatmul.mubr.msk.f32.gmra.mrb[60].mxu1 %vm501_vm0, %v36510_v26  ;;  %v34794_v26 = vld [vmem:[%s30069_s27 + $0x2a0] sm:$0xff] }
 0x5fe   : > { %27537 = vmatmul.mubr.msk.f32.gmra.mrb[28].mxu0 %vm501_vm0, %v36511_v24  ;;  %26187 = vmatprep.mubr.msk.f32.mxu1 %vm501_vm0, %v36512_v32  ;;  %v36529_v24 = vld [vmem:[#allocation44_spill] sm:$0xff]  ;;  %v36530_v32 = vld [vmem:[#allocation46_spill] sm:$0xff] }
 0x5ff   : > { %27539 = vmatprep.mubr.msk.f32.mxu0 %vm501_vm0, %v34697_v47 }
 0x601   : > { %26188 = vmatmul.mubr.msk.f32.gmra.mrb[62].mxu1 %vm501_vm0, %v36513_v14  ;;  %v36531_v14 = vld [vmem:[#allocation21_spill] sm:$0xff] }
 0x602   : > { %27540 = vmatmul.mubr.msk.f32.gmra.mrb[30].mxu0 %vm501_vm0, %v22944_v49  ;;  %26194 = vmatprep.mubr.msk.f32.mxu1 %vm501_vm0, %v21223_v5  ;;  %v34805_v49 = vld [vmem:[%s30069_s27 + $0x2a8] sm:$0xff]  ;;  %v34808_v5 = vld [vmem:[%s30069_s27 + $0x2b0] sm:$0xff] }
 0x603   : > { %27542 = vmatprep.mubr.msk.f32.mxu0 %vm501_vm0, %v36514_v21  ;;  %v34819_v21 = vld [vmem:[%s30069_s27 + $0x2b8] sm:$0xff] }
 0x605   : > { %26195 = vmatmul.mubr.msk.f32.vlgmr.msra.gmra.mrb[0].mxu1 %vm501_vm0, %v21224_v29  ;;  %v36532_v29 = vld [vmem:[#allocation39_spill] sm:$0xff] }
 0x606   : > { %27543 = vmatmul.mubr.msk.f32.gmra.mrb[32].mxu0 %vm501_vm0, %v34188_v58  ;;  %27841 = vmatpush3.bf16.msra.mxu1 %v34386_v16  ;;  %v21228_v58 = vld [vmem:[%s30236_s0 + $0x78] sm:$0xff] }
 0x607   : > { %26197 = vmatprep.mubr.msk.f32.mxu1 %vm501_vm0, %v21225_v8  ;;  %27545 = vmatprep.mubr.msk.f32.mxu0 %vm501_vm0, %v36515_v38  ;;  %v36517_v16 = vld [vmem:[#allocation24_spill] sm:$0xff]  ;;  %v36534_v38 = vld [vmem:[#allocation43_spill] sm:$0xff] }
 0x608   : > { %27898 = vmatprep.subr.bf16.mxu1 %v36516_v19  ;;  %v34822_v8 = vld [vmem:[%s30069_s27 + $0x2c0] sm:$0xff] }
 0x609   : > { %26198 = vmatmul.mubr.msk.f32.gmra.mrb[2].mxu1 %vm501_vm0, %v21226_v42  ;;  %v36533_v42 = vld [vmem:[#allocation41_spill] sm:$0xff] }
 0x60a   : > { %27546 = vmatmul.mubr.msk.f32.gmra.mrb[34].mxu0 %vm501_vm0, %v34208_v36  ;;  %26200 = vmatprep.mubr.msk.f32.mxu1 %vm501_vm0, %v21227_v30  ;;  %v22952_v36 = vld [vmem:[%s30069_s27 + $0x228] sm:$0xff] }
 0x60b   : > { %27548 = vmatprep.mubr.msk.f32.mxu0 %vm501_vm0, %v36517_v16  ;;  %v22968_v30 = vld [vmem:[%s30069_s27 + $0x2c8] sm:$0xff]  ;;  %v22969_v16 = vld [vmem:[%s30069_s27 + $0x2e0] sm:$0xff] }
 0x60d   : > { %26201 = vmatmul.mubr.msk.f32.gmra.mrb[4].mxu1 %vm501_vm0, %v21228_v58  ;;  %v21247_v58 = vld [vmem:[%s30236_s0 + $0x140] sm:$0xff] }
 0x60e   : > { %27549 = vmatmul.mubr.msk.f32.gmra.mrb[36].mxu0 %vm501_vm0, %v36518_v34  ;;  %26203 = vmatprep.mubr.msk.f32.mxu1 %vm501_vm0, %v21229_v11  ;;  %v36535_v11 = vld [vmem:[#allocation47_spill] sm:$0xff]  ;;  %v22970_v34 = vld [vmem:[%s30069_s27 + $0x2e8] sm:$0xff] }
 0x60f   : > { %27551 = vmatprep.mubr.msk.f32.mxu0 %vm501_vm0, %v34736_v9 }
 0x611   : > { %26204 = vmatmul.mubr.msk.f32.gmra.mrb[6].mxu1 %vm501_vm0, %v21230_v7  ;;  %v22971_v7 = vld [vmem:[%s30069_s27 + $0x2f0] sm:$0xff] }
 0x612   : > { %27552 = vmatmul.mubr.msk.f32.gmra.mrb[38].mxu0 %vm501_vm0, %v22952_v36  ;;  %26206 = vmatprep.mubr.msk.f32.mxu1 %vm501_vm0, %v21231_v56  ;;  %v36536_v36 = vld [vmem:[#allocation51_spill] sm:$0xff]  ;;  %v36537_v56 = vld [vmem:[#allocation32_spill] sm:$0xff] }
 0x613   : > { %27554 = vmatprep.mubr.msk.f32.mxu0 %vm501_vm0, %v36519_v54  ;;  %v22972_v54 = vld [vmem:[%s30069_s27 + $0x2f8] sm:$0xff] }
 0x615   : > { %26207 = vmatmul.mubr.msk.f32.gmra.mrb[8].mxu1 %vm501_vm0, %v36520_v25  ;;  %v22973_v25 = vld [vmem:[%s30069_s27 + $0x300] sm:$0xff] }
 0x616   : > { %27555 = vmatmul.mubr.msk.f32.gmra.mrb[40].mxu0 %vm501_vm0, %v34259_v12  ;;  %26209 = vmatprep.mubr.msk.f32.mxu1 %vm501_vm0, %v36521_v61  ;;  %v34769_v12 = vld [vmem:[%s30069_s27 + $0x270] sm:$0xff] }
 0x617   : > { %27557 = vmatprep.mubr.msk.f32.mxu0 %vm501_vm0, %v36522_v22  ;;  %v36538_v61 = vld [vmem:[#allocation55_spill] sm:$0xff] }
 0x618   : > { %v36539_v22 = vld [vmem:[#allocation63_spill] sm:$0xff] }
 0x619   : > { %26210 = vmatmul.mubr.msk.f32.gmra.mrb[10].mxu1 %vm501_vm0, %v36523_v59  ;;  %v22974_v59 = vld [vmem:[%s30069_s27 + $0x308] sm:$0xff] }
 0x61a   : > { %27558 = vmatmul.mubr.msk.f32.gmra.mrb[42].mxu0 %vm501_vm0, %v34279_v1  ;;  %26212 = vmatprep.mubr.msk.f32.mxu1 %vm501_vm0, %v36524_v50  ;;  %v22960_v1 = vld [vmem:[%s30069_s27 + $0x278] sm:$0xff]  ;;  %v22975_v50 = vld [vmem:[%s30069_s27 + $0x310] sm:$0xff] }
 0x61b   : > { %27560 = vmatprep.mubr.msk.f32.mxu0 %vm501_vm0, %v36525_v62  ;;  %v36540_v62 = vld [vmem:[#allocation29_spill] sm:$0xff] }
 0x61d   : > { %26213 = vmatmul.mubr.msk.f32.gmra.mrb[12].mxu1 %vm501_vm0, %v36526_v15  ;;  %v36541_v15 = vld [vmem:[#allocation34_spill] sm:$0xff] }
 0x61e   : > { %27561 = vmatmul.mubr.msk.f32.gmra.mrb[44].mxu0 %vm501_vm0, %v34299_v18  ;;  %26215 = vmatprep.mubr.msk.f32.mxu1 %vm501_vm0, %v36527_v52  ;;  %v34791_v18 = vld [vmem:[%s30069_s27 + $0x298] sm:$0xff] }
 0x61f   : > { %27563 = vmatprep.mubr.msk.f32.mxu0 %vm501_vm0, %v34769_v12  ;;  %v22976_v52 = vld [vmem:[%s30069_s27 + $0x318] sm:$0xff] }
 0x621   : > { %26216 = vmatmul.mubr.msk.f32.gmra.mrb[14].mxu1 %vm501_vm0, %v36528_v60  ;;  %v23044_v60 = vld [vmem:[%s30077_s30 + $0xb8] sm:$0xff] }
 0x622   : > { %27564 = vmatmul.mubr.msk.f32.gmra.mrb[46].mxu0 %vm501_vm0, %v22960_v1  ;;  %26218 = vmatprep.mubr.msk.f32.mxu1 %vm501_vm0, %v21239_v33  ;;  %v21255_v1 = vld [vmem:[%s30236_s0 + $0x190] sm:$0xff] }
 0x623   : > { %27566 = vmatprep.mubr.msk.f32.mxu0 %vm501_vm0, %v34782_v0  ;;  %v23043_v33 = vld [vmem:[%s30077_s30 + $0xb0] sm:$0xff] }
 0x625   : > { %26219 = vmatmul.mubr.msk.f32.gmra.mrb[16].mxu1 %vm501_vm0, %v36529_v24  ;;  %v23045_v24 = vld [vmem:[%s30077_s30 + $0xc0] sm:$0xff] }
 0x626   : > { %27567 = vmatmul.mubr.msk.f32.gmra.mrb[48].mxu0 %vm501_vm0, %v34791_v18  ;;  %26221 = vmatprep.mubr.msk.f32.mxu1 %vm501_vm0, %v36530_v32  ;;  %v23047_v32 = vld [vmem:[%s30077_s30 + $0xd0] sm:$0xff] }
 0x627   : > { %27569 = vmatprep.mubr.msk.f32.mxu0 %vm501_vm0, %v34794_v26 }
 0x629   : > { %26222 = vmatmul.mubr.msk.f32.gmra.mrb[18].mxu1 %vm501_vm0, %v36531_v14  ;;  %v23049_v14 = vld [vmem:[%s30077_s30 + $0xe0] sm:$0xff] }
 0x62a   : > { %27570 = vmatmul.mubr.msk.f32.gmra.mrb[50].mxu0 %vm501_vm0, %v34805_v49  ;;  %26224 = vmatprep.mubr.msk.f32.mxu1 %vm501_vm0, %v36532_v29  ;;  %v36544_v29 = vld [vmem:[#allocation81_spill] sm:$0xff] }
 0x62b   : > { %27572 = vmatprep.mubr.msk.f32.mxu0 %vm501_vm0, %v34808_v5 }
 0x62d   : > { %26225 = vmatmul.mubr.msk.f32.gmra.mrb[20].mxu1 %vm501_vm0, %v36533_v42  ;;  %v21263_v42 = vld [vmem:[%s30236_s0 + $0x1e0] sm:$0xff] }
 0x62e   : > { %27573 = vmatmul.mubr.msk.f32.gmra.mrb[52].mxu0 %vm501_vm0, %v34819_v21  ;;  %26227 = vmatprep.mubr.msk.f32.mxu1 %vm501_vm0, %v36534_v38  ;;  %v23051_v38 = vld [vmem:[%s30077_s30 + $0x100] sm:$0xff] }
 0x62f   : > { %27575 = vmatprep.mubr.msk.f32.mxu0 %vm501_vm0, %v34822_v8 }
 0x631   : > { %26228 = vmatmul.mubr.msk.f32.gmra.mrb[22].mxu1 %vm501_vm0, %v36535_v11  ;;  %v36546_v11 = vld [vmem:[#allocation31_spill] sm:$0xff] }
 0x632   : > { %27576 = vmatmul.mubr.msk.f32.gmra.mrb[54].mxu0 %vm501_vm0, %v22968_v30  ;;  %26230 = vmatprep.mubr.msk.f32.mxu1 %vm501_vm0, %v21247_v58  ;;  %v36545_v30 = vld [vmem:[#allocation83_spill] sm:$0xff]  ;;  %v23052_v58 = vld [vmem:[%s30077_s30 + $0x108] sm:$0xff] }
 0x633   : > { %27578 = vmatprep.mubr.msk.f32.mxu0 %vm501_vm0, %v22969_v16  ;;  %v23053_v16 = vld [vmem:[%s30077_s30 + $0x110] sm:$0xff] }
 0x635   : > { %26231 = vmatmul.mubr.msk.f32.gmra.mrb[24].mxu1 %vm501_vm0, %v36536_v36  ;;  %v23056_v36 = vld [vmem:[%s30077_s30 + $0x128] sm:$0xff] }
 0x636   : > { %27579 = vmatmul.mubr.msk.f32.gmra.mrb[56].mxu0 %vm501_vm0, %v22970_v34  ;;  %26233 = vmatprep.mubr.msk.f32.mxu1 %vm501_vm0, %v36537_v56  ;;  %v23054_v34 = vld [vmem:[%s30077_s30 + $0x118] sm:$0xff]  ;;  %v23057_v56 = vld [vmem:[%s30077_s30 + $0x130] sm:$0xff] }
 0x637   : > { %27581 = vmatprep.mubr.msk.f32.mxu0 %vm501_vm0, %v22971_v7  ;;  %v23055_v7 = vld [vmem:[%s30077_s30 + $0x120] sm:$0xff] }
 0x639   : > { %26234 = vmatmul.mubr.msk.f32.gmra.mrb[26].mxu1 %vm501_vm0, %v36538_v61  ;;  %v23061_v61 = vld [vmem:[%s30077_s30 + $0x160] sm:$0xff] }
 0x63a   : > { %27582 = vmatmul.mubr.msk.f32.gmra.mrb[58].mxu0 %vm501_vm0, %v22972_v54  ;;  %26236 = vmatprep.mubr.msk.f32.mxu1 %vm501_vm0, %v36539_v22  ;;  %v21271_v54 = vld [vmem:[%s30236_s0 + $0x230] sm:$0xff]  ;;  %v23065_v22 = vld [vmem:[%s30077_s30 + $0x180] sm:$0xff] }
 0x63b   : > { %27584 = vmatprep.mubr.msk.f32.mxu0 %vm501_vm0, %v22973_v25  ;;  %v23060_v25 = vld [vmem:[%s30077_s30 + $0x158] sm:$0xff] }
 0x63d   : > { %26237 = vmatmul.mubr.msk.f32.gmra.mrb[28].mxu1 %vm501_vm0, %v36540_v62  ;;  %v21355_v62 = vld [vmem:[%s30069_s27 + $0x68] sm:$0xff] }
 0x63e   : > { %27585 = vmatmul.mubr.msk.f32.gmra.mrb[60].mxu0 %vm501_vm0, %v22974_v59  ;;  %26239 = vmatprep.mubr.msk.f32.mxu1 %vm501_vm0, %v36541_v15  ;;  %v34990_v59 = vld [vmem:[%s30077_s30 + $0x1c0] sm:$0xff] }
 0x63f   : > { %27587 = vmatprep.mubr.msk.f32.mxu0 %vm501_vm0, %v22975_v50  ;;  %v35017_v50 = vld [vmem:[%s30077_s30 + $0x1f0] sm:$0xff]  ;;  %v35031_v15 = vld [vmem:[%s30077_s30 + $0x200] sm:$0xff] }
 0x641   : > { %26240 = vmatmul.mubr.msk.f32.gmra.mrb[30].mxu1 %vm501_vm0, %v34290_v51  ;;  %v23046_v51 = vld [vmem:[%s30077_s30 + $0xc8] sm:$0xff] }
 0x642   : > { %27588 = vmatmul.mubr.msk.f32.gmra.mrb[62].mxu0 %vm501_vm0, %v22976_v52  ;;  %26242 = vmatprep.mubr.msk.f32.mxu1 %vm501_vm0, %v21255_v1  ;;  %v35042_v52 = vld [vmem:[%s30077_s30 + $0x208] sm:$0xff]  ;;  %v21357_v1 = vld [vmem:[%s30069_s27 + $0x78] sm:$0xff] }
 0x643   : > { %27594 = vmatprep.mubr.msk.f32.mxu0 %vm501_vm0, %v23043_v33  ;;  %v35046_v33 = vld [vmem:[%s30077_s30 + $0x210] sm:$0xff] }
 0x645   : > { %26243 = vmatmul.mubr.msk.f32.gmra.mrb[32].mxu1 %vm501_vm0, %v34305_v31  ;;  %v36542_v31 = vld [vmem:[#allocation75_spill] sm:$0xff] }
 0x646   : > { %27595 = vmatmul.mubr.msk.f32.vlgmr.msra.gmra.mrb[0].mxu0 %vm501_vm0, %v23044_v60  ;;  %26245 = vmatprep.mubr.msk.f32.mxu1 %vm501_vm0, %v34315_v63  ;;  %v23048_v63 = vld [vmem:[%s30077_s30 + $0xd8] sm:$0xff] }
 0x647   : > { %27897 = vmatpush3.bf16.msra.mxu0 %v34580_v43  ;;  %27597 = vmatprep.mubr.msk.f32.mxu0 %vm501_vm0, %v23045_v24  ;;  %v36543_v43 = vld [vmem:[#allocation79_spill] sm:$0xff]  ;;  %v21359_v24 = vld [vmem:[%s30069_s27 + $0x88] sm:$0xff] }
 0x648   : > { %v35056_v60 = vld [vmem:[%s30077_s30 + $0x218] sm:$0xff] }
 0x649   : > { %26246 = vmatmul.mubr.msk.f32.gmra.mrb[34].mxu1 %vm501_vm0, %v34318_v57  ;;  %v23050_v57 = vld [vmem:[%s30077_s30 + $0xe8] sm:$0xff] }
 0x64a   : > { %27598 = vmatmul.mubr.msk.f32.gmra.mrb[2].mxu0 %vm501_vm0, %v23046_v51  ;;  %26248 = vmatprep.mubr.msk.f32.mxu1 %vm501_vm0, %v36542_v31  ;;  %v35060_v51 = vld [vmem:[%s30077_s30 + $0x220] sm:$0xff]  ;;  %v23082_v31 = vld [vmem:[%s30077_s30 + $0x228] sm:$0xff] }
 0x64b   : > { %27600 = vmatprep.mubr.msk.f32.mxu0 %vm501_vm0, %v23047_v32  ;;  %v21360_v32 = vld [vmem:[%s30069_s27 + $0x90] sm:$0xff] }
 0x64d   : > { %26249 = vmatmul.mubr.msk.f32.gmra.mrb[36].mxu1 %vm501_vm0, %v36543_v43  ;;  %v21362_v43 = vld [vmem:[%s30069_s27 + $0xb0] sm:$0xff] }
 0x64e   : > { %27601 = vmatmul.mubr.msk.f32.gmra.mrb[4].mxu0 %vm501_vm0, %v23048_v63  ;;  %26251 = vmatprep.mubr.msk.f32.mxu1 %vm501_vm0, %v36544_v29  ;;  %v21361_v63 = vld [vmem:[%s30069_s27 + $0xa8] sm:$0xff] }
 0x64f   : > { %27603 = vmatprep.mubr.msk.f32.mxu0 %vm501_vm0, %v23049_v14  ;;  %v35072_v14 = vld [vmem:[%s30077_s30 + $0x240] sm:$0xff]  ;;  %v35081_v29 = vld [vmem:[%s30077_s30 + $0x248] sm:$0xff] }
 0x651   : > { %26252 = vmatmul.mubr.msk.f32.gmra.mrb[38].mxu1 %vm501_vm0, %v36545_v30  ;;  %v35095_v30 = vld [vmem:[%s30077_s30 + $0x258] sm:$0xff] }
 0x652   : > { %27604 = vmatmul.mubr.msk.f32.gmra.mrb[6].mxu0 %vm501_vm0, %v23050_v57  ;;  %26254 = vmatprep.mubr.msk.f32.mxu1 %vm501_vm0, %v21263_v42  ;;  %v21363_v57 = vld [vmem:[%s30069_s27 + $0xb8] sm:$0xff]  ;;  %v35085_v42 = vld [vmem:[%s30077_s30 + $0x250] sm:$0xff] }
 0x653   : > { %27606 = vmatprep.mubr.msk.f32.mxu0 %vm501_vm0, %v23051_v38  ;;  %v21364_v38 = vld [vmem:[%s30069_s27 + $0xc0] sm:$0xff] }
 0x655   : > { %26255 = vmatmul.mubr.msk.f32.gmra.mrb[40].mxu1 %vm501_vm0, %v36546_v11  ;;  %v21366_v11 = vld [vmem:[%s30069_s27 + $0xd0] sm:$0xff] }
 0x656   : > { %27607 = vmatmul.mubr.msk.f32.gmra.mrb[8].mxu0 %vm501_vm0, %v23052_v58  ;;  %26257 = vmatprep.mubr.msk.f32.mxu1 %vm501_vm0, %v34369_v35  ;;  %v36547_v35 = vld [vmem:[#allocation50_spill] sm:$0xff] }
 0x657   : > { %27609 = vmatprep.mubr.msk.f32.mxu0 %vm501_vm0, %v23053_v16  ;;  %v21365_v58 = vld [vmem:[%s30069_s27 + $0xc8] sm:$0xff]  ;;  %v35099_v16 = vld [vmem:[%s30077_s30 + $0x260] sm:$0xff] }
 0x659   : > { %26258 = vmatmul.mubr.msk.f32.gmra.mrb[42].mxu1 %vm501_vm0, %v34373_v13  ;;  %v23058_v13 = vld [vmem:[%s30077_s30 + $0x138] sm:$0xff] }
 0x65a   : > { %27610 = vmatmul.mubr.msk.f32.gmra.mrb[10].mxu0 %vm501_vm0, %v23054_v34  ;;  %26260 = vmatprep.mubr.msk.f32.mxu1 %vm501_vm0, %v34392_v2  ;;  %v23059_v2 = vld [vmem:[%s30077_s30 + $0x150] sm:$0xff]  ;;  %v35109_v34 = vld [vmem:[%s30077_s30 + $0x268] sm:$0xff] }
 0x65b   : > { %27612 = vmatprep.mubr.msk.f32.mxu0 %vm501_vm0, %v23055_v7  ;;  %v21367_v7 = vld [vmem:[%s30069_s27 + $0xd8] sm:$0xff] }
 0x65d   : > { %26261 = vmatmul.mubr.msk.f32.gmra.mrb[44].mxu1 %vm501_vm0, %v36547_v35  ;;  %v21369_v35 = vld [vmem:[%s30069_s27 + $0xf8] sm:$0xff] }
 0x65e   : > { %27613 = vmatmul.mubr.msk.f32.gmra.mrb[12].mxu0 %vm501_vm0, %v23056_v36  ;;  %26263 = vmatprep.mubr.msk.f32.mxu1 %vm501_vm0, %v34407_v28  ;;  %v23062_v28 = vld [vmem:[%s30077_s30 + $0x168] sm:$0xff]  ;;  %v35113_v36 = vld [vmem:[%s30077_s30 + $0x270] sm:$0xff] }
 0x65f   : > { %27615 = vmatprep.mubr.msk.f32.mxu0 %vm501_vm0, %v23057_v56  ;;  %v23090_v56 = vld [vmem:[%s30077_s30 + $0x278] sm:$0xff] }
 0x661   : > { %26264 = vmatmul.mubr.msk.f32.gmra.mrb[46].mxu1 %vm501_vm0, %v34411_v53  ;;  %v23063_v53 = vld [vmem:[%s30077_s30 + $0x170] sm:$0xff] }
 0x662   : > { %27616 = vmatmul.mubr.msk.f32.gmra.mrb[14].mxu0 %vm501_vm0, %v23058_v13  ;;  %26266 = vmatprep.mubr.msk.f32.mxu1 %vm501_vm0, %v21271_v54  ;;  %v35124_v13 = vld [vmem:[%s30077_s30 + $0x290] sm:$0xff]  ;;  %v21370_v54 = vld [vmem:[%s30069_s27 + $0x100] sm:$0xff] }
 0x663   : > { %27618 = vmatprep.mubr.msk.f32.mxu0 %vm501_vm0, %v23059_v2  ;;  %v35134_v2 = vld [vmem:[%s30077_s30 + $0x298] sm:$0xff] }
 0x665   : > { %26267 = vmatmul.mubr.msk.f32.gmra.mrb[48].mxu1 %vm501_vm0, %v34422_v10  ;;  %v23064_v10 = vld [vmem:[%s30077_s30 + $0x178] sm:$0xff] }
 0x666   : > { %27619 = vmatmul.mubr.msk.f32.gmra.mrb[16].mxu0 %vm501_vm0, %v23060_v25  ;;  %26269 = vmatprep.mubr.msk.f32.mxu1 %vm501_vm0, %v34431_v37  ;;  %v23066_v37 = vld [vmem:[%s30077_s30 + $0x188] sm:$0xff] }
 0x667   : > { %27621 = vmatprep.mubr.msk.f32.mxu0 %vm501_vm0, %v23061_v61  ;;  %v21371_v25 = vld [vmem:[%s30069_s27 + $0x108] sm:$0xff]  ;;  %v35138_v61 = vld [vmem:[%s30077_s30 + $0x2a0] sm:$0xff] }
 0x669   : > { %26270 = vmatmul.mubr.msk.f32.gmra.mrb[50].mxu1 %vm501_vm0, %v34434_v6  ;;  %v21279_v6 = vld [vmem:[%s30236_s0 + $0x280] sm:$0xff] }
 0x66a   : > { %27622 = vmatmul.mubr.msk.f32.gmra.mrb[18].mxu0 %vm501_vm0, %v23062_v28  ;;  %26272 = vmatprep.mubr.msk.f32.mxu1 %vm501_vm0, %v34445_v55  ;;  %v34964_v55 = vld [vmem:[%s30077_s30 + $0x1a0] sm:$0xff]  ;;  %v35148_v28 = vld [vmem:[%s30077_s30 + $0x2a8] sm:$0xff] }
 0x66b   : > { %27624 = vmatprep.mubr.msk.f32.mxu0 %vm501_vm0, %v23063_v53  ;;  %v21373_v53 = vld [vmem:[%s30069_s27 + $0x118] sm:$0xff] }
 0x66d   : > { %26273 = vmatmul.mubr.msk.f32.gmra.mrb[52].mxu1 %vm501_vm0, %v34448_v48  ;;  %v34973_v48 = vld [vmem:[%s30077_s30 + $0x1a8] sm:$0xff] }
 0x66e   : > { %27625 = vmatmul.mubr.msk.f32.gmra.mrb[20].mxu0 %vm501_vm0, %v23064_v10  ;;  %26275 = vmatprep.mubr.msk.f32.mxu1 %vm501_vm0, %v34459_v40  ;;  %v34976_v40 = vld [vmem:[%s30077_s30 + $0x1b0] sm:$0xff] }
 0x66f   : > { %27627 = vmatprep.mubr.msk.f32.mxu0 %vm501_vm0, %v23065_v22  ;;  %v35152_v10 = vld [vmem:[%s30077_s30 + $0x2b0] sm:$0xff]  ;;  %v21374_v22 = vld [vmem:[%s30069_s27 + $0x120] sm:$0xff] }
 0x671   : > { %26276 = vmatmul.mubr.msk.f32.gmra.mrb[54].mxu1 %vm501_vm0, %v34462_v44  ;;  %v34987_v44 = vld [vmem:[%s30077_s30 + $0x1b8] sm:$0xff] }
 0x672   : > { %27628 = vmatmul.mubr.msk.f32.gmra.mrb[22].mxu0 %vm501_vm0, %v23066_v37  ;;  %26278 = vmatprep.mubr.msk.f32.mxu1 %vm501_vm0, %v21279_v6  ;;  %v35162_v37 = vld [vmem:[%s30077_s30 + $0x2b8] sm:$0xff]  ;;  %v21375_v6 = vld [vmem:[%s30069_s27 + $0x128] sm:$0xff] }
 0x673   : > { %27630 = vmatprep.mubr.msk.f32.mxu0 %vm501_vm0, %v34964_v55 }
 0x675   : > { %26279 = vmatmul.mubr.msk.f32.gmra.mrb[56].mxu1 %vm501_vm0, %v34474_v45  ;;  %v35001_v45 = vld [vmem:[%s30077_s30 + $0x1c8] sm:$0xff] }
 0x676   : > { %27631 = vmatmul.mubr.msk.f32.gmra.mrb[24].mxu0 %vm501_vm0, %v34973_v48  ;;  %26281 = vmatprep.mubr.msk.f32.mxu1 %vm501_vm0, %v34484_v41  ;;  %v35004_v41 = vld [vmem:[%s30077_s30 + $0x1d0] sm:$0xff] }
 0x677   : > { %27633 = vmatprep.mubr.msk.f32.mxu0 %vm501_vm0, %v34976_v40 }
 0x679   : > { %26282 = vmatmul.mubr.msk.f32.gmra.mrb[58].mxu1 %vm501_vm0, %v34487_v20  ;;  %v23074_v20 = vld [vmem:[%s30077_s30 + $0x1d8] sm:$0xff] }
 0x67a   : > { %27634 = vmatmul.mubr.msk.f32.gmra.mrb[26].mxu0 %vm501_vm0, %v34987_v44  ;;  %26284 = vmatprep.mubr.msk.f32.mxu1 %vm501_vm0, %v34498_v46  ;;  %v21353_v46 = vld [vmem:[%s30069_s27 + $0x58] sm:$0xff] }
 0x67b   : > { %27636 = vmatprep.mubr.msk.f32.mxu0 %vm501_vm0, %v34990_v59 }
 0x67d   : > { %26285 = vmatmul.mubr.msk.f32.gmra.mrb[60].mxu1 %vm501_vm0, %v34501_v17  ;;  %v21354_v17 = vld [vmem:[%s30069_s27 + $0x60] sm:$0xff] }
 0x67e   : > { %27637 = vmatmul.mubr.msk.f32.gmra.mrb[28].mxu0 %vm501_vm0, %v35001_v45  ;;  %26287 = vmatprep.mubr.msk.f32.mxu1 %vm501_vm0, %v34512_v4  ;;  %v35027_v4 = vld [vmem:[%s30077_s30 + $0x1f8] sm:$0xff] }
 0x67f   : > { %27639 = vmatprep.mubr.msk.f32.mxu0 %vm501_vm0, %v35004_v41 }
 0x681   : > { %26288 = vmatmul.mubr.msk.f32.gmra.mrb[62].mxu1 %vm501_vm0, %v34515_v23  ;;  %v21356_v23 = vld [vmem:[%s30069_s27 + $0x70] sm:$0xff] }
 0x682   : > { %27640 = vmatmul.mubr.msk.f32.gmra.mrb[30].mxu0 %vm501_vm0, %v23074_v20  ;;  %26294 = vmatprep.mubr.msk.f32.mxu1 %vm501_vm0, %v21353_v46  ;;  %v35166_v20 = vld [vmem:[%s30077_s30 + $0x2c0] sm:$0xff]  ;;  %v23098_v46 = vld [vmem:[%s30077_s30 + $0x2c8] sm:$0xff] }
 0x683   : > { %27642 = vmatprep.mubr.msk.f32.mxu0 %vm501_vm0, %v35017_v50 }
 0x685   : > { %26295 = vmatmul.mubr.msk.f32.vlgmr.msra.gmra.mrb[0].mxu1 %vm501_vm0, %v21354_v17  ;;  %v21377_v17 = vld [vmem:[%s30069_s27 + $0x148] sm:$0xff] }
 0x686   : > { %27643 = vmatmul.mubr.msk.f32.gmra.mrb[32].mxu0 %vm501_vm0, %v35027_v4  ;;  %27899 = vmatpush3.bf16.msra.mxu1 %v36516_v19  ;;  %v21358_v19 = vld [vmem:[%s30069_s27 + $0x80] sm:$0xff] }
 0x687   : > { %26297 = vmatprep.mubr.msk.f32.mxu1 %vm501_vm0, %v21355_v62  ;;  %27645 = vmatprep.mubr.msk.f32.mxu0 %vm501_vm0, %v35031_v15  ;;  %v23099_v62 = vld [vmem:[%s30077_s30 + $0x2e0] sm:$0xff] }
 0x689   : > { %26298 = vmatmul.mubr.msk.f32.gmra.mrb[2].mxu1 %vm501_vm0, %v21356_v23  ;;  %v21378_v23 = vld [vmem:[%s30069_s27 + $0x150] sm:$0xff] }
 0x68a   : > { %27646 = vmatmul.mubr.msk.f32.gmra.mrb[34].mxu0 %vm501_vm0, %v35042_v52  ;;  %26300 = vmatprep.mubr.msk.f32.mxu1 %vm501_vm0, %v21357_v1  ;;  %v23100_v1 = vld [vmem:[%s30077_s30 + $0x2e8] sm:$0xff] }
 0x68b   : > { %27648 = vmatprep.mubr.msk.f32.mxu0 %vm501_vm0, %v35046_v33 }
 0x68d   : > { %26301 = vmatmul.mubr.msk.f32.gmra.mrb[4].mxu1 %vm501_vm0, %v21358_v19  ;;  %v21379_v19 = vld [vmem:[%s30069_s27 + $0x158] sm:$0xff] }
 0x68e   : > { %27649 = vmatmul.mubr.msk.f32.gmra.mrb[36].mxu0 %vm501_vm0, %v35056_v60  ;;  %26303 = vmatprep.mubr.msk.f32.mxu1 %vm501_vm0, %v21359_v24  ;;  %v23101_v24 = vld [vmem:[%s30077_s30 + $0x2f0] sm:$0xff] }
 0x68f   : > { %27651 = vmatprep.mubr.msk.f32.mxu0 %vm501_vm0, %v35060_v51 }
 0x691   : > { %26304 = vmatmul.mubr.msk.f32.gmra.mrb[6].mxu1 %vm501_vm0, %v21360_v32  ;;  %v23102_v32 = vld [vmem:[%s30077_s30 + $0x2f8] sm:$0xff] }
 0x692   : > { %27652 = vmatmul.mubr.msk.f32.gmra.mrb[38].mxu0 %vm501_vm0, %v23082_v31  ;;  %26306 = vmatprep.mubr.msk.f32.mxu1 %vm501_vm0, %v21361_v63  ;;  %v21381_v31 = vld [vmem:[%s30069_s27 + $0x168] sm:$0xff]  ;;  %v23103_v63 = vld [vmem:[%s30077_s30 + $0x300] sm:$0xff] }
 0x693   : > { %27654 = vmatprep.mubr.msk.f32.mxu0 %vm501_vm0, %v35072_v14 }
 0x695   : > { %26307 = vmatmul.mubr.msk.f32.gmra.mrb[8].mxu1 %vm501_vm0, %v21362_v43  ;;  %v21382_v43 = vld [vmem:[%s30069_s27 + $0x170] sm:$0xff] }
 0x696   : > { %27655 = vmatmul.mubr.msk.f32.gmra.mrb[40].mxu0 %vm501_vm0, %v35081_v29  ;;  %26309 = vmatprep.mubr.msk.f32.mxu1 %vm501_vm0, %v21363_v57  ;;  %v23104_v57 = vld [vmem:[%s30077_s30 + $0x308] sm:$0xff] }
 0x697   : > { %27657 = vmatprep.mubr.msk.f32.mxu0 %vm501_vm0, %v35085_v42 }
 0x699   : > { %26310 = vmatmul.mubr.msk.f32.gmra.mrb[10].mxu1 %vm501_vm0, %v21364_v38  ;;  %v21383_v38 = vld [vmem:[%s30069_s27 + $0x178] sm:$0xff] }
 0x69a   : > { %27658 = vmatmul.mubr.msk.f32.gmra.mrb[42].mxu0 %vm501_vm0, %v35095_v30  ;;  %26312 = vmatprep.mubr.msk.f32.mxu1 %vm501_vm0, %v21365_v58  ;;  %v23105_v58 = vld [vmem:[%s30077_s30 + $0x310] sm:$0xff] }
 0x69b   : > { %27660 = vmatprep.mubr.msk.f32.mxu0 %vm501_vm0, %v35099_v16 }
 0x69d   : > { %26313 = vmatmul.mubr.msk.f32.gmra.mrb[12].mxu1 %vm501_vm0, %v21366_v11  ;;  %v23106_v11 = vld [vmem:[%s30077_s30 + $0x318] sm:$0xff] }
 0x69e   : > { %27661 = vmatmul.mubr.msk.f32.gmra.mrb[44].mxu0 %vm501_vm0, %v35109_v34  ;;  %26315 = vmatprep.mubr.msk.f32.mxu1 %vm501_vm0, %v21367_v7  ;;  %v21385_v7 = vld [vmem:[%s30069_s27 + $0x198] sm:$0xff] }
 0x69f   : > { %27663 = vmatprep.mubr.msk.f32.mxu0 %vm501_vm0, %v35113_v36 }
 0x6a1   : > { %26316 = vmatmul.mubr.msk.f32.gmra.mrb[14].mxu1 %vm501_vm0, %v34592_v3  ;;  %v21372_v3 = vld [vmem:[%s30069_s27 + $0x110] sm:$0xff] }
 0x6a2   : > { %27664 = vmatmul.mubr.msk.f32.gmra.mrb[46].mxu0 %vm501_vm0, %v23090_v56  ;;  %26318 = vmatprep.mubr.msk.f32.mxu1 %vm501_vm0, %v21369_v35  ;;  %v23173_v56 = vld [vmem:[%s30236_s0 + $0xb0] sm:$0xff]  ;;  %v21386_v35 = vld [vmem:[%s30069_s27 + $0x1a0] sm:$0xff] }
 0x6a3   : > { %27666 = vmatprep.mubr.msk.f32.mxu0 %vm501_vm0, %v35124_v13 }
 0x6a5   : > { %26319 = vmatmul.mubr.msk.f32.gmra.mrb[16].mxu1 %vm501_vm0, %v21370_v54  ;;  %v23174_v54 = vld [vmem:[%s30236_s0 + $0xb8] sm:$0xff] }
 0x6a6   : > { %27667 = vmatmul.mubr.msk.f32.gmra.mrb[48].mxu0 %vm501_vm0, %v35134_v2  ;;  %26321 = vmatprep.mubr.msk.f32.mxu1 %vm501_vm0, %v21371_v25  ;;  %v21387_v25 = vld [vmem:[%s30069_s27 + $0x1a8] sm:$0xff] }
 0x6a7   : > { %27669 = vmatprep.mubr.msk.f32.mxu0 %vm501_vm0, %v35138_v61 }
 0x6a9   : > { %26322 = vmatmul.mubr.msk.f32.gmra.mrb[18].mxu1 %vm501_vm0, %v21372_v3  ;;  %v23175_v3 = vld [vmem:[%s30236_s0 + $0xc0] sm:$0xff] }
 0x6aa   : > { %27670 = vmatmul.mubr.msk.f32.gmra.mrb[50].mxu0 %vm501_vm0, %v35148_v28  ;;  %26324 = vmatprep.mubr.msk.f32.mxu1 %vm501_vm0, %v21373_v53  ;;  %v23176_v53 = vld [vmem:[%s30236_s0 + $0xc8] sm:$0xff] }
 0x6ab   : > { %27672 = vmatprep.mubr.msk.f32.mxu0 %vm501_vm0, %v35152_v10 }
 0x6ad   : > { %26325 = vmatmul.mubr.msk.f32.gmra.mrb[20].mxu1 %vm501_vm0, %v21374_v22  ;;  %v21389_v22 = vld [vmem:[%s30069_s27 + $0x1b8] sm:$0xff] }
 0x6ae   : > { %27673 = vmatmul.mubr.msk.f32.gmra.mrb[52].mxu0 %vm501_vm0, %v35162_v37  ;;  %26327 = vmatprep.mubr.msk.f32.mxu1 %vm501_vm0, %v21375_v6  ;;  %v23177_v6 = vld [vmem:[%s30236_s0 + $0xd0] sm:$0xff] }
 0x6af   : > { %27675 = vmatprep.mubr.msk.f32.mxu0 %vm501_vm0, %v35166_v20 }
 0x6b1   : > { %26328 = vmatmul.mubr.msk.f32.gmra.mrb[22].mxu1 %vm501_vm0, %v34627_v39  ;;  %v21380_v39 = vld [vmem:[%s30069_s27 + $0x160] sm:$0xff] }
 0x6b2   : > { %27676 = vmatmul.mubr.msk.f32.gmra.mrb[54].mxu0 %vm501_vm0, %v23098_v46  ;;  %26330 = vmatprep.mubr.msk.f32.mxu1 %vm501_vm0, %v21377_v17  ;;  %v21390_v46 = vld [vmem:[%s30069_s27 + $0x1c0] sm:$0xff]  ;;  %v23178_v17 = vld [vmem:[%s30236_s0 + $0xd8] sm:$0xff] }
 0x6b3   : > { %27678 = vmatprep.mubr.msk.f32.mxu0 %vm501_vm0, %v23099_v62  ;;  %v21391_v62 = vld [vmem:[%s30069_s27 + $0x1c8] sm:$0xff] }
 0x6b5   : > { %26331 = vmatmul.mubr.msk.f32.gmra.mrb[24].mxu1 %vm501_vm0, %v21378_v23  ;;  %v23179_v23 = vld [vmem:[%s30236_s0 + $0xe0] sm:$0xff] }
 0x6b6   : > { %27679 = vmatmul.mubr.msk.f32.gmra.mrb[56].mxu0 %vm501_vm0, %v23100_v1  ;;  %26333 = vmatprep.mubr.msk.f32.mxu1 %vm501_vm0, %v21379_v19  ;;  %v23180_v1 = vld [vmem:[%s30236_s0 + $0xe8] sm:$0xff] }
 0x6b7   : > { %27681 = vmatprep.mubr.msk.f32.mxu0 %vm501_vm0, %v23101_v24  ;;  %v21393_v19 = vld [vmem:[%s30069_s27 + $0x1e8] sm:$0xff]  ;;  %v23181_v24 = vld [vmem:[%s30236_s0 + $0x100] sm:$0xff] }
 0x6b9   : > { %26334 = vmatmul.mubr.msk.f32.gmra.mrb[26].mxu1 %vm501_vm0, %v21380_v39  ;;  %v21394_v39 = vld [vmem:[%s30069_s27 + $0x1f0] sm:$0xff] }
 0x6ba   : > { %27682 = vmatmul.mubr.msk.f32.gmra.mrb[58].mxu0 %vm501_vm0, %v23102_v32  ;;  %26336 = vmatprep.mubr.msk.f32.mxu1 %vm501_vm0, %v21381_v31  ;;  %v23182_v32 = vld [vmem:[%s30236_s0 + $0x108] sm:$0xff]  ;;  %v21395_v31 = vld [vmem:[%s30069_s27 + $0x1f8] sm:$0xff] }
 0x6bb   : > { %27684 = vmatprep.mubr.msk.f32.mxu0 %vm501_vm0, %v23103_v63  ;;  %v23183_v63 = vld [vmem:[%s30236_s0 + $0x110] sm:$0xff] }
 0x6bd   : > { %26337 = vmatmul.mubr.msk.f32.gmra.mrb[28].mxu1 %vm501_vm0, %v21382_v43  ;;  %v23184_v43 = vld [vmem:[%s30236_s0 + $0x118] sm:$0xff] }
 0x6be   : > { %27685 = vmatmul.mubr.msk.f32.gmra.mrb[60].mxu0 %vm501_vm0, %v23104_v57  ;;  %26339 = vmatprep.mubr.msk.f32.mxu1 %vm501_vm0, %v21383_v38  ;;  %v21397_v57 = vld [vmem:[%s30069_s27 + $0x208] sm:$0xff]  ;;  %v23185_v38 = vld [vmem:[%s30236_s0 + $0x120] sm:$0xff] }
 0x6bf   : > { %27687 = vmatprep.mubr.msk.f32.mxu0 %vm501_vm0, %v23105_v58  ;;  %v21398_v58 = vld [vmem:[%s30069_s27 + $0x210] sm:$0xff] }
 0x6c1   : > { %26340 = vmatmul.mubr.msk.f32.gmra.mrb[30].mxu1 %vm501_vm0, %v34662_v27  ;;  %v21388_v27 = vld [vmem:[%s30069_s27 + $0x1b0] sm:$0xff] }
 0x6c2   : > { %27688 = vmatmul.mubr.msk.f32.gmra.mrb[62].mxu0 %vm501_vm0, %v23106_v11  ;;  %26342 = vmatprep.mubr.msk.f32.mxu1 %vm501_vm0, %v21385_v7  ;;  %v23186_v11 = vld [vmem:[%s30236_s0 + $0x128] sm:$0xff]  ;;  %v21399_v7 = vld [vmem:[%s30069_s27 + $0x218] sm:$0xff] }
 0x6c3   : > { %27694 = vmatprep.mubr.msk.f32.mxu0 %vm501_vm0, %v23173_v56  ;;  %v23187_v56 = vld [vmem:[%s30236_s0 + $0x130] sm:$0xff] }
 0x6c5   : > { %26343 = vmatmul.mubr.msk.f32.gmra.mrb[32].mxu1 %vm501_vm0, %v21386_v35  ;;  %v23188_v35 = vld [vmem:[%s30236_s0 + $0x138] sm:$0xff] }
 0x6c6   : > { %27695 = vmatmul.mubr.msk.f32.vlgmr.msra.gmra.mrb[0].mxu0 %vm501_vm0, %v23174_v54  ;;  %26345 = vmatprep.mubr.msk.f32.mxu1 %vm501_vm0, %v21387_v25  ;;  %v21401_v54 = vld [vmem:[%s30069_s27 + $0x238] sm:$0xff]  ;;  %v23189_v25 = vld [vmem:[%s30236_s0 + $0x150] sm:$0xff] }
 0x6c7   : > { %27697 = vmatprep.mubr.msk.f32.mxu0 %vm501_vm0, %v23175_v3  ;;  %v21402_v3 = vld [vmem:[%s30069_s27 + $0x240] sm:$0xff] }
 0x6c9   : > { %26346 = vmatmul.mubr.msk.f32.gmra.mrb[34].mxu1 %vm501_vm0, %v21388_v27  ;;  %v23190_v27 = vld [vmem:[%s30236_s0 + $0x158] sm:$0xff] }
 0x6ca   : > { %27698 = vmatmul.mubr.msk.f32.gmra.mrb[2].mxu0 %vm501_vm0, %v23176_v53  ;;  %26348 = vmatprep.mubr.msk.f32.mxu1 %vm501_vm0, %v21389_v22  ;;  %v21403_v53 = vld [vmem:[%s30069_s27 + $0x248] sm:$0xff]  ;;  %v23191_v22 = vld [vmem:[%s30236_s0 + $0x160] sm:$0xff] }
 0x6cb   : > { %27700 = vmatprep.mubr.msk.f32.mxu0 %vm501_vm0, %v23177_v6  ;;  %v23192_v6 = vld [vmem:[%s30236_s0 + $0x168] sm:$0xff] }
 0x6cd   : > { %26349 = vmatmul.mubr.msk.f32.gmra.mrb[36].mxu1 %vm501_vm0, %v21390_v46  ;;  %v21405_v46 = vld [vmem:[%s30069_s27 + $0x258] sm:$0xff] }
 0x6ce   : > { %27701 = vmatmul.mubr.msk.f32.gmra.mrb[4].mxu0 %vm501_vm0, %v23178_v17  ;;  %26351 = vmatprep.mubr.msk.f32.mxu1 %vm501_vm0, %v21391_v62  ;;  %v23193_v17 = vld [vmem:[%s30236_s0 + $0x170] sm:$0xff]  ;;  %v21406_v62 = vld [vmem:[%s30069_s27 + $0x260] sm:$0xff] }
 0x6cf   : > { %27703 = vmatprep.mubr.msk.f32.mxu0 %vm501_vm0, %v23179_v23  ;;  %v23194_v23 = vld [vmem:[%s30236_s0 + $0x178] sm:$0xff] }
 0x6d1   : > { %26352 = vmatmul.mubr.msk.f32.gmra.mrb[38].mxu1 %vm501_vm0, %v34697_v47  ;;  %v21396_v47 = vld [vmem:[%s30069_s27 + $0x200] sm:$0xff] }
 0x6d2   : > { %27704 = vmatmul.mubr.msk.f32.gmra.mrb[6].mxu0 %vm501_vm0, %v23180_v1  ;;  %26354 = vmatprep.mubr.msk.f32.mxu1 %vm501_vm0, %v21393_v19  ;;  %v21407_v1 = vld [vmem:[%s30069_s27 + $0x268] sm:$0xff]  ;;  %v23195_v19 = vld [vmem:[%s30236_s0 + $0x180] sm:$0xff] }
 0x6d3   : > { %27706 = vmatprep.mubr.msk.f32.mxu0 %vm501_vm0, %v23181_v24  ;;  %v23196_v24 = vld [vmem:[%s30236_s0 + $0x188] sm:$0xff] }
 0x6d5   : > { %26355 = vmatmul.mubr.msk.f32.gmra.mrb[40].mxu1 %vm501_vm0, %v21394_v39  ;;  %v21409_v39 = vld [vmem:[%s30069_s27 + $0x288] sm:$0xff] }
 0x6d6   : > { %27707 = vmatmul.mubr.msk.f32.gmra.mrb[8].mxu0 %vm501_vm0, %v23182_v32  ;;  %26357 = vmatprep.mubr.msk.f32.mxu1 %vm501_vm0, %v21395_v31  ;;  %v23197_v32 = vld [vmem:[%s30236_s0 + $0x1a0] sm:$0xff]  ;;  %v23198_v31 = vld [vmem:[%s30236_s0 + $0x1a8] sm:$0xff] }
 0x6d7   : > { %27709 = vmatprep.mubr.msk.f32.mxu0 %vm501_vm0, %v23183_v63  ;;  %v23199_v63 = vld [vmem:[%s30236_s0 + $0x1b0] sm:$0xff] }
 0x6d9   : > { %26358 = vmatmul.mubr.msk.f32.gmra.mrb[42].mxu1 %vm501_vm0, %v21396_v47  ;;  %v23201_v47 = vld [vmem:[%s30236_s0 + $0x1c0] sm:$0xff] }
 0x6da   : > { %27710 = vmatmul.mubr.msk.f32.gmra.mrb[10].mxu0 %vm501_vm0, %v23184_v43  ;;  %26360 = vmatprep.mubr.msk.f32.mxu1 %vm501_vm0, %v21397_v57  ;;  %v23203_v43 = vld [vmem:[%s30236_s0 + $0x1d0] sm:$0xff]  ;;  %v23207_v57 = vld [vmem:[%s30236_s0 + $0x200] sm:$0xff] }
 0x6db   : > { %27712 = vmatprep.mubr.msk.f32.mxu0 %vm501_vm0, %v23185_v38  ;;  %v23211_v38 = vld [vmem:[%s30236_s0 + $0x220] sm:$0xff] }
 0x6dd   : > { %26361 = vmatmul.mubr.msk.f32.gmra.mrb[44].mxu1 %vm501_vm0, %v21398_v58  ;;  %v23215_v58 = vld [vmem:[%s30236_s0 + $0x250] sm:$0xff] }
 0x6de   : > { %27713 = vmatmul.mubr.msk.f32.gmra.mrb[12].mxu0 %vm501_vm0, %v23186_v11  ;;  %26363 = vmatprep.mubr.msk.f32.mxu1 %vm501_vm0, %v21399_v7  ;;  %v23219_v11 = vld [vmem:[%s30236_s0 + $0x270] sm:$0xff]  ;;  %v23223_v7 = vld [vmem:[%s30236_s0 + $0x2a0] sm:$0xff] }
 0x6df   : > { %27715 = vmatprep.mubr.msk.f32.mxu0 %vm501_vm0, %v23187_v56  ;;  %v23227_v56 = vld [vmem:[%s30236_s0 + $0x2c0] sm:$0xff] }
 0x6e1   : > { %26364 = vmatmul.mubr.msk.f32.gmra.mrb[46].mxu1 %vm501_vm0, %v34736_v9  ;;  %v21404_v9 = vld [vmem:[%s30069_s27 + $0x250] sm:$0xff]  ;;  %s364_s27 = scalar_select %p363_p13, %s29891_s25, 1 }
 0x6e2   : > { %27716 = vmatmul.mubr.msk.f32.gmra.mrb[14].mxu0 %vm501_vm0, %v23188_v35  ;;  %26366 = vmatprep.mubr.msk.f32.mxu1 %vm501_vm0, %v21401_v54  ;;  %v23231_v35 = vld [vmem:[%s30236_s0 + $0x2f0] sm:$0xff] }
 0x6e3   : > { %27718 = vmatprep.mubr.msk.f32.mxu0 %vm501_vm0, %v23189_v25  ;;  %v23235_v54 = vld [vmem:[%s30236_s0 + $0x310] sm:$0xff] }
 0x6e5   : > { %26367 = vmatmul.mubr.msk.f32.gmra.mrb[48].mxu1 %vm501_vm0, %v21402_v3 }
 0x6e6   : > { %27719 = vmatmul.mubr.msk.f32.gmra.mrb[16].mxu0 %vm501_vm0, %v23190_v27  ;;  %26369 = vmatprep.mubr.msk.f32.mxu1 %vm501_vm0, %v21403_v53 }
 0x6e7   : > { %27721 = vmatprep.mubr.msk.f32.mxu0 %vm501_vm0, %v23191_v22 }
 0x6e9   : > { %26370 = vmatmul.mubr.msk.f32.gmra.mrb[50].mxu1 %vm501_vm0, %v21404_v9 }
 0x6ea   : > { %27722 = vmatmul.mubr.msk.f32.gmra.mrb[18].mxu0 %vm501_vm0, %v23192_v6  ;;  %26372 = vmatprep.mubr.msk.f32.mxu1 %vm501_vm0, %v21405_v46 }
 0x6eb   : > { %27724 = vmatprep.mubr.msk.f32.mxu0 %vm501_vm0, %v23193_v17 }
 0x6ed   : > { %26373 = vmatmul.mubr.msk.f32.gmra.mrb[52].mxu1 %vm501_vm0, %v21406_v62 }
 0x6ee   : > { %27725 = vmatmul.mubr.msk.f32.gmra.mrb[20].mxu0 %vm501_vm0, %v23194_v23  ;;  %26375 = vmatprep.mubr.msk.f32.mxu1 %vm501_vm0, %v21407_v1 }
 0x6ef   : > { %27727 = vmatprep.mubr.msk.f32.mxu0 %vm501_vm0, %v23195_v19 }
 0x6f1   : > { %26376 = vmatmul.mubr.msk.f32.gmra.mrb[54].mxu1 %vm501_vm0, %v34769_v12  ;;  %v23200_v12 = vld [vmem:[%s30236_s0 + $0x1b8] sm:$0xff] }
 0x6f2   : > { %27728 = vmatmul.mubr.msk.f32.gmra.mrb[22].mxu0 %vm501_vm0, %v23196_v24  ;;  %26378 = vmatprep.mubr.msk.f32.mxu1 %vm501_vm0, %v21409_v39 }
 0x6f3   : > { %27730 = vmatprep.mubr.msk.f32.mxu0 %vm501_vm0, %v23197_v32 }
 0x6f5   : > { %26379 = vmatmul.mubr.msk.f32.gmra.mrb[56].mxu1 %vm501_vm0, %v34782_v0  ;;  %v23202_v0 = vld [vmem:[%s30236_s0 + $0x1c8] sm:$0xff] }
 0x6f6   : > { %27731 = vmatmul.mubr.msk.f32.gmra.mrb[24].mxu0 %vm501_vm0, %v23198_v31  ;;  %26381 = vmatprep.mubr.msk.f32.mxu1 %vm501_vm0, %v34791_v18  ;;  %v23204_v18 = vld [vmem:[%s30236_s0 + $0x1d8] sm:$0xff] }
 0x6f7   : > { %27733 = vmatprep.mubr.msk.f32.mxu0 %vm501_vm0, %v23199_v63 }
 0x6f9   : > { %26382 = vmatmul.mubr.msk.f32.gmra.mrb[58].mxu1 %vm501_vm0, %v34794_v26  ;;  %v21515_v26 = vld [vmem:[%s30077_s30 + $0x198] sm:$0xff] }
 0x6fa   : > { %27734 = vmatmul.mubr.msk.f32.gmra.mrb[26].mxu0 %vm501_vm0, %v23200_v12  ;;  %26384 = vmatprep.mubr.msk.f32.mxu1 %vm501_vm0, %v34805_v49  ;;  %v23205_v49 = vld [vmem:[%s30236_s0 + $0x1f0] sm:$0xff] }
 0x6fb   : > { %27736 = vmatprep.mubr.msk.f32.mxu0 %vm501_vm0, %v23201_v47 }
 0x6fd   : > { %26385 = vmatmul.mubr.msk.f32.gmra.mrb[60].mxu1 %vm501_vm0, %v34808_v5  ;;  %v23206_v5 = vld [vmem:[%s30236_s0 + $0x1f8] sm:$0xff] }
 0x6fe   : > { %27737 = vmatmul.mubr.msk.f32.gmra.mrb[28].mxu0 %vm501_vm0, %v23202_v0  ;;  %26387 = vmatprep.mubr.msk.f32.mxu1 %vm501_vm0, %v34819_v21  ;;  %v23208_v21 = vld [vmem:[%s30236_s0 + $0x208] sm:$0xff] }
 0x6ff   : > { %27739 = vmatprep.mubr.msk.f32.mxu0 %vm501_vm0, %v23203_v43 }
 0x701   : > { %26388 = vmatmul.mubr.msk.f32.gmra.mrb[62].mxu1 %vm501_vm0, %v34822_v8  ;;  %v23209_v8 = vld [vmem:[%s30236_s0 + $0x210] sm:$0xff] }
 0x702   : > { %27740 = vmatmul.mubr.msk.f32.gmra.mrb[30].mxu0 %vm501_vm0, %v23204_v18  ;;  %26442 = vmatprep.mubr.msk.f32.mxu1 %vm501_vm0, %v21515_v26 }
 0x703   : > { %27742 = vmatprep.mubr.msk.f32.mxu0 %vm501_vm0, %v23205_v49 }
 0x705   : > { %26443 = vmatmul.mubr.msk.f32.vlgmr.msra.gmra.mrb[32].mxu1 %vm501_vm0, %v34964_v55  ;;  %v23210_v55 = vld [vmem:[%s30236_s0 + $0x218] sm:$0xff] }
 0x706   : > { %27743 = vmatmul.mubr.msk.f32.gmra.mrb[32].mxu0 %vm501_vm0, %v23206_v5  ;;  %26445 = vmatprep.mubr.msk.f32.mxu1 %vm501_vm0, %v34973_v48  ;;  %v23212_v48 = vld [vmem:[%s30236_s0 + $0x228] sm:$0xff] }
 0x707   : > { %27745 = vmatprep.mubr.msk.f32.mxu0 %vm501_vm0, %v23207_v57 }
 0x709   : > { %26446 = vmatmul.mubr.msk.f32.gmra.mrb[34].mxu1 %vm501_vm0, %v34976_v40  ;;  %v21523_v40 = vld [vmem:[%s30077_s30 + $0x1e8] sm:$0xff] }
 0x70a   : > { %27746 = vmatmul.mubr.msk.f32.gmra.mrb[34].mxu0 %vm501_vm0, %v23208_v21  ;;  %26448 = vmatprep.mubr.msk.f32.mxu1 %vm501_vm0, %v34987_v44  ;;  %v23213_v44 = vld [vmem:[%s30236_s0 + $0x240] sm:$0xff] }
 0x70b   : > { %27748 = vmatprep.mubr.msk.f32.mxu0 %vm501_vm0, %v23209_v8 }
 0x70d   : > { %26449 = vmatmul.mubr.msk.f32.gmra.mrb[36].mxu1 %vm501_vm0, %v34990_v59  ;;  %v23214_v59 = vld [vmem:[%s30236_s0 + $0x248] sm:$0xff] }
 0x70e   : > { %27749 = vmatmul.mubr.msk.f32.gmra.mrb[36].mxu0 %vm501_vm0, %v23210_v55  ;;  %26451 = vmatprep.mubr.msk.f32.mxu1 %vm501_vm0, %v35001_v45  ;;  %v23216_v45 = vld [vmem:[%s30236_s0 + $0x258] sm:$0xff] }
 0x70f   : > { %27751 = vmatprep.mubr.msk.f32.mxu0 %vm501_vm0, %v23211_v38 }
 0x711   : > { %26452 = vmatmul.mubr.msk.f32.gmra.mrb[38].mxu1 %vm501_vm0, %v35004_v41  ;;  %v23217_v41 = vld [vmem:[%s30236_s0 + $0x260] sm:$0xff] }
 0x712   : > { %27752 = vmatmul.mubr.msk.f32.gmra.mrb[38].mxu0 %vm501_vm0, %v23212_v48  ;;  %26454 = vmatprep.mubr.msk.f32.mxu1 %vm501_vm0, %v21523_v40 }
 0x713   : > { %27754 = vmatprep.mubr.msk.f32.mxu0 %vm501_vm0, %v23213_v44 }
 0x715   : > { %26455 = vmatmul.mubr.msk.f32.gmra.mrb[40].mxu1 %vm501_vm0, %v35017_v50  ;;  %v23218_v50 = vld [vmem:[%s30236_s0 + $0x268] sm:$0xff] }
 0x716   : > { %27755 = vmatmul.mubr.msk.f32.gmra.mrb[40].mxu0 %vm501_vm0, %v23214_v59  ;;  %26457 = vmatprep.mubr.msk.f32.mxu1 %vm501_vm0, %v35027_v4  ;;  %v23220_v4 = vld [vmem:[%s30236_s0 + $0x278] sm:$0xff] }
 0x717   : > { %27757 = vmatprep.mubr.msk.f32.mxu0 %vm501_vm0, %v23215_v58 }
 0x719   : > { %26458 = vmatmul.mubr.msk.f32.gmra.mrb[42].mxu1 %vm501_vm0, %v35031_v15  ;;  %v21531_v15 = vld [vmem:[%s30077_s30 + $0x238] sm:$0xff] }
 0x71a   : > { %27758 = vmatmul.mubr.msk.f32.gmra.mrb[42].mxu0 %vm501_vm0, %v23216_v45  ;;  %26460 = vmatprep.mubr.msk.f32.mxu1 %vm501_vm0, %v35042_v52  ;;  %v23221_v52 = vld [vmem:[%s30236_s0 + $0x290] sm:$0xff] }
 0x71b   : > { %27760 = vmatprep.mubr.msk.f32.mxu0 %vm501_vm0, %v23217_v41 }
 0x71d   : > { %26461 = vmatmul.mubr.msk.f32.gmra.mrb[44].mxu1 %vm501_vm0, %v35046_v33  ;;  %v23222_v33 = vld [vmem:[%s30236_s0 + $0x298] sm:$0xff] }
 0x71e   : > { %27761 = vmatmul.mubr.msk.f32.gmra.mrb[44].mxu0 %vm501_vm0, %v23218_v50  ;;  %26463 = vmatprep.mubr.msk.f32.mxu1 %vm501_vm0, %v35056_v60  ;;  %v23224_v60 = vld [vmem:[%s30236_s0 + $0x2a8] sm:$0xff] }
 0x71f   : > { %27763 = vmatprep.mubr.msk.f32.mxu0 %vm501_vm0, %v23219_v11 }
 0x721   : > { %26464 = vmatmul.mubr.msk.f32.gmra.mrb[46].mxu1 %vm501_vm0, %v35060_v51  ;;  %v23225_v51 = vld [vmem:[%s30236_s0 + $0x2b0] sm:$0xff] }
 0x722   : > { %27764 = vmatmul.mubr.msk.f32.gmra.mrb[46].mxu0 %vm501_vm0, %v23220_v4  ;;  %26466 = vmatprep.mubr.msk.f32.mxu1 %vm501_vm0, %v21531_v15 }
 0x723   : > { %27766 = vmatprep.mubr.msk.f32.mxu0 %vm501_vm0, %v23221_v52 }
 0x725   : > { %26467 = vmatmul.mubr.msk.f32.gmra.mrb[48].mxu1 %vm501_vm0, %v35072_v14  ;;  %v23226_v14 = vld [vmem:[%s30236_s0 + $0x2b8] sm:$0xff] }
 0x726   : > { %27767 = vmatmul.mubr.msk.f32.gmra.mrb[48].mxu0 %vm501_vm0, %v23222_v33  ;;  %26469 = vmatprep.mubr.msk.f32.mxu1 %vm501_vm0, %v35081_v29  ;;  %v23228_v29 = vld [vmem:[%s30236_s0 + $0x2c8] sm:$0xff] }
 0x727   : > { %27769 = vmatprep.mubr.msk.f32.mxu0 %vm501_vm0, %v23223_v7 }
 0x729   : > { %26470 = vmatmul.mubr.msk.f32.gmra.mrb[50].mxu1 %vm501_vm0, %v35085_v42  ;;  %v21539_v42 = vld [vmem:[%s30077_s30 + $0x288] sm:$0xff]  ;;  %s23307_s30 = sshll.u32 %s364_s27, 9  ;;  %s29728_s27 = sshll.u32 %s29833_s18, 4  ;;  %s29729_s27 = int_to_ptr.vmem [resolvable:$false] %s29728_s27 }
 0x72a   : > { %27770 = vmatmul.mubr.msk.f32.gmra.mrb[50].mxu0 %vm501_vm0, %v23224_v60  ;;  %26472 = vmatprep.mubr.msk.f32.mxu1 %vm501_vm0, %v35095_v30  ;;  %v23229_v30 = vld [vmem:[%s30236_s0 + $0x2e0] sm:$0xff]  ;;  %s35523_s29 = scalar_lea.vmem %s35896_s4, %s23307_s30  ;;  %s29730_s30 = scalar_lea.vmem %s29729_s27, 32 }
 0x72b   : > { %27772 = vmatprep.mubr.msk.f32.mxu0 %vm501_vm0, %v23225_v51  ;;  %p29731_p0 = scmp.lt.s32.totalorder %s35817_s7, %s29729_s27  ;;  %p29732_p8 = scmp.lt.s32.totalorder %s29730_s30, %s29724_s17 }
 0x72d   : > { %26473 = vmatmul.mubr.msk.f32.gmra.mrb[52].mxu1 %vm501_vm0, %v35099_v16  ;;  %v23230_v16 = vld [vmem:[%s30236_s0 + $0x2e8] sm:$0xff]  ;;  %p29733_p10 = por %p29732_p8, %p29731_p0 }
 0x72e   : > { %27773 = vmatmul.mubr.msk.f32.gmra.mrb[52].mxu0 %vm501_vm0, %v23226_v14  ;;  %26475 = vmatprep.mubr.msk.f32.mxu1 %vm501_vm0, %v35109_v34  ;;  %v23232_v34 = vld [vmem:[%s30236_s0 + $0x2f8] sm:$0xff] }
 0x72f   : > { %27775 = vmatprep.mubr.msk.f32.mxu0 %vm501_vm0, %v23227_v56  ;;  %p29734_p11 = pnand %p29733_p10, %p29727_p12 }
 0x731   : > { %26476 = vmatmul.mubr.msk.f32.gmra.mrb[54].mxu1 %vm501_vm0, %v35113_v36  ;;  %v23233_v36 = vld [vmem:[%s30236_s0 + $0x300] sm:$0xff] }
 0x732   : > { %27776 = vmatmul.mubr.msk.f32.gmra.mrb[54].mxu0 %vm501_vm0, %v23228_v29  ;;  %26478 = vmatprep.mubr.msk.f32.mxu1 %vm501_vm0, %v21539_v42 }
 0x733   : > { %27778 = vmatprep.mubr.msk.f32.mxu0 %vm501_vm0, %v23229_v30 }
 0x735   : > { %26479 = vmatmul.mubr.msk.f32.gmra.mrb[56].mxu1 %vm501_vm0, %v35124_v13  ;;  %v23234_v13 = vld [vmem:[%s30236_s0 + $0x308] sm:$0xff] }
 0x736   : > { %27779 = vmatmul.mubr.msk.f32.gmra.mrb[56].mxu0 %vm501_vm0, %v23230_v16  ;;  %26481 = vmatprep.mubr.msk.f32.mxu1 %vm501_vm0, %v35134_v2  ;;  %v23236_v2 = vld [vmem:[%s30236_s0 + $0x318] sm:$0xff] }
 0x737   : > { %27781 = vmatprep.mubr.msk.f32.mxu0 %vm501_vm0, %v23231_v35 }
 0x739   : > { %26482 = vmatmul.mubr.msk.f32.gmra.mrb[58].mxu1 %vm501_vm0, %v35138_v61 }
 0x73a   : > { %27782 = vmatmul.mubr.msk.f32.gmra.mrb[58].mxu0 %vm501_vm0, %v23232_v34  ;;  %26484 = vmatprep.mubr.msk.f32.mxu1 %vm501_vm0, %v35148_v28 }
 0x73b   : > { %27784 = vmatprep.mubr.msk.f32.mxu0 %vm501_vm0, %v23233_v36 }
 0x73d   : > { %26485 = vmatmul.mubr.msk.f32.gmra.mrb[60].mxu1 %vm501_vm0, %v35152_v10 }
 0x73e   : > { %27785 = vmatmul.mubr.msk.f32.gmra.mrb[60].mxu0 %vm501_vm0, %v23234_v13  ;;  %26487 = vmatprep.mubr.msk.f32.mxu1 %vm501_vm0, %v35162_v37 }
 0x73f   : > { %27787 = vmatprep.mubr.msk.f32.mxu0 %vm501_vm0, %v23235_v54 }
 0x741   : > { %26488 = vmatmul.mubr.msk.f32.gmra.mrb[62].mxu1 %vm501_vm0, %v35166_v20 }
 0x742   : > { %27788 = vmatmul.mubr.msk.f32.gmra.mrb[62].mxu0 %vm501_vm0, %v23236_v2 }
 0x758   : > { %v26296_v61 = vpop.f32.mrb[0].mxu1 }
 0x759   : > { %v9071_v28 = vpop.f32.mrb[1].mxu1 }
 0x75c   : > { %v26299_v25 = vpop.f32.mrb[2].mxu1 }
 0x75d   : > { %v9081_v3 = vpop.f32.mrb[3].mxu1 }
 0x760   : > { %v26302_v27 = vpop.f32.mrb[4].mxu1 }
 0x761   : > { %v9091_v53 = vpop.f32.mrb[5].mxu1 }
 0x764   : > { %v35466_v10 = vpop.f32.mrb[6].mxu1 }
 0x765   : > { %v35468_v22 = vpop.f32.mrb[7].mxu1 }
 0x768   : > { %v35470_v9 = vpop.f32.mrb[8].mxu1 }
 0x769   : > { %v35472_v37 = vpop.f32.mrb[9].mxu1 }
 0x76c   : > { %v35474_v6 = vpop.f32.mrb[10].mxu1 }
 0x76d   : > { %v35476_v46 = vpop.f32.mrb[11].mxu1 }
 0x770   : > { %v35478_v20 = vpop.f32.mrb[12].mxu1 }
 0x771   : > { %v35480_v17 = vpop.f32.mrb[13].mxu1 }
 0x774   : > { %v35482_v62 = vpop.f32.mrb[14].mxu1 }
 0x775   : > { %v35484_v23 = vpop.f32.mrb[15].mxu1 }
 0x778   : > { %v35486_v1 = vpop.f32.mrb[16].mxu1 }
 0x779   : > { %v35488_v19 = vpop.f32.mrb[17].mxu1 }
 0x77c   : > { %v35490_v24 = vpop.f32.mrb[18].mxu1 }
 0x77d   : > { %v35492_v39 = vpop.f32.mrb[19].mxu1 }
 0x780   : > { %v35494_v32 = vpop.f32.mrb[20].mxu1 }
 0x781   : > { %v35496_v31 = vpop.f32.mrb[21].mxu1 }
 0x784   : > { %v35498_v63 = vpop.f32.mrb[22].mxu1 }
 0x785   : > { %v35500_v12 = vpop.f32.mrb[23].mxu1 }
 0x788   : > { %v35502_v47 = vpop.f32.mrb[24].mxu1 }
 0x789   : > { %v35504_v0 = vpop.f32.mrb[25].mxu1 }
 0x78c   : > { %v35506_v43 = vpop.f32.mrb[26].mxu1 }
 0x78d   : > { %v35508_v18 = vpop.f32.mrb[27].mxu1 }
 0x790   : > { %v35511_v26 = vpop.f32.mrb[28].mxu1 }
 0x791   : > { %v35513_v49 = vpop.f32.mrb[29].mxu1 }
 0x794   : > { %v35516_v5 = vpop.f32.mrb[30].mxu1 }
 0x795   : > { %v35518_v57 = vpop.f32.mrb[31].mxu1 }
 0x799   : > { %v27696_v21 = vpop.f32.mrb[0].mxu0 }
 0x79a   : > { %v27900_v8 = vadd.f32 %v27696_v21, %v26296_v61  ;;  %v18997_v55 = vpop.f32.mrb[1].mxu0 }
 0x79b   : > { %v27901_v38 = vadd.f32 %v18997_v55, %v9071_v28 }
 0x79c   : > { %19382 = vst.msk [vmem:[%s35523_s29 + $0x8] sm:$0xff] %vm19380_vm1, %v27900_v8  ;;  %v19446_v48 = vsel %vm19380_vm1, %v27900_v8, 0.0  ;;  %v19581_v40 = vmul.f32 %v27900_v8, %v27900_v8 }
 0x79d   : > { %19381 = vst.msk [vmem:[%s35523_s29] sm:$0xff] %vm19380_vm1, %v27901_v38  ;;  %v19445_v44 = vsel %vm19380_vm1, %v27901_v38, 0.0  ;;  %v19580_v59 = vmul.f32 %v27901_v38, %v27901_v38  ;;  %v27699_v58 = vpop.f32.mrb[2].mxu0 }
 0x79e   : > { %v19645_v45 = vsel %vm19380_vm1, %v19581_v40, 0.0  ;;  %v19447_v41 = vadd.f32 %v19446_v48, %v19445_v44  ;;  %v27902_v50 = vadd.f32 %v27699_v58, %v26299_v25  ;;  %v19007_v11 = vpop.f32.mrb[3].mxu0 }
 0x79f   : > { %v19644_v4 = vsel %vm19380_vm1, %v19580_v59, 0.0  ;;  %v27903_v15 = vadd.f32 %v19007_v11, %v9081_v3 }
 0x7a0   : > { %v19646_v52 = vadd.f32 %v19645_v45, %v19644_v4  ;;  %19384 = vst.msk [vmem:[%s35523_s29 + $0x18] sm:$0xff] %vm19380_vm1, %v27902_v50  ;;  %v19583_v33 = vmul.f32 %v27902_v50, %v27902_v50  ;;  %v19450_v42 = vsel %vm19380_vm1, %v27902_v50, 0.0 }
 0x7a1   : > { %19383 = vst.msk [vmem:[%s35523_s29 + $0x10] sm:$0xff] %vm19380_vm1, %v27903_v15  ;;  %v19448_v7 = vsel %vm19380_vm1, %v27903_v15, 0.0  ;;  %v19582_v60 = vmul.f32 %v27903_v15, %v27903_v15  ;;  %v27702_v51 = vpop.f32.mrb[4].mxu0 }
 0x7a2   : > { %v19449_v14 = vadd.f32 %v19448_v7, %v19447_v41  ;;  %v27904_v56 = vadd.f32 %v27702_v51, %v26302_v27  ;;  %v19017_v29 = vpop.f32.mrb[5].mxu0  ;;  %v19649_v36 = vsel %vm19380_vm1, %v19583_v33, 0.0 }
 0x7a3   : > { %v19647_v30 = vsel %vm19380_vm1, %v19582_v60, 0.0  ;;  %v27905_v16 = vadd.f32 %v19017_v29, %v9091_v53 }
 0x7a4   : > { %v19451_v35 = vadd.f32 %v19450_v42, %v19449_v14  ;;  %v19648_v34 = vadd.f32 %v19647_v30, %v19646_v52  ;;  %19386 = vst.msk [vmem:[%s35523_s29 + $0x28] sm:$0xff] %vm19380_vm1, %v27904_v56  ;;  %v19585_v13 = vmul.f32 %v27904_v56, %v27904_v56  ;;  %v19454_v53 = vsel %vm19380_vm1, %v27904_v56, 0.0 }
 0x7a5   : > { %19385 = vst.msk [vmem:[%s35523_s29 + $0x20] sm:$0xff] %vm19380_vm1, %v27905_v16  ;;  %v19452_v54 = vsel %vm19380_vm1, %v27905_v16, 0.0  ;;  %v19584_v2 = vmul.f32 %v27905_v16, %v27905_v16  ;;  %v27705_v61 = vpop.f32.mrb[6].mxu0 }
 0x7a6   : > { %v19650_v28 = vadd.f32 %v19649_v36, %v19648_v34  ;;  %v19453_v25 = vadd.f32 %v19452_v54, %v19451_v35  ;;  %v27906_v3 = vadd.f32 %v27705_v61, %v35466_v10  ;;  %v19027_v27 = vpop.f32.mrb[7].mxu0  ;;  %v19653_v48 = vsel %vm19380_vm1, %v19585_v13, 0.0 }
 0x7a7   : > { %v19651_v21 = vsel %vm19380_vm1, %v19584_v2, 0.0  ;;  %v27907_v8 = vadd.f32 %v19027_v27, %v35468_v22 }
 0x7a8   : > { %v19652_v55 = vadd.f32 %v19651_v21, %v19650_v28  ;;  %19388 = vst.msk [vmem:[%s35523_s29 + $0x38] sm:$0xff] %vm19380_vm1, %v27906_v3  ;;  %v19455_v38 = vadd.f32 %v19454_v53, %v19453_v25  ;;  %v19587_v40 = vmul.f32 %v27906_v3, %v27906_v3  ;;  %v19458_v50 = vsel %vm19380_vm1, %v27906_v3, 0.0 }
 0x7a9   : > { %19387 = vst.msk [vmem:[%s35523_s29 + $0x30] sm:$0xff] %vm19380_vm1, %v27907_v8  ;;  %v19456_v10 = vsel %vm19380_vm1, %v27907_v8, 0.0  ;;  %v19586_v44 = vmul.f32 %v27907_v8, %v27907_v8  ;;  %v27708_v59 = vpop.f32.mrb[8].mxu0 }
 0x7aa   : > { %v19457_v58 = vadd.f32 %v19456_v10, %v19455_v38  ;;  %v19654_v45 = vadd.f32 %v19653_v48, %v19652_v55  ;;  %v27908_v41 = vadd.f32 %v27708_v59, %v35470_v9  ;;  %v19037_v22 = vpop.f32.mrb[9].mxu0  ;;  %v19657_v33 = vsel %vm19380_vm1, %v19587_v40, 0.0 }
 0x7ab   : > { %v19655_v11 = vsel %vm19380_vm1, %v19586_v44, 0.0  ;;  %v27909_v4 = vadd.f32 %v19037_v22, %v35472_v37 }
 0x7ac   : > { %v19656_v15 = vadd.f32 %v19655_v11, %v19654_v45  ;;  %19390 = vst.msk [vmem:[%s35523_s29 + $0x48] sm:$0xff] %vm19380_vm1, %v27908_v41  ;;  %v19459_v52 = vadd.f32 %v19458_v50, %v19457_v58  ;;  %v19589_v7 = vmul.f32 %v27908_v41, %v27908_v41  ;;  %v19462_v42 = vsel %vm19380_vm1, %v27908_v41, 0.0 }
 0x7ad   : > { %19389 = vst.msk [vmem:[%s35523_s29 + $0x40] sm:$0xff] %vm19380_vm1, %v27909_v4  ;;  %v19460_v9 = vsel %vm19380_vm1, %v27909_v4, 0.0  ;;  %v19588_v60 = vmul.f32 %v27909_v4, %v27909_v4  ;;  %v27711_v51 = vpop.f32.mrb[10].mxu0 }
 0x7ae   : > { %v19461_v14 = vadd.f32 %v19460_v9, %v19459_v52  ;;  %v19658_v56 = vadd.f32 %v19657_v33, %v19656_v15  ;;  %v27910_v29 = vadd.f32 %v27711_v51, %v35474_v6  ;;  %v19047_v37 = vpop.f32.mrb[11].mxu0  ;;  %v19661_v36 = vsel %vm19380_vm1, %v19589_v7, 0.0 }
 0x7af   : > { %v19659_v30 = vsel %vm19380_vm1, %v19588_v60, 0.0  ;;  %v27911_v16 = vadd.f32 %v19047_v37, %v35476_v46 }
 0x7b0   : > { %v19660_v35 = vadd.f32 %v19659_v30, %v19658_v56  ;;  %19392 = vst.msk [vmem:[%s35523_s29 + $0x58] sm:$0xff] %vm19380_vm1, %v27910_v29  ;;  %v19463_v34 = vadd.f32 %v19462_v42, %v19461_v14  ;;  %v19591_v13 = vmul.f32 %v27910_v29, %v27910_v29  ;;  %v19466_v3 = vsel %vm19380_vm1, %v27910_v29, 0.0 }
 0x7b1   : > { %19391 = vst.msk [vmem:[%s35523_s29 + $0x50] sm:$0xff] %vm19380_vm1, %v27911_v16  ;;  %v19464_v6 = vsel %vm19380_vm1, %v27911_v16, 0.0  ;;  %v19590_v54 = vmul.f32 %v27911_v16, %v27911_v16  ;;  %v27714_v2 = vpop.f32.mrb[12].mxu0 }
 0x7b2   : > { %v19465_v61 = vadd.f32 %v19464_v6, %v19463_v34  ;;  %v19662_v28 = vadd.f32 %v19661_v36, %v19660_v35  ;;  %v27912_v25 = vadd.f32 %v27714_v2, %v35478_v20  ;;  %v19057_v46 = vpop.f32.mrb[13].mxu0  ;;  %v19665_v55 = vsel %vm19380_vm1, %v19591_v13, 0.0 }
 0x7b3   : > { %v19663_v27 = vsel %vm19380_vm1, %v19590_v54, 0.0  ;;  %v27913_v53 = vadd.f32 %v19057_v46, %v35480_v17 }
 0x7b4   : > { %v19664_v21 = vadd.f32 %v19663_v27, %v19662_v28  ;;  %19394 = vst.msk [vmem:[%s35523_s29 + $0x68] sm:$0xff] %vm19380_vm1, %v27912_v25  ;;  %v19467_v8 = vadd.f32 %v19466_v3, %v19465_v61  ;;  %v19593_v38 = vmul.f32 %v27912_v25, %v27912_v25  ;;  %v19470_v58 = vsel %vm19380_vm1, %v27912_v25, 0.0 }
 0x7b5   : > { %19393 = vst.msk [vmem:[%s35523_s29 + $0x60] sm:$0xff] %vm19380_vm1, %v27913_v53  ;;  %v19468_v20 = vsel %vm19380_vm1, %v27913_v53, 0.0  ;;  %v19592_v48 = vmul.f32 %v27913_v53, %v27913_v53  ;;  %v27717_v40 = vpop.f32.mrb[14].mxu0 }
 0x7b6   : > { %v19469_v10 = vadd.f32 %v19468_v20, %v19467_v8  ;;  %v19666_v44 = vadd.f32 %v19665_v55, %v19664_v21  ;;  %v27914_v59 = vadd.f32 %v27717_v40, %v35482_v62  ;;  %v19067_v17 = vpop.f32.mrb[15].mxu0  ;;  %v19669_v11 = vsel %vm19380_vm1, %v19593_v38, 0.0 }
 0x7b7   : > { %v19667_v45 = vsel %vm19380_vm1, %v19592_v48, 0.0  ;;  %v27915_v41 = vadd.f32 %v19067_v17, %v35484_v23 }
 0x7b8   : > { %v19668_v22 = vadd.f32 %v19667_v45, %v19666_v44  ;;  %19396 = vst.msk [vmem:[%s35523_s29 + $0x78] sm:$0xff] %vm19380_vm1, %v27914_v59  ;;  %v19471_v50 = vadd.f32 %v19470_v58, %v19469_v10  ;;  %v19595_v4 = vmul.f32 %v27914_v59, %v27914_v59  ;;  %v19474_v60 = vsel %vm19380_vm1, %v27914_v59, 0.0 }
 0x7b9   : > { %19395 = vst.msk [vmem:[%s35523_s29 + $0x70] sm:$0xff] %vm19380_vm1, %v27915_v41  ;;  %v19472_v62 = vsel %vm19380_vm1, %v27915_v41, 0.0  ;;  %v19594_v15 = vmul.f32 %v27915_v41, %v27915_v41  ;;  %v27720_v52 = vpop.f32.mrb[16].mxu0 }
 0x7ba   : > { %v19473_v33 = vadd.f32 %v19472_v62, %v19471_v50  ;;  %v19670_v7 = vadd.f32 %v19669_v11, %v19668_v22  ;;  %v27916_v9 = vadd.f32 %v27720_v52, %v35486_v1  ;;  %v19077_v23 = vpop.f32.mrb[17].mxu0  ;;  %v19673_v37 = vsel %vm19380_vm1, %v19595_v4, 0.0 }
 0x7bb   : > { %v19671_v51 = vsel %vm19380_vm1, %v19594_v15, 0.0  ;;  %v27917_v14 = vadd.f32 %v19077_v23, %v35488_v19 }
 0x7bc   : > { %v19672_v56 = vadd.f32 %v19671_v51, %v19670_v7  ;;  %19398 = vst.msk [vmem:[%s35523_s29 + $0x88] sm:$0xff] %vm19380_vm1, %v27916_v9  ;;  %v19475_v29 = vadd.f32 %v19474_v60, %v19473_v33  ;;  %v19597_v42 = vmul.f32 %v27916_v9, %v27916_v9  ;;  %v19478_v13 = vsel %vm19380_vm1, %v27916_v9, 0.0 }
 0x7bd   : > { %19397 = vst.msk [vmem:[%s35523_s29 + $0x80] sm:$0xff] %vm19380_vm1, %v27917_v14  ;;  %v19476_v1 = vsel %vm19380_vm1, %v27917_v14, 0.0  ;;  %v19596_v30 = vmul.f32 %v27917_v14, %v27917_v14  ;;  %v27723_v16 = vpop.f32.mrb[18].mxu0 }
 0x7be   : > { %v19477_v35 = vadd.f32 %v19476_v1, %v19475_v29  ;;  %v19674_v34 = vadd.f32 %v19673_v37, %v19672_v56  ;;  %v27918_v36 = vadd.f32 %v27723_v16, %v35490_v24  ;;  %v19087_v19 = vpop.f32.mrb[19].mxu0  ;;  %v19677_v28 = vsel %vm19380_vm1, %v19597_v42, 0.0 }
 0x7bf   : > { %v19675_v6 = vsel %vm19380_vm1, %v19596_v30, 0.0  ;;  %v27919_v54 = vadd.f32 %v19087_v19, %v35492_v39 }
 0x7c0   : > { %v19676_v2 = vadd.f32 %v19675_v6, %v19674_v34  ;;  %19400 = vst.msk [vmem:[%s35523_s29 + $0x98] sm:$0xff] %vm19380_vm1, %v27918_v36  ;;  %v19479_v61 = vadd.f32 %v19478_v13, %v19477_v35  ;;  %v19599_v25 = vmul.f32 %v27918_v36, %v27918_v36  ;;  %v19482_v8 = vsel %vm19380_vm1, %v27918_v36, 0.0 }
 0x7c1   : > { %19399 = vst.msk [vmem:[%s35523_s29 + $0x90] sm:$0xff] %vm19380_vm1, %v27919_v54  ;;  %v19480_v24 = vsel %vm19380_vm1, %v27919_v54, 0.0  ;;  %v19598_v46 = vmul.f32 %v27919_v54, %v27919_v54  ;;  %v27726_v3 = vpop.f32.mrb[20].mxu0 }
 0x7c2   : > { %v19481_v27 = vadd.f32 %v19480_v24, %v19479_v61  ;;  %v19678_v53 = vadd.f32 %v19677_v28, %v19676_v2  ;;  %v27920_v21 = vadd.f32 %v27726_v3, %v35494_v32  ;;  %v19097_v39 = vpop.f32.mrb[21].mxu0  ;;  %v19681_v40 = vsel %vm19380_vm1, %v19599_v25, 0.0 }
 0x7c3   : > { %v19679_v55 = vsel %vm19380_vm1, %v19598_v46, 0.0  ;;  %v27921_v38 = vadd.f32 %v19097_v39, %v35496_v31 }
 0x7c4   : > { %v19680_v20 = vadd.f32 %v19679_v55, %v19678_v53  ;;  %19402 = vst.msk [vmem:[%s35523_s29 + $0xa8] sm:$0xff] %vm19380_vm1, %v27920_v21  ;;  %v19483_v48 = vadd.f32 %v19482_v8, %v19481_v27  ;;  %v19601_v10 = vmul.f32 %v27920_v21, %v27920_v21  ;;  %v19486_v41 = vsel %vm19380_vm1, %v27920_v21, 0.0 }
 0x7c5   : > { %19401 = vst.msk [vmem:[%s35523_s29 + $0xa0] sm:$0xff] %vm19380_vm1, %v27921_v38  ;;  %v19484_v32 = vsel %vm19380_vm1, %v27921_v38, 0.0  ;;  %v19600_v44 = vmul.f32 %v27921_v38, %v27921_v38  ;;  %v27729_v59 = vpop.f32.mrb[22].mxu0 }
 0x7c6   : > { %v19485_v17 = vadd.f32 %v19484_v32, %v19483_v48  ;;  %v19682_v58 = vadd.f32 %v19681_v40, %v19680_v20  ;;  %v27922_v45 = vadd.f32 %v27729_v59, %v35498_v63  ;;  %v19107_v31 = vpop.f32.mrb[23].mxu0  ;;  %v19685_v62 = vsel %vm19380_vm1, %v19601_v10, 0.0 }
 0x7c7   : > { %v19683_v22 = vsel %vm19380_vm1, %v19600_v44, 0.0  ;;  %v27923_v50 = vadd.f32 %v19107_v31, %v35500_v12 }
 0x7c8   : > { %v19684_v11 = vadd.f32 %v19683_v22, %v19682_v58  ;;  %19404 = vst.msk [vmem:[%s35523_s29 + $0xb8] sm:$0xff] %vm19380_vm1, %v27922_v45  ;;  %v19487_v4 = vadd.f32 %v19486_v41, %v19485_v17  ;;  %v19603_v15 = vmul.f32 %v27922_v45, %v27922_v45  ;;  %v19490_v60 = vsel %vm19380_vm1, %v27922_v45, 0.0 }
 0x7c9   : > { %19403 = vst.msk [vmem:[%s35523_s29 + $0xb0] sm:$0xff] %vm19380_vm1, %v27923_v50  ;;  %v19488_v63 = vsel %vm19380_vm1, %v27923_v50, 0.0  ;;  %v19602_v52 = vmul.f32 %v27923_v50, %v27923_v50  ;;  %v27732_v33 = vpop.f32.mrb[24].mxu0 }
 0x7ca   : > { %v19489_v7 = vadd.f32 %v19488_v63, %v19487_v4  ;;  %v19686_v9 = vadd.f32 %v19685_v62, %v19684_v11  ;;  %v27924_v23 = vadd.f32 %v27732_v33, %v35502_v47  ;;  %v19117_v12 = vpop.f32.mrb[25].mxu0  ;;  %v19689_v37 = vsel %vm19380_vm1, %v19603_v15, 0.0 }
 0x7cb   : > { %v19687_v51 = vsel %vm19380_vm1, %v19602_v52, 0.0  ;;  %v27925_v14 = vadd.f32 %v19117_v12, %v35504_v0 }
 0x7cc   : > { %v19688_v56 = vadd.f32 %v19687_v51, %v19686_v9  ;;  %19406 = vst.msk [vmem:[%s35523_s29 + $0xc8] sm:$0xff] %vm19380_vm1, %v27924_v23  ;;  %v19491_v29 = vadd.f32 %v19490_v60, %v19489_v7  ;;  %v19605_v42 = vmul.f32 %v27924_v23, %v27924_v23  ;;  %v19494_v36 = vsel %vm19380_vm1, %v27924_v23, 0.0 }
 0x7cd   : > { %19405 = vst.msk [vmem:[%s35523_s29 + $0xc0] sm:$0xff] %vm19380_vm1, %v27925_v14  ;;  %v19492_v47 = vsel %vm19380_vm1, %v27925_v14, 0.0  ;;  %v19604_v1 = vmul.f32 %v27925_v14, %v27925_v14  ;;  %v27735_v30 = vpop.f32.mrb[26].mxu0 }
 0x7ce   : > { %v19493_v16 = vadd.f32 %v19492_v47, %v19491_v29  ;;  %v19690_v35 = vadd.f32 %v19689_v37, %v19688_v56  ;;  %v27926_v34 = vadd.f32 %v27735_v30, %v35506_v43  ;;  %v19127_v0 = vpop.f32.mrb[27].mxu0  ;;  %v19693_v2 = vsel %vm19380_vm1, %v19605_v42, 0.0 }
 0x7cf   : > { %v19691_v19 = vsel %vm19380_vm1, %v19604_v1, 0.0  ;;  %v27927_v13 = vadd.f32 %v19127_v0, %v35508_v18 }
 0x7d0   : > { %v19692_v6 = vadd.f32 %v19691_v19, %v19690_v35  ;;  %19408 = vst.msk [vmem:[%s35523_s29 + $0xd8] sm:$0xff] %vm19380_vm1, %v27926_v34  ;;  %v19495_v54 = vadd.f32 %v19494_v36, %v19493_v16  ;;  %v19607_v61 = vmul.f32 %v27926_v34, %v27926_v34  ;;  %v19498_v27 = vsel %vm19380_vm1, %v27926_v34, 0.0 }
 0x7d1   : > { %19407 = vst.msk [vmem:[%s35523_s29 + $0xd0] sm:$0xff] %vm19380_vm1, %v27927_v13  ;;  %v19496_v43 = vsel %vm19380_vm1, %v27927_v13, 0.0  ;;  %v19606_v28 = vmul.f32 %v27927_v13, %v27927_v13  ;;  %v27738_v25 = vpop.f32.mrb[28].mxu0 }
 0x7d2   : > { %v19497_v24 = vadd.f32 %v19496_v43, %v19495_v54  ;;  %v19694_v46 = vadd.f32 %v19693_v2, %v19692_v6  ;;  %v27928_v3 = vadd.f32 %v27738_v25, %v35511_v26  ;;  %v19137_v18 = vpop.f32.mrb[29].mxu0  ;;  %v19697_v55 = vsel %vm19380_vm1, %v19607_v61, 0.0 }
 0x7d3   : > { %v19695_v53 = vsel %vm19380_vm1, %v19606_v28, 0.0  ;;  %v27929_v21 = vadd.f32 %v19137_v18, %v35513_v49 }
 0x7d4   : > { %v19696_v39 = vadd.f32 %v19695_v53, %v19694_v46  ;;  %19410 = vst.msk [vmem:[%s35523_s29 + $0xe8] sm:$0xff] %vm19380_vm1, %v27928_v3  ;;  %v19499_v8 = vadd.f32 %v19498_v27, %v19497_v24  ;;  %v19609_v38 = vmul.f32 %v27928_v3, %v27928_v3  ;;  %v19502_v44 = vsel %vm19380_vm1, %v27928_v3, 0.0 }
 0x7d5   : > { %19409 = vst.msk [vmem:[%s35523_s29 + $0xe0] sm:$0xff] %vm19380_vm1, %v27929_v21  ;;  %v19500_v20 = vsel %vm19380_vm1, %v27929_v21, 0.0  ;;  %v19608_v26 = vmul.f32 %v27929_v21, %v27929_v21  ;;  %v27741_v48 = vpop.f32.mrb[30].mxu0 }
 0x7d6   : > { %v19501_v40 = vadd.f32 %v19500_v20, %v19499_v8  ;;  %v19698_v10 = vadd.f32 %v19697_v55, %v19696_v39  ;;  %v27930_v32 = vadd.f32 %v27741_v48, %v35516_v5  ;;  %v19147_v49 = vpop.f32.mrb[31].mxu0  ;;  %v19701_v41 = vsel %vm19380_vm1, %v19609_v38, 0.0 }
 0x7d7   : > { %v19699_v59 = vsel %vm19380_vm1, %v19608_v26, 0.0  ;;  %v27931_v17 = vadd.f32 %v19147_v49, %v35518_v57 }
 0x7d8   : > { %v19700_v58 = vadd.f32 %v19699_v59, %v19698_v10  ;;  %19412 = vst.msk [vmem:[%s35523_s29 + $0xf8] sm:$0xff] %vm19380_vm1, %v27930_v32  ;;  %v19503_v45 = vadd.f32 %v19502_v44, %v19501_v40  ;;  %v26444_v31 = vpop.f32.mrb[32].mxu1  ;;  %v19611_v22 = vmul.f32 %v27930_v32, %v27930_v32  ;;  %v19506_v52 = vsel %vm19380_vm1, %v27930_v32, 0.0 }
 0x7d9   : > { %19411 = vst.msk [vmem:[%s35523_s29 + $0xf0] sm:$0xff] %vm19380_vm1, %v27931_v17  ;;  %v19504_v5 = vsel %vm19380_vm1, %v27931_v17, 0.0  ;;  %v19610_v50 = vmul.f32 %v27931_v17, %v27931_v17  ;;  %v27744_v11 = vpop.f32.mrb[32].mxu0  ;;  %v9940_v4 = vpop.f32.mrb[33].mxu1 }
 0x7da   : > { %v19505_v62 = vadd.f32 %v19504_v5, %v19503_v45  ;;  %v19702_v15 = vadd.f32 %v19701_v41, %v19700_v58  ;;  %v27932_v57 = vadd.f32 %v27744_v11, %v26444_v31  ;;  %v19157_v63 = vpop.f32.mrb[33].mxu0  ;;  %v19705_v60 = vsel %vm19380_vm1, %v19611_v22, 0.0 }
 0x7db   : > { %v19703_v33 = vsel %vm19380_vm1, %v19610_v50, 0.0  ;;  %v27933_v7 = vadd.f32 %v19157_v63, %v9940_v4 }
 0x7dc   : > { %v19704_v9 = vadd.f32 %v19703_v33, %v19702_v15  ;;  %19414 = vst.msk [vmem:[%s35523_s29 + $0x108] sm:$0xff] %vm19380_vm1, %v27932_v57  ;;  %v19507_v23 = vadd.f32 %v19506_v52, %v19505_v62  ;;  %v26447_v12 = vpop.f32.mrb[34].mxu1  ;;  %v19613_v51 = vmul.f32 %v27932_v57, %v27932_v57  ;;  %v19510_v16 = vsel %vm19380_vm1, %v27932_v57, 0.0 }
 0x7dd   : > { %19413 = vst.msk [vmem:[%s35523_s29 + $0x100] sm:$0xff] %vm19380_vm1, %v27933_v7  ;;  %v19508_v14 = vsel %vm19380_vm1, %v27933_v7, 0.0  ;;  %v19612_v56 = vmul.f32 %v27933_v7, %v27933_v7  ;;  %v27747_v29 = vpop.f32.mrb[34].mxu0  ;;  %v9950_v37 = vpop.f32.mrb[35].mxu1 }
 0x7de   : > { %v19509_v42 = vadd.f32 %v19508_v14, %v19507_v23  ;;  %v19706_v47 = vadd.f32 %v19705_v60, %v19704_v9  ;;  %v27934_v1 = vadd.f32 %v27747_v29, %v26447_v12  ;;  %v19167_v30 = vpop.f32.mrb[35].mxu0  ;;  %v19709_v13 = vsel %vm19380_vm1, %v19613_v51, 0.0 }
 0x7df   : > { %v19707_v35 = vsel %vm19380_vm1, %v19612_v56, 0.0  ;;  %v27935_v34 = vadd.f32 %v19167_v30, %v9950_v37 }
 0x7e0   : > { %v19708_v0 = vadd.f32 %v19707_v35, %v19706_v47  ;;  %19416 = vst.msk [vmem:[%s35523_s29 + $0x118] sm:$0xff] %vm19380_vm1, %v27934_v1  ;;  %v19511_v36 = vadd.f32 %v19510_v16, %v19509_v42  ;;  %v26450_v19 = vpop.f32.mrb[36].mxu1  ;;  %v19615_v6 = vmul.f32 %v27934_v1, %v27934_v1  ;;  %v19514_v3 = vsel %vm19380_vm1, %v27934_v1, 0.0 }
 0x7e1   : > { %19415 = vst.msk [vmem:[%s35523_s29 + $0x110] sm:$0xff] %vm19380_vm1, %v27935_v34  ;;  %v19512_v54 = vsel %vm19380_vm1, %v27935_v34, 0.0  ;;  %v19614_v2 = vmul.f32 %v27935_v34, %v27935_v34  ;;  %v27750_v61 = vpop.f32.mrb[36].mxu0  ;;  %v9960_v43 = vpop.f32.mrb[37].mxu1 }
 0x7e2   : > { %v19513_v28 = vadd.f32 %v19512_v54, %v19511_v36  ;;  %v19710_v25 = vadd.f32 %v19709_v13, %v19708_v0  ;;  %v27936_v24 = vadd.f32 %v27750_v61, %v26450_v19  ;;  %v19177_v46 = vpop.f32.mrb[37].mxu0  ;;  %v19713_v8 = vsel %vm19380_vm1, %v19615_v6, 0.0 }
 0x7e3   : > { %v19711_v18 = vsel %vm19380_vm1, %v19614_v2, 0.0  ;;  %v27937_v27 = vadd.f32 %v19177_v46, %v9960_v43 }
 0x7e4   : > { %v19712_v53 = vadd.f32 %v19711_v18, %v19710_v25  ;;  %19418 = vst.msk [vmem:[%s35523_s29 + $0x128] sm:$0xff] %vm19380_vm1, %v27936_v24  ;;  %v19515_v21 = vadd.f32 %v19514_v3, %v19513_v28  ;;  %v26453_v39 = vpop.f32.mrb[38].mxu1  ;;  %v19617_v55 = vmul.f32 %v27936_v24, %v27936_v24  ;;  %v19518_v44 = vsel %vm19380_vm1, %v27936_v24, 0.0 }
 0x7e5   : > { %19417 = vst.msk [vmem:[%s35523_s29 + $0x120] sm:$0xff] %vm19380_vm1, %v27937_v27  ;;  %v19516_v38 = vsel %vm19380_vm1, %v27937_v27, 0.0  ;;  %v19616_v20 = vmul.f32 %v27937_v27, %v27937_v27  ;;  %v27753_v26 = vpop.f32.mrb[38].mxu0  ;;  %v9970_v48 = vpop.f32.mrb[39].mxu1 }
 0x7e6   : > { %v19517_v40 = vadd.f32 %v19516_v38, %v19515_v21  ;;  %v19714_v10 = vadd.f32 %v19713_v8, %v19712_v53  ;;  %v27938_v32 = vadd.f32 %v27753_v26, %v26453_v39  ;;  %v19187_v49 = vpop.f32.mrb[39].mxu0  ;;  %v19717_v41 = vsel %vm19380_vm1, %v19617_v55, 0.0 }
 0x7e7   : > { %v19715_v59 = vsel %vm19380_vm1, %v19616_v20, 0.0  ;;  %v27939_v17 = vadd.f32 %v19187_v49, %v9970_v48 }
 0x7e8   : > { %v19716_v58 = vadd.f32 %v19715_v59, %v19714_v10  ;;  %19420 = vst.msk [vmem:[%s35523_s29 + $0x138] sm:$0xff] %vm19380_vm1, %v27938_v32  ;;  %v19519_v45 = vadd.f32 %v19518_v44, %v19517_v40  ;;  %v26456_v31 = vpop.f32.mrb[40].mxu1  ;;  %v19619_v22 = vmul.f32 %v27938_v32, %v27938_v32  ;;  %v19522_v52 = vsel %vm19380_vm1, %v27938_v32, 0.0 }
 0x7e9   : > { %19419 = vst.msk [vmem:[%s35523_s29 + $0x130] sm:$0xff] %vm19380_vm1, %v27939_v17  ;;  %v19520_v5 = vsel %vm19380_vm1, %v27939_v17, 0.0  ;;  %v19618_v50 = vmul.f32 %v27939_v17, %v27939_v17  ;;  %v27756_v11 = vpop.f32.mrb[40].mxu0  ;;  %v9980_v4 = vpop.f32.mrb[41].mxu1 }
 0x7ea   : > { %v19521_v62 = vadd.f32 %v19520_v5, %v19519_v45  ;;  %v19718_v15 = vadd.f32 %v19717_v41, %v19716_v58  ;;  %v27940_v57 = vadd.f32 %v27756_v11, %v26456_v31  ;;  %v19197_v63 = vpop.f32.mrb[41].mxu0  ;;  %v19721_v60 = vsel %vm19380_vm1, %v19619_v22, 0.0 }
 0x7eb   : > { %v19719_v33 = vsel %vm19380_vm1, %v19618_v50, 0.0  ;;  %v27941_v7 = vadd.f32 %v19197_v63, %v9980_v4 }
 0x7ec   : > { %v19720_v9 = vadd.f32 %v19719_v33, %v19718_v15  ;;  %19422 = vst.msk [vmem:[%s35523_s29 + $0x148] sm:$0xff] %vm19380_vm1, %v27940_v57  ;;  %v19523_v23 = vadd.f32 %v19522_v52, %v19521_v62  ;;  %v26459_v12 = vpop.f32.mrb[42].mxu1  ;;  %v19621_v51 = vmul.f32 %v27940_v57, %v27940_v57  ;;  %v19526_v16 = vsel %vm19380_vm1, %v27940_v57, 0.0 }
 0x7ed   : > { %19421 = vst.msk [vmem:[%s35523_s29 + $0x140] sm:$0xff] %vm19380_vm1, %v27941_v7  ;;  %v19524_v14 = vsel %vm19380_vm1, %v27941_v7, 0.0  ;;  %v19620_v56 = vmul.f32 %v27941_v7, %v27941_v7  ;;  %v27759_v29 = vpop.f32.mrb[42].mxu0  ;;  %v9990_v37 = vpop.f32.mrb[43].mxu1 }
 0x7ee   : > { %v19525_v42 = vadd.f32 %v19524_v14, %v19523_v23  ;;  %v19722_v47 = vadd.f32 %v19721_v60, %v19720_v9  ;;  %v27942_v1 = vadd.f32 %v27759_v29, %v26459_v12  ;;  %v19207_v30 = vpop.f32.mrb[43].mxu0  ;;  %v19725_v13 = vsel %vm19380_vm1, %v19621_v51, 0.0 }
 0x7ef   : > { %v19723_v35 = vsel %vm19380_vm1, %v19620_v56, 0.0  ;;  %v27943_v34 = vadd.f32 %v19207_v30, %v9990_v37 }
 0x7f0   : > { %v19724_v0 = vadd.f32 %v19723_v35, %v19722_v47  ;;  %19424 = vst.msk [vmem:[%s35523_s29 + $0x158] sm:$0xff] %vm19380_vm1, %v27942_v1  ;;  %v19527_v36 = vadd.f32 %v19526_v16, %v19525_v42  ;;  %v26462_v19 = vpop.f32.mrb[44].mxu1  ;;  %v19623_v6 = vmul.f32 %v27942_v1, %v27942_v1  ;;  %v19530_v3 = vsel %vm19380_vm1, %v27942_v1, 0.0 }
 0x7f1   : > { %19423 = vst.msk [vmem:[%s35523_s29 + $0x150] sm:$0xff] %vm19380_vm1, %v27943_v34  ;;  %v19528_v54 = vsel %vm19380_vm1, %v27943_v34, 0.0  ;;  %v19622_v2 = vmul.f32 %v27943_v34, %v27943_v34  ;;  %v27762_v61 = vpop.f32.mrb[44].mxu0  ;;  %v10000_v43 = vpop.f32.mrb[45].mxu1 }
 0x7f2   : > { %v19529_v28 = vadd.f32 %v19528_v54, %v19527_v36  ;;  %v19726_v25 = vadd.f32 %v19725_v13, %v19724_v0  ;;  %v27944_v24 = vadd.f32 %v27762_v61, %v26462_v19  ;;  %v19217_v46 = vpop.f32.mrb[45].mxu0  ;;  %v19729_v8 = vsel %vm19380_vm1, %v19623_v6, 0.0 }
 0x7f3   : > { %v19727_v18 = vsel %vm19380_vm1, %v19622_v2, 0.0  ;;  %v27945_v27 = vadd.f32 %v19217_v46, %v10000_v43 }
 0x7f4   : > { %v19728_v53 = vadd.f32 %v19727_v18, %v19726_v25  ;;  %19426 = vst.msk [vmem:[%s35523_s29 + $0x168] sm:$0xff] %vm19380_vm1, %v27944_v24  ;;  %v19531_v21 = vadd.f32 %v19530_v3, %v19529_v28  ;;  %v26465_v39 = vpop.f32.mrb[46].mxu1  ;;  %v19625_v55 = vmul.f32 %v27944_v24, %v27944_v24  ;;  %v19534_v44 = vsel %vm19380_vm1, %v27944_v24, 0.0 }
 0x7f5   : > { %19425 = vst.msk [vmem:[%s35523_s29 + $0x160] sm:$0xff] %vm19380_vm1, %v27945_v27  ;;  %v19532_v38 = vsel %vm19380_vm1, %v27945_v27, 0.0  ;;  %v19624_v20 = vmul.f32 %v27945_v27, %v27945_v27  ;;  %v27765_v26 = vpop.f32.mrb[46].mxu0  ;;  %v10010_v48 = vpop.f32.mrb[47].mxu1 }
 0x7f6   : > { %v19533_v40 = vadd.f32 %v19532_v38, %v19531_v21  ;;  %v19730_v10 = vadd.f32 %v19729_v8, %v19728_v53  ;;  %v27946_v32 = vadd.f32 %v27765_v26, %v26465_v39  ;;  %v19227_v49 = vpop.f32.mrb[47].mxu0  ;;  %v19733_v41 = vsel %vm19380_vm1, %v19625_v55, 0.0 }
 0x7f7   : > { %v19731_v59 = vsel %vm19380_vm1, %v19624_v20, 0.0  ;;  %v27947_v17 = vadd.f32 %v19227_v49, %v10010_v48 }
 0x7f8   : > { %v19732_v58 = vadd.f32 %v19731_v59, %v19730_v10  ;;  %19428 = vst.msk [vmem:[%s35523_s29 + $0x178] sm:$0xff] %vm19380_vm1, %v27946_v32  ;;  %v19535_v45 = vadd.f32 %v19534_v44, %v19533_v40  ;;  %v26468_v31 = vpop.f32.mrb[48].mxu1  ;;  %v19627_v22 = vmul.f32 %v27946_v32, %v27946_v32  ;;  %v19538_v52 = vsel %vm19380_vm1, %v27946_v32, 0.0 }
 0x7f9   : > { %19427 = vst.msk [vmem:[%s35523_s29 + $0x170] sm:$0xff] %vm19380_vm1, %v27947_v17  ;;  %v19536_v5 = vsel %vm19380_vm1, %v27947_v17, 0.0  ;;  %v19626_v50 = vmul.f32 %v27947_v17, %v27947_v17  ;;  %v27768_v11 = vpop.f32.mrb[48].mxu0  ;;  %v10020_v4 = vpop.f32.mrb[49].mxu1 }
 0x7fa   : > { %v19537_v62 = vadd.f32 %v19536_v5, %v19535_v45  ;;  %v19734_v15 = vadd.f32 %v19733_v41, %v19732_v58  ;;  %v27948_v57 = vadd.f32 %v27768_v11, %v26468_v31  ;;  %v19237_v63 = vpop.f32.mrb[49].mxu0  ;;  %v19737_v60 = vsel %vm19380_vm1, %v19627_v22, 0.0 }
 0x7fb   : > { %v19735_v33 = vsel %vm19380_vm1, %v19626_v50, 0.0  ;;  %v27949_v7 = vadd.f32 %v19237_v63, %v10020_v4 }
 0x7fc   : > { %v19736_v9 = vadd.f32 %v19735_v33, %v19734_v15  ;;  %19430 = vst.msk [vmem:[%s35523_s29 + $0x188] sm:$0xff] %vm19380_vm1, %v27948_v57  ;;  %v19539_v23 = vadd.f32 %v19538_v52, %v19537_v62  ;;  %v26471_v12 = vpop.f32.mrb[50].mxu1  ;;  %v19629_v51 = vmul.f32 %v27948_v57, %v27948_v57  ;;  %v19542_v16 = vsel %vm19380_vm1, %v27948_v57, 0.0 }
 0x7fd   : > { %19429 = vst.msk [vmem:[%s35523_s29 + $0x180] sm:$0xff] %vm19380_vm1, %v27949_v7  ;;  %v19540_v14 = vsel %vm19380_vm1, %v27949_v7, 0.0  ;;  %v19628_v56 = vmul.f32 %v27949_v7, %v27949_v7  ;;  %v27771_v29 = vpop.f32.mrb[50].mxu0  ;;  %v10030_v37 = vpop.f32.mrb[51].mxu1 }
 0x7fe   : > { %v19541_v42 = vadd.f32 %v19540_v14, %v19539_v23  ;;  %v19738_v47 = vadd.f32 %v19737_v60, %v19736_v9  ;;  %v27950_v1 = vadd.f32 %v27771_v29, %v26471_v12  ;;  %v19247_v30 = vpop.f32.mrb[51].mxu0  ;;  %v19741_v13 = vsel %vm19380_vm1, %v19629_v51, 0.0 }
 0x7ff   : > { %v19739_v35 = vsel %vm19380_vm1, %v19628_v56, 0.0  ;;  %v27951_v34 = vadd.f32 %v19247_v30, %v10030_v37 }
 0x800   : > { %v19740_v0 = vadd.f32 %v19739_v35, %v19738_v47  ;;  %19432 = vst.msk [vmem:[%s35523_s29 + $0x198] sm:$0xff] %vm19380_vm1, %v27950_v1  ;;  %v19543_v36 = vadd.f32 %v19542_v16, %v19541_v42  ;;  %v26474_v19 = vpop.f32.mrb[52].mxu1  ;;  %v19631_v6 = vmul.f32 %v27950_v1, %v27950_v1  ;;  %v19546_v3 = vsel %vm19380_vm1, %v27950_v1, 0.0 }
 0x801   : > { %19431 = vst.msk [vmem:[%s35523_s29 + $0x190] sm:$0xff] %vm19380_vm1, %v27951_v34  ;;  %v19544_v54 = vsel %vm19380_vm1, %v27951_v34, 0.0  ;;  %v19630_v2 = vmul.f32 %v27951_v34, %v27951_v34  ;;  %v27774_v61 = vpop.f32.mrb[52].mxu0  ;;  %v10040_v43 = vpop.f32.mrb[53].mxu1 }
 0x802   : > { %v19545_v28 = vadd.f32 %v19544_v54, %v19543_v36  ;;  %v19742_v25 = vadd.f32 %v19741_v13, %v19740_v0  ;;  %v27952_v24 = vadd.f32 %v27774_v61, %v26474_v19  ;;  %v19257_v46 = vpop.f32.mrb[53].mxu0  ;;  %v19745_v8 = vsel %vm19380_vm1, %v19631_v6, 0.0 }
 0x803   : > { %v19743_v18 = vsel %vm19380_vm1, %v19630_v2, 0.0  ;;  %v27953_v27 = vadd.f32 %v19257_v46, %v10040_v43 }
 0x804   : > { %v19744_v53 = vadd.f32 %v19743_v18, %v19742_v25  ;;  %19434 = vst.msk [vmem:[%s35523_s29 + $0x1a8] sm:$0xff] %vm19380_vm1, %v27952_v24  ;;  %v19547_v21 = vadd.f32 %v19546_v3, %v19545_v28  ;;  %v26477_v39 = vpop.f32.mrb[54].mxu1  ;;  %v19633_v55 = vmul.f32 %v27952_v24, %v27952_v24  ;;  %v19550_v44 = vsel %vm19380_vm1, %v27952_v24, 0.0 }
 0x805   : > { %19433 = vst.msk [vmem:[%s35523_s29 + $0x1a0] sm:$0xff] %vm19380_vm1, %v27953_v27  ;;  %v19548_v38 = vsel %vm19380_vm1, %v27953_v27, 0.0  ;;  %v19632_v20 = vmul.f32 %v27953_v27, %v27953_v27  ;;  %v27777_v26 = vpop.f32.mrb[54].mxu0  ;;  %v10050_v48 = vpop.f32.mrb[55].mxu1 }
 0x806   : > { %v19549_v40 = vadd.f32 %v19548_v38, %v19547_v21  ;;  %v19746_v10 = vadd.f32 %v19745_v8, %v19744_v53  ;;  %v27954_v32 = vadd.f32 %v27777_v26, %v26477_v39  ;;  %v19267_v49 = vpop.f32.mrb[55].mxu0  ;;  %v19749_v41 = vsel %vm19380_vm1, %v19633_v55, 0.0 }
 0x807   : > { %v19747_v59 = vsel %vm19380_vm1, %v19632_v20, 0.0  ;;  %v27955_v17 = vadd.f32 %v19267_v49, %v10050_v48 }
 0x808   : > { %v19748_v58 = vadd.f32 %v19747_v59, %v19746_v10  ;;  %19436 = vst.msk [vmem:[%s35523_s29 + $0x1b8] sm:$0xff] %vm19380_vm1, %v27954_v32  ;;  %v19551_v45 = vadd.f32 %v19550_v44, %v19549_v40  ;;  %v26480_v31 = vpop.f32.mrb[56].mxu1  ;;  %v19635_v22 = vmul.f32 %v27954_v32, %v27954_v32  ;;  %v19554_v52 = vsel %vm19380_vm1, %v27954_v32, 0.0 }
 0x809   : > { %19435 = vst.msk [vmem:[%s35523_s29 + $0x1b0] sm:$0xff] %vm19380_vm1, %v27955_v17  ;;  %v19552_v5 = vsel %vm19380_vm1, %v27955_v17, 0.0  ;;  %v19634_v50 = vmul.f32 %v27955_v17, %v27955_v17  ;;  %v27780_v11 = vpop.f32.mrb[56].mxu0  ;;  %v10060_v4 = vpop.f32.mrb[57].mxu1 }
 0x80a   : > { %v19553_v62 = vadd.f32 %v19552_v5, %v19551_v45  ;;  %v19750_v15 = vadd.f32 %v19749_v41, %v19748_v58  ;;  %v27956_v57 = vadd.f32 %v27780_v11, %v26480_v31  ;;  %v19277_v63 = vpop.f32.mrb[57].mxu0  ;;  %v19753_v60 = vsel %vm19380_vm1, %v19635_v22, 0.0 }
 0x80b   : > { %v19751_v33 = vsel %vm19380_vm1, %v19634_v50, 0.0  ;;  %v27957_v7 = vadd.f32 %v19277_v63, %v10060_v4 }
 0x80c   : > { %v19752_v9 = vadd.f32 %v19751_v33, %v19750_v15  ;;  %19438 = vst.msk [vmem:[%s35523_s29 + $0x1c8] sm:$0xff] %vm19380_vm1, %v27956_v57  ;;  %v19555_v23 = vadd.f32 %v19554_v52, %v19553_v62  ;;  %v26483_v12 = vpop.f32.mrb[58].mxu1  ;;  %v19637_v51 = vmul.f32 %v27956_v57, %v27956_v57  ;;  %v19558_v16 = vsel %vm19380_vm1, %v27956_v57, 0.0 }
 0x80d   : > { %19437 = vst.msk [vmem:[%s35523_s29 + $0x1c0] sm:$0xff] %vm19380_vm1, %v27957_v7  ;;  %v19556_v14 = vsel %vm19380_vm1, %v27957_v7, 0.0  ;;  %v19636_v56 = vmul.f32 %v27957_v7, %v27957_v7  ;;  %v27783_v29 = vpop.f32.mrb[58].mxu0  ;;  %v10070_v37 = vpop.f32.mrb[59].mxu1 }
 0x80e   : > { %v19557_v42 = vadd.f32 %v19556_v14, %v19555_v23  ;;  %v19754_v47 = vadd.f32 %v19753_v60, %v19752_v9  ;;  %v27958_v1 = vadd.f32 %v27783_v29, %v26483_v12  ;;  %v19287_v30 = vpop.f32.mrb[59].mxu0  ;;  %v19757_v13 = vsel %vm19380_vm1, %v19637_v51, 0.0 }
 0x80f   : > { %v19755_v35 = vsel %vm19380_vm1, %v19636_v56, 0.0  ;;  %v27959_v34 = vadd.f32 %v19287_v30, %v10070_v37 }
 0x810   : > { %v19756_v0 = vadd.f32 %v19755_v35, %v19754_v47  ;;  %19440 = vst.msk [vmem:[%s35523_s29 + $0x1d8] sm:$0xff] %vm19380_vm1, %v27958_v1  ;;  %v19559_v36 = vadd.f32 %v19558_v16, %v19557_v42  ;;  %v26486_v19 = vpop.f32.mrb[60].mxu1  ;;  %v19639_v6 = vmul.f32 %v27958_v1, %v27958_v1  ;;  %v19562_v3 = vsel %vm19380_vm1, %v27958_v1, 0.0 }
 0x811   : > { %19439 = vst.msk [vmem:[%s35523_s29 + $0x1d0] sm:$0xff] %vm19380_vm1, %v27959_v34  ;;  %v19560_v54 = vsel %vm19380_vm1, %v27959_v34, 0.0  ;;  %v19638_v2 = vmul.f32 %v27959_v34, %v27959_v34  ;;  %v27786_v61 = vpop.f32.mrb[60].mxu0  ;;  %v10080_v43 = vpop.f32.mrb[61].mxu1 }
 0x812   : > { %v19561_v28 = vadd.f32 %v19560_v54, %v19559_v36  ;;  %v19758_v25 = vadd.f32 %v19757_v13, %v19756_v0  ;;  %v27960_v24 = vadd.f32 %v27786_v61, %v26486_v19  ;;  %v19297_v46 = vpop.f32.mrb[61].mxu0  ;;  %v19761_v8 = vsel %vm19380_vm1, %v19639_v6, 0.0 }
 0x813   : > { %v19759_v18 = vsel %vm19380_vm1, %v19638_v2, 0.0  ;;  %v27961_v27 = vadd.f32 %v19297_v46, %v10080_v43 }
 0x814   : > { %v19760_v53 = vadd.f32 %v19759_v18, %v19758_v25  ;;  %19442 = vst.msk [vmem:[%s35523_s29 + $0x1e8] sm:$0xff] %vm19380_vm1, %v27960_v24  ;;  %v19563_v21 = vadd.f32 %v19562_v3, %v19561_v28  ;;  %v26489_v39 = vpop.f32.mrb[62].mxu1  ;;  %v19641_v55 = vmul.f32 %v27960_v24, %v27960_v24  ;;  %v19566_v44 = vsel %vm19380_vm1, %v27960_v24, 0.0 }
 0x815   : > { %19441 = vst.msk [vmem:[%s35523_s29 + $0x1e0] sm:$0xff] %vm19380_vm1, %v27961_v27  ;;  %v19564_v38 = vsel %vm19380_vm1, %v27961_v27, 0.0  ;;  %v19640_v20 = vmul.f32 %v27961_v27, %v27961_v27  ;;  %v27789_v26 = vpop.f32.mrb[62].mxu0  ;;  %v10090_v48 = vpop.f32.mrb[63].mxu1 }
 0x816   : > { %v19565_v40 = vadd.f32 %v19564_v38, %v19563_v21  ;;  %v19762_v10 = vadd.f32 %v19761_v8, %v19760_v53  ;;  %v27962_v32 = vadd.f32 %v27789_v26, %v26489_v39  ;;  %v19307_v49 = vpop.f32.mrb[63].mxu0  ;;  %v19765_v31 = vsel %vm19380_vm1, %v19641_v55, 0.0 }
 0x817   : > { %v19763_v59 = vsel %vm19380_vm1, %v19640_v20, 0.0  ;;  %v27963_v17 = vadd.f32 %v19307_v49, %v10090_v48 }
 0x818   : > { %v19764_v58 = vadd.f32 %v19763_v59, %v19762_v10  ;;  %19444 = vst.msk [vmem:[%s35523_s29 + $0x1f8] sm:$0xff] %vm19380_vm1, %v27962_v32  ;;  %v19567_v45 = vadd.f32 %v19566_v44, %v19565_v40  ;;  %v19643_v41 = vmul.f32 %v27962_v32, %v27962_v32  ;;  %v19570_v4 = vsel %vm19380_vm1, %v27962_v32, 0.0 }
 0x819   : > { %19443 = vst.msk [vmem:[%s35523_s29 + $0x1f0] sm:$0xff] %vm19380_vm1, %v27963_v17  ;;  %v19568_v22 = vsel %vm19380_vm1, %v27963_v17, 0.0  ;;  %v19642_v5 = vmul.f32 %v27963_v17, %v27963_v17 }
 0x81a   : > { %v19569_v50 = vadd.f32 %v19568_v22, %v19567_v45  ;;  %v19766_v11 = vadd.f32 %v19765_v31, %v19764_v58  ;;  %v19769_v63 = vsel %vm19380_vm1, %v19643_v41, 0.0 }
 0x81b   : > { %v19767_v62 = vsel %vm19380_vm1, %v19642_v5, 0.0 }
 0x81c   : > { %v19571_v15 = vadd.f32 %v19570_v4, %v19569_v50  ;;  %v19768_v57 = vadd.f32 %v19767_v62, %v19766_v11 }
 0x81e   : > { %v19572_v52 = vrot.slane %v19571_v15, 4  ;;  %v19770_v33 = vadd.f32 %v19769_v63, %v19768_v57 }
 0x820   : > { %v19573_v7 = vadd.f32 %v19572_v52, %v19571_v15  ;;  %v19771_v9 = vrot.slane %v19770_v33, 4 }
 0x822   : > { %v19574_v23 = vrot.slane %v19573_v7, 2  ;;  %v19772_v12 = vadd.f32 %v19771_v9, %v19770_v33 }
 0x824   : > { %v19575_v60 = vadd.f32 %v19574_v23, %v19573_v7  ;;  %v19773_v51 = vrot.slane %v19772_v12, 2 }
 0x826   : > { %v19576_v14 = vrot.slane %v19575_v60, 1  ;;  %v19774_v56 = vadd.f32 %v19773_v51, %v19772_v12 }
 0x828   : > { %v19577_v29 = vadd.f32 %v19576_v14, %v19575_v60  ;;  %v19775_v37 = vrot.slane %v19774_v56, 1 }
 0x82a   : > { %19579 = vst.msk [vmem:[%s356_s11] sm:$0x1] %vm19578_vm2, %v19577_v29  ;;  %v19776_v42 = vadd.f32 %v19775_v37, %v19774_v56 }
 0x82b   : > { %29737 = shalt.err (!%p29734_p11)
}
 0x82c   : > { %s29738_s0 = scalar_lea.hbm %s35815_s13, 16  ;;  %s29742_s19 = scalar_lea.hbm %s35897_s5, 32 }
 0x82d   : > { %p29739_p4 = scmp.ne.s32.totalorder %s35815_s13, %s29738_s0  ;;  %p29743_p2 = scmp.lt.u32.totalorder %s35815_s13, %s35897_s5 }
 0x82e   : > { %p29744_p1 = scmp.lt.u32.totalorder %s29742_s19, %s29738_s0  ;;  %p29746_p7 = scmp.lt.u32.totalorder %s29738_s0, %s35815_s13 }
 0x82f   : > { %p29740_p3 = pnand %p29739_p4, %p36548_p6 }
 0x830   : > { %p29745_p13 = por %p29744_p1, %p29743_p2 }
 0x831   : > { %p29741_p5 = pneg %p29740_p3 }
 0x832   : > { %p29747_p9 = por %p29746_p7, %p29745_p13 }
 0x834   : > { %p29748_p12 = pnand %p29747_p9, %p29741_p5 }
 0x836   : > { %29751 = shalt.err (!%p29748_p12)
}
 0x837   : > { %29577 = dma.vmem_to_hbm [thread:$0]  (%p36548_p6), %s35817_s7, 16, %s35815_s13, %s19784_s26   ;;  %19777 = vst.msk [vmem:[%s362_s12] sm:$0x1] %vm19578_vm2, %v19776_v42 }
 0x838   : > { %s19788_s14 = scalar_lea.sflag [#allocation10], %s30062_s28  ;;  %s29752_s25 = scalar_lea.vmem %s35825_s10, 16 }
 0x839   : > { %p29753_p0 = scmp.ne.s32.totalorder %s35825_s10, %s29752_s25  ;;  %s29834_s20 = smov [#allocation9]  }
 0x83a   : > { %s29756_s17 = sshll.u32 %s29834_s20, 4  ;;  %s29757_s17 = int_to_ptr.vmem [resolvable:$false] %s29756_s17 }
 0x83b   : > { %p29754_p8 = pnand %p29753_p0, %p36548_p6  ;;  %s29758_s18 = scalar_lea.vmem %s29757_s17, 32 }
 0x83c   : > { %p29759_p11 = scmp.lt.s32.totalorder %s35825_s10, %s29757_s17  ;;  %p29760_p4 = scmp.lt.s32.totalorder %s29758_s18, %s29752_s25 }
 0x83d   : > { %p29755_p10 = pneg %p29754_p8 }
 0x83e   : > { %p29761_p3 = por %p29760_p4, %p29759_p11 }
 0x840   : > { %p29762_p5 = pnand %p29761_p3, %p29755_p10 }
 0x842   : > { %29765 = shalt.err (!%p29762_p5)
}
 0x843   : > { %s29766_s28 = scalar_lea.hbm %s35823_s15, 16  ;;  %s29770_s13 = scalar_lea.hbm %s35898_s6, 32 }
 0x844   : > { %p29767_p2 = scmp.ne.s32.totalorder %s35823_s15, %s29766_s28  ;;  %p29771_p7 = scmp.lt.u32.totalorder %s35823_s15, %s35898_s6 }
 0x845   : > { %p29772_p9 = scmp.lt.u32.totalorder %s29770_s13, %s29766_s28  ;;  %p29774_p0 = scmp.lt.u32.totalorder %s29766_s28, %s35823_s15 }
 0x846   : > { %p29768_p1 = pnand %p29767_p2, %p36548_p6 }
 0x847   : > { %p29773_p12 = por %p29772_p9, %p29771_p7 }
 0x848   : > { %p29769_p13 = pneg %p29768_p1 }
 0x849   : > { %p29775_p8 = por %p29774_p0, %p29773_p12 }
 0x84b   : > { %p29776_p10 = pnand %p29775_p8, %p29769_p13 }
 0x84d   : > { %29779 = shalt.err (!%p29776_p10)
}
 0x84e   : > { %29578 = dma.vmem_to_hbm [thread:$0]  (%p36548_p6), %s35825_s10, 16, %s35823_s15, %s19788_s14  }
 0x84f PF: > { %s19836_s30 = sand.u32 1, %s29814_s21   ;;  %p36549_p11 = scmp.ne.s32.totalorder %s36122_s9, 0 }
 0x850   : > { %p36550_p4 = scmp.ge.s32.totalorder %s29826_s24, 2  ;;  %s19837_s0 = scalar_lea.sflag [#allocation4], %s19836_s30 }
 0x852   : > { %p29592_p3 = pnand %p36550_p4, %p36549_p11 }
 0x854   : > { %29805 = dma.done.wait (!%p29592_p3), %s19837_s0, 16  }
 0x855   : > { %29807 = vsyncadd (!%p29592_p3), %s19837_s0, 4294967280  ;;  %s19845_s1 = scalar_lea.sflag [#allocation10], %s19836_s30 }
 0x856   : > { %29809 = dma.done.wait (!%p29592_p3), %s19845_s1, 16  }
 0x857   : > { %29811 = vsyncadd (!%p29592_p3), %s19845_s1, 4294967280  ;;  %s36551_s24 = sld [smem:[#allocation15_spill]]  ;;  %s36552_s8 = sld [smem:[#allocation16_spill]] }
 0x858   : > { %s36553_s21 = smov %s29818_s22  ;;  %s36554_s22 = smov %s29822_s23 }
 0x85d   : > { %p26_p6 = scmp.ge.s32.totalorder %s36551_s24, 4   ;;  %s36555_s23 = smov %s36552_s8 }
 0x85f   :  { %28 = sbr.rel (!%p26_p6) target bundleno = 12 (0xc), region = 184 }
 0x866   :  { %19849 = vsyncpa [#allocation3], 1 }
 0x867   :  { %19851 = vsyncpa [#allocation3 + $0x1], 1 }
 0x868   :  { %19852 = vsyncpa [#allocation6], 1 }
 0x869   :  { %19854 = vsyncpa [#allocation6 + $0x1], 1 }
 0x86a   :  { %19855 = vsyncpa [#allocation4], 1 }
 0x86b   :  { %19857 = vsyncpa [#allocation4 + $0x1], 1 }
 0x86c   :  { %19858 = vsyncpa [#allocation10], 1 }
 0x86d   :  { %19860 = vsyncpa [#allocation10 + $0x1], 1 }

</bundles_post_ra>
